<compile_context>
chip_gen: v7x
topology: tpu7x:2x2x1
jax: 0.10.0
libtpu: 0.0.40
codegen_flags: <defaults>
</compile_context>

<pallas_src>
import functools

import jax
import jax.numpy as jnp
import numpy as np
from jax import lax
from jax.experimental import pallas as pl
from jax.experimental.pallas import tpu as pltpu

LEAKY_SLOPE = 0.1
BN_EPS = 1e-5


def _leaky(x):
    return jnp.where(x >= 0, x, LEAKY_SLOPE * x)


def _deconv_stats_kernel(xp_ref, wd_ref, d_ref, stats_ref, patch_ref, *,
                         H, W, Cin, Cout, offsets, halo_l, B_blk):
    """Pass 1: sub-pixel transposed conv (main + skip, all four 2x2 output
    phases) for one block of B_blk batch elements, plus BN partial sums.

    xp_ref:    [B_blk, Hp, Wp, Cin]     bf16  padded low-res input (NHWC)
    wd_ref:    [U*U*Cin, 8*Cout]        bf16  fused deconv weights,
                                              cols ordered (branch, r, c, co)
    d_ref:     [B_blk*HW, 8*Cout]       f32   deconv output, both branches
    stats_ref: [1, 2, 4*Cout]           f32   row0 = sum(d_main), row1 = sum(d_main^2)
    patch_ref: VMEM [B_blk*HW, U*U*Cin] bf16  deconv im2col (built in VMEM)
    """
    U = len(offsets)
    HW = H * W
    C4 = 4 * Cout

    # Sub-pixel patch extraction: only the 1-px-padded low-res input is read;
    # no zero-inflated upsampled im2col ever exists and no MAC hits a zero.
    for uh, dh in enumerate(offsets):
        for uw, dw in enumerate(offsets):
            win = xp_ref[:, halo_l + dh:halo_l + dh + H,
                         halo_l + dw:halo_l + dw + W, :]       # [B,H,W,Cin] bf16
            c0 = (uh * U + uw) * Cin
            # TODO(synk): width-Cin stores are masked (sub-128 lanes) for tiny
            # channel counts; lane-dense packing would need a layout change.
            patch_ref[:, c0:c0 + Cin] = win.reshape(B_blk * HW, Cin)

    # ONE MXU matmul covers the main deconv AND the skip deconv for all four
    # sub-pixel output phases (bf16 operands, f32 accumulation).
    d_all = jnp.dot(patch_ref[...], wd_ref[...],
                    preferred_element_type=jnp.float32)        # [B*HW, 8*Cout]
    d_ref[...] = d_all

    # Per-block BatchNorm partial statistics (reduced across blocks in XLA so
    # the batch grid axis stays megacore-parallel).
    d_main = d_all[:, :C4]
    stats_ref[0, 0:1, :] = jnp.sum(d_main, axis=0, keepdims=True)
    stats_ref[0, 1:2, :] = jnp.sum(d_main * d_main, axis=0, keepdims=True)


def _bn_conv_res_kernel(d_ref, bnp_ref, wc_ref, out_ref, phase_ref, *,
                        H, W, Cout, B_blk):
    """Pass 2: BatchNorm (batch stats) + LeakyReLU + 3x3 'same' conv in
    sub-pixel phase space (9 accumulating MXU dots per phase, no conv im2col
    scratch) + LeakyReLU(skip) + residual add + LeakyReLU.

    d_ref:     [B_blk*HW, 8*Cout]            f32   deconv output from pass 1
    bnp_ref:   [2, Cout]                     f32   row0 = mean, row1 = 1/std
    wc_ref:    [9, Cout, Cout]               bf16  3x3 taps (t = kh*3 + kw)
    out_ref:   [B_blk*HW, 4*Cout]            f32   cols ordered (r, c, co)
    phase_ref: VMEM [B_blk, 4, H+2, W+2, Cout] bf16 zero-bordered phase planes
    """
    HW = H * W
    C4 = 4 * Cout
    mean = bnp_ref[0:1, :]
    inv_std = bnp_ref[1:2, :]

    # Zero only the 1-px border (interiors are fully overwritten below; the
    # border supplies the conv "same" padding).  Done every grid step (4 thin
    # stores) so the batch axis needs no "first iteration" scratch init and
    # can be megacore-parallel.
    zrow = jnp.zeros((B_blk, 4, 1, W + 2, Cout), jnp.bfloat16)
    zcol = jnp.zeros((B_blk, 4, H + 2, 1, Cout), jnp.bfloat16)
    phase_ref[:, :, 0:1, :, :] = zrow
    phase_ref[:, :, H + 1:H + 2, :, :] = zrow
    phase_ref[:, :, :, 0:1, :] = zcol
    phase_ref[:, :, :, W + 1:W + 2, :] = zcol

    # BatchNorm (training-mode batch stats, gamma=1, beta=0) + LeakyReLU in
    # f32, cast to bf16 once at write time (MXU operand dtype).
    for ph in range(4):
        blk = d_ref[:, ph * Cout:(ph + 1) * Cout]              # [B*HW, Cout]
        blk = (blk - mean) * inv_std
        blk = jnp.where(blk >= 0, blk, LEAKY_SLOPE * blk)
        phase_ref[:, ph, 1:1 + H, 1:1 + W, :] = (
            blk.reshape(B_blk, H, W, Cout).astype(jnp.bfloat16))

    # Full-resolution 3x3 conv expressed in 2x2 sub-pixel phase space: each
    # output phase is 9 accumulating dots of contraction Cout reading shifted
    # phase windows directly (no [4*HW, 9*Cout] im2col buffer).
    # TODO(synk): on 128 MiB-VMEM parts (v5e/v6e) with large Cout a fused
    # 9*Cout-contraction matmul would amortize MXU weight pushes better.
    for r in range(2):
        for c in range(2):
            ph = 2 * r + c
            acc = jnp.zeros((B_blk * HW, Cout), jnp.float32)
            for di in (-1, 0, 1):
                sr = (r + di) % 2
                sh = (r + di - sr) // 2
                for dj in (-1, 0, 1):
                    sc = (c + dj) % 2
                    sw = (c + dj - sc) // 2
                    win = phase_ref[:, sr * 2 + sc,
                                    1 + sh:1 + sh + H,
                                    1 + sw:1 + sw + W, :]      # [B,H,W,Cout]
                    t = (di + 1) * 3 + (dj + 1)
                    acc = acc + jnp.dot(win.reshape(B_blk * HW, Cout),
                                        wc_ref[t],
                                        preferred_element_type=jnp.float32)
            # skip-branch LeakyReLU fused here (no full-tensor temp)
            sk = d_ref[:, C4 + ph * Cout:C4 + (ph + 1) * Cout]
            res = acc + jnp.where(sk >= 0, sk, LEAKY_SLOPE * sk)
            out_ref[:, ph * Cout:(ph + 1) * Cout] = jnp.where(
                res >= 0, res, LEAKY_SLOPE * res)


def res_deconv_block(x_nchw, w_deconv, w_skip, w_conv, *, stride, padding):
    """x_nchw: [N, Cin, H, W]; PyTorch-shaped weights:
         w_deconv / w_skip: [Cin, Cout, K, K]   (nn.ConvTranspose2d, bias=False)
         w_conv:            [Cout, Cout, 3, 3]  (nn.Conv2d, padding=1, bias=False)
       Returns the NCHW forward output of ResDeconvBlock (BatchNorm in
       training mode, LeakyReLU slope 0.1)."""
    N, Cin, H, W = x_nchw.shape
    _, Cout, K, _ = w_deconv.shape
    # TODO(synk): only the canonical x2-upsampling configuration
    # (stride=2, even K, padding=(K-2)//2) is lowered via the sub-pixel
    # decomposition; other configurations are not implemented here.
    assert stride == 2 and K % 2 == 0 and padding == (K - 2) // 2
    M = K // 2
    HW = H * W
    C4 = 4 * Cout

    # Static sub-pixel tap tables: output phase r uses kernel rows
    # kh = 2*m + rho[r] against input rows i + (cen[r] - m).
    rho = [(r + padding) % 2 for r in range(2)]
    cen = [(r + padding) // 2 for r in range(2)]
    offs = sorted({cen[r] - m for r in range(2) for m in range(M)})
    U = len(offs)
    halo_l = max(0, -offs[0])
    halo_r = max(0, offs[-1])
    Hp = H + halo_l + halo_r
    Wp = W + halo_l + halo_r

    # Fused deconv weight: rows (uh, uw, ci), cols (branch, r, c, co), bf16.
    wd_np = np.zeros((U * U * Cin, 2 * 2 * 2 * Cout), np.float32)
    for b, w in enumerate((np.asarray(w_deconv, np.float32),
                           np.asarray(w_skip, np.float32))):
        for r in range(2):
            for c in range(2):
                col0 = ((b * 2 + r) * 2 + c) * Cout
                for mh in range(M):
                    uh = offs.index(cen[r] - mh)
                    for mw in range(M):
                        uw = offs.index(cen[c] - mw)
                        row0 = (uh * U + uw) * Cin
                        wd_np[row0:row0 + Cin, col0:col0 + Cout] = \
                            w[:, :, 2 * mh + rho[r], 2 * mw + rho[c]]
    wd = jnp.asarray(wd_np, dtype=jnp.bfloat16)

    # 3x3 conv weights as nine [Cout_in, Cout_out] tap matrices, t = kh*3+kw.
    wc3 = jnp.asarray(
        np.transpose(np.asarray(w_conv, np.float32), (2, 3, 1, 0))
        .reshape(9, Cout, Cout), dtype=jnp.bfloat16)

    # Padded low-resolution input, NHWC, bf16 (halved HBM/DMA bytes).
    x = jnp.transpose(x_nchw, (0, 2, 3, 1)).astype(jnp.float32)
    xp = jnp.pad(x, ((0, 0), (halo_l, halo_r), (halo_l, halo_r), (0, 0)))
    xp = xp.astype(jnp.bfloat16)

    # ---- per-generation VMEM budget & batch blocking ----
    try:
        phys_vmem = int(pltpu.get_tpu_info().vmem_capacity_bytes)
    except Exception:
        phys_vmem = 64 * 1024 * 1024               # v7x-conservative fallback
    vmem_limit = min(int(phys_vmem * 0.75), 100 * 1024 * 1024)

    def footprint(bb):
        k1 = (bb * HW * U * U * Cin * 2            # patch scratch (bf16)
              + 2 * bb * Hp * Wp * Cin * 2         # double-buffered input blk
              + 2 * bb * HW * 8 * Cout * 4         # double-buffered d_all blk
              + U * U * Cin * 8 * Cout * 2         # resident deconv weights
              + 4 * 2 * C4 * 4)                    # stats blocks
        k2 = (bb * 4 * (H + 2) * (W + 2) * Cout * 2  # phase scratch (bf16)
              + 2 * bb * HW * 8 * Cout * 4           # d_all input blk
              + 2 * bb * HW * C4 * 4                 # output blk
              + 9 * Cout * Cout * 2 + 2 * Cout * 4)  # resident conv/BN params
        return max(k1, k2)

    # TODO(synk): B_blk is restricted to divisors of N (no ragged last block).
    B_blk = 1
    for bb in range(1, N + 1):
        if N % bb == 0 and footprint(bb) <= vmem_limit - (4 << 20):
            B_blk = bb
    n_blocks = N // B_blk

    cp = pltpu.CompilerParams(dimension_semantics=("parallel",),
                              vmem_limit_bytes=vmem_limit)

    # ---- pass 1: sub-pixel deconv (both branches) + BN partial sums ----
    d_all, stats = pl.pallas_call(
        functools.partial(_deconv_stats_kernel, H=H, W=W, Cin=Cin, Cout=Cout,
                          offsets=tuple(offs), halo_l=halo_l, B_blk=B_blk),
        grid=(n_blocks,),
        out_shape=(jax.ShapeDtypeStruct((N * HW, 8 * Cout), jnp.float32),
                   jax.ShapeDtypeStruct((n_blocks, 2, C4), jnp.float32)),
        in_specs=[
            pl.BlockSpec((B_blk, Hp, Wp, Cin), lambda i: (i, 0, 0, 0)),
            # constant index map -> deconv weights stay resident in VMEM
            pl.BlockSpec((U * U * Cin, 8 * Cout), lambda i: (0, 0)),
        ],
        out_specs=(
            pl.BlockSpec((B_blk * HW, 8 * Cout), lambda i: (i, 0)),
            pl.BlockSpec((1, 2, C4), lambda i: (i, 0, 0)),
        ),
        scratch_shapes=[pltpu.VMEM((B_blk * HW, U * U * Cin), jnp.bfloat16)],
        compiler_params=cp,
    )(xp, wd)

    # ---- batch-global BatchNorm statistics (tiny XLA reduction) ----
    # TODO(synk): running_mean/running_var buffer updates (training-side
    # effects of nn.BatchNorm2d) are not reproduced here.
    cnt = float(N * 4 * HW)                        # = N * OH * OW
    s = jnp.sum(stats[:, 0, :], axis=0).reshape(4, Cout).sum(axis=0)
    q = jnp.sum(stats[:, 1, :], axis=0).reshape(4, Cout).sum(axis=0)
    mean = s / cnt
    # TODO(synk): E[x^2]-E[x]^2 in f32 can cancel for large-mean activations;
    # a shifted / two-pass variance would be safer for non-zero-mean data.
    var = jnp.maximum(q / cnt - mean * mean, 0.0)
    inv_std = lax.rsqrt(var + BN_EPS)
    bnp = jnp.stack([mean, inv_std], axis=0).astype(jnp.float32)   # [2, Cout]

    # ---- pass 2: BN + LeakyReLU + 3x3 conv + skip + residual ----
    out2d = pl.pallas_call(
        functools.partial(_bn_conv_res_kernel, H=H, W=W, Cout=Cout,
                          B_blk=B_blk),
        grid=(n_blocks,),
        out_shape=jax.ShapeDtypeStruct((N * HW, C4), jnp.float32),
        in_specs=[
            pl.BlockSpec((B_blk * HW, 8 * Cout), lambda i: (i, 0)),
            # constant index maps -> BN params + conv weights stay resident
            pl.BlockSpec((2, Cout), lambda i: (0, 0)),
            pl.BlockSpec((9, Cout, Cout), lambda i: (0, 0, 0)),
        ],
        out_specs=pl.BlockSpec((B_blk * HW, C4), lambda i: (i, 0)),
        scratch_shapes=[
            pltpu.VMEM((B_blk, 4, H + 2, W + 2, Cout), jnp.bfloat16)],
        compiler_params=cp,
    )(d_all, bnp, wc3)

    # pixel shuffle: rows (n, i, j), cols (r, c, co) -> full-resolution NCHW
    out = out2d.reshape(N, H, W, 2, 2, Cout)
    out = jnp.transpose(out, (0, 5, 1, 3, 2, 4)).reshape(N, Cout, 2 * H, 2 * W)
    return out


def ref_forward(x, w_deconv, w_skip, w_conv, *, stride, padding):
    """Pure-JAX f32 reference mirroring the PyTorch forward (training-mode BN)."""
    K = w_deconv.shape[2]
    pad = K - 1 - padding

    def tconv(xx, w):
        wr = jnp.transpose(w[:, :, ::-1, ::-1], (1, 0, 2, 3))  # (Cout, Cin, K, K)
        return lax.conv_general_dilated(
            xx, wr, window_strides=(1, 1),
            padding=[(pad, pad), (pad, pad)],
            lhs_dilation=(stride, stride),
            dimension_numbers=('NCHW', 'OIHW', 'NCHW'))

    d = tconv(x, w_deconv)
    sk = tconv(x, w_skip)
    mean = d.mean(axis=(0, 2, 3), keepdims=True)
    var = ((d - mean) ** 2).mean(axis=(0, 2, 3), keepdims=True)
    bn = (d - mean) / jnp.sqrt(var + BN_EPS)
    l = _leaky(bn)
    c = lax.conv_general_dilated(
        l, w_conv, (1, 1), [(1, 1), (1, 1)],
        dimension_numbers=('NCHW', 'OIHW', 'NCHW'))
    return _leaky(c + _leaky(sk))


if __name__ == "__main__":
    # ResDeconvBlock(in_channel=4, out_channel=8, kernel_size=4, stride=2, padding=1)
    N, Cin, H, W = 2, 4, 16, 16
    Cout, K, stride, padding = 8, 4, 2, 1

    key = jax.random.PRNGKey(0)
    kx, k1, k2, k3 = jax.random.split(key, 4)
    x = jax.random.normal(kx, (N, Cin, H, W), jnp.float32)
    w_deconv = jax.random.normal(k1, (Cin, Cout, K, K), jnp.float32) * 0.1
    w_skip = jax.random.normal(k2, (Cin, Cout, K, K), jnp.float32) * 0.1
    w_conv = jax.random.normal(k3, (Cout, Cout, 3, 3), jnp.float32) * 0.1

    out = res_deconv_block(x, w_deconv, w_skip, w_conv,
                           stride=stride, padding=padding)
    out = jax.block_until_ready(out)

    ref = ref_forward(x, w_deconv, w_skip, w_conv, stride=stride, padding=padding)
    # MXU operands are bf16 inside the kernels, so compare against the f32
    # reference at bf16-level tolerance.
    np.testing.assert_allclose(np.asarray(out), np.asarray(ref),
                               rtol=5e-2, atol=5e-2)
    print("KERNEL_OK")
</pallas_src>

<mosaic_0001>
module attributes {stable_mosaic.version = 11 : i64} {
  func.func @_deconv_stats_kernel(%arg0: i32, %arg1: memref<2x18x18x4xbf16, #tpu.memory_space<vmem>>, %arg2: memref<36x64xbf16, #tpu.memory_space<vmem>>, %arg3: memref<512x64xf32, #tpu.memory_space<vmem>>, %arg4: memref<1x2x32xf32, #tpu.memory_space<vmem>>, %arg5: memref<512x36xbf16, #tpu.memory_space<vmem>>) attributes {dimension_semantics = [#tpu.dimension_semantics<parallel>], iteration_bounds = array<i64: 1>, scalar_prefetch = 0 : i64, scratch_operands = 1 : i64, tpu.core_type = #tpu.core_type<tc>, window_params = [{transform_indices = @transform_0, window_bounds = array<i64: 2, 18, 18, 4>}, {pipeline_mode = #tpu.pipeline_mode<synchronous>, transform_indices = @transform_1, window_bounds = array<i64: 36, 64>}, {transform_indices = @transform_2, window_bounds = array<i64: 512, 64>}, {transform_indices = @transform_3, window_bounds = array<i64: 1, 2, 32>}]} {
    %c0 = arith.constant 0 : index
    %c0_0 = arith.constant 0 : index
    %c0_1 = arith.constant 0 : index
    %c0_2 = arith.constant 0 : index
    %0 = vector.load %arg1[%c0, %c0_0, %c0_1, %c0_2] : memref<2x18x18x4xbf16, #tpu.memory_space<vmem>>, vector<2x16x16x4xbf16>
    %1 = vector.shape_cast %0 : vector<2x16x16x4xbf16> to vector<512x4xbf16>
    %c0_3 = arith.constant 0 : index
    %c0_4 = arith.constant 0 : index
    %2 = vector.load %arg5[%c0_3, %c0_4] : memref<512x36xbf16, #tpu.memory_space<vmem>>, vector<512x4xbf16>
    tpu.vector_store %arg5[%c0_3, %c0_4], %1 {strides = array<i32>} : memref<512x36xbf16, #tpu.memory_space<vmem>>, vector<512x4xbf16>,
    %c0_5 = arith.constant 0 : index
    %c0_6 = arith.constant 0 : index
    %c1 = arith.constant 1 : index
    %c0_7 = arith.constant 0 : index
    %3 = vector.load %arg1[%c0_5, %c0_6, %c1, %c0_7] : memref<2x18x18x4xbf16, #tpu.memory_space<vmem>>, vector<2x16x16x4xbf16>
    %4 = vector.shape_cast %3 : vector<2x16x16x4xbf16> to vector<512x4xbf16>
    %c0_8 = arith.constant 0 : index
    %c4 = arith.constant 4 : index
    %5 = vector.load %arg5[%c0_8, %c4] : memref<512x36xbf16, #tpu.memory_space<vmem>>, vector<512x4xbf16>
    tpu.vector_store %arg5[%c0_8, %c4], %4 {strides = array<i32>} : memref<512x36xbf16, #tpu.memory_space<vmem>>, vector<512x4xbf16>,
    %c0_9 = arith.constant 0 : index
    %c0_10 = arith.constant 0 : index
    %c2 = arith.constant 2 : index
    %c0_11 = arith.constant 0 : index
    %6 = vector.load %arg1[%c0_9, %c0_10, %c2, %c0_11] : memref<2x18x18x4xbf16, #tpu.memory_space<vmem>>, vector<2x16x16x4xbf16>
    %7 = vector.shape_cast %6 : vector<2x16x16x4xbf16> to vector<512x4xbf16>
    %c0_12 = arith.constant 0 : index
    %c8 = arith.constant 8 : index
    %8 = vector.load %arg5[%c0_12, %c8] : memref<512x36xbf16, #tpu.memory_space<vmem>>, vector<512x4xbf16>
    tpu.vector_store %arg5[%c0_12, %c8], %7 {strides = array<i32>} : memref<512x36xbf16, #tpu.memory_space<vmem>>, vector<512x4xbf16>,
    %c0_13 = arith.constant 0 : index
    %c1_14 = arith.constant 1 : index
    %c0_15 = arith.constant 0 : index
    %c0_16 = arith.constant 0 : index
    %9 = vector.load %arg1[%c0_13, %c1_14, %c0_15, %c0_16] : memref<2x18x18x4xbf16, #tpu.memory_space<vmem>>, vector<2x16x16x4xbf16>
    %10 = vector.shape_cast %9 : vector<2x16x16x4xbf16> to vector<512x4xbf16>
    %c0_17 = arith.constant 0 : index
    %c12 = arith.constant 12 : index
    %11 = vector.load %arg5[%c0_17, %c12] : memref<512x36xbf16, #tpu.memory_space<vmem>>, vector<512x4xbf16>
    tpu.vector_store %arg5[%c0_17, %c12], %10 {strides = array<i32>} : memref<512x36xbf16, #tpu.memory_space<vmem>>, vector<512x4xbf16>,
    %c0_18 = arith.constant 0 : index
    %c1_19 = arith.constant 1 : index
    %c1_20 = arith.constant 1 : index
    %c0_21 = arith.constant 0 : index
    %12 = vector.load %arg1[%c0_18, %c1_19, %c1_20, %c0_21] : memref<2x18x18x4xbf16, #tpu.memory_space<vmem>>, vector<2x16x16x4xbf16>
    %13 = vector.shape_cast %12 : vector<2x16x16x4xbf16> to vector<512x4xbf16>
    %c0_22 = arith.constant 0 : index
    %c16 = arith.constant 16 : index
    %14 = vector.load %arg5[%c0_22, %c16] : memref<512x36xbf16, #tpu.memory_space<vmem>>, vector<512x4xbf16>
    tpu.vector_store %arg5[%c0_22, %c16], %13 {strides = array<i32>} : memref<512x36xbf16, #tpu.memory_space<vmem>>, vector<512x4xbf16>,
    %c0_23 = arith.constant 0 : index
    %c1_24 = arith.constant 1 : index
    %c2_25 = arith.constant 2 : index
    %c0_26 = arith.constant 0 : index
    %15 = vector.load %arg1[%c0_23, %c1_24, %c2_25, %c0_26] : memref<2x18x18x4xbf16, #tpu.memory_space<vmem>>, vector<2x16x16x4xbf16>
    %16 = vector.shape_cast %15 : vector<2x16x16x4xbf16> to vector<512x4xbf16>
    %c0_27 = arith.constant 0 : index
    %c20 = arith.constant 20 : index
    %17 = vector.load %arg5[%c0_27, %c20] : memref<512x36xbf16, #tpu.memory_space<vmem>>, vector<512x4xbf16>
    tpu.vector_store %arg5[%c0_27, %c20], %16 {strides = array<i32>} : memref<512x36xbf16, #tpu.memory_space<vmem>>, vector<512x4xbf16>,
    %c0_28 = arith.constant 0 : index
    %c2_29 = arith.constant 2 : index
    %c0_30 = arith.constant 0 : index
    %c0_31 = arith.constant 0 : index
    %18 = vector.load %arg1[%c0_28, %c2_29, %c0_30, %c0_31] : memref<2x18x18x4xbf16, #tpu.memory_space<vmem>>, vector<2x16x16x4xbf16>
    %19 = vector.shape_cast %18 : vector<2x16x16x4xbf16> to vector<512x4xbf16>
    %c0_32 = arith.constant 0 : index
    %c24 = arith.constant 24 : index
    %20 = vector.load %arg5[%c0_32, %c24] : memref<512x36xbf16, #tpu.memory_space<vmem>>, vector<512x4xbf16>
    tpu.vector_store %arg5[%c0_32, %c24], %19 {strides = array<i32>} : memref<512x36xbf16, #tpu.memory_space<vmem>>, vector<512x4xbf16>,
    %c0_33 = arith.constant 0 : index
    %c2_34 = arith.constant 2 : index
    %c1_35 = arith.constant 1 : index
    %c0_36 = arith.constant 0 : index
    %21 = vector.load %arg1[%c0_33, %c2_34, %c1_35, %c0_36] : memref<2x18x18x4xbf16, #tpu.memory_space<vmem>>, vector<2x16x16x4xbf16>
    %22 = vector.shape_cast %21 : vector<2x16x16x4xbf16> to vector<512x4xbf16>
    %c0_37 = arith.constant 0 : index
    %c28 = arith.constant 28 : index
    %23 = vector.load %arg5[%c0_37, %c28] : memref<512x36xbf16, #tpu.memory_space<vmem>>, vector<512x4xbf16>
    tpu.vector_store %arg5[%c0_37, %c28], %22 {strides = array<i32>} : memref<512x36xbf16, #tpu.memory_space<vmem>>, vector<512x4xbf16>,
    %c0_38 = arith.constant 0 : index
    %c2_39 = arith.constant 2 : index
    %c2_40 = arith.constant 2 : index
    %c0_41 = arith.constant 0 : index
    %24 = vector.load %arg1[%c0_38, %c2_39, %c2_40, %c0_41] : memref<2x18x18x4xbf16, #tpu.memory_space<vmem>>, vector<2x16x16x4xbf16>
    %25 = vector.shape_cast %24 : vector<2x16x16x4xbf16> to vector<512x4xbf16>
    %c0_42 = arith.constant 0 : index
    %c32 = arith.constant 32 : index
    %26 = vector.load %arg5[%c0_42, %c32] : memref<512x36xbf16, #tpu.memory_space<vmem>>, vector<512x4xbf16>
    tpu.vector_store %arg5[%c0_42, %c32], %25 {strides = array<i32>} : memref<512x36xbf16, #tpu.memory_space<vmem>>, vector<512x4xbf16>,
    %c0_43 = arith.constant 0 : index
    %c0_44 = arith.constant 0 : index
    %27 = vector.load %arg5[%c0_43, %c0_44] : memref<512x36xbf16, #tpu.memory_space<vmem>>, vector<512x36xbf16>
    %c0_45 = arith.constant 0 : index
    %c0_46 = arith.constant 0 : index
    %28 = vector.load %arg2[%c0_45, %c0_46] : memref<36x64xbf16, #tpu.memory_space<vmem>>, vector<36x64xbf16>
    %cst = arith.constant dense<0.000000e+00> : vector<512x64xf32>
    %29 = tpu.matmul %27, %28, %cst {dimension_numbers = #tpu.dot_dimension_numbers<[1], [0], [0], [1], [0, 0, 1, 1], [], []>} : vector<512x36xbf16>, vector<36x64xbf16>, vector<512x64xf32> -> vector<512x64xf32>
    %c0_47 = arith.constant 0 : index
    %c0_48 = arith.constant 0 : index
    %30 = vector.load %arg3[%c0_47, %c0_48] : memref<512x64xf32, #tpu.memory_space<vmem>>, vector<512x64xf32>
    tpu.vector_store %arg3[%c0_47, %c0_48], %29 {strides = array<i32>} : memref<512x64xf32, #tpu.memory_space<vmem>>, vector<512x64xf32>,
    %31 = vector.extract_strided_slice %29 {offsets = [0, 0], sizes = [512, 32], strides = [1, 1]} : vector<512x64xf32> to vector<512x32xf32>
    %cst_49 = arith.constant dense<0.000000e+00> : vector<32xf32>
    %32 = vector.multi_reduction <add>, %31, %cst_49 [0] : vector<512x32xf32> to vector<32xf32>
    %33 = vector.shape_cast %32 : vector<32xf32> to vector<1x32xf32>
    %c0_50 = arith.constant 0 : index
    %c0_51 = arith.constant 0 : index
    %c0_52 = arith.constant 0 : index
    %34 = vector.load %arg4[%c0_50, %c0_51, %c0_52] : memref<1x2x32xf32, #tpu.memory_space<vmem>>, vector<1x1x32xf32>
    %35 = vector.shape_cast %34 : vector<1x1x32xf32> to vector<1x32xf32>
    %36 = vector.shape_cast %33 : vector<1x32xf32> to vector<1x1x32xf32>
    tpu.vector_store %arg4[%c0_50, %c0_51, %c0_52], %36 {strides = array<i32>} : memref<1x2x32xf32, #tpu.memory_space<vmem>>, vector<1x1x32xf32>,
    %37 = arith.mulf %31, %31 : vector<512x32xf32>
    %cst_53 = arith.constant dense<0.000000e+00> : vector<32xf32>
    %38 = vector.multi_reduction <add>, %37, %cst_53 [0] : vector<512x32xf32> to vector<32xf32>
    %39 = vector.shape_cast %38 : vector<32xf32> to vector<1x32xf32>
    %c0_54 = arith.constant 0 : index
    %c1_55 = arith.constant 1 : index
    %c0_56 = arith.constant 0 : index
    %40 = vector.load %arg4[%c0_54, %c1_55, %c0_56] : memref<1x2x32xf32, #tpu.memory_space<vmem>>, vector<1x1x32xf32>
    %41 = vector.shape_cast %40 : vector<1x1x32xf32> to vector<1x32xf32>
    %42 = vector.shape_cast %39 : vector<1x32xf32> to vector<1x1x32xf32>
    tpu.vector_store %arg4[%c0_54, %c1_55, %c0_56], %42 {strides = array<i32>} : memref<1x2x32xf32, #tpu.memory_space<vmem>>, vector<1x1x32xf32>,
    return
  }
  func.func @transform_0(%arg0: i32) -> (i32, i32, i32, i32) {
    %c0_i32 = arith.constant 0 : i32
    %c0_i32_0 = arith.constant 0 : i32
    %c0_i32_1 = arith.constant 0 : i32
    %c0_i32_2 = arith.constant 0 : i32
    return %arg0, %c0_i32, %c0_i32_0, %c0_i32_1 : i32, i32, i32, i32
  }
  func.func @transform_1(%arg0: i32) -> (i32, i32) {
    %c0_i32 = arith.constant 0 : i32
    %c0_i32_0 = arith.constant 0 : i32
    %c0_i32_1 = arith.constant 0 : i32
    return %c0_i32, %c0_i32_0 : i32, i32
  }
  func.func @transform_2(%arg0: i32) -> (i32, i32) {
    %c0_i32 = arith.constant 0 : i32
    %c0_i32_0 = arith.constant 0 : i32
    return %arg0, %c0_i32 : i32, i32
  }
  func.func @transform_3(%arg0: i32) -> (i32, i32, i32) {
    %c0_i32 = arith.constant 0 : i32
    %c0_i32_0 = arith.constant 0 : i32
    %c0_i32_1 = arith.constant 0 : i32
    return %arg0, %c0_i32, %c0_i32_0 : i32, i32, i32
  }
}

</mosaic_0001>

<bundles_post_ra>
// kernel: tpu_custom_call.1
= control target key start
LH: loop header
LB: loop body
LE: loop exit
PB: predicated region body
PF: predicated region fallthrough
CT: control target
= control target key end

     0   :  { %vm400_vm0 = vsmask.f32 3328  ;;  %vm401_vm1 = vsmask.f32 7440  ;;  %v12445_v22 = vmov 0  ;;  %s8243_s9 = smov 4   ;;  %s12435_s0 = inlined_call_operand.vmem [shape: bf16[2,18,18,4], index: 0, kind: input, shape index: {}]   ;;  %s12436_s1 = inlined_call_operand.vmem [shape: bf16[36,64], index: 1, kind: input, shape index: {}]   ;;  %s12437_s2 = inlined_call_operand.vmem [shape: f32[512,64], index: 2, kind: output, shape index: {0}]   ;;  %s12438_s3 = inlined_call_operand.hbm [shape: f32[1,2,32], index: 3, kind: output, shape index: {1}]  }
   0x1   :  { %v304_v0 = vld [vmem:[%s12435_s0] sm:$0xf]  ;;  %v305_v1 = vld [vmem:[%s12435_s0 + $0x4] sm:$0xf]  ;;  %v306_v2 = vld [vmem:[%s12435_s0 + $0x8] sm:$0x1] }
   0x2   :  { %v404_v3 = vshrl.u32 %v304_v0, 16  ;;  %v407_v4 = vshll.u32 %v304_v0, 16  ;;  %v413_v5 = vshll.u32 %v305_v1, 16  ;;  %v417_v6 = vshrl.u32 %v305_v1, 16  ;;  %v310_v8 = vld [vmem:[%s12435_s0 + $0x18] sm:$0xf]  ;;  %vm8295_vm2 = vmor %vm400_vm0, %vm401_vm1 }
   0x3   :  { %v423_v7 = vshll.u32 %v306_v2, 16  ;;  %v311_v11 = vld [vmem:[%s12435_s0 + $0x1c] sm:$0xf]  ;;  %v312_v12 = vld [vmem:[%s12435_s0 + $0x20] sm:$0x1]  ;;  %v452_v16 = vshrl.u32 %v310_v8, 16 }
   0x4   :  { %v406_v9 = vrot.slane %v404_v3, 4  ;;  %v409_v10 = vrot.slane %v407_v4, 5  ;;  %v415_v13 = vrot.slane %v413_v5, 5  ;;  %v419_v14 = vrot.slane %v417_v6, 4  ;;  %v307_v17 = vld [vmem:[%s12435_s0 + $0xc] sm:$0xf] }
   0x5   :  { %v425_v15 = vrot.slane %v423_v7, 5  ;;  %v455_v19 = vshll.u32 %v310_v8, 16  ;;  %v461_v20 = vshll.u32 %v311_v11, 16  ;;  %v465_v21 = vshrl.u32 %v311_v11, 16  ;;  %v308_v26 = vld [vmem:[%s12435_s0 + $0x10] sm:$0xf] }
   0x6   :  { %v410_v18 = vor.u32 %v409_v10, %v406_v9  ;;  %v12446_v22 = vsel %vm8295_vm2, 4294967295, %v12445_v22  ;;  %v420_v23 = vor.u32 %v419_v14, %v415_v13  ;;  %v454_v24 = vrot.slane %v452_v16, 4  ;;  %v309_v32 = vld [vmem:[%s12435_s0 + $0x14] sm:$0x1]  ;;  %v313_v41 = vld [vmem:[%s12435_s0 + $0x24] sm:$0xf] }
   0x7   :  { %12447 = vst [vmem:[#allocation6_spill] sm:$0xff] %v12446_v22  ;;  %v471_v25 = vshll.u32 %v312_v12, 16  ;;  %v428_v27 = vshrl.u32 %v307_v17, 16  ;;  %v457_v29 = vrot.slane %v455_v19, 5  ;;  %v463_v30 = vrot.slane %v461_v20, 5  ;;  %s8244_s16 = smov 8  }
   0x8   :  { %v411_v28 = vrot.slane %v410_v18, 4  ;;  %v467_v31 = vrot.slane %v465_v21, 4  ;;  %v421_v33 = vrot.slane %v420_v23, 4  ;;  %v431_v36 = vshll.u32 %v307_v17, 16  ;;  %v314_v46 = vld [vmem:[%s12435_s0 + $0x28] sm:$0xf] }
   0x9   :  { %v473_v34 = vrot.slane %v471_v25, 5  ;;  %v430_v35 = vrot.slane %v428_v27, 4  ;;  %v458_v38 = vor.u32 %v457_v29, %v454_v24  ;;  %v437_v40 = vshll.u32 %v308_v26, 16  ;;  %v315_v54 = vld [vmem:[%s12435_s0 + $0x2c] sm:$0x1]  ;;  %s8245_s7 = smov 12  }
   0xa   :  { %v416_v37 = vsel %vm8295_vm2, %v411_v28, %v415_v13  ;;  %v468_v39 = vor.u32 %v467_v31, %v463_v30  ;;  %v426_v42 = vsel %vm8295_vm2, %v421_v33, %v425_v15  ;;  %v433_v43 = vrot.slane %v431_v36, 5  ;;  %v316_v60 = vld [vmem:[%s12435_s0 + $0x30] sm:$0xf]  ;;  %v317_v1 = vld [vmem:[%s12435_s0 + $0x34] sm:$0xf]  ;;  %s8246_s21 = smov 16  }
   0xb   :  { %v441_v44 = vshrl.u32 %v308_v26, 16  ;;  %v447_v45 = vshll.u32 %v309_v32, 16  ;;  %v7099_v47 = vcombine.low %v416_v37, %v426_v42  ;;  %v459_v48 = vrot.slane %v458_v38, 4  ;;  %v318_v8 = vld [vmem:[%s12435_s0 + $0x38] sm:$0x1]  ;;  %s8247_s8 = smov 20  }
   0xc   :  { %v469_v49 = vrot.slane %v468_v39, 4  ;;  %v439_v50 = vrot.slane %v437_v40, 5  ;;  %v434_v51 = vor.u32 %v433_v43, %v430_v35  ;;  %v476_v55 = vshrl.u32 %v313_v41, 16  ;;  %v319_v15 = vld [vmem:[%s12435_s0 + $0x3c] sm:$0xf]  ;;  %s8248_s25 = smov 24  }
   0xd   :  { %v443_v52 = vrot.slane %v441_v44, 4  ;;  %v449_v53 = vrot.slane %v447_v45, 5  ;;  %1267 = vrot.lane.b32.xlu0 %v7099_v47, %s8243_s9  ;;  %v464_v56 = vsel %vm8295_vm2, %v459_v48, %v463_v30  ;;  %v479_v58 = vshll.u32 %v313_v41, 16  ;;  %v320_v20 = vld [vmem:[%s12435_s0 + $0x40] sm:$0xf]  ;;  %s8249_s23 = smov 28  }
   0xe   :  { %v474_v57 = vsel %vm8295_vm2, %v469_v49, %v473_v34  ;;  %v485_v59 = vshll.u32 %v314_v46, 16  ;;  %v435_v62 = vrot.slane %v434_v51, 4  ;;  %v478_v0 = vrot.slane %v476_v55, 4  ;;  %v321_v32 = vld [vmem:[%s12435_s0 + $0x44] sm:$0x1]  ;;  %s8250_s13 = smov 32  }
   0xf   :  { %v7101_v61 = vcombine.low %v464_v56, %v474_v57  ;;  %v444_v63 = vor.u32 %v443_v52, %v439_v50  ;;  %v481_v2 = vrot.slane %v479_v58, 5  ;;  %v489_v4 = vshrl.u32 %v314_v46, 16  ;;  %v322_v39 = vld [vmem:[%s12435_s0 + $0x48] sm:$0xf]  ;;  %v323_v44 = vld [vmem:[%s12435_s0 + $0x4c] sm:$0xf] }
  0x10   :  { %v487_v3 = vrot.slane %v485_v59, 5  ;;  %v495_v5 = vshll.u32 %v315_v54, 16  ;;  %v440_v6 = vsel %vm8295_vm2, %v435_v62, %v439_v50  ;;  %v500_v9 = vshrl.u32 %v316_v60, 16  ;;  %v324_v51 = vld [vmem:[%s12435_s0 + $0x50] sm:$0x1]  ;;  %v9238_v22 = vld [vmem:[%s12435_s0 + $0x180] sm:$0xff]  }
  0x11   :  { %1271 = vrot.lane.b32.xlu1 %v7101_v61, %s8243_s9  ;;  %v445_v7 = vrot.slane %v444_v63, 4  ;;  %v503_v10 = vshll.u32 %v316_v60, 16  ;;  %v482_v11 = vor.u32 %v481_v2, %v478_v0  ;;  %v491_v12 = vrot.slane %v489_v4, 4  ;;  %v325_v58 = vld [vmem:[%s12435_s0 + $0x54] sm:$0xf] }
  0x12   :  { %v497_v13 = vrot.slane %v495_v5, 5  ;;  %v509_v14 = vshll.u32 %v317_v1, 16  ;;  %v502_v17 = vrot.slane %v500_v9, 4  ;;  %v513_v19 = vshrl.u32 %v317_v1, 16  ;;  %v326_v63 = vld [vmem:[%s12435_s0 + $0x58] sm:$0xf] }
  0x13   :  { %v450_v16 = vsel %vm8295_vm2, %v445_v7, %v449_v53  ;;  %v505_v18 = vrot.slane %v503_v10, 5  ;;  %v483_v23 = vrot.slane %v482_v11, 4  ;;  %v492_v24 = vor.u32 %v491_v12, %v487_v3  ;;  %v327_v11 = vld [vmem:[%s12435_s0 + $0x5c] sm:$0x1] }
  0x14   :  { %v7100_v21 = vcombine.low %v440_v6, %v450_v16  ;;  %v511_v25 = vrot.slane %v509_v14, 5  ;;  %v515_v27 = vrot.slane %v513_v19, 4  ;;  %v519_v28 = vshll.u32 %v318_v8, 16 }
  0x15   :  { %v506_v26 = vor.u32 %v505_v18, %v502_v17  ;;  %v524_v29 = vshrl.u32 %v319_v15, 16  ;;  %v488_v30 = vsel %vm8295_vm2, %v483_v23, %v487_v3  ;;  %v493_v31 = vrot.slane %v492_v24, 4  ;;  %v329_v18 = vld [vmem:[%s12435_s0 + $0x64] sm:$0xf] }
  0x16   :  { %1269 = vrot.lane.b32.xlu0 %v7100_v21, %s8243_s9  ;;  %v527_v33 = vshll.u32 %v319_v15, 16  ;;  %v533_v34 = vshll.u32 %v320_v20, 16  ;;  %v516_v36 = vor.u32 %v515_v27, %v511_v25  ;;  %v521_v37 = vrot.slane %v519_v28, 5 }
  0x17   :  { %v507_v35 = vrot.slane %v506_v26, 4  ;;  %v526_v38 = vrot.slane %v524_v29, 4  ;;  %v498_v40 = vsel %vm8295_vm2, %v493_v31, %v497_v13  ;;  %v537_v43 = vshrl.u32 %v320_v20, 16  ;;  %v328_v13 = vld [vmem:[%s12435_s0 + $0x60] sm:$0xf] }
  0x18   :  { %v529_v41 = vrot.slane %v527_v33, 5  ;;  %v535_v42 = vrot.slane %v533_v34, 5  ;;  %v7102_v45 = vcombine.low %v488_v30, %v498_v40  ;;  %v517_v47 = vrot.slane %v516_v36, 4  ;;  %v330_v30 = vld [vmem:[%s12435_s0 + $0x68] sm:$0x1] }
  0x19   :  { %v512_v46 = vsel %vm8295_vm2, %v507_v35, %v511_v25  ;;  %v543_v48 = vshll.u32 %v321_v32, 16  ;;  %v539_v50 = vrot.slane %v537_v43, 4  ;;  %v548_v52 = vshrl.u32 %v322_v39, 16  ;;  %v331_v33 = vld [vmem:[%s12435_s0 + $0x6c] sm:$0xf] }
  0x1a   :  { %v530_v49 = vor.u32 %v529_v41, %v526_v38  ;;  %v551_v53 = vshll.u32 %v322_v39, 16  ;;  %1273 = vrot.lane.b32.xlu1 %v7102_v45, %s8243_s9  ;;  %v522_v54 = vsel %vm8295_vm2, %v517_v47, %v521_v37  ;;  %v557_v56 = vshll.u32 %v323_v44, 16  ;;  %v332_v38 = vld [vmem:[%s12435_s0 + $0x70] sm:$0xf] }
  0x1b   :  { %v545_v55 = vrot.slane %v543_v48, 5  ;;  %v561_v57 = vshrl.u32 %v323_v44, 16  ;;  %v7103_v59 = vcombine.low %v512_v46, %v522_v54  ;;  %v540_v61 = vor.u32 %v539_v50, %v535_v42  ;;  %v333_v46 = vld [vmem:[%s12435_s0 + $0x74] sm:$0x1] }
  0x1c   :  { %v531_v60 = vrot.slane %v530_v49, 4  ;;  %v550_v62 = vrot.slane %v548_v52, 4  ;;  %v553_v0 = vrot.slane %v551_v53, 5  ;;  %v559_v1 = vrot.slane %v557_v56, 5  ;;  %v334_v52 = vld [vmem:[%s12435_s0 + $0x78] sm:$0xf] }
  0x1d   :  { %v563_v2 = vrot.slane %v561_v57, 4  ;;  %v567_v3 = vshll.u32 %v324_v51, 16  ;;  %1275 = vrot.lane.b32.xlu0 %v7103_v59, %s8243_s9  ;;  %v541_v5 = vrot.slane %v540_v61, 4  ;;  %v572_v6 = vshrl.u32 %v325_v58, 16  ;;  %v335_v61 = vld [vmem:[%s12435_s0 + $0x7c] sm:$0xf] }
  0x1e   :  { %v536_v4 = vsel %vm8295_vm2, %v531_v60, %v535_v42  ;;  %v575_v7 = vshll.u32 %v325_v58, 16  ;;  %v554_v8 = vor.u32 %v553_v0, %v550_v62  ;;  %v581_v12 = vshll.u32 %v326_v63, 16 }
  0x1f   :  { %v564_v9 = vor.u32 %v563_v2, %v559_v1  ;;  %v569_v10 = vrot.slane %v567_v3, 5  ;;  %v546_v14 = vsel %vm8295_vm2, %v541_v5, %v545_v55  ;;  %v574_v15 = vrot.slane %v572_v6, 4  ;;  %v336_v5 = vld [vmem:[%s12435_s0 + $0x80] sm:$0x1] }
  0x20   :  { %v577_v16 = vrot.slane %v575_v7, 5  ;;  %v585_v17 = vshrl.u32 %v326_v63, 16  ;;  %v7104_v19 = vcombine.low %v536_v4, %v546_v14  ;;  %v555_v20 = vrot.slane %v554_v8, 4 }
  0x21   :  { %v565_v21 = vrot.slane %v564_v9, 4  ;;  %v583_v23 = vrot.slane %v581_v12, 5  ;;  %v591_v26 = vshll.u32 %v327_v11, 16  ;;  %v596_v27 = vshrl.u32 %v328_v13, 16  ;;  %v337_v11 = vld [vmem:[%s12435_s0 + $0x84] sm:$0xf] }
  0x22   :  { %v578_v24 = vor.u32 %v577_v16, %v574_v15  ;;  %v587_v25 = vrot.slane %v585_v17, 4  ;;  %1277 = vrot.lane.b32.xlu1 %v7104_v19, %s8243_s9  ;;  %v560_v28 = vsel %vm8295_vm2, %v555_v20, %v559_v1  ;;  %v599_v31 = vshll.u32 %v328_v13, 16  ;;  %v338_v16 = vld [vmem:[%s12435_s0 + $0x88] sm:$0xf] }
  0x23   :  { %v570_v29 = vsel %vm8295_vm2, %v565_v21, %v569_v10  ;;  %v605_v32 = vshll.u32 %v329_v18, 16  ;;  %v593_v37 = vrot.slane %v591_v26, 5  ;;  %v598_v39 = vrot.slane %v596_v27, 4 }
  0x24   :  { %v7105_v34 = vcombine.low %v560_v28, %v570_v29  ;;  %v579_v35 = vrot.slane %v578_v24, 4  ;;  %v588_v36 = vor.u32 %v587_v25, %v583_v23  ;;  %v601_v40 = vrot.slane %v599_v31, 5  ;;  %v339_v25 = vld [vmem:[%s12435_s0 + $0x8c] sm:$0x1]  ;;  %v340_v31 = vld [vmem:[%s12435_s0 + $0x90] sm:$0xf] }
  0x25   :  { %v607_v41 = vrot.slane %v605_v32, 5  ;;  %v609_v42 = vshrl.u32 %v329_v18, 16  ;;  %v615_v45 = vshll.u32 %v330_v30, 16  ;;  %v620_v47 = vshrl.u32 %v331_v33, 16 }
  0x26   :  { %1279 = vrot.lane.b32.xlu0 %v7105_v34, %s8243_s9  ;;  %v584_v43 = vsel %vm8295_vm2, %v579_v35, %v583_v23  ;;  %v589_v44 = vrot.slane %v588_v36, 4  ;;  %v602_v48 = vor.u32 %v601_v40, %v598_v39  ;;  %v623_v50 = vshll.u32 %v331_v33, 16  ;;  %v341_v36 = vld [vmem:[%s12435_s0 + $0x94] sm:$0xf] }
  0x27   :  { %v611_v49 = vrot.slane %v609_v42, 4  ;;  %v629_v51 = vshll.u32 %v332_v38, 16  ;;  %v617_v54 = vrot.slane %v615_v45, 5  ;;  %v622_v55 = vrot.slane %v620_v47, 4 }
  0x28   :  { %v594_v53 = vsel %vm8295_vm2, %v589_v44, %v593_v37  ;;  %v633_v56 = vshrl.u32 %v332_v38, 16  ;;  %v603_v58 = vrot.slane %v602_v48, 4  ;;  %v625_v60 = vrot.slane %v623_v50, 5  ;;  %v343_v50 = vld [vmem:[%s12435_s0 + $0x9c] sm:$0xf] }
  0x29   :  { %v7106_v57 = vcombine.low %v584_v43, %v594_v53  ;;  %v612_v59 = vor.u32 %v611_v49, %v607_v41  ;;  %v631_v62 = vrot.slane %v629_v51, 5  ;;  %v639_v0 = vshll.u32 %v333_v46, 16  ;;  %v342_v43 = vld [vmem:[%s12435_s0 + $0x98] sm:$0x1] }
  0x2a   :  { %v635_v63 = vrot.slane %v633_v56, 4  ;;  %v644_v1 = vshrl.u32 %v334_v52, 16  ;;  %v608_v2 = vsel %vm8295_vm2, %v603_v58, %v607_v41  ;;  %v626_v4 = vor.u32 %v625_v60, %v622_v55  ;;  %v344_v55 = vld [vmem:[%s12435_s0 + $0xa0] sm:$0xf] }
  0x2b   :  { %1281 = vrot.lane.b32.xlu1 %v7106_v57, %s8243_s9  ;;  %v613_v3 = vrot.slane %v612_v59, 4  ;;  %v647_v6 = vshll.u32 %v334_v52, 16  ;;  %v641_v8 = vrot.slane %v639_v0, 5  ;;  %v653_v10 = vshll.u32 %v335_v61, 16 }
  0x2c   :  { %v636_v7 = vor.u32 %v635_v63, %v631_v62  ;;  %v646_v9 = vrot.slane %v644_v1, 4  ;;  %v627_v13 = vrot.slane %v626_v4, 4  ;;  %v657_v15 = vshrl.u32 %v335_v61, 16 }
  0x2d   :  { %v618_v12 = vsel %vm8295_vm2, %v613_v3, %v617_v54  ;;  %v649_v14 = vrot.slane %v647_v6, 5  ;;  %v655_v19 = vrot.slane %v653_v10, 5  ;;  %v663_v20 = vshll.u32 %v336_v5, 16 }
  0x2e   :  { %v7107_v17 = vcombine.low %v608_v2, %v618_v12  ;;  %v637_v18 = vrot.slane %v636_v7, 4  ;;  %v632_v21 = vsel %vm8295_vm2, %v627_v13, %v631_v62  ;;  %v659_v24 = vrot.slane %v657_v15, 4  ;;  %v345_v2 = vld [vmem:[%s12435_s0 + $0xa4] sm:$0x1] }
  0x2f   :  { %v650_v23 = vor.u32 %v649_v14, %v646_v9  ;;  %v668_v26 = vshrl.u32 %v337_v11, 16  ;;  %v665_v28 = vrot.slane %v663_v20, 5  ;;  %v671_v29 = vshll.u32 %v337_v11, 16  ;;  %v346_v9 = vld [vmem:[%s12435_s0 + $0xa8] sm:$0xf] }
  0x30   :  { %1283 = vrot.lane.b32.xlu0 %v7107_v17, %s8243_s9  ;;  %v642_v27 = vsel %vm8295_vm2, %v637_v18, %v641_v8  ;;  %v677_v30 = vshll.u32 %v338_v16, 16  ;;  %v660_v34 = vor.u32 %v659_v24, %v655_v19  ;;  %v681_v39 = vshrl.u32 %v338_v16, 16  ;;  %v347_v14 = vld [vmem:[%s12435_s0 + $0xac] sm:$0xf] }
  0x31   :  { %v7108_v32 = vcombine.low %v632_v21, %v642_v27  ;;  %v651_v33 = vrot.slane %v650_v23, 4  ;;  %v670_v35 = vrot.slane %v668_v26, 4  ;;  %v673_v37 = vrot.slane %v671_v29, 5  ;;  %v348_v21 = vld [vmem:[%s12435_s0 + $0xb0] sm:$0x1] }
  0x32   :  { %v679_v38 = vrot.slane %v677_v30, 5  ;;  %v687_v40 = vshll.u32 %v339_v25, 16  ;;  %v661_v42 = vrot.slane %v660_v34, 4  ;;  %v692_v44 = vshrl.u32 %v340_v31, 16  ;;  %v349_v29 = vld [vmem:[%s12435_s0 + $0xb4] sm:$0xf] }
  0x33   :  { %1285 = vrot.lane.b32.xlu1 %v7108_v32, %s8243_s9  ;;  %v656_v41 = vsel %vm8295_vm2, %v651_v33, %v655_v19  ;;  %v695_v45 = vshll.u32 %v340_v31, 16  ;;  %v674_v46 = vor.u32 %v673_v37, %v670_v35  ;;  %v683_v47 = vrot.slane %v681_v39, 4  ;;  %v350_v34 = vld [vmem:[%s12435_s0 + $0xb8] sm:$0xf] }
  0x34   :  { %v689_v48 = vrot.slane %v687_v40, 5  ;;  %v701_v49 = vshll.u32 %v341_v36, 16  ;;  %v666_v51 = vsel %vm8295_vm2, %v661_v42, %v665_v28  ;;  %v694_v52 = vrot.slane %v692_v44, 4 }
  0x35   :  { %v697_v53 = vrot.slane %v695_v45, 5  ;;  %v705_v54 = vshrl.u32 %v341_v36, 16  ;;  %v7109_v56 = vcombine.low %v656_v41, %v666_v51  ;;  %v675_v57 = vrot.slane %v674_v46, 4  ;;  %v351_v46 = vld [vmem:[%s12435_s0 + $0xbc] sm:$0x1] }
  0x36   :  { %v684_v58 = vor.u32 %v683_v47, %v679_v38  ;;  %v703_v59 = vrot.slane %v701_v49, 5  ;;  %v711_v62 = vshll.u32 %v342_v43, 16  ;;  %v716_v63 = vshrl.u32 %v343_v50, 16 }
  0x37   :  { %v698_v60 = vor.u32 %v697_v53, %v694_v52  ;;  %v707_v61 = vrot.slane %v705_v54, 4  ;;  %1287 = vrot.lane.b32.xlu0 %v7109_v56, %s8243_s9  ;;  %v680_v0 = vsel %vm8295_vm2, %v675_v57, %v679_v38  ;;  %v719_v3 = vshll.u32 %v343_v50, 16  ;;  %v353_v53 = vld [vmem:[%s12435_s0 + $0xdc] sm:$0xf] }
  0x38   :  { %v685_v1 = vrot.slane %v684_v58, 4  ;;  %v725_v4 = vshll.u32 %v344_v55, 16  ;;  %v713_v7 = vrot.slane %v711_v62, 5  ;;  %v718_v8 = vrot.slane %v716_v63, 4 }
  0x39   :  { %v699_v5 = vrot.slane %v698_v60, 4  ;;  %v708_v6 = vor.u32 %v707_v61, %v703_v59  ;;  %v721_v11 = vrot.slane %v719_v3, 5  ;;  %v729_v13 = vshrl.u32 %v344_v55, 16  ;;  %v355_v3 = vld [vmem:[%s12435_s0 + $0xe4] sm:$0xf] }
  0x3a   :  { %v690_v10 = vsel %vm8295_vm2, %v685_v1, %v689_v48  ;;  %v727_v12 = vrot.slane %v725_v4, 5  ;;  %v735_v18 = vshll.u32 %v345_v2, 16  ;;  %v740_v23 = vshrl.u32 %v346_v9, 16  ;;  %v352_v48 = vld [vmem:[%s12435_s0 + $0xd8] sm:$0xf] }
  0x3b   :  { %v7110_v15 = vcombine.low %v680_v0, %v690_v10  ;;  %v704_v16 = vsel %vm8295_vm2, %v699_v5, %v703_v59  ;;  %v709_v17 = vrot.slane %v708_v6, 4  ;;  %v722_v19 = vor.u32 %v721_v11, %v718_v8  ;;  %v354_v0 = vld [vmem:[%s12435_s0 + $0xe0] sm:$0x1]  ;;  %v356_v8 = vld [vmem:[%s12435_s0 + $0xe8] sm:$0xf] }
  0x3c   :  { %v731_v20 = vrot.slane %v729_v13, 4  ;;  %v743_v24 = vshll.u32 %v346_v9, 16  ;;  %v737_v26 = vrot.slane %v735_v18, 5  ;;  %v749_v27 = vshll.u32 %v347_v14, 16 }
  0x3d   :  { %1289 = vrot.lane.b32.xlu1 %v7110_v15, %s8243_s9  ;;  %v714_v25 = vsel %vm8295_vm2, %v709_v17, %v713_v7  ;;  %v753_v28 = vshrl.u32 %v347_v14, 16  ;;  %v723_v31 = vrot.slane %v722_v19, 4  ;;  %v742_v33 = vrot.slane %v740_v23, 4  ;;  %v358_v23 = vld [vmem:[%s12435_s0 + $0xf0] sm:$0xf] }
  0x3e   :  { %v7111_v30 = vcombine.low %v704_v16, %v714_v25  ;;  %v732_v32 = vor.u32 %v731_v20, %v727_v12  ;;  %v745_v35 = vrot.slane %v743_v24, 5  ;;  %v751_v36 = vrot.slane %v749_v27, 5  ;;  %v357_v16 = vld [vmem:[%s12435_s0 + $0xec] sm:$0x1] }
  0x3f   :  { %v755_v37 = vrot.slane %v753_v28, 4  ;;  %v759_v38 = vshll.u32 %v348_v21, 16  ;;  %v728_v39 = vsel %vm8295_vm2, %v723_v31, %v727_v12  ;;  %v764_v41 = vshrl.u32 %v349_v29, 16 }
  0x40   :  { %1291 = vrot.lane.b32.xlu0 %v7111_v30, %s8243_s9  ;;  %v733_v40 = vrot.slane %v732_v32, 4  ;;  %v767_v42 = vshll.u32 %v349_v29, 16  ;;  %v746_v43 = vor.u32 %v745_v35, %v742_v33  ;;  %v773_v47 = vshll.u32 %v350_v34, 16  ;;  %v359_v32 = vld [vmem:[%s12435_s0 + $0xf4] sm:$0xf] }
  0x41   :  { %v756_v44 = vor.u32 %v755_v37, %v751_v36  ;;  %v761_v45 = vrot.slane %v759_v38, 5  ;;  %v766_v50 = vrot.slane %v764_v41, 4  ;;  %v777_v52 = vshrl.u32 %v350_v34, 16 }
  0x42   :  { %v738_v49 = vsel %vm8295_vm2, %v733_v40, %v737_v26  ;;  %v769_v51 = vrot.slane %v767_v42, 5  ;;  %v747_v55 = vrot.slane %v746_v43, 4  ;;  %v775_v57 = vrot.slane %v773_v47, 5  ;;  %v360_v40 = vld [vmem:[%s12435_s0 + $0xf8] sm:$0x1] }
  0x43   :  { %v7112_v54 = vcombine.low %v728_v39, %v738_v49  ;;  %v757_v56 = vrot.slane %v756_v44, 4  ;;  %v779_v59 = vrot.slane %v777_v52, 4  ;;  %v783_v60 = vshll.u32 %v351_v46, 16  ;;  %v361_v46 = vld [vmem:[%s12435_s0 + $0xfc] sm:$0xf] }
  0x44   :  { %v770_v58 = vor.u32 %v769_v51, %v766_v50  ;;  %v788_v61 = vshrl.u32 %v352_v48, 16  ;;  %v752_v62 = vsel %vm8295_vm2, %v747_v55, %v751_v36  ;;  %v791_v1 = vshll.u32 %v352_v48, 16  ;;  %v362_v51 = vld [vmem:[%s12435_s0 + $0x100] sm:$0xf] }
  0x45   :  { %1293 = vrot.lane.b32.xlu1 %v7112_v54, %s8243_s9  ;;  %v762_v63 = vsel %vm8295_vm2, %v757_v56, %v761_v45  ;;  %v797_v2 = vshll.u32 %v353_v53, 16  ;;  %v780_v6 = vor.u32 %v779_v59, %v775_v57  ;;  %v785_v7 = vrot.slane %v783_v60, 5  ;;  %v363_v59 = vld [vmem:[%s12435_s0 + $0x104] sm:$0x1] }
  0x46   :  { %v7113_v4 = vcombine.low %v752_v62, %v762_v63  ;;  %v771_v5 = vrot.slane %v770_v58, 4  ;;  %v790_v9 = vrot.slane %v788_v61, 4  ;;  %v793_v10 = vrot.slane %v791_v1, 5  ;;  %v364_v1 = vld [vmem:[%s12435_s0 + $0x108] sm:$0xf] }
  0x47   :  { %v799_v11 = vrot.slane %v797_v2, 5  ;;  %v801_v12 = vshrl.u32 %v353_v53, 16  ;;  %v781_v14 = vrot.slane %v780_v6, 4  ;;  %v807_v15 = vshll.u32 %v354_v0, 16  ;;  %v365_v6 = vld [vmem:[%s12435_s0 + $0x10c] sm:$0xf] }
  0x48   :  { %1295 = vrot.lane.b32.xlu0 %v7113_v4, %s8243_s9  ;;  %v776_v13 = vsel %vm8295_vm2, %v771_v5, %v775_v57  ;;  %v812_v17 = vshrl.u32 %v355_v3, 16  ;;  %v794_v18 = vor.u32 %v793_v10, %v790_v9  ;;  %v815_v20 = vshll.u32 %v355_v3, 16 }
  0x49   :  { %v803_v19 = vrot.slane %v801_v12, 4  ;;  %v821_v21 = vshll.u32 %v356_v8, 16  ;;  %v786_v24 = vsel %vm8295_vm2, %v781_v14, %v785_v7  ;;  %v809_v25 = vrot.slane %v807_v15, 5 }
  0x4a   :  { %v814_v26 = vrot.slane %v812_v17, 4  ;;  %v825_v27 = vshrl.u32 %v356_v8, 16  ;;  %v7114_v28 = vcombine.low %v776_v13, %v786_v24  ;;  %v795_v29 = vrot.slane %v794_v18, 4  ;;  %v366_v13 = vld [vmem:[%s12435_s0 + $0x110] sm:$0x1] }
  0x4b   :  { %v804_v30 = vor.u32 %v803_v19, %v799_v11  ;;  %v817_v31 = vrot.slane %v815_v20, 5  ;;  %v823_v33 = vrot.slane %v821_v21, 5  ;;  %v831_v35 = vshll.u32 %v357_v16, 16  ;;  %v367_v20 = vld [vmem:[%s12435_s0 + $0x114] sm:$0xf] }
  0x4c   :  { %v827_v34 = vrot.slane %v825_v27, 4  ;;  %v836_v36 = vshrl.u32 %v358_v23, 16  ;;  %1297 = vrot.lane.b32.xlu1 %v7114_v28, %s8243_s9  ;;  %v800_v37 = vsel %vm8295_vm2, %v795_v29, %v799_v11  ;;  %v839_v41 = vshll.u32 %v358_v23, 16 }
  0x4d   :  { %v805_v38 = vrot.slane %v804_v30, 4  ;;  %v818_v39 = vor.u32 %v817_v31, %v814_v26  ;;  %v833_v43 = vrot.slane %v831_v35, 5  ;;  %v845_v45 = vshll.u32 %v359_v32, 16  ;;  %v368_v26 = vld [vmem:[%s12435_s0 + $0x118] sm:$0xf] }
  0x4e   :  { %v828_v42 = vor.u32 %v827_v34, %v823_v33  ;;  %v838_v44 = vrot.slane %v836_v36, 4  ;;  %v841_v49 = vrot.slane %v839_v41, 5  ;;  %v849_v50 = vshrl.u32 %v359_v32, 16 }
  0x4f   :  { %v810_v47 = vsel %vm8295_vm2, %v805_v38, %v809_v25  ;;  %v819_v48 = vrot.slane %v818_v39, 4  ;;  %v847_v54 = vrot.slane %v845_v45, 5  ;;  %v855_v55 = vshll.u32 %v360_v40, 16 }
  0x50   :  { %v7115_v52 = vcombine.low %v800_v37, %v810_v47  ;;  %v829_v53 = vrot.slane %v828_v42, 4  ;;  %v842_v57 = vor.u32 %v841_v49, %v838_v44  ;;  %v851_v58 = vrot.slane %v849_v50, 4  ;;  %v369_v37 = vld [vmem:[%s12435_s0 + $0x11c] sm:$0x1]  ;;  %v370_v44 = vld [vmem:[%s12435_s0 + $0x120] sm:$0xf] }
  0x51   :  { %v824_v56 = vsel %vm8295_vm2, %v819_v48, %v823_v33  ;;  %v860_v60 = vshrl.u32 %v361_v46, 16  ;;  %v857_v62 = vrot.slane %v855_v55, 5  ;;  %v863_v63 = vshll.u32 %v361_v46, 16  ;;  %v371_v49 = vld [vmem:[%s12435_s0 + $0x124] sm:$0xf] }
  0x52   :  { %1299 = vrot.lane.b32.xlu0 %v7115_v52, %s8243_s9  ;;  %v834_v61 = vsel %vm8295_vm2, %v829_v53, %v833_v43  ;;  %v869_v0 = vshll.u32 %v362_v51, 16  ;;  %v843_v3 = vrot.slane %v842_v57, 4  ;;  %v852_v4 = vor.u32 %v851_v58, %v847_v54 }
  0x53   :  { %v7116_v2 = vcombine.low %v824_v56, %v834_v61  ;;  %v862_v5 = vrot.slane %v860_v60, 4  ;;  %v865_v7 = vrot.slane %v863_v63, 5  ;;  %v873_v9 = vshrl.u32 %v362_v51, 16  ;;  %v372_v56 = vld [vmem:[%s12435_s0 + $0x128] sm:$0x1] }
  0x54   :  { %v871_v8 = vrot.slane %v869_v0, 5  ;;  %v879_v10 = vshll.u32 %v363_v59, 16  ;;  %v848_v11 = vsel %vm8295_vm2, %v843_v3, %v847_v54  ;;  %v853_v12 = vrot.slane %v852_v4, 4  ;;  %v373_v63 = vld [vmem:[%s12435_s0 + $0x12c] sm:$0xf] }
  0x55   :  { %1301 = vrot.lane.b32.xlu1 %v7116_v2, %s8243_s9  ;;  %v884_v14 = vshrl.u32 %v364_v1, 16  ;;  %v887_v15 = vshll.u32 %v364_v1, 16  ;;  %v866_v16 = vor.u32 %v865_v7, %v862_v5  ;;  %v875_v17 = vrot.slane %v873_v9, 4  ;;  %v374_v4 = vld [vmem:[%s12435_s0 + $0x130] sm:$0xf] }
  0x56   :  { %v881_v18 = vrot.slane %v879_v10, 5  ;;  %v893_v19 = vshll.u32 %v365_v6, 16  ;;  %v858_v21 = vsel %vm8295_vm2, %v853_v12, %v857_v62  ;;  %v897_v25 = vshrl.u32 %v365_v6, 16  ;;  %v375_v9 = vld [vmem:[%s12435_s0 + $0x134] sm:$0x1] }
  0x57   :  { %v886_v23 = vrot.slane %v884_v14, 4  ;;  %v889_v24 = vrot.slane %v887_v15, 5  ;;  %v7117_v27 = vcombine.low %v848_v11, %v858_v21  ;;  %v867_v28 = vrot.slane %v866_v16, 4  ;;  %v376_v10 = vld [vmem:[%s12435_s0 + $0x138] sm:$0xf] }
  0x58   :  { %v876_v29 = vor.u32 %v875_v17, %v871_v8  ;;  %v895_v30 = vrot.slane %v893_v19, 5  ;;  %v899_v32 = vrot.slane %v897_v25, 4  ;;  %v903_v33 = vshll.u32 %v366_v13, 16  ;;  %v377_v15 = vld [vmem:[%s12435_s0 + $0x13c] sm:$0xf] }
  0x59   :  { %v890_v31 = vor.u32 %v889_v24, %v886_v23  ;;  %v908_v34 = vshrl.u32 %v367_v20, 16  ;;  %1303 = vrot.lane.b32.xlu0 %v7117_v27, %s8243_s9  ;;  %v872_v35 = vsel %vm8295_vm2, %v867_v28, %v871_v8  ;;  %v911_v38 = vshll.u32 %v367_v20, 16 }
  0x5a   :  { %v877_v36 = vrot.slane %v876_v29, 4  ;;  %v917_v39 = vshll.u32 %v368_v26, 16  ;;  %v900_v41 = vor.u32 %v899_v32, %v895_v30  ;;  %v905_v42 = vrot.slane %v903_v33, 5 }
  0x5b   :  { %v891_v40 = vrot.slane %v890_v31, 4  ;;  %v910_v43 = vrot.slane %v908_v34, 4  ;;  %v913_v46 = vrot.slane %v911_v38, 5  ;;  %v921_v48 = vshrl.u32 %v368_v26, 16  ;;  %v379_v38 = vld [vmem:[%s12435_s0 + $0x144] sm:$0xf] }
  0x5c   :  { %v882_v45 = vsel %vm8295_vm2, %v877_v36, %v881_v18  ;;  %v919_v47 = vrot.slane %v917_v39, 5  ;;  %v901_v52 = vrot.slane %v900_v41, 4  ;;  %v927_v53 = vshll.u32 %v369_v37, 16 }
  0x5d   :  { %v7118_v50 = vcombine.low %v872_v35, %v882_v45  ;;  %v896_v51 = vsel %vm8295_vm2, %v891_v40, %v895_v30  ;;  %v914_v54 = vor.u32 %v913_v46, %v910_v43  ;;  %v923_v55 = vrot.slane %v921_v48, 4  ;;  %v378_v35 = vld [vmem:[%s12435_s0 + $0x140] sm:$0x1]  ;;  %v380_v43 = vld [vmem:[%s12435_s0 + $0x148] sm:$0xf] }
  0x5e   :  { %v932_v57 = vshrl.u32 %v370_v44, 16  ;;  %v935_v58 = vshll.u32 %v370_v44, 16  ;;  %v906_v59 = vsel %vm8295_vm2, %v901_v52, %v905_v42  ;;  %v929_v60 = vrot.slane %v927_v53, 5 }
  0x5f   :  { %1305 = vrot.lane.b32.xlu1 %v7118_v50, %s8243_s9  ;;  %v941_v61 = vshll.u32 %v371_v49, 16  ;;  %v945_v62 = vshrl.u32 %v371_v49, 16  ;;  %v7119_v0 = vcombine.low %v896_v51, %v906_v59  ;;  %v915_v1 = vrot.slane %v914_v54, 4  ;;  %v381_v51 = vld [vmem:[%s12435_s0 + $0x14c] sm:$0x1] }
  0x60   :  { %v924_v2 = vor.u32 %v923_v55, %v919_v47  ;;  %v934_v3 = vrot.slane %v932_v57, 4  ;;  %v937_v5 = vrot.slane %v935_v58, 5  ;;  %v951_v8 = vshll.u32 %v372_v56, 16  ;;  %v382_v57 = vld [vmem:[%s12435_s0 + $0x150] sm:$0xf] }
  0x61   :  { %v943_v6 = vrot.slane %v941_v61, 5  ;;  %v947_v7 = vrot.slane %v945_v62, 4  ;;  %1307 = vrot.lane.b32.xlu0 %v7119_v0, %s8243_s9  ;;  %v920_v11 = vsel %vm8295_vm2, %v915_v1, %v919_v47  ;;  %v956_v13 = vshrl.u32 %v373_v63, 16 }
  0x62   :  { %v925_v12 = vrot.slane %v924_v2, 4  ;;  %v959_v14 = vshll.u32 %v373_v63, 16  ;;  %v938_v16 = vor.u32 %v937_v5, %v934_v3  ;;  %v953_v18 = vrot.slane %v951_v8, 5  ;;  %v383_v2 = vld [vmem:[%s12435_s0 + $0x154] sm:$0xf] }
  0x63   :  { %v948_v17 = vor.u32 %v947_v7, %v943_v6  ;;  %v965_v19 = vshll.u32 %v374_v4, 16  ;;  %v958_v21 = vrot.slane %v956_v13, 4  ;;  %v969_v24 = vshrl.u32 %v374_v4, 16  ;;  %v384_v3 = vld [vmem:[%s12435_s0 + $0x158] sm:$0x1] }
  0x64   :  { %v930_v20 = vsel %vm8295_vm2, %v925_v12, %v929_v60  ;;  %v961_v23 = vrot.slane %v959_v14, 5  ;;  %v939_v26 = vrot.slane %v938_v16, 4  ;;  %v975_v31 = vshll.u32 %v375_v9, 16  ;;  %v385_v8 = vld [vmem:[%s12435_s0 + $0x15c] sm:$0xf] }
  0x65   :  { %v7120_v25 = vcombine.low %v920_v11, %v930_v20  ;;  %v949_v27 = vrot.slane %v948_v17, 4  ;;  %v967_v28 = vrot.slane %v965_v19, 5  ;;  %v971_v30 = vrot.slane %v969_v24, 4  ;;  %v386_v13 = vld [vmem:[%s12435_s0 + $0x160] sm:$0xf] }
  0x66   :  { %v962_v29 = vor.u32 %v961_v23, %v958_v21  ;;  %v980_v32 = vshrl.u32 %v376_v10, 16  ;;  %v944_v33 = vsel %vm8295_vm2, %v939_v26, %v943_v6  ;;  %v983_v36 = vshll.u32 %v376_v10, 16 }
  0x67   :  { %1309 = vrot.lane.b32.xlu1 %v7120_v25, %s8243_s9  ;;  %v954_v34 = vsel %vm8295_vm2, %v949_v27, %v953_v18  ;;  %v989_v37 = vshll.u32 %v377_v15, 16  ;;  %v972_v41 = vor.u32 %v971_v30, %v967_v28  ;;  %v977_v42 = vrot.slane %v975_v31, 5  ;;  %v387_v30 = vld [vmem:[%s12435_s0 + $0x164] sm:$0x1] }
  0x68   :  { %v7121_v39 = vcombine.low %v944_v33, %v954_v34  ;;  %v963_v40 = vrot.slane %v962_v29, 4  ;;  %v982_v44 = vrot.slane %v980_v32, 4  ;;  %v985_v45 = vrot.slane %v983_v36, 5  ;;  %v388_v36 = vld [vmem:[%s12435_s0 + $0x168] sm:$0xf] }
  0x69   :  { %v991_v46 = vrot.slane %v989_v37, 5  ;;  %v993_v47 = vshrl.u32 %v377_v15, 16  ;;  %v973_v49 = vrot.slane %v972_v41, 4  ;;  %v999_v50 = vshll.u32 %v378_v35, 16  ;;  %v389_v41 = vld [vmem:[%s12435_s0 + $0x16c] sm:$0xf] }
  0x6a   :  { %1311 = vrot.lane.b32.xlu0 %v7121_v39, %s8243_s9  ;;  %v968_v48 = vsel %vm8295_vm2, %v963_v40, %v967_v28  ;;  %v1004_v52 = vshrl.u32 %v379_v38, 16  ;;  %v986_v53 = vor.u32 %v985_v45, %v982_v44  ;;  %v1007_v55 = vshll.u32 %v379_v38, 16 }
  0x6b   :  { %v995_v54 = vrot.slane %v993_v47, 4  ;;  %v1013_v56 = vshll.u32 %v380_v43, 16  ;;  %v978_v58 = vsel %vm8295_vm2, %v973_v49, %v977_v42  ;;  %v1001_v59 = vrot.slane %v999_v50, 5 }
  0x6c   :  { %v1006_v60 = vrot.slane %v1004_v52, 4  ;;  %v1017_v61 = vshrl.u32 %v380_v43, 16  ;;  %v7122_v62 = vcombine.low %v968_v48, %v978_v58  ;;  %v987_v63 = vrot.slane %v986_v53, 4  ;;  %v390_v48 = vld [vmem:[%s12435_s0 + $0x170] sm:$0x1] }
  0x6d   :  { %v996_v0 = vor.u32 %v995_v54, %v991_v46  ;;  %v1009_v1 = vrot.slane %v1007_v55, 5  ;;  %v1015_v4 = vrot.slane %v1013_v56, 5  ;;  %v1023_v6 = vshll.u32 %v381_v51, 16  ;;  %v391_v55 = vld [vmem:[%s12435_s0 + $0x174] sm:$0xf] }
  0x6e   :  { %v1019_v5 = vrot.slane %v1017_v61, 4  ;;  %v1028_v7 = vshrl.u32 %v382_v57, 16  ;;  %1313 = vrot.lane.b32.xlu1 %v7122_v62, %s8243_s9  ;;  %v992_v9 = vsel %vm8295_vm2, %v987_v63, %v991_v46  ;;  %v1031_v12 = vshll.u32 %v382_v57, 16 }
  0x6f   :  { %v997_v10 = vrot.slane %v996_v0, 4  ;;  %v1010_v11 = vor.u32 %v1009_v1, %v1006_v60  ;;  %v1025_v15 = vrot.slane %v1023_v6, 5  ;;  %v1037_v17 = vshll.u32 %v383_v2, 16  ;;  %v392_v60 = vld [vmem:[%s12435_s0 + $0x178] sm:$0xf] }
  0x70   :  { %v1020_v14 = vor.u32 %v1019_v5, %v1015_v4  ;;  %v1030_v16 = vrot.slane %v1028_v7, 4  ;;  %v1033_v20 = vrot.slane %v1031_v12, 5  ;;  %v1041_v21 = vshrl.u32 %v383_v2, 16  ;;  %v393_v1 = vld [vmem:[%s12435_s0 + $0x17c] sm:$0x1] }
  0x71   :  { %v1002_v18 = vsel %vm8295_vm2, %v997_v10, %v1001_v59  ;;  %v1011_v19 = vrot.slane %v1010_v11, 4  ;;  %v1039_v25 = vrot.slane %v1037_v17, 5  ;;  %v1047_v26 = vshll.u32 %v384_v3, 16  ;;  %v394_v6 = vld [vmem:[%s12435_s0 + $0x180] sm:$0xf] }
  0x72   :  { %v7123_v23 = vcombine.low %v992_v9, %v1002_v18  ;;  %v1021_v24 = vrot.slane %v1020_v14, 4  ;;  %v1034_v28 = vor.u32 %v1033_v20, %v1030_v16  ;;  %v1043_v29 = vrot.slane %v1041_v21, 4  ;;  %v395_v11 = vld [vmem:[%s12435_s0 + $0x184] sm:$0xf] }
  0x73   :  { %v1016_v27 = vsel %vm8295_vm2, %v1011_v19, %v1015_v4  ;;  %v1052_v31 = vshrl.u32 %v385_v8, 16  ;;  %v1049_v33 = vrot.slane %v1047_v26, 5  ;;  %v1055_v34 = vshll.u32 %v385_v8, 16 }
  0x74   :  { %1315 = vrot.lane.b32.xlu0 %v7123_v23, %s8243_s9  ;;  %v1026_v32 = vsel %vm8295_vm2, %v1021_v24, %v1025_v15  ;;  %v1061_v35 = vshll.u32 %v386_v13, 16  ;;  %v1035_v38 = vrot.slane %v1034_v28, 4  ;;  %v1044_v39 = vor.u32 %v1043_v29, %v1039_v25 }
  0x75   :  { %v7124_v37 = vcombine.low %v1016_v27, %v1026_v32  ;;  %v1054_v40 = vrot.slane %v1052_v31, 4  ;;  %v1057_v42 = vrot.slane %v1055_v34, 5  ;;  %v1065_v44 = vshrl.u32 %v386_v13, 16  ;;  %v396_v27 = vld [vmem:[%s12435_s0 + $0x188] sm:$0x1] }
  0x76   :  { %v1063_v43 = vrot.slane %v1061_v35, 5  ;;  %v1071_v45 = vshll.u32 %v387_v30, 16  ;;  %v1040_v46 = vsel %vm8295_vm2, %v1035_v38, %v1039_v25  ;;  %v1045_v47 = vrot.slane %v1044_v39, 4  ;;  %v397_v34 = vld [vmem:[%s12435_s0 + $0x18c] sm:$0xf] }
  0x77   :  { %1317 = vrot.lane.b32.xlu1 %v7124_v37, %s8243_s9  ;;  %v1076_v49 = vshrl.u32 %v388_v36, 16  ;;  %v1079_v50 = vshll.u32 %v388_v36, 16  ;;  %v1058_v51 = vor.u32 %v1057_v42, %v1054_v40  ;;  %v1067_v52 = vrot.slane %v1065_v44, 4  ;;  %v398_v39 = vld [vmem:[%s12435_s0 + $0x190] sm:$0xf] }
  0x78   :  { %v1073_v53 = vrot.slane %v1071_v45, 5  ;;  %v1085_v54 = vshll.u32 %v389_v41, 16  ;;  %v1050_v56 = vsel %vm8295_vm2, %v1045_v47, %v1049_v33  ;;  %v1089_v59 = vshrl.u32 %v389_v41, 16  ;;  %v399_v44 = vld [vmem:[%s12435_s0 + $0x194] sm:$0x1] }
  0x79   :  { %v1078_v57 = vrot.slane %v1076_v49, 4  ;;  %v1081_v58 = vrot.slane %v1079_v50, 5  ;;  %v7125_v61 = vcombine.low %v1040_v46, %v1050_v56  ;;  %v1059_v62 = vrot.slane %v1058_v51, 4  ;;  %v1396_v49 = vld [vmem:[%s12435_s0] sm:$0xe] }
  0x7a   :  { %v1068_v63 = vor.u32 %v1067_v52, %v1063_v43  ;;  %v1087_v0 = vrot.slane %v1085_v54, 5  ;;  %v1091_v3 = vrot.slane %v1089_v59, 4  ;;  %v1095_v4 = vshll.u32 %v390_v48, 16  ;;  %v1398_v59 = vld [vmem:[%s12435_s0 + $0x8] sm:$0x1] }
  0x7b   :  { %v1082_v2 = vor.u32 %v1081_v58, %v1078_v57  ;;  %v1100_v5 = vshrl.u32 %v391_v55, 16  ;;  %1319 = vrot.lane.b32.xlu0 %v7125_v61, %s8243_s9  ;;  %v1064_v7 = vsel %vm8295_vm2, %v1059_v62, %v1063_v43  ;;  %v1103_v9 = vshll.u32 %v391_v55, 16  ;;  %v1397_v58 = vld [vmem:[%s12435_s0 + $0x4] sm:$0xf]  ;;  %v1400_v61 = vld [vmem:[%s12435_s0 + $0x10] sm:$0xf] }
  0x7c   :  { %v1069_v8 = vrot.slane %v1068_v63, 4  ;;  %v1109_v10 = vshll.u32 %v392_v60, 16  ;;  %v1092_v13 = vor.u32 %v1091_v3, %v1087_v0  ;;  %v1097_v14 = vrot.slane %v1095_v4, 5 }
  0x7d   :  { %v1083_v12 = vrot.slane %v1082_v2, 4  ;;  %v1102_v15 = vrot.slane %v1100_v5, 4  ;;  %v1105_v17 = vrot.slane %v1103_v9, 5  ;;  %v1113_v19 = vshrl.u32 %v392_v60, 16  ;;  %v1399_v60 = vld [vmem:[%s12435_s0 + $0xc] sm:$0xe] }
  0x7e   :  { %v1074_v16 = vsel %vm8295_vm2, %v1069_v8, %v1073_v53  ;;  %v1111_v18 = vrot.slane %v1109_v10, 5  ;;  %v1093_v23 = vrot.slane %v1092_v13, 4  ;;  %v1119_v24 = vshll.u32 %v393_v1, 16  ;;  %v1401_v2 = vld [vmem:[%s12435_s0 + $0x14] sm:$0x1] }
  0x7f   :  { %v7126_v20 = vcombine.low %v1064_v7, %v1074_v16  ;;  %v1088_v21 = vsel %vm8295_vm2, %v1083_v12, %v1087_v0  ;;  %v1106_v25 = vor.u32 %v1105_v17, %v1102_v15  ;;  %v1115_v26 = vrot.slane %v1113_v19, 4  ;;  %v1403_v10 = vld [vmem:[%s12435_s0 + $0x1c] sm:$0xf]  ;;  %v1405_v12 = vld [vmem:[%s12435_s0 + $0x24] sm:$0xe] }
  0x80   :  { %v1124_v28 = vshrl.u32 %v394_v6, 16  ;;  %v1127_v29 = vshll.u32 %v394_v6, 16  ;;  %v1098_v30 = vsel %vm8295_vm2, %v1093_v23, %v1097_v14  ;;  %v1121_v31 = vrot.slane %v1119_v24, 5  ;;  %v1402_v6 = vld [vmem:[%s12435_s0 + $0x18] sm:$0xe] }
  0x81   :  { %1321 = vrot.lane.b32.xlu1 %v7126_v20, %s8243_s9  ;;  %v1133_v32 = vshll.u32 %v395_v11, 16  ;;  %v1137_v33 = vshrl.u32 %v395_v11, 16  ;;  %v7127_v35 = vcombine.low %v1088_v21, %v1098_v30  ;;  %v1107_v36 = vrot.slane %v1106_v25, 4  ;;  %v1404_v11 = vld [vmem:[%s12435_s0 + $0x20] sm:$0x1] }
  0x82   :  { %v1116_v37 = vor.u32 %v1115_v26, %v1111_v18  ;;  %v1126_v38 = vrot.slane %v1124_v28, 4  ;;  %v1129_v40 = vrot.slane %v1127_v29, 5  ;;  %v1143_v43 = vshll.u32 %v396_v27, 16  ;;  %v1407_v28 = vld [vmem:[%s12435_s0 + $0x2c] sm:$0x1] }
  0x83   :  { %v1135_v41 = vrot.slane %v1133_v32, 5  ;;  %v1139_v42 = vrot.slane %v1137_v33, 4  ;;  %1323 = vrot.lane.b32.xlu0 %v7127_v35, %s8243_s9  ;;  %v1112_v45 = vsel %vm8295_vm2, %v1107_v36, %v1111_v18  ;;  %v1148_v47 = vshrl.u32 %v397_v34, 16  ;;  %v1406_v18 = vld [vmem:[%s12435_s0 + $0x28] sm:$0xf] }
  0x84   :  { %v1117_v46 = vrot.slane %v1116_v37, 4  ;;  %v1151_v48 = vshll.u32 %v397_v34, 16  ;;  %v1130_v50 = vor.u32 %v1129_v40, %v1126_v38  ;;  %v1145_v52 = vrot.slane %v1143_v43, 5  ;;  %v1408_v29 = vld [vmem:[%s12435_s0 + $0x30] sm:$0xe] }
  0x85   :  { %v1140_v51 = vor.u32 %v1139_v42, %v1135_v41  ;;  %v1157_v53 = vshll.u32 %v398_v39, 16  ;;  %v1150_v55 = vrot.slane %v1148_v47, 4  ;;  %v1161_v57 = vshrl.u32 %v398_v39, 16  ;;  %v1409_v34 = vld [vmem:[%s12435_s0 + $0x34] sm:$0xf] }
  0x86   :  { %v1122_v54 = vsel %vm8295_vm2, %v1117_v46, %v1121_v31  ;;  %v1153_v56 = vrot.slane %v1151_v48, 5  ;;  %v1131_v63 = vrot.slane %v1130_v50, 4  ;;  %v1167_v5 = vshll.u32 %v399_v44, 16  ;;  %v1410_v35 = vld [vmem:[%s12435_s0 + $0x38] sm:$0x1] }
  0x87   :  { %v7128_v62 = vcombine.low %v1112_v45, %v1122_v54  ;;  %v1141_v0 = vrot.slane %v1140_v51, 4  ;;  %v1159_v1 = vrot.slane %v1157_v53, 5  ;;  %v1163_v4 = vrot.slane %v1161_v57, 4  ;;  %v1411_v36 = vld [vmem:[%s12435_s0 + $0x3c] sm:$0xe]  ;;  %v8802_v54 = vpop.permute.xlu0 %1267 }
  0x88   :  { %v1154_v3 = vor.u32 %v1153_v56, %v1150_v55  ;;  %vm1588_vm3 = vcmask 1042432   ;;  %v1136_v7 = vsel %vm8295_vm2, %v1131_v63, %v1135_v41  ;;  %vm1589_vm4 = vcmask 1046532   ;;  %v1412_v41 = vld [vmem:[%s12435_s0 + $0x40] sm:$0xf]  ;;  %v1413_v42 = vld [vmem:[%s12435_s0 + $0x44] sm:$0x1] }
  0x89   :  { %1325 = vrot.lane.b32.xlu1 %v7128_v62, %s8243_s9  ;;  %v1146_v8 = vsel %vm8295_vm2, %v1141_v0, %v1145_v52  ;;  %v7131_v9 = vrot.slane %v1396_v49, 9  ;;  %v1164_v15 = vor.u32 %v1163_v4, %v1159_v1  ;;  %v1169_v16 = vrot.slane %v1167_v5, 5  ;;  %vm8750_vm5 = vmor %vm1588_vm3, %vm1589_vm4  ;;  %v1414_v47 = vld [vmem:[%s12435_s0 + $0x48] sm:$0xe]  ;;  %v1415_v52 = vld [vmem:[%s12435_s0 + $0x4c] sm:$0xf] }
  0x8a   :  { %v7129_v13 = vcombine.low %v1136_v7, %v1146_v8  ;;  %v1155_v14 = vrot.slane %v1154_v3, 4  ;;  %v12448_v17 = vmov 0  ;;  %v1593_v19 = vrot.slane %v1397_v58, 5  ;;  %v1416_v53 = vld [vmem:[%s12435_s0 + $0x50] sm:$0x1] }
  0x8b   :  { %v12449_v17 = vsel %vm8750_vm5, 4294967295, %v12448_v17  ;;  %v1596_v20 = vrot.slane %v1398_v59, 5  ;;  %v7132_v21 = vrot.slane %v1399_v60, 9  ;;  %v1600_v23 = vrot.slane %v1400_v61, 5  ;;  %v1417_v59 = vld [vmem:[%s12435_s0 + $0x54] sm:$0xe] }
  0x8c   :  { %12450 = vst [vmem:[#allocation7_spill] sm:$0xff] %v12449_v17  ;;  %1327 = vrot.lane.b32.xlu0 %v7129_v13, %s8243_s9  ;;  %v1160_v24 = vsel %vm8295_vm2, %v1155_v14, %v1159_v1  ;;  %v1165_v25 = vrot.slane %v1164_v15, 4  ;;  %v1603_v26 = vrot.slane %v1401_v2, 5  ;;  %v7133_v27 = vrot.slane %v1402_v6, 9  ;;  %v1418_v60 = vld [vmem:[%s12435_s0 + $0x58] sm:$0xf] }
  0x8d   :  { %v1594_v30 = vsel %vm8750_vm5, %v7131_v9, %v1593_v19  ;;  %v1595_v31 = vrot.slane %v1593_v19, 4  ;;  %v1601_v32 = vsel %vm8750_vm5, %v7132_v21, %v1600_v23  ;;  %v1602_v33 = vrot.slane %v1600_v23, 4  ;;  %v1419_v5 = vld [vmem:[%s12435_s0 + $0x5c] sm:$0x1]  ;;  %v1420_v6 = vld [vmem:[%s12435_s0 + $0x60] sm:$0xe]  ;;  %v8844_v21 = vpop.permute.xlu1 %1271 }
  0x8e   :  { %v1170_v37 = vsel %vm8295_vm2, %v1165_v25, %v1169_v16  ;;  %v1607_v38 = vrot.slane %v1403_v10, 5  ;;  %v1610_v39 = vrot.slane %v1404_v11, 5  ;;  %v7134_v40 = vrot.slane %v1405_v12, 9  ;;  %v1421_v11 = vld [vmem:[%s12435_s0 + $0x64] sm:$0xf] }
  0x8f   :  { %v7130_v43 = vcombine.low %v1160_v24, %v1170_v37  ;;  %v1597_v44 = vsel %vm8750_vm5, %v1595_v31, %v1596_v20  ;;  %v1604_v45 = vsel %vm8750_vm5, %v1602_v33, %v1603_v26  ;;  %v1614_v46 = vrot.slane %v1406_v18, 5  ;;  %v1422_v12 = vld [vmem:[%s12435_s0 + $0x68] sm:$0x1]  ;;  %v1423_v13 = vld [vmem:[%s12435_s0 + $0x6c] sm:$0xe] }
  0x90   :  { %v7163_v48 = vcombine.low %v1594_v30, %v1597_v44  ;;  %v7164_v49 = vcombine.low %v1601_v32, %v1604_v45  ;;  %v1608_v50 = vsel %vm8750_vm5, %v7133_v27, %v1607_v38  ;;  %v1609_v51 = vrot.slane %v1607_v38, 4  ;;  %v1424_v19 = vld [vmem:[%s12435_s0 + $0x70] sm:$0xf]  ;;  %v1425_v20 = vld [vmem:[%s12435_s0 + $0x74] sm:$0x1] }
  0x91   :  { %1329 = vrot.lane.b32.xlu1 %v7130_v43, %s8243_s9  ;;  %v1615_v55 = vsel %vm8750_vm5, %v7134_v40, %v1614_v46  ;;  %v1616_v56 = vrot.slane %v1614_v46, 4  ;;  %v1617_v57 = vrot.slane %v1407_v28, 5  ;;  %v7135_v58 = vrot.slane %v1408_v29, 9  ;;  %v7291_v27 = vld [vmem:[%s12435_s0 + $0xc] sm:$0xf]  ;;  %v8852_v28 = vpop.permute.xlu0 %1269 }
  0x92   :  { %1911 = vrot.lane.b32.xlu0 %v7163_v48, %s8244_s16  ;;  %v1611_v61 = vsel %vm8750_vm5, %v1609_v51, %v1610_v39  ;;  %v1621_v62 = vrot.slane %v1409_v34, 5  ;;  %v1624_v63 = vrot.slane %v1410_v35, 5  ;;  %v7136_v0 = vrot.slane %v1411_v36, 9  ;;  %v7293_v46 = vld [vmem:[%s12435_s0 + $0x14] sm:$0x1] }
  0x93   :  { %v7165_v1 = vcombine.low %v1608_v50, %v1611_v61  ;;  %v1618_v2 = vsel %vm8750_vm5, %v1616_v56, %v1617_v57  ;;  %v1628_v3 = vrot.slane %v1412_v41, 5  ;;  %v1631_v4 = vrot.slane %v1413_v42, 5  ;;  %v7292_v41 = vld [vmem:[%s12435_s0 + $0x10] sm:$0xf]  ;;  %v7294_v51 = vld [vmem:[%s12435_s0 + $0x18] sm:$0xf] }
  0x94   :  { %v7166_v7 = vcombine.low %v1615_v55, %v1618_v2  ;;  %v1622_v8 = vsel %vm8750_vm5, %v7135_v58, %v1621_v62  ;;  %v1623_v9 = vrot.slane %v1621_v62, 4  ;;  %v7137_v10 = vrot.slane %v1414_v47, 9 }
  0x95   :  { %1913 = vrot.lane.b32.xlu1 %v7164_v49, %s8244_s16  ;;  %v1629_v14 = vsel %vm8750_vm5, %v7136_v0, %v1628_v3  ;;  %v1630_v15 = vrot.slane %v1628_v3, 4  ;;  %v1635_v16 = vrot.slane %v1415_v52, 5  ;;  %v1638_v18 = vrot.slane %v1416_v53, 5  ;;  %v7295_v52 = vld [vmem:[%s12435_s0 + $0x1c] sm:$0xf]  ;;  %v8880_v53 = vpop.permute.xlu1 %1273  ;;  %v8890_v61 = vpop.permute.xlu0 %1275 }
  0x96   :  { %1915 = vrot.lane.b32.xlu0 %v7165_v1, %s8244_s16  ;;  %v1625_v23 = vsel %vm8750_vm5, %v1623_v9, %v1624_v63  ;;  %v7138_v24 = vrot.slane %v1417_v59, 9  ;;  %v1642_v25 = vrot.slane %v1418_v60, 5  ;;  %v1645_v26 = vrot.slane %v1419_v5, 5  ;;  %v7296_v59 = vld [vmem:[%s12435_s0 + $0x20] sm:$0x1] }
  0x97   :  { %v7167_v29 = vcombine.low %v1622_v8, %v1625_v23  ;;  %v1632_v30 = vsel %vm8750_vm5, %v1630_v15, %v1631_v4  ;;  %v1636_v31 = vsel %vm8750_vm5, %v7137_v10, %v1635_v16  ;;  %v1637_v32 = vrot.slane %v1635_v16, 4  ;;  %v7419_v60 = vld [vmem:[%s12435_s0 + $0xc] sm:$0xe] }
  0x98   :  { %v7168_v33 = vcombine.low %v1629_v14, %v1632_v30  ;;  %v1643_v34 = vsel %vm8750_vm5, %v7138_v24, %v1642_v25  ;;  %v1644_v35 = vrot.slane %v1642_v25, 4  ;;  %v7139_v36 = vrot.slane %v1420_v6, 9  ;;  %v7420_v6 = vld [vmem:[%s12435_s0 + $0x10] sm:$0xf] }
  0x99   :  { %1917 = vrot.lane.b32.xlu1 %v7166_v7, %s8244_s16  ;;  %v1639_v37 = vsel %vm8750_vm5, %v1637_v32, %v1638_v18  ;;  %v1649_v38 = vrot.slane %v1421_v11, 5  ;;  %v1652_v39 = vrot.slane %v1422_v12, 5  ;;  %v7140_v40 = vrot.slane %v1423_v13, 9  ;;  %v7421_v7 = vld [vmem:[%s12435_s0 + $0x14] sm:$0x1]  ;;  %v8120_v13 = vld [vmem:[%s12435_s0 + $0xc] sm:$0xff]  }
  0x9a   :  { %1919 = vrot.lane.b32.xlu0 %v7167_v29, %s8244_s16  ;;  %v7169_v42 = vcombine.low %v1636_v31, %v1639_v37  ;;  %v1646_v43 = vsel %vm8750_vm5, %v1644_v35, %v1645_v26  ;;  %v1656_v44 = vrot.slane %v1424_v19, 5  ;;  %v1659_v45 = vrot.slane %v1425_v20, 5  ;;  %v7422_v12 = vld [vmem:[%s12435_s0 + $0x18] sm:$0xe]  ;;  %v7423_v19 = vld [vmem:[%s12435_s0 + $0x1c] sm:$0xf] }
  0x9b   :  { %v7170_v47 = vcombine.low %v1643_v34, %v1646_v43  ;;  %v1650_v48 = vsel %vm8750_vm5, %v7139_v36, %v1649_v38  ;;  %v1651_v49 = vrot.slane %v1649_v38, 4  ;;  %v2491_v50 = vshrl.u32 %v7291_v27, 16  ;;  %v7424_v26 = vld [vmem:[%s12435_s0 + $0x20] sm:$0x1]  ;;  %v8923_v34 = vpop.permute.xlu0 %1279 }
  0x9c   :  { %v1657_v55 = vsel %vm8750_vm5, %v7140_v40, %v1656_v44  ;;  %v1658_v56 = vrot.slane %v1656_v44, 4  ;;  %v2494_v57 = vshll.u32 %v7291_v27, 16  ;;  %v2500_v58 = vshll.u32 %v7292_v41, 16  ;;  %v8917_v27 = vpop.permute.xlu1 %1277 }
  0x9d   :  { %1921 = vrot.lane.b32.xlu1 %v7168_v33, %s8244_s16  ;;  %v1653_v62 = vsel %vm8750_vm5, %v1651_v49, %v1652_v39  ;;  %v2493_v63 = vrot.slane %v2491_v50, 4  ;;  %v2504_v0 = vshrl.u32 %v7292_v41, 16  ;;  %v2510_v1 = vshll.u32 %v7293_v46, 16  ;;  %v7675_v33 = vld [vmem:[%s12435_s0 + $0x18] sm:$0xf] }
  0x9e   :  { %1923 = vrot.lane.b32.xlu0 %v7169_v42, %s8244_s16  ;;  %v7171_v2 = vcombine.low %v1650_v48, %v1653_v62  ;;  %v1660_v3 = vsel %vm8750_vm5, %v1658_v56, %v1659_v45  ;;  %v2496_v4 = vrot.slane %v2494_v57, 5  ;;  %v2502_v5 = vrot.slane %v2500_v58, 5  ;;  %v8121_v39 = vld [vmem:[%s12435_s0 + $0x18] sm:$0xff]   ;;  %v7677_v58 = vld [vmem:[%s12435_s0 + $0x20] sm:$0x1] }
  0x9f   :  { %v7172_v8 = vcombine.low %v1657_v55, %v1660_v3  ;;  %v2506_v9 = vrot.slane %v2504_v0, 4  ;;  %v2512_v10 = vrot.slane %v2510_v1, 5  ;;  %v2515_v11 = vshrl.u32 %v7294_v51, 16  ;;  %v7679_v3 = vld [vmem:[%s12435_s0 + $0x28] sm:$0xf] }
  0xa0   :  { %v2497_v14 = vor.u32 %v2496_v4, %v2493_v63  ;;  %v2518_v15 = vshll.u32 %v7294_v51, 16  ;;  %v2524_v16 = vshll.u32 %v7295_v52, 16  ;;  %v2528_v18 = vshrl.u32 %v7295_v52, 16  ;;  %v7676_v52 = vld [vmem:[%s12435_s0 + $0x1c] sm:$0xf]  ;;  %v8951_v62 = vpop.permute.xlu1 %1281 }
  0xa1   :  { %1925 = vrot.lane.b32.xlu1 %v7170_v47, %s8244_s16  ;;  %v2507_v20 = vor.u32 %v2506_v9, %v2502_v5  ;;  %v2517_v23 = vrot.slane %v2515_v11, 4  ;;  %v2534_v24 = vshll.u32 %v7296_v59, 16  ;;  %v7515_v25 = vrot.slane %v7419_v60, 9  ;;  %v7678_v60 = vld [vmem:[%s12435_s0 + $0x24] sm:$0xf] }
  0xa2   :  { %1927 = vrot.lane.b32.xlu0 %v7171_v2, %s8244_s16  ;;  %v2498_v29 = vrot.slane %v2497_v14, 4  ;;  %v2520_v30 = vrot.slane %v2518_v15, 5  ;;  %v2526_v31 = vrot.slane %v2524_v16, 5  ;;  %v2530_v32 = vrot.slane %v2528_v18, 4  ;;  %v7680_v4 = vld [vmem:[%s12435_s0 + $0x2c] sm:$0x1] }
  0xa3   :  { %v2508_v35 = vrot.slane %v2507_v20, 4  ;;  %v2536_v36 = vrot.slane %v2534_v24, 5  ;;  %v3677_v37 = vrot.slane %v7420_v6, 5  ;;  %v3680_v38 = vrot.slane %v7421_v7, 5  ;;  %v7804_v15 = vld [vmem:[%s12435_s0 + $0x1c] sm:$0xf] }
  0xa4   :  { %v2503_v40 = vsel %vm8295_vm2, %v2498_v29, %v2502_v5  ;;  %v2521_v41 = vor.u32 %v2520_v30, %v2517_v23  ;;  %v2531_v42 = vor.u32 %v2530_v32, %v2526_v31  ;;  %v7516_v43 = vrot.slane %v7422_v12, 9  ;;  %v8963_v5 = vpop.permute.xlu0 %1283  ;;  %v8979_v16 = vld [vmem:[%s12435_s0 + $0x20] sm:$0x1] }
  0xa5   :  { %1929 = vrot.lane.b32.xlu1 %v7172_v8, %s8244_s16  ;;  %v2513_v44 = vsel %vm8295_vm2, %v2508_v35, %v2512_v10  ;;  %v3678_v45 = vsel %vm8750_vm5, %v7515_v25, %v3677_v37  ;;  %v3679_v46 = vrot.slane %v3677_v37, 4  ;;  %v3684_v47 = vrot.slane %v7423_v19, 5  ;;  %v7803_v10 = vld [vmem:[%s12435_s0 + $0x18] sm:$0xe]  ;;  %v8174_v18 = vld [vmem:[%s12436_s1] sm:$0xff]  }
  0xa6   :  { %2265 = vrot.lane.b32.xlu0 %v8120_v13, %s8245_s7  ;;  %v7387_v48 = vcombine.low %v2503_v40, %v2513_v44  ;;  %v2522_v49 = vrot.slane %v2521_v41, 4  ;;  %v2532_v50 = vrot.slane %v2531_v42, 4  ;;  %v3687_v51 = vrot.slane %v7424_v26, 5  ;;  %v7806_v25 = vld [vmem:[%s12435_s0 + $0x24] sm:$0xe]  ;;  %v8122_v26 = vld [vmem:[%s12435_s0 + $0x18] sm:$0xff]   ;;  %8033 = vmatprep.subr.bf16.mxu0 %v8174_v18 }
  0xa7   :  { %v3681_v55 = vsel %vm8750_vm5, %v3679_v46, %v3680_v38  ;;  %v8943_v56 = vsel %vm8750_vm5, %v7516_v43, %v3684_v47  ;;  %v3686_v57 = vrot.slane %v3684_v47, 4  ;;  %v4575_v59 = vshrl.u32 %v7675_v33, 16  ;;  %8103 = vmatprep.subr.bf16.mxu1 %v8174_v18  ;;  %v7807_v38 = vld [vmem:[%s12435_s0 + $0x28] sm:$0xf]  ;;  %8034 = vmatpush3.bf16.msra.mxu0 %v8174_v18  ;;  %v9000_v44 = vld [vmem:[%s12435_s0 + $0x2c] sm:$0x1] }
  0xa8   :  { %v2527_v63 = vsel %vm8295_vm2, %v2522_v49, %v2526_v31  ;;  %v2537_v0 = vsel %vm8295_vm2, %v2532_v50, %v2536_v36  ;;  %v7547_v1 = vcombine.low %v3678_v45, %v3681_v55  ;;  %v4578_v2 = vshll.u32 %v7675_v33, 16  ;;  %v8175_v46 = vld [vmem:[%s12436_s1 + $0x8] sm:$0xff]   ;;  %8106 = vmatpush3.bf16.msra.mxu1 %v8174_v18 }
  0xa9   :  { %2267 = vrot.lane.b32.xlu1 %v8121_v39, %s8245_s7  ;;  %v7388_v6 = vcombine.low %v2527_v63, %v2537_v0  ;;  %v3688_v7 = vsel %vm8750_vm5, %v3686_v57, %v3687_v51  ;;  %v4577_v8 = vrot.slane %v4575_v59, 4  ;;  %v4584_v9 = vshll.u32 %v7676_v52, 16  ;;  %v8994_v39 = vpop.permute.xlu1 %1285  ;;  %v9002_v45 = vpop.permute.xlu0 %1287  ;;  %v9011_v51 = vld [vmem:[%s12435_s0 + $0x24] sm:$0xf]  ;;  %v9021_v59 = vld [vmem:[%s12435_s0 + $0x28] sm:$0xf]  ;;  %8035 = vmatprep.subr.bf16.mxu0 %v8175_v46 }
  0xaa   :  { %3354 = vrot.lane.b32.xlu0 %v7387_v48, %s8246_s21  ;;  %v7548_v11 = vcombine.low %v8943_v56, %v3688_v7  ;;  %v4580_v12 = vrot.slane %v4578_v2, 5  ;;  %v4588_v13 = vshrl.u32 %v7676_v52, 16  ;;  %v4594_v14 = vshll.u32 %v7677_v58, 16  ;;  %12451 = vst [vmem:[#allocation8_spill] sm:$0xff] %v8994_v39  ;;  %12452 = vst [vmem:[#allocation9_spill] sm:$0xff] %v9002_v45  ;;  %v8123_v52 = vld [vmem:[%s12435_s0 + $0x24] sm:$0xff]   ;;  %8104 = vmatprep.subr.bf16.mxu1 %v8175_v46 }
  0xab   :  { %v4586_v19 = vrot.slane %v4584_v9, 5  ;;  %v4599_v20 = vshrl.u32 %v7678_v60, 16  ;;  %v4602_v23 = vshll.u32 %v7678_v60, 16  ;;  %v4608_v24 = vshll.u32 %v7679_v3, 16  ;;  %v9031_v2 = vld [vmem:[%s12435_s0 + $0x2c] sm:$0x1]  ;;  %8036 = vmatpush3.bf16.msra.mxu0 %v8175_v46 }
  0xac   :  { %v4581_v29 = vor.u32 %v4580_v12, %v4577_v8  ;;  %v4590_v30 = vrot.slane %v4588_v13, 4  ;;  %v4596_v31 = vrot.slane %v4594_v14, 5  ;;  %v4612_v32 = vshrl.u32 %v7679_v3, 16  ;;  %v9036_v3 = vld [vmem:[%s12435_s0 + $0x30] sm:$0xf]  ;;  %8107 = vmatpush3.bf16.msra.mxu1 %v8175_v46  ;;  %v9145_v46 = vld [vmem:[%s12435_s0 + $0x9c] sm:$0xff]  }
  0xad   :  { %3356 = vrot.lane.b32.xlu1 %v7388_v6, %s8246_s21  ;;  %v4601_v33 = vrot.slane %v4599_v20, 4  ;;  %v4604_v35 = vrot.slane %v4602_v23, 5  ;;  %v4610_v36 = vrot.slane %v4608_v24, 5  ;;  %v4618_v37 = vshll.u32 %v7680_v4, 16  ;;  %v9056_v13 = vld [vmem:[%s12435_s0 + $0x34] sm:$0xf] }
  0xae   :  { %3995 = vrot.lane.b32.xlu0 %v7547_v1, %s8247_s8  ;;  %v4582_v40 = vrot.slane %v4581_v29, 4  ;;  %v4591_v41 = vor.u32 %v4590_v30, %v4586_v19  ;;  %v4614_v42 = vrot.slane %v4612_v32, 4  ;;  %v7899_v43 = vrot.slane %v7803_v10, 9  ;;  %v9069_v20 = vld [vmem:[%s12435_s0 + $0x38] sm:$0x1]  ;;  %v9080_v30 = vld [vmem:[%s12435_s0] sm:$0xff]  }
  0xaf   :  { %v4605_v47 = vor.u32 %v4604_v35, %v4601_v33  ;;  %v4620_v48 = vrot.slane %v4618_v37, 5  ;;  %v5761_v49 = vrot.slane %v7804_v15, 5  ;;  %v5764_v50 = vrot.slane %v8979_v16, 5  ;;  %v9058_v14 = vpop.permute.xlu1 %1289  ;;  %v9090_v32 = vld [vmem:[%s12435_s0 + $0xc] sm:$0xff]   ;;  %v9095_v33 = vld [vmem:[%s12435_s0 + $0x24] sm:$0xff]  }
  0xb0   :  { %v4587_v55 = vsel %vm8295_vm2, %v4582_v40, %v4586_v19  ;;  %v4592_v56 = vrot.slane %v4591_v41, 4  ;;  %v4615_v57 = vor.u32 %v4614_v42, %v4610_v36  ;;  %v7900_v58 = vrot.slane %v7806_v25, 9  ;;  %12454 = vst [vmem:[#allocation11_spill] sm:$0xff] %v9058_v14  ;;  %v9100_v35 = vld [vmem:[%s12435_s0 + $0x30] sm:$0xff]   ;;  %v9110_v37 = vld [vmem:[%s12435_s0 + $0x48] sm:$0xff]   ;;  %v9120_v40 = vld [vmem:[%s12435_s0 + $0x60] sm:$0xff]  }
  0xb1   :  { %3997 = vrot.lane.b32.xlu1 %v7548_v11, %s8247_s8  ;;  %v4606_v60 = vrot.slane %v4605_v47, 4  ;;  %v9026_v63 = vsel %vm8750_vm5, %v7899_v43, %v5761_v49  ;;  %v5763_v0 = vrot.slane %v5761_v49, 4  ;;  %v5768_v1 = vrot.slane %v7807_v38, 5  ;;  %v9115_v38 = vld [vmem:[%s12435_s0 + $0x54] sm:$0xff]   ;;  %v9125_v41 = vld [vmem:[%s12435_s0 + $0x6c] sm:$0xff]   ;;  %v9135_v43 = vld [vmem:[%s12435_s0 + $0x84] sm:$0xff]  }
  0xb2   :  { %4349 = vrot.lane.b32.xlu0 %v8122_v26, %s8248_s25  ;;  %v4597_v4 = vsel %vm8295_vm2, %v4592_v56, %v4596_v31  ;;  %v4616_v6 = vrot.slane %v4615_v57, 4  ;;  %v5771_v7 = vrot.slane %v9000_v44, 5  ;;  %v2539_v8 = vshrl.u32 %v9011_v51, 16  ;;  %v9071_v23 = vpop.permute.xlu0 %1291  ;;  %v9085_v31 = vld [vmem:[%s12435_s0 + $0x18] sm:$0xff]   ;;  %v9140_v44 = vld [vmem:[%s12435_s0 + $0x90] sm:$0xff]   ;;  %v9150_v47 = vld [vmem:[%s12435_s0 + $0xa8] sm:$0xff]  }
  0xb3   :  { %v7771_v9 = vcombine.low %v4587_v55, %v4597_v4  ;;  %v4611_v10 = vsel %vm8295_vm2, %v4606_v60, %v4610_v36  ;;  %v9047_v11 = vsel %vm8750_vm5, %v5763_v0, %v5764_v50  ;;  %v9051_v12 = vsel %vm8750_vm5, %v7900_v58, %v5768_v1  ;;  %12455 = vst [vmem:[#allocation12_spill] sm:$0xff] %v9071_v23  ;;  %v9105_v36 = vld [vmem:[%s12435_s0 + $0x3c] sm:$0xff]   ;;  %v9165_v50 = vld [vmem:[%s12435_s0 + $0xe4] sm:$0xff]   ;;  %v9185_v56 = vld [vmem:[%s12435_s0 + $0x114] sm:$0xff]  }
  0xb4   :  { %12453 = vst [vmem:[#allocation10_spill] sm:$0xff] %v9051_v12  ;;  %v4621_v15 = vsel %vm8295_vm2, %v4616_v6, %v4620_v48  ;;  %v5770_v18 = vrot.slane %v5768_v1, 4  ;;  %v9064_v19 = vrot.slane %v2539_v8, 4  ;;  %v2542_v25 = vshll.u32 %v9011_v51, 16  ;;  %v9130_v42 = vld [vmem:[%s12435_s0 + $0x78] sm:$0xff]   ;;  %v9170_v51 = vld [vmem:[%s12435_s0 + $0xf0] sm:$0xff]  }
  0xb5   :  { %4351 = vrot.lane.b32.xlu1 %v8123_v52, %s8248_s25  ;;  %v7772_v24 = vcombine.low %v4611_v10, %v4621_v15  ;;  %v2548_v26 = vshll.u32 %v9021_v59, 16  ;;  %v2552_v29 = vshrl.u32 %v9021_v59, 16  ;;  %v9155_v48 = vld [vmem:[%s12435_s0 + $0xb4] sm:$0xff]   ;;  %v9175_v52 = vld [vmem:[%s12435_s0 + $0xfc] sm:$0xff]   ;;  %v9180_v55 = vld [vmem:[%s12435_s0 + $0x108] sm:$0xff]   ;;  %v2558_v10 = vshll.u32 %v9031_v2, 16 }
  0xb6   :  { %v9160_v49 = vld [vmem:[%s12435_s0 + $0xd8] sm:$0xff]   ;;  %v9190_v57 = vld [vmem:[%s12435_s0 + $0x120] sm:$0xff]   ;;  %v9195_v58 = vld [vmem:[%s12435_s0 + $0x12c] sm:$0xff]   ;;  %5438 = vrot.lane.b32.xlu0 %v7771_v9, %s8249_s23  ;;  %v9230_v8 = vsel %vm8750_vm5, %v5770_v18, %v5771_v7  ;;  %v2563_v15 = vshrl.u32 %v9036_v3, 16  ;;  %v2566_v16 = vshll.u32 %v9036_v3, 16  ;;  %v2544_v14 = vrot.slane %v2542_v25, 5 }
  0xb7   :  { %v9200_v59 = vld [vmem:[%s12435_s0 + $0x138] sm:$0xff]   ;;  %v9205_v60 = vld [vmem:[%s12435_s0 + $0x144] sm:$0xff]   ;;  %v9210_v0 = vld [vmem:[%s12435_s0 + $0x150] sm:$0xff]   ;;  %12456 = vst [vmem:[#allocation13_spill] sm:$0xff] %v9230_v8  ;;  %v9242_v9 = vrot.slane %v2548_v26, 5  ;;  %v2554_v17 = vrot.slane %v2552_v29, 4 }
  0xb8   :  { %v9215_v1 = vld [vmem:[%s12435_s0 + $0x15c] sm:$0xff]   ;;  %v9220_v4 = vld [vmem:[%s12435_s0 + $0x168] sm:$0xff]   ;;  %v9225_v6 = vld [vmem:[%s12435_s0 + $0x174] sm:$0xff]   ;;  %v9262_v25 = vrot.slane %v2558_v10, 5  ;;  %v2565_v26 = vrot.slane %v2563_v15, 4  ;;  %v2568_v29 = vrot.slane %v2566_v16, 5  ;;  %v2545_v12 = vor.u32 %v2544_v14, %v9064_v19 }
  0xb9   :  { %v9247_v2 = vld [vmem:[%s12435_s0 + $0x24] sm:$0xe]  ;;  %v9252_v3 = vld [vmem:[%s12435_s0 + $0x28] sm:$0xf]  ;;  %v9257_v7 = vld [vmem:[%s12435_s0 + $0x2c] sm:$0x1]  ;;  %5440 = vrot.lane.b32.xlu1 %v7772_v24, %s8249_s23  ;;  %v2555_v45 = vor.u32 %v2554_v17, %v9242_v9  ;;  %v12458_v16 = vcombine.low %v9026_v63, %v9047_v11 }
  0xba   :  { %v8167_v18 = vld [vmem:[%s12435_s0 + $0x18c] sm:$0xff]   ;;  %12457 = vst [vmem:[#allocation14_spill] sm:$0xff] %v9262_v25  ;;  %v2572_v23 = vshll.u32 %v9056_v13, 16  ;;  %v2576_v39 = vshrl.u32 %v9056_v13, 16  ;;  %v2582_v10 = vshll.u32 %v9069_v20, 16  ;;  %v9275_v25 = vpop.permute.xlu1 %1293  ;;  %v9284_v24 = vld [vmem:[%s12435_s0 + $0x24] sm:$0xff]   ;;  %v2569_v14 = vor.u32 %v2568_v29, %v2565_v26  ;;  %v1296_v13 = vpop.permute.xlu0 %1295 }
  0xbb   :  { %v9268_v8 = vld [vmem:[%s12435_s0 + $0x30] sm:$0xe]  ;;  %6079 = vrot.lane.b32.xlu0 %v12458_v16, %s8250_s13  ;;  %vm1363_vm6 = vcmask 64544   ;;  %vm271_vm7 = vcmask 31744   ;;  %v9291_v17 = vld [vmem:[%s12435_s0 + $0x34] sm:$0xf] }
  0xbc   :  { %v9286_v19 = vrot.slane %v2572_v23, 5  ;;  %v9293_v20 = vrot.slane %v2545_v12, 4  ;;  %v9295_v63 = vrot.slane %v2555_v45, 4  ;;  %v9297_v11 = vrot.slane %v2576_v39, 4  ;;  %272 = vst.msk [vmem:[#allocation2] sm:$0xff] %vm271_vm7, %v9080_v30  ;;  %274 = vst.msk [vmem:[#allocation2 + $0x10] sm:$0xff] %vm271_vm7, %v9085_v31 }
  0xbd   :  { %v9299_v15 = vrot.slane %v2582_v10, 5  ;;  %v9308_v23 = vld [vmem:[%s12435_s0 + $0x38] sm:$0x1]  ;;  %273 = vst.msk [vmem:[#allocation2 + $0x8] sm:$0xff] %vm271_vm7, %v9090_v32  ;;  %275 = vst.msk [vmem:[#allocation2 + $0x18] sm:$0xff] %vm271_vm7, %v9095_v33  ;;  %v2570_v39 = vrot.slane %v2569_v14, 4 }
  0xbe   :  { %276 = vst.msk [vmem:[#allocation2 + $0x20] sm:$0xff] %vm271_vm7, %v9100_v35  ;;  %277 = vst.msk [vmem:[#allocation2 + $0x28] sm:$0xff] %vm271_vm7, %v9105_v36  ;;  %v7517_v45 = vrot.slane %v9247_v2, 9  ;;  %v3691_v12 = vrot.slane %v9252_v3, 5  ;;  %v3694_v30 = vrot.slane %v9257_v7, 5  ;;  %v2551_v31 = vsel %vm8295_vm2, %v9293_v20, %v9242_v9 }
  0xbf   :  { %278 = vst.msk [vmem:[#allocation2 + $0x30] sm:$0xff] %vm271_vm7, %v9110_v37  ;;  %279 = vst.msk [vmem:[#allocation2 + $0x38] sm:$0xff] %vm271_vm7, %v9115_v38  ;;  %v2579_v35 = vor.u32 %v9297_v11, %v9286_v19  ;;  %v7518_v36 = vrot.slane %v9268_v8, 9  ;;  %v7682_v37 = vld [vmem:[%s12435_s0 + $0x34] sm:$0xf]  ;;  %2269 = vrot.lane.b32.xlu0 %v9284_v24, %s8245_s7  ;;  %vm2007_vm8 = vcmask 97344  }
  0xc0   :  { %280 = vst.msk [vmem:[#allocation2 + $0x40] sm:$0xff] %vm271_vm7, %v9120_v40  ;;  %281 = vst.msk [vmem:[#allocation2 + $0x48] sm:$0xff] %vm271_vm7, %v9125_v41  ;;  %v2575_v40 = vsel %vm8295_vm2, %v2570_v39, %v9286_v19  ;;  %v7686_v2 = vld [vmem:[%s12435_s0 + $0x44] sm:$0x1]  ;;  %v7809_v26 = vld [vmem:[%s12435_s0 + $0x30] sm:$0xe] }
  0xc1   :  { %282 = vst.msk [vmem:[#allocation2 + $0x50] sm:$0xff] %vm271_vm7, %v9130_v42  ;;  %283 = vst.msk [vmem:[#allocation2 + $0x58] sm:$0xff] %vm271_vm7, %v9135_v43  ;;  %v12467_v32 = vld [vmem:[#allocation14_spill] sm:$0xff]  ;;  %v3692_v42 = vsel %vm8750_vm5, %v7517_v45, %v3691_v12  ;;  %v3693_v43 = vrot.slane %v3691_v12, 4  ;;  %v7810_v14 = vld [vmem:[%s12435_s0 + $0x34] sm:$0xf] }
  0xc2   :  { %284 = vst.msk [vmem:[#allocation2 + $0x60] sm:$0xff] %vm271_vm7, %v9140_v44  ;;  %285 = vst.msk [vmem:[#allocation2 + $0x68] sm:$0xff] %vm271_vm7, %v9145_v46  ;;  %v2561_v33 = vsel %vm8295_vm2, %v9295_v63, %v12467_v32  ;;  %v7683_v44 = vld [vmem:[%s12435_s0 + $0x38] sm:$0x1]  ;;  %v7684_v46 = vld [vmem:[%s12435_s0 + $0x3c] sm:$0xf] }
  0xc3   :  { %286 = vst.msk [vmem:[#allocation2 + $0x70] sm:$0xff] %vm271_vm7, %v9150_v47  ;;  %287 = vst.msk [vmem:[#allocation2 + $0x78] sm:$0xff] %vm271_vm7, %v9155_v48  ;;  %v7389_v38 = vcombine.low %v2551_v31, %v2561_v33  ;;  %v2580_v47 = vrot.slane %v2579_v35, 4  ;;  %v3698_v48 = vrot.slane %v9291_v17, 5  ;;  %v4650_v16 = vshll.u32 %v7684_v46, 16 }
  0xc4   :  { %288 = vst.msk [vmem:[#allocation2 + $0x80] sm:$0xff] %vm271_vm7, %v9160_v49  ;;  %289 = vst.msk [vmem:[#allocation2 + $0x88] sm:$0xff] %vm271_vm7, %v9165_v50  ;;  %v3701_v49 = vrot.slane %v9308_v23, 5  ;;  %v7811_v19 = vld [vmem:[%s12435_s0 + $0x38] sm:$0x1]  ;;  %v1300_v17 = vpop.permute.xlu0 %1299  ;;  %vm2361_vm9 = vcmask 130144  }
  0xc5   :  { %290 = vst.msk [vmem:[#allocation2 + $0x90] sm:$0xff] %vm271_vm7, %v9170_v51  ;;  %291 = vst.msk [vmem:[#allocation2 + $0x98] sm:$0xff] %vm271_vm7, %v9175_v52  ;;  %v1298_v51 = vpop.permute.xlu1 %1297  ;;  %v3695_v52 = vsel %vm8750_vm5, %v3693_v43, %v3694_v30  ;;  %3358 = vrot.lane.b32.xlu0 %v7389_v38, %s8246_s21  ;;  %v7812_v23 = vld [vmem:[%s12435_s0 + $0x3c] sm:$0xe]  ;;  %v7813_v39 = vld [vmem:[%s12435_s0 + $0x40] sm:$0xf] }
  0xc6   :  { %292 = vst.msk [vmem:[#allocation2 + $0xa0] sm:$0xff] %vm271_vm7, %v9180_v55  ;;  %293 = vst.msk [vmem:[#allocation2 + $0xa8] sm:$0xff] %vm271_vm7, %v9185_v56  ;;  %v4632_v56 = vshll.u32 %v7682_v37, 16  ;;  %v4652_v12 = vrot.slane %v4650_v16, 5  ;;  %v5778_v33 = vrot.slane %v7811_v19, 5  ;;  %vm3450_vm10 = vcmask 162944  }
  0xc7   :  { %294 = vst.msk [vmem:[#allocation2 + $0xb0] sm:$0xff] %vm271_vm7, %v9190_v57  ;;  %295 = vst.msk [vmem:[#allocation2 + $0xb8] sm:$0xff] %vm271_vm7, %v9195_v58  ;;  %v4636_v57 = vshrl.u32 %v7682_v37, 16  ;;  %v2585_v58 = vsel %vm8295_vm2, %v2580_v47, %v9299_v15  ;;  %v7304_v35 = vld [vmem:[%s12435_s0 + $0x40] sm:$0xf]  ;;  %v7902_v47 = vrot.slane %v7812_v23, 9 }
  0xc8   :  { %296 = vst.msk [vmem:[#allocation2 + $0xc0] sm:$0xff] %vm271_vm7, %v9200_v59  ;;  %297 = vst.msk [vmem:[#allocation2 + $0xc8] sm:$0xff] %vm271_vm7, %v9205_v60  ;;  %v7549_v59 = vcombine.low %v3692_v42, %v3695_v52  ;;  %v3699_v60 = vsel %vm8750_vm5, %v7518_v36, %v3698_v48  ;;  %v4634_v9 = vrot.slane %v4632_v56, 5  ;;  %v8131_v36 = vld [vmem:[%s12435_s0 + $0x3c] sm:$0xff]   ;;  %v7305_v43 = vld [vmem:[%s12435_s0 + $0x44] sm:$0x1] }
  0xc9   :  { %298 = vst.msk [vmem:[#allocation2 + $0xd0] sm:$0xff] %vm271_vm7, %v9210_v0  ;;  %299 = vst.msk [vmem:[#allocation2 + $0xd8] sm:$0xff] %vm271_vm7, %v9215_v1  ;;  %v3700_v0 = vrot.slane %v3698_v48, 4  ;;  %v7685_v1 = vld [vmem:[%s12435_s0 + $0x40] sm:$0xf]  ;;  %v4638_v7 = vrot.slane %v4636_v57, 4 }
  0xca   :  { %300 = vst.msk [vmem:[#allocation2 + $0xe0] sm:$0xff] %vm271_vm7, %v9220_v4  ;;  %301 = vst.msk [vmem:[#allocation2 + $0xe8] sm:$0xff] %vm271_vm7, %v9225_v6  ;;  %v7390_v4 = vcombine.low %v2575_v40, %v2585_v58  ;;  %v4656_v24 = vshll.u32 %v7685_v1, 16  ;;  %v4660_v15 = vshrl.u32 %v7685_v1, 16  ;;  %3999 = vrot.lane.b32.xlu0 %v7549_v59, %s8247_s8  ;;  %v5782_v48 = vrot.slane %v7813_v39, 5 }
  0xcb   :  { %302 = vst.msk [vmem:[#allocation2 + $0xf0] sm:$0xff] %vm271_vm7, %v9238_v22  ;;  %303 = vst.msk [vmem:[#allocation2 + $0xf8] sm:$0xff] %vm271_vm7, %v8167_v18  ;;  %v7681_v22 = vld [vmem:[%s12435_s0 + $0x30] sm:$0xf]  ;;  %v3702_v3 = vsel %vm8750_vm5, %v3700_v0, %v3701_v49  ;;  %v4642_v18 = vshll.u32 %v7683_v44, 16  ;;  %v4639_v20 = vor.u32 %v4638_v7, %v4634_v9  ;;  %v1304_v1 = vpop.permute.xlu0 %1303  ;;  %vm4091_vm11 = vcmask 195744  }
  0xcc   :  { %1364 = vst.msk [vmem:[#allocation2] sm:$0xff] %vm1363_vm6, %v8802_v54  ;;  %1366 = vst.msk [vmem:[#allocation2 + $0x10] sm:$0xff] %vm1363_vm6, %v8844_v21  ;;  %v12459_v54 = vld [vmem:[#allocation8_spill] sm:$0xff]  ;;  %v12460_v21 = vld [vmem:[#allocation9_spill] sm:$0xff]  ;;  %v4623_v50 = vshrl.u32 %v7681_v22, 16  ;;  %v4626_v55 = vshll.u32 %v7681_v22, 16  ;;  %v7550_v29 = vcombine.low %v3699_v60, %v3702_v3  ;;  %v5783_v59 = vsel %vm8750_vm5, %v7902_v47, %v5782_v48 }
  0xcd   :  { %1365 = vst.msk [vmem:[#allocation2 + $0x8] sm:$0xff] %vm1363_vm6, %v8852_v28  ;;  %1367 = vst.msk [vmem:[#allocation2 + $0x18] sm:$0xff] %vm1363_vm6, %v8880_v53  ;;  %v12461_v28 = vld [vmem:[#allocation11_spill] sm:$0xff]  ;;  %v12462_v53 = vld [vmem:[#allocation12_spill] sm:$0xff]  ;;  %v4644_v63 = vrot.slane %v4642_v18, 5  ;;  %v4658_v30 = vrot.slane %v4656_v24, 5 }
  0xce   :  { %1368 = vst.msk [vmem:[#allocation2 + $0x20] sm:$0xff] %vm1363_vm6, %v8890_v61  ;;  %1369 = vst.msk [vmem:[#allocation2 + $0x28] sm:$0xff] %vm1363_vm6, %v8917_v27  ;;  %v12463_v61 = vld [vmem:[#allocation10_spill] sm:$0xff]  ;;  %v12464_v27 = vld [vmem:[#allocation13_spill] sm:$0xff]  ;;  %v4625_v6 = vrot.slane %v4623_v50, 4  ;;  %v4628_v8 = vrot.slane %v4626_v55, 5 }
  0xcf   :  { %1370 = vst.msk [vmem:[#allocation2 + $0x30] sm:$0xff] %vm1363_vm6, %v8923_v34  ;;  %1371 = vst.msk [vmem:[#allocation2 + $0x38] sm:$0xff] %vm1363_vm6, %v8951_v62  ;;  %v12465_v34 = vcombine.low %v12463_v61, %v12464_v27  ;;  %v8125_v62 = vld [vmem:[%s12435_s0 + $0x30] sm:$0xff]   ;;  %v4666_v22 = vshll.u32 %v7686_v2, 16  ;;  %v7901_v61 = vrot.slane %v7809_v26, 9  ;;  %v5775_v27 = vrot.slane %v7810_v14, 5 }
  0xd0   :  { %1372 = vst.msk [vmem:[#allocation2 + $0x40] sm:$0xff] %vm1363_vm6, %v8963_v5  ;;  %1373 = vst.msk [vmem:[#allocation2 + $0x48] sm:$0xff] %vm1363_vm6, %v12459_v54  ;;  %v4629_v10 = vor.u32 %v4628_v8, %v4625_v6  ;;  %v7814_v54 = vld [vmem:[%s12435_s0 + $0x44] sm:$0x1]  ;;  %v7306_v49 = vld [vmem:[%s12435_s0 + $0x48] sm:$0xf] }
  0xd1   :  { %1374 = vst.msk [vmem:[#allocation2 + $0x50] sm:$0xff] %vm1363_vm6, %v12460_v21  ;;  %1375 = vst.msk [vmem:[#allocation2 + $0x58] sm:$0xff] %vm1363_vm6, %v12461_v28  ;;  %6081 = vrot.lane.b32.xlu1 %v12465_v34, %s8250_s13  ;;  %v7303_v21 = vld [vmem:[%s12435_s0 + $0x3c] sm:$0xf]  ;;  %v4640_v28 = vrot.slane %v4639_v20, 4  ;;  %v1302_v34 = vpop.permute.xlu1 %1301  ;;  %v4668_v32 = vrot.slane %v4666_v22, 5  ;;  %v5776_v40 = vsel %vm8750_vm5, %v7901_v61, %v5775_v27 }
  0xd2   :  { %1376 = vst.msk [vmem:[#allocation2 + $0x60] sm:$0xff] %vm1363_vm6, %v12462_v53  ;;  %1377 = vst.msk [vmem:[#allocation2 + $0x68] sm:$0xff] %vm1363_vm6, %v9275_v25  ;;  %v4647_v25 = vshrl.u32 %v7684_v46, 16  ;;  %v4630_v45 = vrot.slane %v4629_v10, 4  ;;  %v4662_v53 = vrot.slane %v4660_v15, 4  ;;  %v5777_v42 = vrot.slane %v5775_v27, 4 }
  0xd3   :  { %1378 = vst.msk [vmem:[#allocation2 + $0x70] sm:$0xff] %vm1363_vm6, %v1296_v13  ;;  %1379 = vst.msk [vmem:[#allocation2 + $0x78] sm:$0xff] %vm1363_vm6, %v1298_v51  ;;  %v8130_v13 = vld [vmem:[%s12435_s0 + $0x30] sm:$0xff]   ;;  %v4645_v37 = vsel %vm8295_vm2, %v4640_v28, %v4644_v63  ;;  %v5785_v52 = vrot.slane %v7814_v54, 5  ;;  %v2587_v55 = vshrl.u32 %v7303_v21, 16  ;;  %v5784_v60 = vrot.slane %v5782_v48, 4 }
  0xd4   :  { %v4649_v11 = vrot.slane %v4647_v25, 4  ;;  %1380 = vst.msk [vmem:[#allocation2 + $0x80] sm:$0xff] %vm1363_vm6, %v1300_v17  ;;  %1381 = vst.msk [vmem:[#allocation2 + $0x88] sm:$0xff] %vm1363_vm6, %v1302_v34  ;;  %v4663_v38 = vor.u32 %v4662_v53, %v4658_v30  ;;  %4353 = vrot.lane.b32.xlu0 %v8130_v13, %s8248_s25  ;;  %v5779_v51 = vsel %vm8750_vm5, %v5777_v42, %v5778_v33  ;;  %v7307_v56 = vld [vmem:[%s12435_s0 + $0x4c] sm:$0xf]  ;;  %v2590_v8 = vshll.u32 %v7303_v21, 16 }
  0xd5   :  { %2271 = vrot.lane.b32.xlu1 %v8125_v62, %s8245_s7  ;;  %v4635_v62 = vsel %vm8295_vm2, %v4630_v45, %v4634_v9  ;;  %v7933_v58 = vcombine.low %v5776_v40, %v5779_v51  ;;  %v7308_v0 = vld [vmem:[%s12435_s0 + $0x50] sm:$0x1]  ;;  %v2589_v6 = vrot.slane %v2587_v55, 4  ;;  %v2596_v9 = vshll.u32 %v7304_v35, 16  ;;  %v7431_v2 = vld [vmem:[%s12435_s0 + $0x3c] sm:$0xe] }
  0xd6   :  { %v4653_v31 = vor.u32 %v4652_v12, %v4649_v11  ;;  %v7773_v44 = vcombine.low %v4635_v62, %v4645_v37  ;;  %v4664_v50 = vrot.slane %v4663_v38, 4  ;;  %1382 = vst.msk [vmem:[#allocation2 + $0x90] sm:$0xff] %vm1363_vm6, %v1304_v1  ;;  %v5786_v7 = vsel %vm8750_vm5, %v5784_v60, %v5785_v52  ;;  %v7432_v26 = vld [vmem:[%s12435_s0 + $0x40] sm:$0xf]  ;;  %v7433_v14 = vld [vmem:[%s12435_s0 + $0x44] sm:$0x1]  ;;  %v1306_v12 = vpop.permute.xlu1 %1305  ;;  %v1308_v38 = vpop.permute.xlu0 %1307 }
  0xd7   :  { %v2600_v18 = vshrl.u32 %v7304_v35, 16  ;;  %v2606_v25 = vshll.u32 %v7305_v43, 16  ;;  %v2592_v10 = vrot.slane %v2590_v8, 5  ;;  %v2598_v16 = vrot.slane %v2596_v9, 5  ;;  %v7434_v63 = vld [vmem:[%s12435_s0 + $0x48] sm:$0xe] }
  0xd8   :  { %v4654_v46 = vrot.slane %v4653_v31, 4  ;;  %5442 = vrot.lane.b32.xlu0 %v7773_v44, %s8249_s23  ;;  %v2611_v24 = vshrl.u32 %v7306_v49, 16  ;;  %v2614_v13 = vshll.u32 %v7306_v49, 16  ;;  %v2620_v20 = vshll.u32 %v7307_v56, 16  ;;  %v7435_v45 = vld [vmem:[%s12435_s0 + $0x4c] sm:$0xf] }
  0xd9   :  { %3360 = vrot.lane.b32.xlu1 %v7390_v4, %s8246_s21  ;;  %v4669_v4 = vsel %vm8295_vm2, %v4664_v50, %v4668_v32  ;;  %v2602_v19 = vrot.slane %v2600_v18, 4  ;;  %v2608_v17 = vrot.slane %v2606_v25, 5  ;;  %v2593_v11 = vor.u32 %v2592_v10, %v2589_v6  ;;  %v7436_v53 = vld [vmem:[%s12435_s0 + $0x50] sm:$0x1]  ;;  %1383 = vst.msk [vmem:[#allocation2 + $0x98] sm:$0xff] %vm1363_vm6, %v1306_v12  ;;  %v8139_v40 = vld [vmem:[%s12435_s0 + $0x48] sm:$0xff]  }
  0xda   :  { %v4659_v57 = vsel %vm8295_vm2, %v4654_v46, %v4658_v30  ;;  %v2613_v15 = vrot.slane %v2611_v24, 4  ;;  %v2624_v23 = vshrl.u32 %v7307_v56, 16  ;;  %v2630_v39 = vshll.u32 %v7308_v0, 16  ;;  %v8138_v30 = vld [vmem:[%s12435_s0 + $0x3c] sm:$0xff]   ;;  %v7687_v31 = vld [vmem:[%s12435_s0 + $0x48] sm:$0xf]  ;;  %v1310_v18 = vpop.permute.xlu1 %1309 }
  0xdb   :  { %v7774_v3 = vcombine.low %v4659_v57, %v4669_v4  ;;  %v2603_v22 = vor.u32 %v2602_v19, %v2598_v16  ;;  %v2616_v54 = vrot.slane %v2614_v13, 5  ;;  %v2622_v21 = vrot.slane %v2620_v20, 5  ;;  %v7688_v37 = vld [vmem:[%s12435_s0 + $0x4c] sm:$0xf]  ;;  %1384 = vst.msk [vmem:[#allocation2 + $0xa0] sm:$0xff] %vm1363_vm6, %v1308_v38  ;;  %1385 = vst.msk [vmem:[#allocation2 + $0xa8] sm:$0xff] %vm1363_vm6, %v1310_v18 }
  0xdc   :  { %6083 = vrot.lane.b32.xlu0 %v7933_v58, %s8250_s13  ;;  %v7519_v28 = vrot.slane %v7431_v2, 9  ;;  %v2594_v61 = vrot.slane %v2593_v11, 4  ;;  %v2626_v27 = vrot.slane %v2624_v23, 4  ;;  %v2632_v34 = vrot.slane %v2630_v39, 5  ;;  %v7689_v56 = vld [vmem:[%s12435_s0 + $0x50] sm:$0x1]  ;;  %v1312_v39 = vpop.permute.xlu0 %1311 }
  0xdd   :  { %4001 = vrot.lane.b32.xlu1 %v7550_v29, %s8247_s8  ;;  %v7934_v29 = vcombine.low %v5783_v59, %v5786_v7  ;;  %v3705_v62 = vrot.slane %v7432_v26, 5  ;;  %v2604_v32 = vrot.slane %v2603_v22, 4  ;;  %v2617_v33 = vor.u32 %v2616_v54, %v2613_v15  ;;  %v7690_v58 = vld [vmem:[%s12435_s0 + $0x54] sm:$0xf]  ;;  %v7691_v4 = vld [vmem:[%s12435_s0 + $0x58] sm:$0xf] }
  0xde   :  { %v3708_v35 = vrot.slane %v7433_v14, 5  ;;  %v2599_v42 = vsel %vm8295_vm2, %v2594_v61, %v2598_v16  ;;  %v2627_v43 = vor.u32 %v2626_v27, %v2622_v21  ;;  %v3712_v49 = vrot.slane %v7435_v45, 5  ;;  %v7692_v6 = vld [vmem:[%s12435_s0 + $0x5c] sm:$0x1]  ;;  %v7815_v7 = vld [vmem:[%s12435_s0 + $0x48] sm:$0xe] }
  0xdf   :  { %v3706_v44 = vsel %vm8750_vm5, %v7519_v28, %v3705_v62  ;;  %v3707_v46 = vrot.slane %v3705_v62, 4  ;;  %v2609_v47 = vsel %vm8295_vm2, %v2604_v32, %v2608_v17  ;;  %v2618_v48 = vrot.slane %v2617_v33, 4  ;;  %v7816_v16 = vld [vmem:[%s12435_s0 + $0x4c] sm:$0xf]  ;;  %v7817_v13 = vld [vmem:[%s12435_s0 + $0x50] sm:$0x1] }
  0xe0   :  { %2273 = vrot.lane.b32.xlu0 %v8138_v30, %s8245_s7  ;;  %v3715_v50 = vrot.slane %v7436_v53, 5  ;;  %v7391_v51 = vcombine.low %v2599_v42, %v2609_v47  ;;  %v2628_v52 = vrot.slane %v2627_v43, 4  ;;  %v4671_v57 = vshrl.u32 %v7687_v31, 16  ;;  %v7818_v20 = vld [vmem:[%s12435_s0 + $0x54] sm:$0xe]  ;;  %1386 = vst.msk [vmem:[#allocation2 + $0xb0] sm:$0xff] %vm1363_vm6, %v1312_v39 }
  0xe1   :  { %4355 = vrot.lane.b32.xlu1 %v8131_v36, %s8248_s25  ;;  %v7520_v36 = vrot.slane %v7434_v63, 9  ;;  %v3709_v55 = vsel %vm8750_vm5, %v3707_v46, %v3708_v35  ;;  %v2623_v59 = vsel %vm8295_vm2, %v2618_v48, %v2622_v21  ;;  %v3714_v1 = vrot.slane %v3712_v49, 4  ;;  %v7819_v54 = vld [vmem:[%s12435_s0 + $0x58] sm:$0xf]  ;;  %v7820_v21 = vld [vmem:[%s12435_s0 + $0x5c] sm:$0x1] }
  0xe2   :  { %v7551_v60 = vcombine.low %v3706_v44, %v3709_v55  ;;  %v2633_v8 = vsel %vm8295_vm2, %v2628_v52, %v2632_v34  ;;  %v4673_v9 = vrot.slane %v4671_v57, 4  ;;  %v4674_v2 = vshll.u32 %v7687_v31, 16  ;;  %v8146_v28 = vld [vmem:[%s12435_s0 + $0x48] sm:$0xff]   ;;  %v7309_v62 = vld [vmem:[%s12435_s0 + $0x54] sm:$0xf] }
  0xe3   :  { %v3713_v0 = vsel %vm8750_vm5, %v7520_v36, %v3712_v49  ;;  %v7392_v25 = vcombine.low %v2623_v59, %v2633_v8  ;;  %v3716_v26 = vsel %vm8750_vm5, %v3714_v1, %v3715_v50  ;;  %v4690_v10 = vshll.u32 %v7689_v56, 16  ;;  %v7310_v42 = vld [vmem:[%s12435_s0 + $0x58] sm:$0xf]  ;;  %v1314_v49 = vpop.permute.xlu1 %1313  ;;  %v7311_v50 = vld [vmem:[%s12435_s0 + $0x5c] sm:$0x1] }
  0xe4   :  { %3362 = vrot.lane.b32.xlu0 %v7391_v51, %s8246_s21  ;;  %v7552_v24 = vcombine.low %v3713_v0, %v3716_v26  ;;  %v4676_v14 = vrot.slane %v4674_v2, 5  ;;  %v4695_v17 = vshrl.u32 %v7690_v58, 16  ;;  %v4698_v15 = vshll.u32 %v7690_v58, 16  ;;  %v8147_v43 = vld [vmem:[%s12435_s0 + $0x54] sm:$0xff]   ;;  %1387 = vst.msk [vmem:[#allocation2 + $0xb8] sm:$0xff] %vm1363_vm6, %v1314_v49 }
  0xe5   :  { %5444 = vrot.lane.b32.xlu1 %v7774_v3, %s8249_s23  ;;  %v4680_v3 = vshll.u32 %v7688_v37, 16  ;;  %v4692_v11 = vrot.slane %v4690_v10, 5  ;;  %v4704_v23 = vshll.u32 %v7691_v4, 16  ;;  %v4708_v30 = vshrl.u32 %v7691_v4, 16  ;;  %v7312_v8 = vld [vmem:[%s12435_s0 + $0x60] sm:$0xf] }
  0xe6   :  { %v4677_v45 = vor.u32 %v4676_v14, %v4673_v9  ;;  %v4697_v12 = vrot.slane %v4695_v17, 4  ;;  %v4714_v22 = vshll.u32 %v7692_v6, 16  ;;  %v4700_v61 = vrot.slane %v4698_v15, 5  ;;  %v7313_v9 = vld [vmem:[%s12435_s0 + $0x64] sm:$0xf] }
  0xe7   :  { %v4682_v19 = vrot.slane %v4680_v3, 5  ;;  %v4706_v27 = vrot.slane %v4704_v23, 5  ;;  %v7903_v34 = vrot.slane %v7815_v7, 9  ;;  %v4710_v32 = vrot.slane %v4708_v30, 4  ;;  %v7437_v14 = vld [vmem:[%s12435_s0 + $0x54] sm:$0xe] }
  0xe8   :  { %4003 = vrot.lane.b32.xlu0 %v7551_v60, %s8247_s8  ;;  %v4678_v31 = vrot.slane %v4677_v45, 4  ;;  %v4716_v33 = vrot.slane %v4714_v22, 5  ;;  %v5789_v35 = vrot.slane %v7816_v16, 5  ;;  %v5792_v38 = vrot.slane %v7817_v13, 5  ;;  %v7440_v15 = vld [vmem:[%s12435_s0 + $0x60] sm:$0xe] }
  0xe9   :  { %6085 = vrot.lane.b32.xlu1 %v7934_v29, %s8250_s13  ;;  %v4684_v29 = vshrl.u32 %v7688_v37, 16  ;;  %v4701_v37 = vor.u32 %v4700_v61, %v4697_v12  ;;  %v4711_v46 = vor.u32 %v4710_v32, %v4706_v27  ;;  %v5796_v55 = vrot.slane %v7819_v54, 5  ;;  %v7442_v61 = vld [vmem:[%s12435_s0 + $0x68] sm:$0x1] }
  0xea   :  { %v4683_v44 = vsel %vm8295_vm2, %v4678_v31, %v4682_v19  ;;  %v5790_v47 = vsel %vm8750_vm5, %v7903_v34, %v5789_v35  ;;  %v5791_v48 = vrot.slane %v5789_v35, 4  ;;  %v5799_v56 = vrot.slane %v7820_v21, 5 }
  0xeb   :  { %v4686_v63 = vrot.slane %v4684_v29, 4  ;;  %v4702_v52 = vrot.slane %v4701_v37, 4  ;;  %v4712_v58 = vrot.slane %v4711_v46, 4  ;;  %v2635_v60 = vshrl.u32 %v7309_v62, 16  ;;  %v8155_v46 = vld [vmem:[%s12435_s0 + $0x60] sm:$0xff]  }
  0xec   :  { %4357 = vrot.lane.b32.xlu0 %v8146_v28, %s8248_s25  ;;  %v5793_v59 = vsel %vm8750_vm5, %v5791_v48, %v5792_v38  ;;  %v5798_v6 = vrot.slane %v5796_v55, 4  ;;  %v2638_v7 = vshll.u32 %v7309_v62, 16  ;;  %v2644_v18 = vshll.u32 %v7310_v42, 16  ;;  %v1318_v28 = vpop.permute.xlu1 %1317 }
  0xed   :  { %2275 = vrot.lane.b32.xlu1 %v8139_v40, %s8245_s7  ;;  %v4687_v53 = vor.u32 %v4686_v63, %v4682_v19  ;;  %v7904_v40 = vrot.slane %v7818_v20, 9  ;;  %v4707_v0 = vsel %vm8295_vm2, %v4702_v52, %v4706_v27  ;;  %v7935_v1 = vcombine.low %v5790_v47, %v5793_v59  ;;  %v7438_v19 = vld [vmem:[%s12435_s0 + $0x58] sm:$0xf]  ;;  %1389 = vst.msk [vmem:[#allocation2 + $0xc8] sm:$0xff] %vm1363_vm6, %v1318_v28  ;;  %v7695_v59 = vld [vmem:[%s12435_s0 + $0x68] sm:$0x1] }
  0xee   :  { %v4717_v2 = vsel %vm8295_vm2, %v4712_v58, %v4716_v33  ;;  %v2637_v3 = vrot.slane %v2635_v60, 4  ;;  %v5800_v29 = vsel %vm8750_vm5, %v5798_v6, %v5799_v56  ;;  %v2648_v10 = vshrl.u32 %v7310_v42, 16  ;;  %v8154_v27 = vld [vmem:[%s12435_s0 + $0x54] sm:$0xff]   ;;  %v7696_v6 = vld [vmem:[%s12435_s0 + $0x6c] sm:$0xf] }
  0xef   :  { %v4688_v36 = vrot.slane %v4687_v53, 4  ;;  %v5797_v4 = vsel %vm8750_vm5, %v7904_v40, %v5796_v55  ;;  %v7776_v26 = vcombine.low %v4707_v0, %v4717_v2  ;;  %v2654_v16 = vshll.u32 %v7311_v50, 16  ;;  %v7441_v53 = vld [vmem:[%s12435_s0 + $0x64] sm:$0xf] }
  0xf0   :  { %v7936_v17 = vcombine.low %v5797_v4, %v5800_v29  ;;  %v2640_v13 = vrot.slane %v2638_v7, 5  ;;  %v2646_v20 = vrot.slane %v2644_v18, 5  ;;  %v2659_v63 = vshrl.u32 %v7312_v8, 16  ;;  %v7698_v18 = vld [vmem:[%s12435_s0 + $0x74] sm:$0x1] }
  0xf1   :  { %3364 = vrot.lane.b32.xlu1 %v7392_v25, %s8246_s21  ;;  %v4693_v51 = vsel %vm8295_vm2, %v4688_v36, %v4692_v11  ;;  %v7314_v25 = vld [vmem:[%s12435_s0 + $0x68] sm:$0x1]  ;;  %v7439_v11 = vld [vmem:[%s12435_s0 + $0x5c] sm:$0x1]  ;;  %v2650_v23 = vrot.slane %v2648_v10, 4  ;;  %v2656_v39 = vrot.slane %v2654_v16, 5 }
  0xf2   :  { %v7775_v57 = vcombine.low %v4683_v44, %v4693_v51  ;;  %v2662_v45 = vshll.u32 %v7312_v8, 16  ;;  %v2668_v12 = vshll.u32 %v7313_v9, 16  ;;  %v2641_v30 = vor.u32 %v2640_v13, %v2637_v3  ;;  %v7693_v44 = vld [vmem:[%s12435_s0 + $0x60] sm:$0xf]  ;;  %v7694_v51 = vld [vmem:[%s12435_s0 + $0x64] sm:$0xf] }
  0xf3   :  { %v2661_v22 = vrot.slane %v2659_v63, 4  ;;  %v2672_v54 = vshrl.u32 %v7313_v9, 16  ;;  %v2678_v21 = vshll.u32 %v7314_v25, 16  ;;  %v2651_v34 = vor.u32 %v2650_v23, %v2646_v20  ;;  %v7697_v8 = vld [vmem:[%s12435_s0 + $0x70] sm:$0xf] }
  0xf4   :  { %5446 = vrot.lane.b32.xlu0 %v7775_v57, %s8249_s23  ;;  %v2664_v62 = vrot.slane %v2662_v45, 5  ;;  %v2670_v31 = vrot.slane %v2668_v12, 5  ;;  %v7521_v32 = vrot.slane %v7437_v14, 9  ;;  %v2642_v33 = vrot.slane %v2641_v30, 4  ;;  %v7822_v23 = vld [vmem:[%s12435_s0 + $0x64] sm:$0xf] }
  0xf5   :  { %4005 = vrot.lane.b32.xlu1 %v7552_v24, %s8247_s8  ;;  %v1316_v24 = vpop.permute.xlu0 %1315  ;;  %v2674_v35 = vrot.slane %v2672_v54, 4  ;;  %v2680_v36 = vrot.slane %v2678_v21, 5  ;;  %v3719_v37 = vrot.slane %v7438_v19, 5  ;;  %v2652_v38 = vrot.slane %v2651_v34, 4 }
  0xf6   :  { %1388 = vst.msk [vmem:[#allocation2 + $0xc0] sm:$0xff] %vm1363_vm6, %v1316_v24  ;;  %v2665_v40 = vor.u32 %v2664_v62, %v2661_v22  ;;  %v3722_v42 = vrot.slane %v7439_v11, 5  ;;  %v2647_v47 = vsel %vm8295_vm2, %v2642_v33, %v2646_v20  ;;  %v3726_v56 = vrot.slane %v7441_v53, 5  ;;  %v1322_v20 = vpop.permute.xlu1 %1321  ;;  %v7823_v22 = vld [vmem:[%s12435_s0 + $0x68] sm:$0x1] }
  0xf7   :  { %v2675_v48 = vor.u32 %v2674_v35, %v2670_v31  ;;  %v3720_v49 = vsel %vm8750_vm5, %v7521_v32, %v3719_v37  ;;  %v3721_v50 = vrot.slane %v3719_v37, 4  ;;  %v2657_v52 = vsel %vm8295_vm2, %v2652_v38, %v2656_v39  ;;  %1391 = vst.msk [vmem:[#allocation2 + $0xd8] sm:$0xff] %vm1363_vm6, %v1322_v20  ;;  %v7825_v35 = vld [vmem:[%s12435_s0 + $0x70] sm:$0xf] }
  0xf8   :  { %6087 = vrot.lane.b32.xlu0 %v7935_v1, %s8250_s13  ;;  %v2666_v55 = vrot.slane %v2665_v40, 4  ;;  %v3729_v57 = vrot.slane %v7442_v61, 5  ;;  %v7393_v60 = vcombine.low %v2647_v47, %v2657_v52  ;;  %v4719_v4 = vshrl.u32 %v7693_v44, 16  ;;  %v7824_v61 = vld [vmem:[%s12435_s0 + $0x6c] sm:$0xe] }
  0xf9   :  { %4359 = vrot.lane.b32.xlu1 %v8147_v43, %s8248_s25  ;;  %v7522_v43 = vrot.slane %v7440_v15, 9  ;;  %v1320_v58 = vpop.permute.xlu0 %1319  ;;  %v2676_v0 = vrot.slane %v2675_v48, 4  ;;  %v3723_v1 = vsel %vm8750_vm5, %v3721_v50, %v3722_v42  ;;  %v3728_v7 = vrot.slane %v3726_v56, 4  ;;  %v7826_v42 = vld [vmem:[%s12435_s0 + $0x74] sm:$0x1]  ;;  %v8163_v48 = vld [vmem:[%s12435_s0 + $0x6c] sm:$0xff]  }
  0xfa   :  { %1390 = vst.msk [vmem:[#allocation2 + $0xd0] sm:$0xff] %vm1363_vm6, %v1320_v58  ;;  %v2671_v9 = vsel %vm8295_vm2, %v2666_v55, %v2670_v31  ;;  %v7553_v2 = vcombine.low %v3720_v49, %v3723_v1  ;;  %v4722_v29 = vshll.u32 %v7693_v44, 16  ;;  %v4728_v10 = vshll.u32 %v7694_v51, 16  ;;  %v7315_v55 = vld [vmem:[%s12435_s0 + $0x6c] sm:$0xf] }
  0xfb   :  { %v3727_v3 = vsel %vm8750_vm5, %v7522_v43, %v3726_v56  ;;  %v2681_v25 = vsel %vm8295_vm2, %v2676_v0, %v2680_v36  ;;  %v3730_v24 = vsel %vm8750_vm5, %v3728_v7, %v3729_v57  ;;  %v4732_v14 = vshrl.u32 %v7694_v51, 16  ;;  %v1326_v0 = vpop.permute.xlu1 %1325 }
  0xfc   :  { %2277 = vrot.lane.b32.xlu0 %v8154_v27, %s8245_s7  ;;  %v7394_v16 = vcombine.low %v2671_v9, %v2681_v25  ;;  %v4738_v19 = vshll.u32 %v7695_v59, 16  ;;  %v7554_v13 = vcombine.low %v3727_v3, %v3730_v24  ;;  %v4724_v63 = vrot.slane %v4722_v29, 5  ;;  %v8162_v27 = vld [vmem:[%s12435_s0 + $0x60] sm:$0xff]   ;;  %v7318_v9 = vld [vmem:[%s12435_s0 + $0x78] sm:$0xf]  ;;  %1393 = vst.msk [vmem:[#allocation2 + $0xe8] sm:$0xff] %vm1363_vm6, %v1326_v0 }
  0xfd   :  { %5448 = vrot.lane.b32.xlu1 %v7776_v26, %s8249_s23  ;;  %v4721_v26 = vrot.slane %v4719_v4, 4  ;;  %v4730_v11 = vrot.slane %v4728_v10, 5  ;;  %v4743_v15 = vshrl.u32 %v7696_v6, 16  ;;  %v4734_v39 = vrot.slane %v4732_v14, 4  ;;  %v1324_v34 = vpop.permute.xlu0 %1323  ;;  %v7319_v25 = vld [vmem:[%s12435_s0 + $0x7c] sm:$0xf] }
  0xfe   :  { %v4740_v45 = vrot.slane %v4738_v19, 5  ;;  %v4746_v12 = vshll.u32 %v7696_v6, 16  ;;  %v4752_v30 = vshll.u32 %v7697_v8, 16  ;;  %v4756_v28 = vshrl.u32 %v7697_v8, 16  ;;  %1392 = vst.msk [vmem:[#allocation2 + $0xe0] sm:$0xff] %vm1363_vm6, %v1324_v34 }
  0xff   :  { %v4725_v54 = vor.u32 %v4724_v63, %v4721_v26  ;;  %v4745_v21 = vrot.slane %v4743_v15, 4  ;;  %v4762_v53 = vshll.u32 %v7698_v18, 16  ;;  %v4735_v62 = vor.u32 %v4734_v39, %v4730_v11  ;;  %v7317_v8 = vld [vmem:[%s12435_s0 + $0x74] sm:$0x1]  ;;  %v7320_v26 = vld [vmem:[%s12435_s0 + $0x80] sm:$0x1] }
 0x100   :  { %3366 = vrot.lane.b32.xlu0 %v7393_v60, %s8246_s21  ;;  %v4748_v31 = vrot.slane %v4746_v12, 5  ;;  %v4754_v32 = vrot.slane %v4752_v30, 5  ;;  %v4758_v37 = vrot.slane %v4756_v28, 4  ;;  %v5803_v40 = vrot.slane %v7822_v23, 5  ;;  %v7316_v60 = vld [vmem:[%s12435_s0 + $0x70] sm:$0xf] }
 0x101   :  { %6089 = vrot.lane.b32.xlu1 %v7936_v17, %s8250_s13  ;;  %v7821_v17 = vld [vmem:[%s12435_s0 + $0x60] sm:$0xe]  ;;  %v4726_v36 = vrot.slane %v4725_v54, 4  ;;  %v4764_v38 = vrot.slane %v4762_v53, 5  ;;  %v4736_v43 = vrot.slane %v4735_v62, 4  ;;  %v7906_v47 = vrot.slane %v7824_v61, 9  ;;  %v1328_v19 = vpop.permute.xlu0 %1327 }
 0x102   :  { %v7905_v33 = vrot.slane %v7821_v17, 9  ;;  %v4749_v44 = vor.u32 %v4748_v31, %v4745_v21  ;;  %v4759_v50 = vor.u32 %v4758_v37, %v4754_v32  ;;  %v5805_v52 = vrot.slane %v5803_v40, 4  ;;  %v7443_v63 = vld [vmem:[%s12435_s0 + $0x6c] sm:$0xe]  ;;  %1394 = vst.msk [vmem:[#allocation2 + $0xf0] sm:$0xff] %vm1363_vm6, %v1328_v19 }
 0x103   :  { %v4731_v49 = vsel %vm8295_vm2, %v4726_v36, %v4730_v11  ;;  %v4741_v56 = vsel %vm8295_vm2, %v4736_v43, %v4740_v45  ;;  %v5810_v58 = vrot.slane %v7825_v35, 5  ;;  %v5813_v59 = vrot.slane %v7826_v42, 5  ;;  %v7444_v45 = vld [vmem:[%s12435_s0 + $0x70] sm:$0xf]  ;;  %v7445_v21 = vld [vmem:[%s12435_s0 + $0x74] sm:$0x1]  ;;  %v1330_v37 = vpop.permute.xlu1 %1329 }
 0x104   :  { %4007 = vrot.lane.b32.xlu0 %v7553_v2, %s8247_s8  ;;  %v5804_v51 = vsel %vm8750_vm5, %v7905_v33, %v5803_v40  ;;  %v4750_v57 = vrot.slane %v4749_v44, 4  ;;  %v7777_v1 = vcombine.low %v4731_v49, %v4741_v56  ;;  %v4760_v4 = vrot.slane %v4759_v50, 4  ;;  %v7446_v34 = vld [vmem:[%s12435_s0 + $0x78] sm:$0xe]  ;;  %v8168_v62 = vld [vmem:[%s12435_s0 + $0x6c] sm:$0xff]   ;;  %1395 = vst.msk [vmem:[#allocation2 + $0xf8] sm:$0xff] %vm1363_vm6, %v1330_v37 }
 0x105   :  { %2279 = vrot.lane.b32.xlu1 %v8155_v46, %s8245_s7  ;;  %v5806_v46 = vrot.slane %v7823_v22, 5  ;;  %v5811_v7 = vsel %vm8750_vm5, %v7906_v47, %v5810_v58  ;;  %v5812_v18 = vrot.slane %v5810_v58, 4  ;;  %v2683_v10 = vshrl.u32 %v7315_v55, 16  ;;  %v7447_v36 = vld [vmem:[%s12435_s0 + $0x7c] sm:$0xf]  ;;  %v1912_v44 = vpop.permute.xlu0 %1911 }
 0x106   :  { %v4755_v2 = vsel %vm8295_vm2, %v4750_v57, %v4754_v32  ;;  %v4765_v29 = vsel %vm8295_vm2, %v4760_v4, %v4764_v38  ;;  %v2692_v24 = vshll.u32 %v7316_v60, 16  ;;  %v2702_v20 = vshll.u32 %v7317_v8, 16  ;;  %2008 = vst.msk [vmem:[#allocation2] sm:$0xff] %vm2007_vm8, %v1912_v44  ;;  %v7699_v58 = vld [vmem:[%s12435_s0 + $0x78] sm:$0xf] }
 0x107   :  { %v5807_v6 = vsel %vm8750_vm5, %v5805_v52, %v5806_v46  ;;  %v7778_v14 = vcombine.low %v4755_v2, %v4765_v29  ;;  %v5814_v17 = vsel %vm8750_vm5, %v5812_v18, %v5813_v59  ;;  %v2685_v15 = vrot.slane %v2683_v10, 4  ;;  %v8169_v46 = vld [vmem:[%s12435_s0 + $0x78] sm:$0xff]   ;;  %v7701_v29 = vld [vmem:[%s12435_s0 + $0x80] sm:$0x1]  ;;  %v7831_v44 = vld [vmem:[%s12435_s0 + $0x88] sm:$0xf] }
 0x108   :  { %4361 = vrot.lane.b32.xlu0 %v8162_v27, %s8248_s25  ;;  %v7937_v3 = vcombine.low %v5804_v51, %v5807_v6  ;;  %v7938_v11 = vcombine.low %v5811_v7, %v5814_v17  ;;  %v2694_v39 = vrot.slane %v2692_v24, 5  ;;  %v2704_v30 = vrot.slane %v2702_v20, 5  ;;  %v7700_v4 = vld [vmem:[%s12435_s0 + $0x7c] sm:$0xf]  ;;  %v1914_v6 = vpop.permute.xlu1 %1913  ;;  %v7702_v17 = vld [vmem:[%s12435_s0 + $0x84] sm:$0xf] }
 0x109   :  { %3368 = vrot.lane.b32.xlu1 %v7394_v16, %s8246_s21  ;;  %v2686_v16 = vshll.u32 %v7315_v55, 16  ;;  %v2707_v22 = vshrl.u32 %v7318_v9, 16  ;;  %v2710_v54 = vshll.u32 %v7318_v9, 16  ;;  %v2716_v53 = vshll.u32 %v7319_v25, 16  ;;  %v7448_v55 = vld [vmem:[%s12435_s0 + $0x80] sm:$0x1]  ;;  %v1916_v7 = vpop.permute.xlu0 %1915 }
 0x10a   :  { %v2720_v61 = vshrl.u32 %v7319_v25, 16  ;;  %v2726_v27 = vshll.u32 %v7320_v26, 16  ;;  %v7523_v35 = vrot.slane %v7443_v63, 9  ;;  %v3733_v49 = vrot.slane %v7444_v45, 5  ;;  %2009 = vst.msk [vmem:[#allocation2 + $0x8] sm:$0xff] %vm2007_vm8, %v1914_v6  ;;  %2010 = vst.msk [vmem:[#allocation2 + $0x10] sm:$0xff] %vm2007_vm8, %v1916_v7 }
 0x10b   :  { %v2688_v23 = vrot.slane %v2686_v16, 5  ;;  %v2709_v32 = vrot.slane %v2707_v22, 4  ;;  %v2712_v33 = vrot.slane %v2710_v54, 5  ;;  %v2718_v40 = vrot.slane %v2716_v53, 5  ;;  %v7827_v54 = vld [vmem:[%s12435_s0 + $0x78] sm:$0xe] }
 0x10c   :  { %5450 = vrot.lane.b32.xlu0 %v7777_v1, %s8249_s23  ;;  %v2722_v42 = vrot.slane %v2720_v61, 4  ;;  %v2728_v43 = vrot.slane %v2726_v27, 5  ;;  %v3736_v50 = vrot.slane %v7445_v21, 5  ;;  %v7524_v56 = vrot.slane %v7446_v34, 9  ;;  %v7828_v21 = vld [vmem:[%s12435_s0 + $0x7c] sm:$0xf] }
 0x10d   :  { %4009 = vrot.lane.b32.xlu1 %v7554_v13, %s8247_s8  ;;  %v2696_v13 = vshrl.u32 %v7316_v60, 16  ;;  %v2689_v28 = vor.u32 %v2688_v23, %v2685_v15  ;;  %v3740_v57 = vrot.slane %v7447_v36, 5  ;;  %v3734_v0 = vsel %vm8750_vm5, %v7523_v35, %v3733_v49  ;;  %v7704_v23 = vld [vmem:[%s12435_s0 + $0x8c] sm:$0x1]  ;;  %v8170_v37 = vld [vmem:[%s12435_s0 + $0x78] sm:$0xff]  }
 0x10e   :  { %v2723_v52 = vor.u32 %v2722_v42, %v2718_v40  ;;  %v3735_v1 = vrot.slane %v3733_v49, 4  ;;  %v3743_v26 = vrot.slane %v7448_v55, 5  ;;  %v4767_v10 = vshrl.u32 %v7699_v58, 16  ;;  %v1427_v6 = vld [vmem:[%s12435_s0 + $0x7c] sm:$0xf] }
 0x10f   :  { %v2698_v12 = vrot.slane %v2696_v13, 4  ;;  %v2690_v38 = vrot.slane %v2689_v28, 4  ;;  %v9837_v2 = vsel %vm8750_vm5, %v7524_v56, %v3740_v57  ;;  %v4776_v19 = vshll.u32 %v7700_v4, 16  ;;  %v7703_v13 = vld [vmem:[%s12435_s0 + $0x88] sm:$0xf]  ;;  %v1920_v28 = vpop.permute.xlu0 %1919 }
 0x110   :  { %6091 = vrot.lane.b32.xlu0 %v7937_v3, %s8250_s13  ;;  %v2724_v9 = vrot.slane %v2723_v52, 4  ;;  %v3742_v3 = vrot.slane %v3740_v57, 4  ;;  %v3737_v25 = vsel %vm8750_vm5, %v3735_v1, %v3736_v50  ;;  %v4780_v15 = vshrl.u32 %v7700_v4, 16  ;;  %2012 = vst.msk [vmem:[#allocation2 + $0x20] sm:$0xff] %vm2007_vm8, %v1920_v28  ;;  %v7832_v50 = vld [vmem:[%s12435_s0 + $0x8c] sm:$0x1] }
 0x111   :  { %4363 = vrot.lane.b32.xlu1 %v8163_v48, %s8248_s25  ;;  %v2699_v31 = vor.u32 %v2698_v12, %v2694_v39  ;;  %v2713_v48 = vor.u32 %v2712_v33, %v2709_v32  ;;  %v2695_v51 = vsel %vm8295_vm2, %v2690_v38, %v2694_v39  ;;  %v7555_v24 = vcombine.low %v3734_v0, %v3737_v25  ;;  %v1918_v39 = vpop.permute.xlu1 %1917  ;;  %v8171_v52 = vld [vmem:[%s12435_s0 + $0x84] sm:$0xff]  }
 0x112   :  { %v2729_v16 = vsel %vm8295_vm2, %v2724_v9, %v2728_v43  ;;  %v3744_v63 = vsel %vm8750_vm5, %v3742_v3, %v3743_v26  ;;  %v4786_v22 = vshll.u32 %v7701_v29, 16  ;;  %2011 = vst.msk [vmem:[#allocation2 + $0x18] sm:$0xff] %vm2007_vm8, %v1918_v39  ;;  %v4782_v53 = vrot.slane %v4780_v15, 4  ;;  %v7321_v39 = vld [vmem:[%s12435_s0 + $0x84] sm:$0xf] }
 0x113   :  { %v2700_v47 = vrot.slane %v2699_v31, 4  ;;  %v2714_v60 = vrot.slane %v2713_v48, 4  ;;  %v7556_v45 = vcombine.low %v9837_v2, %v3744_v63  ;;  %v4791_v61 = vshrl.u32 %v7702_v17, 16  ;;  %v7830_v31 = vld [vmem:[%s12435_s0 + $0x84] sm:$0xe] }
 0x114   :  { %2281 = vrot.lane.b32.xlu0 %v8168_v62, %s8245_s7  ;;  %v4794_v27 = vshll.u32 %v7702_v17, 16  ;;  %v4800_v34 = vshll.u32 %v7703_v13, 16  ;;  %v7829_v62 = vld [vmem:[%s12435_s0 + $0x80] sm:$0x1]  ;;  %v4788_v33 = vrot.slane %v4786_v22, 5  ;;  %v4804_v35 = vshrl.u32 %v7703_v13, 16 }
 0x115   :  { %5452 = vrot.lane.b32.xlu1 %v7778_v14, %s8249_s23  ;;  %v2705_v59 = vsel %vm8295_vm2, %v2700_v47, %v2704_v30  ;;  %v2719_v18 = vsel %vm8295_vm2, %v2714_v60, %v2718_v40  ;;  %v4770_v14 = vshll.u32 %v7699_v58, 16  ;;  %v4778_v30 = vrot.slane %v4776_v19, 5  ;;  %v1430_v13 = vld [vmem:[%s12435_s0 + $0x88] sm:$0xf] }
 0x116   :  { %v7395_v8 = vcombine.low %v2695_v51, %v2705_v59  ;;  %v7396_v20 = vcombine.low %v2719_v18, %v2729_v16  ;;  %v4810_v36 = vshll.u32 %v7704_v23, 16  ;;  %v4793_v40 = vrot.slane %v4791_v61, 4  ;;  %v1924_v51 = vpop.permute.xlu0 %1923  ;;  %v1426_v59 = vld [vmem:[%s12435_s0 + $0x78] sm:$0xe]  ;;  %v1429_v18 = vld [vmem:[%s12435_s0 + $0x84] sm:$0xe] }
 0x117   :  { %v4772_v12 = vrot.slane %v4770_v14, 5  ;;  %v4783_v38 = vor.u32 %v4782_v53, %v4778_v30  ;;  %v4796_v42 = vrot.slane %v4794_v27, 5  ;;  %v4802_v43 = vrot.slane %v4800_v34, 5  ;;  %2014 = vst.msk [vmem:[#allocation2 + $0x30] sm:$0xff] %vm2007_vm8, %v1924_v51  ;;  %v7323_v27 = vld [vmem:[%s12435_s0 + $0x8c] sm:$0x1] }
 0x118   :  { %3370 = vrot.lane.b32.xlu0 %v7395_v8, %s8246_s21  ;;  %v4806_v48 = vrot.slane %v4804_v35, 4  ;;  %v4812_v49 = vrot.slane %v4810_v36, 5  ;;  %v7907_v57 = vrot.slane %v7827_v54, 9  ;;  %v5817_v58 = vrot.slane %v7828_v21, 5  ;;  %v1428_v8 = vld [vmem:[%s12435_s0 + $0x80] sm:$0x1] }
 0x119   :  { %6093 = vrot.lane.b32.xlu1 %v7938_v11, %s8250_s13  ;;  %v4769_v11 = vrot.slane %v4767_v10, 4  ;;  %v4784_v55 = vrot.slane %v4783_v38, 4  ;;  %v4797_v56 = vor.u32 %v4796_v42, %v4793_v40  ;;  %v5820_v1 = vrot.slane %v7829_v62, 5  ;;  %v7322_v54 = vld [vmem:[%s12435_s0 + $0x88] sm:$0xf] }
 0x11a   :  { %v4807_v0 = vor.u32 %v4806_v48, %v4802_v43  ;;  %v7908_v4 = vrot.slane %v7830_v31, 9  ;;  %v5818_v3 = vsel %vm8750_vm5, %v7907_v57, %v5817_v58  ;;  %v5819_v7 = vrot.slane %v5817_v58, 4  ;;  %v7325_v35 = vld [vmem:[%s12435_s0 + $0x94] sm:$0xf]  ;;  %v7326_v42 = vld [vmem:[%s12435_s0 + $0x98] sm:$0x1] }
 0x11b   :  { %v4773_v32 = vor.u32 %v4772_v12, %v4769_v11  ;;  %v4789_v9 = vsel %vm8295_vm2, %v4784_v55, %v4788_v33  ;;  %v4798_v2 = vrot.slane %v4797_v56, 4  ;;  %v5824_v10 = vrot.slane %v7831_v44, 5  ;;  %v7324_v33 = vld [vmem:[%s12435_s0 + $0x90] sm:$0xf]  ;;  %v7449_v55 = vld [vmem:[%s12435_s0 + $0x84] sm:$0xe] }
 0x11c   :  { %4011 = vrot.lane.b32.xlu0 %v7555_v24, %s8247_s8  ;;  %v4808_v29 = vrot.slane %v4807_v0, 4  ;;  %v5827_v16 = vrot.slane %v7832_v50, 5  ;;  %v1928_v24 = vpop.permute.xlu0 %1927  ;;  %v5821_v19 = vsel %vm8750_vm5, %v5819_v7, %v5820_v1  ;;  %v7141_v17 = vrot.slane %v1426_v59, 9  ;;  %v7450_v0 = vld [vmem:[%s12435_s0 + $0x88] sm:$0xf] }
 0x11d   :  { %2283 = vrot.lane.b32.xlu1 %v8169_v46, %s8245_s7  ;;  %v1922_v46 = vpop.permute.xlu1 %1921  ;;  %v4774_v47 = vrot.slane %v4773_v32, 4  ;;  %v4803_v14 = vsel %vm8295_vm2, %v4798_v2, %v4802_v43  ;;  %2016 = vst.msk [vmem:[#allocation2 + $0x40] sm:$0xff] %vm2007_vm8, %v1928_v24  ;;  %v7939_v11 = vcombine.low %v5818_v3, %v5821_v19  ;;  %v5825_v15 = vsel %vm8750_vm5, %v7908_v4, %v5824_v10  ;;  %v8172_v2 = vld [vmem:[%s12435_s0 + $0x84] sm:$0xff]  }
 0x11e   :  { %2013 = vst.msk [vmem:[#allocation2 + $0x28] sm:$0xff] %vm2007_vm8, %v1922_v46  ;;  %v4813_v63 = vsel %vm8295_vm2, %v4808_v29, %v4812_v49  ;;  %v5826_v23 = vrot.slane %v5824_v10, 4  ;;  %v1663_v12 = vrot.slane %v1427_v6, 5  ;;  %v7142_v22 = vrot.slane %v1429_v18, 9 }
 0x11f   :  { %v4779_v60 = vsel %vm8295_vm2, %v4774_v47, %v4778_v30  ;;  %v1666_v30 = vrot.slane %v1428_v8, 5  ;;  %v1670_v53 = vrot.slane %v1430_v13, 5  ;;  %v2731_v38 = vshrl.u32 %v7321_v39, 16 }
 0x120   :  { %4365 = vrot.lane.b32.xlu0 %v8170_v37, %s8248_s25  ;;  %v7779_v26 = vcombine.low %v4779_v60, %v4789_v9  ;;  %v5828_v28 = vsel %vm8750_vm5, %v5826_v23, %v5827_v16  ;;  %v2266_v34 = vpop.permute.xlu0 %2265  ;;  %v1664_v31 = vsel %vm8750_vm5, %v7141_v17, %v1663_v12  ;;  %v1665_v32 = vrot.slane %v1663_v12, 4  ;;  %v7451_v9 = vld [vmem:[%s12435_s0 + $0x8c] sm:$0x1]  ;;  %v7454_v12 = vld [vmem:[%s12435_s0 + $0x98] sm:$0x1] }
 0x121   :  { %3372 = vrot.lane.b32.xlu1 %v7396_v20, %s8246_s21  ;;  %v1926_v25 = vpop.permute.xlu1 %1925  ;;  %v1431_v20 = vld [vmem:[%s12435_s0 + $0x8c] sm:$0x1]  ;;  %v7940_v62 = vcombine.low %v5825_v15, %v5828_v28  ;;  %2362 = vst.msk [vmem:[#allocation2] sm:$0xff] %vm2361_vm9, %v2266_v34  ;;  %v1671_v36 = vsel %vm8750_vm5, %v7142_v22, %v1670_v53  ;;  %v1672_v37 = vrot.slane %v1670_v53, 4  ;;  %v2734_v40 = vshll.u32 %v7321_v39, 16 }
 0x122   :  { %2015 = vst.msk [vmem:[#allocation2 + $0x38] sm:$0xff] %vm2007_vm8, %v1926_v25  ;;  %v1673_v61 = vrot.slane %v1431_v20, 5  ;;  %v1667_v43 = vsel %vm8750_vm5, %v1665_v32, %v1666_v30  ;;  %vm4445_vm12 = vcmask 228544   ;;  %v2740_v44 = vshll.u32 %v7322_v54, 16  ;;  %v7452_v25 = vld [vmem:[%s12435_s0 + $0x90] sm:$0xe] }
 0x123   :  { %v2744_v46 = vshrl.u32 %v7322_v54, 16  ;;  %v2750_v47 = vshll.u32 %v7323_v27, 16  ;;  %v7173_v49 = vcombine.low %v1664_v31, %v1667_v43  ;;  %v2733_v51 = vrot.slane %v2731_v38, 4  ;;  %v8178_v28 = vld [vmem:[%s12436_s1 + $0x10] ss:$0 sps:$4 sm:$0x33]  }
 0x124   :  { %5454 = vrot.lane.b32.xlu0 %v7779_v26, %s8249_s23  ;;  %v1674_v50 = vsel %vm8750_vm5, %v1672_v37, %v1673_v61  ;;  %v3355_v56 = vpop.permute.xlu0 %3354  ;;  %v2742_v58 = vrot.slane %v2740_v44, 5  ;;  %v2755_v4 = vshrl.u32 %v7324_v33, 16  ;;  %v2758_v6 = vshll.u32 %v7324_v33, 16  ;;  %v7705_v31 = vld [vmem:[%s12435_s0 + $0x90] sm:$0xf] }
 0x125   :  { %4013 = vrot.lane.b32.xlu1 %v7556_v45, %s8247_s8  ;;  %v7780_v45 = vcombine.low %v4803_v14, %v4813_v63  ;;  %v1930_v21 = vpop.permute.xlu1 %1929  ;;  %v7174_v57 = vcombine.low %v1671_v36, %v1674_v50  ;;  %v2746_v59 = vrot.slane %v2744_v46, 4  ;;  %v2752_v60 = vrot.slane %v2750_v47, 5  ;;  %3451 = vst.msk [vmem:[#allocation2] sm:$0xff] %vm3450_vm10, %v3355_v56  ;;  %v7453_v14 = vld [vmem:[%s12435_s0 + $0x94] sm:$0xf] }
 0x126   :  { %2017 = vst.msk [vmem:[#allocation2 + $0x48] sm:$0xff] %vm2007_vm8, %v1930_v21  ;;  %v2764_v8 = vshll.u32 %v7325_v35, 16  ;;  %v2768_v7 = vshrl.u32 %v7325_v35, 16  ;;  %v2774_v18 = vshll.u32 %v7326_v42, 16  ;;  %vm5534_vm13 = vcmask 261344  }
 0x127   :  { %v2747_v3 = vor.u32 %v2746_v59, %v2742_v58  ;;  %v2757_v10 = vrot.slane %v2755_v4, 4  ;;  %v2760_v16 = vrot.slane %v2758_v6, 5  ;;  %v7525_v63 = vrot.slane %v7449_v55, 9  ;;  %v7706_v38 = vld [vmem:[%s12435_s0 + $0x94] sm:$0xf] }
 0x128   :  { %6095 = vrot.lane.b32.xlu0 %v7939_v11, %s8250_s13  ;;  %v2766_v24 = vrot.slane %v2764_v8, 5  ;;  %v3996_v19 = vpop.permute.xlu0 %3995  ;;  %v2770_v13 = vrot.slane %v2768_v7, 4  ;;  %v2776_v20 = vrot.slane %v2774_v18, 5  ;;  %v8173_v11 = vld [vmem:[%s12435_s0 + $0x90] sm:$0xff]   ;;  %v3747_v39 = vrot.slane %v7450_v0, 5 }
 0x129   :  { %4367 = vrot.lane.b32.xlu1 %v8171_v52, %s8248_s25  ;;  %v2268_v48 = vpop.permute.xlu1 %2267  ;;  %v2736_v52 = vrot.slane %v2734_v40, 5  ;;  %v2748_v17 = vrot.slane %v2747_v3, 4  ;;  %4092 = vst.msk [vmem:[#allocation2] sm:$0xff] %vm4091_vm11, %v3996_v19  ;;  %v2761_v23 = vor.u32 %v2760_v16, %v2757_v10  ;;  %v7526_v54 = vrot.slane %v7452_v25, 9  ;;  %v7707_v43 = vld [vmem:[%s12435_s0 + $0x98] sm:$0x1] }
 0x12a   :  { %2363 = vst.msk [vmem:[#allocation2 + $0x8] sm:$0xff] %vm2361_vm9, %v2268_v48  ;;  %v2771_v22 = vor.u32 %v2770_v13, %v2766_v24  ;;  %v3754_v21 = vrot.slane %v7453_v14, 5  ;;  %v3748_v34 = vsel %vm8750_vm5, %v7525_v63, %v3747_v39  ;;  %v3757_v37 = vrot.slane %v7454_v12, 5  ;;  %v7833_v8 = vld [vmem:[%s12435_s0 + $0x90] sm:$0xe] }
 0x12b   :  { %v2737_v1 = vor.u32 %v2736_v52, %v2733_v51  ;;  %v2753_v30 = vsel %vm8295_vm2, %v2748_v17, %v2752_v60  ;;  %v2762_v27 = vrot.slane %v2761_v23, 4  ;;  %vm6175_vm14 = vcmask 294144   ;;  %v8176_v60 = vld [vmem:[%s12435_s0 + $0x90] sm:$0xff]   ;;  %v7835_v25 = vld [vmem:[%s12435_s0 + $0x98] sm:$0x1] }
 0x12c   :  { %1931 = vrot.lane.b32.xlu0 %v7173_v49, %s8244_s16  ;;  %v4350_v32 = vpop.permute.xlu0 %4349  ;;  %v2772_v33 = vrot.slane %v2771_v22, 4  ;;  %v3755_v35 = vsel %vm8750_vm5, %v7526_v54, %v3754_v21  ;;  %v3756_v36 = vrot.slane %v3754_v21, 4  ;;  %vm6357_vm15 = vcmask 1041408   ;;  %v7708_v49 = vld [vmem:[%s12435_s0 + $0x9c] sm:$0xf] }
 0x12d   :  { %5456 = vrot.lane.b32.xlu1 %v7780_v45, %s8249_s23  ;;  %v3357_v26 = vpop.permute.xlu1 %3356  ;;  %v2738_v29 = vrot.slane %v2737_v1, 4  ;;  %v3750_v45 = vrot.slane %v7451_v9, 5  ;;  %4446 = vst.msk [vmem:[#allocation2] sm:$0xff] %vm4445_vm12, %v4350_v32  ;;  %v2767_v40 = vsel %vm8295_vm2, %v2762_v27, %v2766_v24  ;;  %8109 = vmatprep.subr.msk.bf16.mxu0 %vm6357_vm15, %v8178_v28  ;;  %v4815_v48 = vshrl.u32 %v7705_v31, 16  ;;  %v7834_v18 = vld [vmem:[%s12435_s0 + $0x94] sm:$0xf] }
 0x12e   :  { %3452 = vst.msk [vmem:[#allocation2 + $0x8] sm:$0xff] %vm3450_vm10, %v3357_v26  ;;  %v2777_v44 = vsel %vm8295_vm2, %v2772_v33, %v2776_v20  ;;  %v3758_v47 = vsel %vm8750_vm5, %v3756_v36, %v3757_v37  ;;  %v4818_v55 = vshll.u32 %v7705_v31, 16  ;;  %v4824_v56 = vshll.u32 %v7706_v38, 16  ;;  %8110 = vmatprep.subr.msk.bf16.mxu1 %vm6357_vm15, %v8178_v28  ;;  %v7836_v24 = vld [vmem:[%s12435_s0 + $0x9c] sm:$0xe] }
 0x12f   :  { %v2743_v15 = vsel %vm8295_vm2, %v2738_v29, %v2742_v58  ;;  %v7398_v51 = vcombine.low %v2767_v40, %v2777_v44  ;;  %v7558_v52 = vcombine.low %v3755_v35, %v3758_v47  ;;  %v7710_v58 = vld [vmem:[%s12435_s0 + $0xa4] sm:$0x1]  ;;  %v4817_v0 = vrot.slane %v4815_v48, 4  ;;  %v7837_v14 = vld [vmem:[%s12435_s0 + $0xa0] sm:$0xf] }
 0x130   :  { %2285 = vrot.lane.b32.xlu0 %v8172_v2, %s8245_s7  ;;  %v7397_v61 = vcombine.low %v2743_v15, %v2753_v30  ;;  %v5439_v59 = vpop.permute.xlu0 %5438  ;;  %v4828_v1 = vshrl.u32 %v7706_v38, 16  ;;  %v4834_v4 = vshll.u32 %v7707_v43, 16  ;;  %v6359_v6 = vsel %vm6357_vm15, %v8178_v28, 0  ;;  %v7838_v21 = vld [vmem:[%s12435_s0 + $0xa4] sm:$0x1] }
 0x131   :  { %6097 = vrot.lane.b32.xlu1 %v7940_v62, %s8250_s13  ;;  %v3998_v53 = vpop.permute.xlu1 %3997  ;;  %v3749_v62 = vrot.slane %v3747_v39, 4  ;;  %5535 = vst.msk [vmem:[#allocation2] sm:$0xff] %vm5534_vm13, %v5439_v59  ;;  %v4820_v9 = vrot.slane %v4818_v55, 5  ;;  %v4826_v2 = vrot.slane %v4824_v56, 5  ;;  %8038 = vmatpush3.bf16.msra.mxu0 %v6359_v6  ;;  %v4839_v3 = vshrl.u32 %v7708_v49, 16 }
 0x132   :  { %4093 = vst.msk [vmem:[#allocation2 + $0x8] sm:$0xff] %vm4091_vm11, %v3998_v53  ;;  %v4842_v7 = vshll.u32 %v7708_v49, 16  ;;  %v4830_v26 = vrot.slane %v4828_v1, 4  ;;  %v4836_v29 = vrot.slane %v4834_v4, 5  ;;  %8108 = vmatpush3.bf16.msra.mxu1 %v6359_v6  ;;  %v4858_v63 = vshll.u32 %v7710_v58, 16 }
 0x133   :  { %v3751_v42 = vsel %vm8750_vm5, %v3749_v62, %v3750_v45  ;;  %v4821_v17 = vor.u32 %v4820_v9, %v4817_v0  ;;  %v4841_v13 = vrot.slane %v4839_v3, 4  ;;  %vm6260_vm0 = vcmask 293888   ;;  %v8177_v45 = vld [vmem:[%s12435_s0 + $0x9c] sm:$0xff]   ;;  %v1433_v36 = vld [vmem:[%s12435_s0 + $0x94] sm:$0xf] }
 0x134   :  { %3374 = vrot.lane.b32.xlu0 %v7397_v61, %s8246_s21  ;;  %v7557_v46 = vcombine.low %v3748_v34, %v3751_v42  ;;  %v4844_v20 = vrot.slane %v4842_v7, 5  ;;  %v4831_v15 = vor.u32 %v4830_v26, %v4826_v2  ;;  %v4860_v22 = vrot.slane %v4858_v63, 5  ;;  %v1432_v34 = vld [vmem:[%s12435_s0 + $0x90] sm:$0xe]  ;;  %v1434_v44 = vld [vmem:[%s12435_s0 + $0x98] sm:$0x1] }
 0x135   :  { %1933 = vrot.lane.b32.xlu1 %v7174_v57, %s8244_s16  ;;  %v4352_v50 = vpop.permute.xlu1 %4351  ;;  %v7709_v57 = vld [vmem:[%s12435_s0 + $0xa0] sm:$0xf]  ;;  %v4822_v12 = vrot.slane %v4821_v17, 4  ;;  %v7909_v54 = vrot.slane %v7833_v8, 9  ;;  %v5831_v61 = vrot.slane %v7834_v18, 5  ;;  %v5834_v27 = vrot.slane %v7835_v25, 5 }
 0x136   :  { %4447 = vst.msk [vmem:[#allocation2 + $0x8] sm:$0xff] %vm4445_vm12, %v4352_v50  ;;  %v4848_v10 = vshll.u32 %v7709_v57, 16  ;;  %v4852_v16 = vshrl.u32 %v7709_v57, 16  ;;  %v4845_v30 = vor.u32 %v4844_v20, %v4841_v13  ;;  %v4832_v28 = vrot.slane %v4831_v15, 4  ;;  %v7327_v59 = vld [vmem:[%s12435_s0 + $0x9c] sm:$0xf] }
 0x137   :  { %v4827_v31 = vsel %vm8295_vm2, %v4822_v12, %v4826_v2  ;;  %v7910_v33 = vrot.slane %v7836_v24, 9  ;;  %v5838_v35 = vrot.slane %v7837_v14, 5  ;;  %v5832_v42 = vsel %vm8750_vm5, %v7909_v54, %v5831_v61  ;;  %v7328_v8 = vld [vmem:[%s12435_s0 + $0xa0] sm:$0xf]  ;;  %v7329_v9 = vld [vmem:[%s12435_s0 + $0xa4] sm:$0x1] }
 0x138   :  { %4015 = vrot.lane.b32.xlu0 %v7557_v46, %s8247_s8  ;;  %v4850_v23 = vrot.slane %v4848_v10, 5  ;;  %v4854_v39 = vrot.slane %v4852_v16, 4  ;;  %v4846_v32 = vrot.slane %v4845_v30, 4  ;;  %v4837_v38 = vsel %vm8295_vm2, %v4832_v28, %v4836_v29  ;;  %v1435_v46 = vld [vmem:[%s12435_s0 + $0x9c] sm:$0xe] }
 0x139   :  { %2287 = vrot.lane.b32.xlu1 %v8173_v11, %s8245_s7  ;;  %v5441_v19 = vpop.permute.xlu1 %5440  ;;  %v6080_v11 = vpop.permute.xlu0 %6079  ;;  %v5833_v43 = vrot.slane %v5831_v61, 4  ;;  %v7781_v47 = vcombine.low %v4827_v31, %v4837_v38  ;;  %v5839_v49 = vsel %vm8750_vm5, %v7910_v33, %v5838_v35  ;;  %v5840_v50 = vrot.slane %v5838_v35, 4  ;;  %v7330_v29 = vld [vmem:[%s12435_s0 + $0xa8] sm:$0xf]  ;;  %v7455_v61 = vld [vmem:[%s12435_s0 + $0x9c] sm:$0xe] }
 0x13a   :  { %5536 = vst.msk [vmem:[#allocation2 + $0x8] sm:$0xff] %vm5534_vm13, %v5441_v19  ;;  %v4855_v53 = vor.u32 %v4854_v39, %v4850_v23  ;;  %v4851_v48 = vsel %vm8295_vm2, %v4846_v32, %v4850_v23  ;;  %v5841_v57 = vrot.slane %v7838_v21, 5  ;;  %v7143_v58 = vrot.slane %v1432_v34, 9  ;;  %v7331_v19 = vld [vmem:[%s12435_s0 + $0xac] sm:$0xf]  ;;  %v8179_v33 = vld [vmem:[%s12435_s0 + $0x9c] sm:$0xff]  }
 0x13b   :  { %6176 = vst.msk [vmem:[#allocation2] sm:$0xff] %vm6175_vm14, %v6080_v11  ;;  %v5835_v56 = vsel %vm8750_vm5, %v5833_v43, %v5834_v27  ;;  %v1677_v4 = vrot.slane %v1433_v36, 5  ;;  %v1680_v6 = vrot.slane %v1434_v44, 5  ;;  %v7144_v18 = vrot.slane %v1435_v46, 9  ;;  %v7332_v11 = vld [vmem:[%s12435_s0 + $0xb0] sm:$0x1] }
 0x13c   :  { %4369 = vrot.lane.b32.xlu0 %v8176_v60, %s8248_s25  ;;  %v4856_v40 = vrot.slane %v4855_v53, 4  ;;  %v7941_v1 = vcombine.low %v5832_v42, %v5835_v56  ;;  %v5842_v7 = vsel %vm8750_vm5, %v5840_v50, %v5841_v57  ;;  %v2779_v14 = vshrl.u32 %v7327_v59, 16  ;;  %v7456_v32 = vld [vmem:[%s12435_s0 + $0xa0] sm:$0xf]  ;;  %v8180_v43 = vld [vmem:[%s12435_s0 + $0xa8] sm:$0xff]  }
 0x13d   :  { %3376 = vrot.lane.b32.xlu1 %v7398_v51, %s8246_s21  ;;  %v2270_v37 = vpop.permute.xlu0 %2269  ;;  %v1436_v51 = vld [vmem:[%s12435_s0 + $0xa0] sm:$0xf]  ;;  %v7942_v10 = vcombine.low %v5839_v49, %v5842_v7  ;;  %v1678_v16 = vsel %vm8750_vm5, %v7143_v58, %v1677_v4  ;;  %v1679_v24 = vrot.slane %v1677_v4, 4  ;;  %v2782_v20 = vshll.u32 %v7327_v59, 16  ;;  %v7458_v49 = vld [vmem:[%s12435_s0 + $0xa8] sm:$0xe] }
 0x13e   :  { %2364 = vst.msk [vmem:[#allocation2 + $0x10] sm:$0xff] %vm2361_vm9, %v2270_v37  ;;  %v4861_v55 = vsel %vm8295_vm2, %v4856_v40, %v4860_v22  ;;  %v1684_v25 = vrot.slane %v1436_v51, 5  ;;  %v2788_v63 = vshll.u32 %v7328_v8, 16  ;;  %v2792_v12 = vshrl.u32 %v7328_v8, 16  ;;  %v7457_v40 = vld [vmem:[%s12435_s0 + $0xa4] sm:$0x1] }
 0x13f   :  { %v7782_v0 = vcombine.low %v4851_v48, %v4861_v55  ;;  %v1681_v39 = vsel %vm8750_vm5, %v1679_v24, %v1680_v6  ;;  %v2798_v30 = vshll.u32 %v7329_v9, 16  ;;  %v2784_v28 = vrot.slane %v2782_v20, 5  ;;  %v7459_v57 = vld [vmem:[%s12435_s0 + $0xac] sm:$0xf] }
 0x140   :  { %5458 = vrot.lane.b32.xlu0 %v7781_v47, %s8249_s23  ;;  %v1685_v17 = vsel %vm8750_vm5, %v7144_v18, %v1684_v25  ;;  %v1686_v13 = vrot.slane %v1684_v25, 4  ;;  %v7175_v54 = vcombine.low %v1678_v16, %v1681_v39  ;;  %v2790_v53 = vrot.slane %v2788_v63, 5  ;;  %v7713_v63 = vld [vmem:[%s12435_s0 + $0xb0] sm:$0x1] }
 0x141   :  { %4017 = vrot.lane.b32.xlu1 %v7558_v52, %s8247_s8  ;;  %v1437_v52 = vld [vmem:[%s12435_s0 + $0xa4] sm:$0x1]  ;;  %v3359_v2 = vpop.permute.xlu0 %3358  ;;  %v2794_v34 = vrot.slane %v2792_v12, 4  ;;  %v2803_v31 = vshrl.u32 %v7330_v29, 16  ;;  %v2806_v36 = vshll.u32 %v7330_v29, 16  ;;  %v2812_v37 = vshll.u32 %v7331_v19, 16 }
 0x142   :  { %v6208_v3 = vld [vmem:[#allocation2] sm:$0xff]  ;;  %v1687_v26 = vrot.slane %v1437_v52, 5  ;;  %3453 = vst.msk [vmem:[#allocation2 + $0x10] sm:$0xff] %vm3450_vm10, %v3359_v2  ;;  %v2816_v38 = vshrl.u32 %v7331_v19, 16  ;;  %v2822_v47 = vshll.u32 %v7332_v11, 16  ;;  %v7527_v48 = vrot.slane %v7455_v61, 9 }
 0x143   :  { %v6082_v62 = vpop.permute.xlu1 %6081  ;;  %8039 = vmatprep.mubr.msk.bf16.mxu0 %vm6260_vm0, %v6208_v3  ;;  %v2795_v44 = vor.u32 %v2794_v34, %v2790_v53  ;;  %v2805_v46 = vrot.slane %v2803_v31, 4  ;;  %v2808_v52 = vrot.slane %v2806_v36, 5  ;;  %v2814_v55 = vrot.slane %v2812_v37, 5  ;;  %v7711_v2 = vld [vmem:[%s12435_s0 + $0xa8] sm:$0xf] }
 0x144   :  { %6177 = vst.msk [vmem:[#allocation2 + $0x8] sm:$0xff] %vm6175_vm14, %v6082_v62  ;;  %6099 = vrot.lane.b32.xlu0 %v7941_v1, %s8250_s13  ;;  %v1688_v21 = vsel %vm8750_vm5, %v1686_v13, %v1687_v26  ;;  %v2800_v62 = vrot.slane %v2798_v30, 5  ;;  %v2818_v56 = vrot.slane %v2816_v38, 4  ;;  %v2824_v59 = vrot.slane %v2822_v47, 5  ;;  %v7460_v1 = vld [vmem:[%s12435_s0 + $0xb0] sm:$0x1] }
 0x145   :  { %4371 = vrot.lane.b32.xlu1 %v8177_v45, %s8248_s25  ;;  %v2781_v45 = vrot.slane %v2779_v14, 4  ;;  %v4000_v22 = vpop.permute.xlu0 %3999  ;;  %v7176_v27 = vcombine.low %v1685_v17, %v1688_v21  ;;  %v2796_v58 = vrot.slane %v2795_v44, 4  ;;  %v2809_v6 = vor.u32 %v2808_v52, %v2805_v46  ;;  %v7712_v19 = vld [vmem:[%s12435_s0 + $0xac] sm:$0xf]  ;;  %v7714_v12 = vld [vmem:[%s12435_s0 + $0xb4] sm:$0xf] }
 0x146   :  { %4094 = vst.msk [vmem:[#allocation2 + $0x10] sm:$0xff] %vm4091_vm11, %v4000_v22  ;;  %v2819_v8 = vor.u32 %v2818_v56, %v2814_v55  ;;  %v7528_v9 = vrot.slane %v7458_v49, 9  ;;  %v3768_v26 = vrot.slane %v7459_v57, 5  ;;  %v3771_v14 = vrot.slane %v7460_v1, 5  ;;  %v7715_v30 = vld [vmem:[%s12435_s0 + $0xb8] sm:$0xf] }
 0x147   :  { %v2272_v60 = vpop.permute.xlu1 %2271  ;;  %v2785_v35 = vor.u32 %v2784_v28, %v2781_v45  ;;  %v2801_v7 = vsel %vm8295_vm2, %v2796_v58, %v2800_v62  ;;  %v2810_v16 = vrot.slane %v2809_v6, 4  ;;  %v4863_v11 = vshrl.u32 %v7711_v2, 16  ;;  %v7716_v61 = vld [vmem:[%s12435_s0 + $0xbc] sm:$0x1]  ;;  %v7841_v36 = vld [vmem:[%s12435_s0 + $0xb0] sm:$0x1] }
 0x148   :  { %2365 = vst.msk [vmem:[#allocation2 + $0x18] sm:$0xff] %vm2361_vm9, %v2272_v60  ;;  %1935 = vrot.lane.b32.xlu0 %v7175_v54, %s8244_s16  ;;  %v3761_v60 = vrot.slane %v7456_v32, 5  ;;  %v2820_v24 = vrot.slane %v2819_v8, 4  ;;  %v3769_v13 = vsel %vm8750_vm5, %v7528_v9, %v3768_v26  ;;  %v3770_v20 = vrot.slane %v3768_v26, 4  ;;  %v8181_v44 = vld [vmem:[%s12435_s0 + $0xa8] sm:$0xff]   ;;  %v8182_v6 = vld [vmem:[%s12435_s0 + $0xb4] sm:$0xff]  }
 0x149   :  { %5460 = vrot.lane.b32.xlu1 %v7782_v0, %s8249_s23  ;;  %v4354_v50 = vpop.permute.xlu0 %4353  ;;  %v2786_v51 = vrot.slane %v2785_v35, 4  ;;  %v3764_v0 = vrot.slane %v7457_v40, 5  ;;  %v4866_v45 = vshll.u32 %v7711_v2, 16  ;;  %v4865_v28 = vrot.slane %v4863_v11, 4  ;;  %v7840_v35 = vld [vmem:[%s12435_s0 + $0xac] sm:$0xf] }
 0x14a   :  { %4448 = vst.msk [vmem:[#allocation2 + $0x10] sm:$0xff] %vm4445_vm12, %v4354_v50  ;;  %v3762_v18 = vsel %vm8750_vm5, %v7527_v48, %v3761_v60  ;;  %v3763_v25 = vrot.slane %v3761_v60, 4  ;;  %v3772_v21 = vsel %vm8750_vm5, %v3770_v20, %v3771_v14  ;;  %v4876_v32 = vshrl.u32 %v7712_v19, 16  ;;  %v7843_v50 = vld [vmem:[%s12435_s0 + $0xb8] sm:$0xf] }
 0x14b   :  { %v3361_v15 = vpop.permute.xlu1 %3360  ;;  %v6209_v23 = vld [vmem:[#allocation2 + $0x8] sm:$0xff]  ;;  %v2791_v4 = vsel %vm8295_vm2, %v2786_v51, %v2790_v53  ;;  %v4872_v53 = vshll.u32 %v7712_v19, 16  ;;  %v7560_v62 = vcombine.low %v3769_v13, %v3772_v21  ;;  %v4868_v31 = vrot.slane %v4866_v45, 5  ;;  %v7844_v58 = vld [vmem:[%s12435_s0 + $0xbc] sm:$0x1] }
 0x14c   :  { %3454 = vst.msk [vmem:[#allocation2 + $0x18] sm:$0xff] %vm3450_vm10, %v3361_v15  ;;  %8040 = vmatmul.mubr.msk.bf16.vlgmr.msra.gmra.mrb[0].mxu0 %vm6260_vm0, %v6209_v23  ;;  %2289 = vrot.lane.b32.xlu0 %v8179_v33, %s8245_s7  ;;  %v3765_v17 = vsel %vm8750_vm5, %v3763_v25, %v3764_v0  ;;  %v2815_v15 = vsel %vm8295_vm2, %v2810_v16, %v2814_v55  ;;  %v4882_v33 = vshll.u32 %v7713_v63, 16  ;;  %v4887_v38 = vshrl.u32 %v7714_v12, 16  ;;  %v1440_v13 = vld [vmem:[%s12435_s0 + $0xb0] sm:$0x1] }
 0x14d   :  { %6101 = vrot.lane.b32.xlu1 %v7942_v10, %s8250_s13  ;;  %v5443_v29 = vpop.permute.xlu0 %5442  ;;  %v7399_v10 = vcombine.low %v2791_v4, %v2801_v7  ;;  %v2825_v23 = vsel %vm8295_vm2, %v2820_v24, %v2824_v59  ;;  %v7559_v39 = vcombine.low %v3762_v18, %v3765_v17  ;;  %v4874_v37 = vrot.slane %v4872_v53, 5  ;;  %v1438_v7 = vld [vmem:[%s12435_s0 + $0xa8] sm:$0xe]  ;;  %v1441_v45 = vld [vmem:[%s12435_s0 + $0xb4] sm:$0xe] }
 0x14e   :  { %5537 = vst.msk [vmem:[#allocation2 + $0x10] sm:$0xff] %vm5534_vm13, %v5443_v29  ;;  %v7400_v54 = vcombine.low %v2815_v15, %v2825_v23  ;;  %v4890_v40 = vshll.u32 %v7714_v12, 16  ;;  %v4869_v46 = vor.u32 %v4868_v31, %v4865_v28  ;;  %v4878_v47 = vrot.slane %v4876_v32, 4  ;;  %v1442_v21 = vld [vmem:[%s12435_s0 + $0xb8] sm:$0xf] }
 0x14f   :  { %v4002_v42 = vpop.permute.xlu1 %4001  ;;  %v4884_v48 = vrot.slane %v4882_v33, 5  ;;  %v4900_v49 = vshrl.u32 %v7715_v30, 16  ;;  %v4889_v52 = vrot.slane %v4887_v38, 4  ;;  %v4906_v57 = vshll.u32 %v7716_v61, 16  ;;  %v1443_v28 = vld [vmem:[%s12435_s0 + $0xbc] sm:$0x1] }
 0x150   :  { %4095 = vst.msk [vmem:[#allocation2 + $0x18] sm:$0xff] %vm4091_vm11, %v4002_v42  ;;  %3378 = vrot.lane.b32.xlu0 %v7399_v10, %s8246_s21  ;;  %v4896_v42 = vshll.u32 %v7715_v30, 16  ;;  %v4892_v55 = vrot.slane %v4890_v40, 5  ;;  %v4870_v60 = vrot.slane %v4869_v46, 4  ;;  %v4879_v0 = vor.u32 %v4878_v47, %v4874_v37  ;;  %v1439_v10 = vld [vmem:[%s12435_s0 + $0xac] sm:$0xf] }
 0x151   :  { %1937 = vrot.lane.b32.xlu1 %v7176_v27, %s8244_s16  ;;  %v7839_v27 = vld [vmem:[%s12435_s0 + $0xa8] sm:$0xe]  ;;  %v6084_v34 = vpop.permute.xlu0 %6083  ;;  %v4902_v1 = vrot.slane %v4900_v49, 4  ;;  %v4908_v9 = vrot.slane %v4906_v57, 5  ;;  %v5845_v2 = vrot.slane %v7840_v35, 5  ;;  %v5852_v17 = vrot.slane %v7843_v50, 5 }
 0x152   :  { %6178 = vst.msk [vmem:[#allocation2 + $0x10] sm:$0xff] %vm6175_vm14, %v6084_v34  ;;  %v4898_v56 = vrot.slane %v4896_v42, 5  ;;  %v7911_v4 = vrot.slane %v7839_v27, 9  ;;  %v4893_v8 = vor.u32 %v4892_v55, %v4889_v52  ;;  %v4875_v18 = vsel %vm8295_vm2, %v4870_v60, %v4874_v37  ;;  %v7334_v31 = vld [vmem:[%s12435_s0 + $0xb8] sm:$0xf] }
 0x153   :  { %v4356_v3 = vpop.permute.xlu1 %4355  ;;  %v4880_v25 = vrot.slane %v4879_v0, 4  ;;  %v5847_v19 = vrot.slane %v5845_v2, 4  ;;  %v5855_v23 = vrot.slane %v7844_v58, 5  ;;  %v1691_v34 = vrot.slane %v1439_v10, 5  ;;  %v7335_v40 = vld [vmem:[%s12435_s0 + $0xbc] sm:$0x1] }
 0x154   :  { %4449 = vst.msk [vmem:[#allocation2 + $0x18] sm:$0xff] %vm4445_vm12, %v4356_v3  ;;  %4019 = vrot.lane.b32.xlu0 %v7559_v39, %s8247_s8  ;;  %v5848_v3 = vrot.slane %v7841_v36, 5  ;;  %v4903_v26 = vor.u32 %v4902_v1, %v4898_v56  ;;  %v4894_v24 = vrot.slane %v4893_v8, 4  ;;  %v5846_v14 = vsel %vm8750_vm5, %v7911_v4, %v5845_v2  ;;  %v7337_v49 = vld [vmem:[%s12435_s0 + $0xc4] sm:$0xf] }
 0x155   :  { %2291 = vrot.lane.b32.xlu1 %v8180_v43, %s8245_s7  ;;  %v7842_v43 = vld [vmem:[%s12435_s0 + $0xb4] sm:$0xe]  ;;  %v2274_v59 = vpop.permute.xlu0 %2273  ;;  %v4885_v11 = vsel %vm8295_vm2, %v4880_v25, %v4884_v48  ;;  %v7145_v39 = vrot.slane %v1438_v7, 9  ;;  %v1694_v37 = vrot.slane %v1440_v13, 5  ;;  %v7146_v38 = vrot.slane %v1441_v45, 9 }
 0x156   :  { %2366 = vst.msk [vmem:[#allocation2 + $0x20] sm:$0xff] %vm2361_vm9, %v2274_v59  ;;  %v7912_v29 = vrot.slane %v7842_v43, 9  ;;  %v4904_v15 = vrot.slane %v4903_v26, 4  ;;  %v7783_v12 = vcombine.low %v4875_v18, %v4885_v11  ;;  %v4899_v30 = vsel %vm8295_vm2, %v4894_v24, %v4898_v56  ;;  %v7336_v48 = vld [vmem:[%s12435_s0 + $0xc0] sm:$0xf] }
 0x157   :  { %v5445_v22 = vpop.permute.xlu1 %5444  ;;  %v1693_v46 = vrot.slane %v1691_v34, 4  ;;  %v1698_v47 = vrot.slane %v1442_v21, 5  ;;  %v1701_v50 = vrot.slane %v1443_v28, 5  ;;  %v2836_v55 = vshll.u32 %v7334_v31, 16  ;;  %v7338_v7 = vld [vmem:[%s12435_s0 + $0xc8] sm:$0x1] }
 0x158   :  { %5538 = vst.msk [vmem:[#allocation2 + $0x18] sm:$0xff] %vm5534_vm13, %v5445_v22  ;;  %4373 = vrot.lane.b32.xlu0 %v8181_v44, %s8248_s25  ;;  %v5849_v22 = vsel %vm8750_vm5, %v5847_v19, %v5848_v3  ;;  %v4909_v53 = vsel %vm8295_vm2, %v4904_v15, %v4908_v9  ;;  %v5853_v27 = vsel %vm8750_vm5, %v7912_v29, %v5852_v17  ;;  %v2840_v59 = vshrl.u32 %v7334_v31, 16  ;;  %v7462_v24 = vld [vmem:[%s12435_s0 + $0xb8] sm:$0xf]  ;;  %v8184_v15 = vld [vmem:[%s12435_s0 + $0xc0] sm:$0xff]  }
 0x159   :  { %3380 = vrot.lane.b32.xlu1 %v7400_v54, %s8246_s21  ;;  %v3363_v20 = vpop.permute.xlu0 %3362  ;;  %v6210_v63 = vld [vmem:[#allocation2 + $0x10] sm:$0xff]  ;;  %v5854_v54 = vrot.slane %v5852_v17, 4  ;;  %v7943_v61 = vcombine.low %v5846_v14, %v5849_v22  ;;  %v7784_v35 = vcombine.low %v4899_v30, %v4909_v53  ;;  %v1692_v44 = vsel %vm8750_vm5, %v7145_v39, %v1691_v34  ;;  %v7464_v30 = vld [vmem:[%s12435_s0 + $0xc0] sm:$0xe] }
 0x15a   :  { %3455 = vst.msk [vmem:[#allocation2 + $0x20] sm:$0xff] %vm3450_vm10, %v3363_v20  ;;  %8043 = vmatprep.mubr.msk.bf16.mxu0 %vm6260_vm0, %v6210_v63  ;;  %v1695_v56 = vsel %vm8750_vm5, %v1693_v46, %v1694_v37  ;;  %v1699_v57 = vsel %vm8750_vm5, %v7146_v38, %v1698_v47  ;;  %v1700_v58 = vrot.slane %v1698_v47, 4  ;;  %v2842_v2 = vrot.slane %v2840_v59, 4  ;;  %v8183_v14 = vld [vmem:[%s12435_s0 + $0xb4] sm:$0xff]   ;;  %v7463_v63 = vld [vmem:[%s12435_s0 + $0xbc] sm:$0x1] }
 0x15b   :  { %v6086_v51 = vpop.permute.xlu1 %6085  ;;  %v5856_v36 = vsel %vm8750_vm5, %v5854_v54, %v5855_v23  ;;  %v7177_v0 = vcombine.low %v1692_v44, %v1695_v56  ;;  %v2846_v3 = vshll.u32 %v7335_v40, 16  ;;  %v2851_v18 = vshrl.u32 %v7336_v48, 16  ;;  %v7718_v47 = vld [vmem:[%s12435_s0 + $0xc4] sm:$0xf] }
 0x15c   :  { %6179 = vst.msk [vmem:[#allocation2 + $0x18] sm:$0xff] %vm6175_vm14, %v6086_v51  ;;  %5462 = vrot.lane.b32.xlu0 %v7783_v12, %s8249_s23  ;;  %v7944_v43 = vcombine.low %v5853_v27, %v5856_v36  ;;  %v1702_v9 = vsel %vm8750_vm5, %v1700_v58, %v1701_v50  ;;  %v2854_v29 = vshll.u32 %v7336_v48, 16  ;;  %v2860_v10 = vshll.u32 %v7337_v49, 16 }
 0x15d   :  { %4021 = vrot.lane.b32.xlu1 %v7560_v62, %s8247_s8  ;;  %v7333_v62 = vld [vmem:[%s12435_s0 + $0xb4] sm:$0xf]  ;;  %v4004_v42 = vpop.permute.xlu0 %4003  ;;  %v7178_v25 = vcombine.low %v1699_v57, %v1702_v9  ;;  %v2848_v17 = vrot.slane %v2846_v3, 5  ;;  %v2853_v13 = vrot.slane %v2851_v18, 4  ;;  %v2864_v20 = vshrl.u32 %v7337_v49, 16 }
 0x15e   :  { %4096 = vst.msk [vmem:[#allocation2 + $0x20] sm:$0xff] %vm4091_vm11, %v4004_v42  ;;  %v2827_v51 = vshrl.u32 %v7333_v62, 16  ;;  %v2830_v52 = vshll.u32 %v7333_v62, 16  ;;  %v2856_v39 = vrot.slane %v2854_v29, 5  ;;  %v2862_v45 = vrot.slane %v2860_v10, 5 }
 0x15f   :  { %v2276_v16 = vpop.permute.xlu1 %2275  ;;  %v2870_v12 = vshll.u32 %v7338_v7, 16  ;;  %v2866_v21 = vrot.slane %v2864_v20, 4  ;;  %v3775_v53 = vrot.slane %v7462_v24, 5  ;;  %v3778_v31 = vrot.slane %v7463_v63, 5  ;;  %v7722_v9 = vld [vmem:[%s12435_s0 + $0xd4] sm:$0x1] }
 0x160   :  { %2367 = vst.msk [vmem:[#allocation2 + $0x28] sm:$0xff] %vm2361_vm9, %v2276_v16  ;;  %6103 = vrot.lane.b32.xlu0 %v7943_v61, %s8250_s13  ;;  %v2829_v1 = vrot.slane %v2827_v51, 4  ;;  %v2832_v4 = vrot.slane %v2830_v52, 5  ;;  %v7461_v16 = vld [vmem:[%s12435_s0 + $0xb4] sm:$0xe]  ;;  %v2857_v34 = vor.u32 %v2856_v39, %v2853_v13  ;;  %v7530_v44 = vrot.slane %v7464_v30, 9 }
 0x161   :  { %4375 = vrot.lane.b32.xlu1 %v8182_v6, %s8248_s25  ;;  %v2838_v6 = vrot.slane %v2836_v55, 5  ;;  %v4358_v8 = vpop.permute.xlu0 %4357  ;;  %v7529_v28 = vrot.slane %v7461_v16, 9  ;;  %v7465_v61 = vld [vmem:[%s12435_s0 + $0xc4] sm:$0xf]  ;;  %v2872_v62 = vrot.slane %v2870_v12, 5  ;;  %v2867_v36 = vor.u32 %v2866_v21, %v2862_v45 }
 0x162   :  { %4450 = vst.msk [vmem:[#allocation2 + $0x20] sm:$0xff] %vm4445_vm12, %v4358_v8  ;;  %v2833_v26 = vor.u32 %v2832_v4, %v2829_v1  ;;  %v3777_v38 = vrot.slane %v3775_v53, 4  ;;  %v3782_v46 = vrot.slane %v7465_v61, 5  ;;  %v7719_v52 = vld [vmem:[%s12435_s0 + $0xc8] sm:$0x1]  ;;  %v4920_v8 = vshll.u32 %v7718_v47, 16 }
 0x163   :  { %v3365_v32 = vpop.permute.xlu1 %3364  ;;  %v6211_v33 = vld [vmem:[#allocation2 + $0x18] sm:$0xff]  ;;  %v2843_v19 = vor.u32 %v2842_v2, %v2838_v6  ;;  %v3776_v37 = vsel %vm8750_vm5, %v7529_v28, %v3775_v53  ;;  %v2868_v49 = vrot.slane %v2867_v36, 4  ;;  %v4924_v18 = vshrl.u32 %v7718_v47, 16  ;;  %v7846_v29 = vld [vmem:[%s12435_s0 + $0xc4] sm:$0xf] }
 0x164   :  { %3456 = vst.msk [vmem:[#allocation2 + $0x28] sm:$0xff] %vm3450_vm10, %v3365_v32  ;;  %8044 = vmatmul.mubr.msk.bf16.gmra.mrb[4].mxu0 %vm6260_vm0, %v6211_v33  ;;  %1939 = vrot.lane.b32.xlu0 %v7177_v0, %s8244_s16  ;;  %v2834_v23 = vrot.slane %v2833_v26, 4  ;;  %v7466_v32 = vld [vmem:[%s12435_s0 + $0xc8] sm:$0x1]  ;;  %v7717_v33 = vld [vmem:[%s12435_s0 + $0xc0] sm:$0xf]  ;;  %v3779_v50 = vsel %vm8750_vm5, %v3777_v38, %v3778_v31  ;;  %v3783_v58 = vsel %vm8750_vm5, %v7530_v44, %v3782_v46 }
 0x165   :  { %5464 = vrot.lane.b32.xlu1 %v7784_v35, %s8249_s23  ;;  %v2844_v54 = vrot.slane %v2843_v19, 4  ;;  %v3785_v51 = vrot.slane %v7466_v32, 5  ;;  %v4911_v55 = vshrl.u32 %v7717_v33, 16  ;;  %v7561_v57 = vcombine.low %v3776_v37, %v3779_v50  ;;  %v7721_v0 = vld [vmem:[%s12435_s0 + $0xd0] sm:$0xf]  ;;  %v8185_v21 = vld [vmem:[%s12435_s0 + $0xc0] sm:$0xff]  }
 0x166   :  { %v5447_v22 = vpop.permute.xlu0 %5446  ;;  %v2839_v27 = vsel %vm8295_vm2, %v2834_v23, %v2838_v6  ;;  %v3784_v59 = vrot.slane %v3782_v46, 4  ;;  %v2873_v1 = vsel %vm8295_vm2, %v2868_v49, %v2872_v62  ;;  %v4914_v6 = vshll.u32 %v7717_v33, 16  ;;  %v7845_v26 = vld [vmem:[%s12435_s0 + $0xc0] sm:$0xe]  ;;  %v10397_v13 = vld [vmem:[%s12435_s0 + $0xcc] sm:$0xe] }
 0x167   :  { %v4006_v60 = vpop.permute.xlu1 %4005  ;;  %5539 = vst.msk [vmem:[#allocation2 + $0x20] sm:$0xff] %vm5534_vm13, %v5447_v22  ;;  %v2849_v35 = vsel %vm8295_vm2, %v2844_v54, %v2848_v17  ;;  %v4913_v4 = vrot.slane %v4911_v55, 4  ;;  %v7847_v17 = vld [vmem:[%s12435_s0 + $0xc8] sm:$0x1]  ;;  %v4926_v20 = vrot.slane %v4924_v18, 4  ;;  %v4954_v12 = vshll.u32 %v7722_v9, 16 }
 0x168   :  { %4097 = vst.msk [vmem:[#allocation2 + $0x28] sm:$0xff] %vm4091_vm11, %v4006_v60  ;;  %2293 = vrot.lane.b32.xlu0 %v8183_v14, %s8245_s7  ;;  %v7401_v42 = vcombine.low %v2839_v27, %v2849_v35  ;;  %v7720_v60 = vld [vmem:[%s12435_s0 + $0xcc] sm:$0xf]  ;;  %v3786_v7 = vsel %vm8750_vm5, %v3784_v59, %v3785_v51  ;;  %v4916_v24 = vrot.slane %v4914_v6, 5  ;;  %v4922_v14 = vrot.slane %v4920_v8, 5 }
 0x169   :  { %6105 = vrot.lane.b32.xlu1 %v7944_v43, %s8250_s13  ;;  %v2858_v43 = vrot.slane %v2857_v34, 4  ;;  %v7562_v16 = vcombine.low %v3783_v58, %v3786_v7  ;;  %v4935_v19 = vshrl.u32 %v7720_v60, 16  ;;  %v7849_v30 = vld [vmem:[%s12435_s0 + $0xd0] sm:$0xf]  ;;  %v10407_v22 = vld [vmem:[%s12435_s0 + $0xd4] sm:$0x1] }
 0x16a   :  { %v6088_v48 = vpop.permute.xlu0 %6087  ;;  %v4917_v23 = vor.u32 %v4916_v24, %v4913_v4  ;;  %v4927_v28 = vor.u32 %v4926_v20, %v4922_v14  ;;  %v7913_v27 = vrot.slane %v7845_v26, 9  ;;  %v10416_v34 = vld [vmem:[%s12435_s0 + $0xd8] sm:$0xe]  ;;  %v4956_v35 = vrot.slane %v4954_v12, 5  ;;  %v8186_v37 = vld [vmem:[%s12435_s0 + $0xcc] sm:$0xff]  }
 0x16b   :  { %v4360_v11 = vpop.permute.xlu1 %4359  ;;  %6180 = vst.msk [vmem:[#allocation2 + $0x20] sm:$0xff] %vm6175_vm14, %v6088_v48  ;;  %v2863_v56 = vsel %vm8295_vm2, %v2858_v43, %v2862_v45  ;;  %v4937_v39 = vrot.slane %v4935_v19, 4  ;;  %v4948_v45 = vshrl.u32 %v7721_v0, 16  ;;  %v5859_v36 = vrot.slane %v7846_v29, 5  ;;  %v1445_v49 = vld [vmem:[%s12435_s0 + $0xdc] sm:$0xf] }
 0x16c   :  { %4451 = vst.msk [vmem:[#allocation2 + $0x28] sm:$0xff] %vm4445_vm12, %v4360_v11  ;;  %3382 = vrot.lane.b32.xlu0 %v7401_v42, %s8246_s21  ;;  %v7402_v3 = vcombine.low %v2863_v56, %v2873_v1  ;;  %v4938_v11 = vshll.u32 %v7720_v60, 16  ;;  %v4918_v32 = vrot.slane %v4917_v23, 4  ;;  %v4928_v38 = vrot.slane %v4927_v28, 4  ;;  %v1446_v50 = vld [vmem:[%s12435_s0 + $0xe0] sm:$0x1] }
 0x16d   :  { %1941 = vrot.lane.b32.xlu1 %v7178_v25, %s8244_s16  ;;  %v4930_v25 = vshll.u32 %v7719_v52, 16  ;;  %v4950_v33 = vrot.slane %v4948_v45, 4  ;;  %v5862_v42 = vrot.slane %v7847_v17, 5  ;;  %v7914_v43 = vrot.slane %v10397_v13, 9  ;;  %v1447_v59 = vld [vmem:[%s12435_s0 + $0xe4] sm:$0xe] }
 0x16e   :  { %v2278_v10 = vpop.permute.xlu0 %2277  ;;  %v4940_v53 = vrot.slane %v4938_v11, 5  ;;  %v4923_v44 = vsel %vm8295_vm2, %v4918_v32, %v4922_v14  ;;  %v5860_v47 = vsel %vm8750_vm5, %v7913_v27, %v5859_v36  ;;  %v5861_v48 = vrot.slane %v5859_v36, 4  ;;  %v1448_v8 = vld [vmem:[%s12435_s0 + $0xe8] sm:$0xf]  ;;  %v1449_v9 = vld [vmem:[%s12435_s0 + $0xec] sm:$0x1] }
 0x16f   :  { %v5449_v40 = vpop.permute.xlu1 %5448  ;;  %2368 = vst.msk [vmem:[#allocation2 + $0x30] sm:$0xff] %vm2361_vm9, %v2278_v10  ;;  %v4932_v63 = vrot.slane %v4930_v25, 5  ;;  %v5869_v58 = vrot.slane %v10407_v22, 5  ;;  %v7147_v6 = vrot.slane %v10416_v34, 9  ;;  %v7339_v25 = vld [vmem:[%s12435_s0 + $0xe4] sm:$0xf] }
 0x170   :  { %5540 = vst.msk [vmem:[#allocation2 + $0x28] sm:$0xff] %vm5534_vm13, %v5449_v40  ;;  %4023 = vrot.lane.b32.xlu0 %v7561_v57, %s8247_s8  ;;  %v4941_v40 = vor.u32 %v4940_v53, %v4937_v39  ;;  %v5866_v57 = vrot.slane %v7849_v30, 5  ;;  %v5863_v4 = vsel %vm8750_vm5, %v5861_v48, %v5862_v42  ;;  %v1705_v29 = vrot.slane %v1445_v49, 5  ;;  %v7340_v24 = vld [vmem:[%s12435_s0 + $0xe8] sm:$0xf] }
 0x171   :  { %2295 = vrot.lane.b32.xlu1 %v8184_v15, %s8245_s7  ;;  %v4944_v15 = vshll.u32 %v7721_v0, 16  ;;  %v4933_v55 = vsel %vm8295_vm2, %v4928_v38, %v4932_v63  ;;  %v1708_v10 = vrot.slane %v1446_v50, 5  ;;  %v1712_v13 = vrot.slane %v1448_v8, 5  ;;  %v7341_v63 = vld [vmem:[%s12435_s0 + $0xec] sm:$0x1] }
 0x172   :  { %v3367_v62 = vpop.permute.xlu0 %3366  ;;  %v6212_v31 = vld [vmem:[#allocation2 + $0x20] sm:$0xff]  ;;  %v4942_v56 = vrot.slane %v4941_v40, 4  ;;  %v7785_v0 = vcombine.low %v4923_v44, %v4933_v55  ;;  %v5867_v7 = vsel %vm8750_vm5, %v7914_v43, %v5866_v57  ;;  %v5868_v18 = vrot.slane %v5866_v57, 4  ;;  %v7342_v12 = vld [vmem:[%s12435_s0 + $0xf0] sm:$0xf] }
 0x173   :  { %v6090_v2 = vpop.permute.xlu1 %6089  ;;  %v4946_v61 = vrot.slane %v4944_v15, 5  ;;  %3457 = vst.msk [vmem:[#allocation2 + $0x30] sm:$0xff] %vm3450_vm10, %v3367_v62  ;;  %8047 = vmatprep.mubr.msk.bf16.mxu0 %vm6260_vm0, %v6212_v31  ;;  %v1715_v20 = vrot.slane %v1449_v9, 5  ;;  %v1706_v23 = vsel %vm8750_vm5, %v7147_v6, %v1705_v29  ;;  %v1707_v39 = vrot.slane %v1705_v29, 4  ;;  %v7343_v30 = vld [vmem:[%s12435_s0 + $0xf4] sm:$0xf] }
 0x174   :  { %6181 = vst.msk [vmem:[#allocation2 + $0x28] sm:$0xff] %vm6175_vm14, %v6090_v2  ;;  %4377 = vrot.lane.b32.xlu0 %v8185_v21, %s8248_s25  ;;  %v5870_v17 = vsel %vm8750_vm5, %v5868_v18, %v5869_v58  ;;  %v2875_v45 = vshrl.u32 %v7339_v25, 16  ;;  %v2878_v21 = vshll.u32 %v7339_v25, 16  ;;  %v2884_v28 = vshll.u32 %v7340_v24, 16  ;;  %v7344_v53 = vld [vmem:[%s12435_s0 + $0xf8] sm:$0x1] }
 0x175   :  { %3384 = vrot.lane.b32.xlu1 %v7402_v3, %s8246_s21  ;;  %v4951_v46 = vor.u32 %v4950_v33, %v4946_v61  ;;  %v4947_v2 = vsel %vm8295_vm2, %v4942_v56, %v4946_v61  ;;  %v7945_v3 = vcombine.low %v5860_v47, %v5863_v4  ;;  %v7946_v15 = vcombine.low %v5867_v7, %v5870_v17  ;;  %v7467_v61 = vld [vmem:[%s12435_s0 + $0xe4] sm:$0xe]  ;;  %v7471_v8 = vld [vmem:[%s12435_s0 + $0xf4] sm:$0xf]  ;;  %v7472_v25 = vld [vmem:[%s12435_s0 + $0xf8] sm:$0x1] }
 0x176   :  { %v4008_v60 = vpop.permute.xlu0 %4007  ;;  %v1709_v27 = vsel %vm8750_vm5, %v1707_v39, %v1708_v10  ;;  %v2877_v34 = vrot.slane %v2875_v45, 4  ;;  %v2888_v62 = vshrl.u32 %v7340_v24, 16  ;;  %v2894_v31 = vshll.u32 %v7341_v63, 16  ;;  %v7724_v45 = vld [vmem:[%s12435_s0 + $0xf4] sm:$0xf] }
 0x177   :  { %v2280_v54 = vpop.permute.xlu1 %2279  ;;  %v4952_v1 = vrot.slane %v4951_v46, 4  ;;  %4098 = vst.msk [vmem:[#allocation2 + $0x30] sm:$0xff] %vm4091_vm11, %v4008_v60  ;;  %v7179_v33 = vcombine.low %v1706_v23, %v1709_v27  ;;  %v2880_v36 = vrot.slane %v2878_v21, 5  ;;  %v2899_v44 = vshrl.u32 %v7342_v12, 16  ;;  %v7468_v46 = vld [vmem:[%s12435_s0 + $0xe8] sm:$0xf] }
 0x178   :  { %2369 = vst.msk [vmem:[#allocation2 + $0x38] sm:$0xff] %vm2361_vm9, %v2280_v54  ;;  %5466 = vrot.lane.b32.xlu0 %v7785_v0, %s8249_s23  ;;  %v1714_v54 = vrot.slane %v1712_v13, 4  ;;  %v2890_v42 = vrot.slane %v2888_v62, 4  ;;  %v2896_v43 = vrot.slane %v2894_v31, 5  ;;  %v2902_v48 = vshll.u32 %v7342_v12, 16 }
 0x179   :  { %4025 = vrot.lane.b32.xlu1 %v7562_v16, %s8247_s8  ;;  %v4957_v26 = vsel %vm8295_vm2, %v4952_v1, %v4956_v35  ;;  %v7148_v16 = vrot.slane %v1447_v59, 9  ;;  %v2881_v47 = vor.u32 %v2880_v36, %v2877_v34  ;;  %v2908_v49 = vshll.u32 %v7343_v30, 16  ;;  %v7470_v59 = vld [vmem:[%s12435_s0 + $0xf0] sm:$0xe]  ;;  %v7725_v21 = vld [vmem:[%s12435_s0 + $0xf8] sm:$0x1] }
 0x17a   :  { %v7786_v19 = vcombine.low %v4947_v2, %v4957_v26  ;;  %v4362_v11 = vpop.permute.xlu0 %4361  ;;  %v1716_v35 = vsel %vm8750_vm5, %v1714_v54, %v1715_v20  ;;  %v2912_v50 = vshrl.u32 %v7343_v30, 16  ;;  %v2901_v56 = vrot.slane %v2899_v44, 4  ;;  %v8188_v26 = vld [vmem:[%s12435_s0 + $0xf0] sm:$0xff]   ;;  %v7726_v62 = vld [vmem:[%s12435_s0 + $0xfc] sm:$0xf] }
 0x17b   :  { %v3369_v51 = vpop.permute.xlu1 %3368  ;;  %v6213_v52 = vld [vmem:[#allocation2 + $0x28] sm:$0xff]  ;;  %4452 = vst.msk [vmem:[#allocation2 + $0x30] sm:$0xff] %vm4445_vm12, %v4362_v11  ;;  %v1713_v22 = vsel %vm8750_vm5, %v7148_v16, %v1712_v13  ;;  %v2918_v57 = vshll.u32 %v7344_v53, 16  ;;  %v7531_v58 = vrot.slane %v7467_v61, 9  ;;  %v2882_v0 = vrot.slane %v2881_v47, 4 }
 0x17c   :  { %3458 = vst.msk [vmem:[#allocation2 + $0x38] sm:$0xff] %vm3450_vm10, %v3369_v51  ;;  %8048 = vmatmul.mubr.msk.bf16.gmra.mrb[8].mxu0 %vm6260_vm0, %v6213_v52  ;;  %6107 = vrot.lane.b32.xlu0 %v7945_v3, %s8250_s13  ;;  %v7180_v40 = vcombine.low %v1713_v22, %v1716_v35  ;;  %v7469_v51 = vld [vmem:[%s12435_s0 + $0xec] sm:$0x1]  ;;  %v8187_v52 = vld [vmem:[%s12435_s0 + $0xe4] sm:$0xff]   ;;  %v2904_v1 = vrot.slane %v2902_v48, 5  ;;  %v2910_v4 = vrot.slane %v2908_v49, 5 }
 0x17d   :  { %4379 = vrot.lane.b32.xlu1 %v8186_v37, %s8248_s25  ;;  %v2886_v37 = vrot.slane %v2884_v28, 5  ;;  %v2914_v6 = vrot.slane %v2912_v50, 4  ;;  %v2920_v3 = vrot.slane %v2918_v57, 5  ;;  %v3789_v7 = vrot.slane %v7468_v46, 5  ;;  %v7727_v31 = vld [vmem:[%s12435_s0 + $0x100] sm:$0xf] }
 0x17e   :  { %v5451_v38 = vpop.permute.xlu0 %5450  ;;  %v3792_v18 = vrot.slane %v7469_v51, 5  ;;  %v2905_v10 = vor.u32 %v2904_v1, %v2901_v56  ;;  %v7532_v24 = vrot.slane %v7470_v59, 9  ;;  %v3796_v20 = vrot.slane %v7471_v8, 5  ;;  %v7852_v47 = vld [vmem:[%s12435_s0 + $0xf4] sm:$0xf] }
 0x17f   :  { %v4010_v14 = vpop.permute.xlu1 %4009  ;;  %5541 = vst.msk [vmem:[#allocation2 + $0x30] sm:$0xff] %vm5534_vm13, %v5451_v38  ;;  %v2891_v55 = vor.u32 %v2890_v42, %v2886_v37  ;;  %v2887_v29 = vsel %vm8295_vm2, %v2882_v0, %v2886_v37  ;;  %v2915_v16 = vor.u32 %v2914_v6, %v2910_v4  ;;  %v10535_v17 = vsel %vm8750_vm5, %v7531_v58, %v3789_v7  ;;  %v7728_v37 = vld [vmem:[%s12435_s0 + $0x104] sm:$0x1]  ;;  %v7851_v38 = vld [vmem:[%s12435_s0 + $0xf0] sm:$0xe] }
 0x180   :  { %4099 = vst.msk [vmem:[#allocation2 + $0x38] sm:$0xff] %vm4091_vm11, %v4010_v14  ;;  %1943 = vrot.lane.b32.xlu0 %v7179_v33, %s8244_s16  ;;  %v7723_v14 = vld [vmem:[%s12435_s0 + $0xf0] sm:$0xf]  ;;  %v3791_v13 = vrot.slane %v3789_v7, 4  ;;  %v3799_v39 = vrot.slane %v7472_v25, 5  ;;  %v10546_v22 = vsel %vm8750_vm5, %v7532_v24, %v3796_v20  ;;  %v3798_v54 = vrot.slane %v3796_v20, 4 }
 0x181   :  { %5468 = vrot.lane.b32.xlu1 %v7786_v19, %s8249_s23  ;;  %v2892_v2 = vrot.slane %v2891_v55, 4  ;;  %v2916_v23 = vrot.slane %v2915_v16, 4  ;;  %v4959_v28 = vshrl.u32 %v7723_v14, 16  ;;  %v4962_v34 = vshll.u32 %v7723_v14, 16  ;;  %v10580_v48 = vld [vmem:[%s12435_s0 + $0xf8] sm:$0x1] }
 0x182   :  { %v6092_v9 = vpop.permute.xlu0 %6091  ;;  %v3793_v30 = vsel %vm8750_vm5, %v3791_v13, %v3792_v18  ;;  %v3800_v33 = vsel %vm8750_vm5, %v3798_v54, %v3799_v39  ;;  %v4968_v36 = vshll.u32 %v7724_v45, 16  ;;  %v4972_v44 = vshrl.u32 %v7724_v45, 16  ;;  %v7854_v57 = vld [vmem:[%s12435_s0 + $0xfc] sm:$0xe]  ;;  %v8189_v58 = vld [vmem:[%s12435_s0 + $0xf0] sm:$0xff]  }
 0x183   :  { %v4364_v32 = vpop.permute.xlu1 %4363  ;;  %6182 = vst.msk [vmem:[#allocation2 + $0x30] sm:$0xff] %vm6175_vm14, %v6092_v9  ;;  %v2897_v19 = vsel %vm8295_vm2, %v2892_v2, %v2896_v43  ;;  %v2921_v61 = vsel %vm8295_vm2, %v2916_v23, %v2920_v3  ;;  %v7563_v27 = vcombine.low %v10535_v17, %v3793_v30  ;;  %v4961_v35 = vrot.slane %v4959_v28, 4  ;;  %v7856_v3 = vld [vmem:[%s12435_s0 + $0x104] sm:$0x1]  ;;  %v1450_v7 = vld [vmem:[%s12435_s0 + $0xf0] sm:$0xe] }
 0x184   :  { %4453 = vst.msk [vmem:[#allocation2 + $0x38] sm:$0xff] %vm4445_vm12, %v4364_v32  ;;  %2297 = vrot.lane.b32.xlu0 %v8187_v52, %s8245_s7  ;;  %v7403_v11 = vcombine.low %v2887_v29, %v2897_v19  ;;  %v7564_v42 = vcombine.low %v10546_v22, %v3800_v33  ;;  %v4964_v43 = vrot.slane %v4962_v34, 5  ;;  %v4978_v46 = vshll.u32 %v7725_v21, 16  ;;  %v8190_v14 = vld [vmem:[%s12435_s0 + $0xfc] sm:$0xff]   ;;  %v1452_v45 = vld [vmem:[%s12435_s0 + $0xf8] sm:$0x1] }
 0x185   :  { %6109 = vrot.lane.b32.xlu1 %v7946_v15, %s8250_s13  ;;  %v2906_v15 = vrot.slane %v2905_v10, 4  ;;  %v4970_v51 = vrot.slane %v4968_v36, 5  ;;  %v4983_v52 = vshrl.u32 %v7726_v62, 16  ;;  %v4986_v55 = vshll.u32 %v7726_v62, 16  ;;  %v1453_v21 = vld [vmem:[%s12435_s0 + $0xfc] sm:$0xe] }
 0x186   :  { %v2282_v12 = vpop.permute.xlu0 %2281  ;;  %v4992_v56 = vshll.u32 %v7727_v31, 16  ;;  %v4965_v59 = vor.u32 %v4964_v43, %v4961_v35  ;;  %v4980_v0 = vrot.slane %v4978_v46, 5  ;;  %v4996_v1 = vshrl.u32 %v7727_v31, 16  ;;  %v1454_v62 = vld [vmem:[%s12435_s0 + $0x100] sm:$0xf] }
 0x187   :  { %v5453_v60 = vpop.permute.xlu1 %5452  ;;  %2370 = vst.msk [vmem:[#allocation2 + $0x40] sm:$0xff] %vm2361_vm9, %v2282_v12  ;;  %v2911_v53 = vsel %vm8295_vm2, %v2906_v15, %v2910_v4  ;;  %v7855_v4 = vld [vmem:[%s12435_s0 + $0x100] sm:$0xf]  ;;  %v4985_v6 = vrot.slane %v4983_v52, 4  ;;  %v4988_v8 = vrot.slane %v4986_v55, 5  ;;  %v5002_v2 = vshll.u32 %v7728_v37, 16 }
 0x188   :  { %5542 = vst.msk [vmem:[#allocation2 + $0x38] sm:$0xff] %vm5534_vm13, %v5453_v60  ;;  %v7404_v32 = vcombine.low %v2911_v53, %v2921_v61  ;;  %3386 = vrot.lane.b32.xlu0 %v7403_v11, %s8246_s21  ;;  %v4974_v60 = vrot.slane %v4972_v44, 4  ;;  %v4994_v9 = vrot.slane %v4992_v56, 5  ;;  %v4998_v10 = vrot.slane %v4996_v1, 4  ;;  %v1455_v37 = vld [vmem:[%s12435_s0 + $0x104] sm:$0x1] }
 0x189   :  { %1945 = vrot.lane.b32.xlu1 %v7180_v40, %s8244_s16  ;;  %v7915_v16 = vrot.slane %v7851_v38, 9  ;;  %v4989_v19 = vor.u32 %v4988_v8, %v4985_v6  ;;  %v5004_v17 = vrot.slane %v5002_v2, 5  ;;  %v5873_v13 = vrot.slane %v7852_v47, 5  ;;  %v7345_v44 = vld [vmem:[%s12435_s0 + $0xfc] sm:$0xf] }
 0x18a   :  { %v3371_v49 = vpop.permute.xlu0 %3370  ;;  %v6214_v50 = vld [vmem:[#allocation2 + $0x30] sm:$0xff]  ;;  %v4975_v29 = vor.u32 %v4974_v60, %v4970_v51  ;;  %v5876_v20 = vrot.slane %v10580_v48, 5  ;;  %v4999_v23 = vor.u32 %v4998_v10, %v4994_v9  ;;  %v7916_v39 = vrot.slane %v7854_v57, 9  ;;  %v7346_v46 = vld [vmem:[%s12435_s0 + $0x100] sm:$0xf] }
 0x18b   :  { %v6094_v63 = vpop.permute.xlu1 %6093  ;;  %3459 = vst.msk [vmem:[#allocation2 + $0x40] sm:$0xff] %vm3450_vm10, %v3371_v49  ;;  %8051 = vmatprep.mubr.msk.bf16.mxu0 %vm6260_vm0, %v6214_v50  ;;  %v4990_v12 = vrot.slane %v4989_v19, 4  ;;  %v5874_v30 = vsel %vm8750_vm5, %v7915_v16, %v5873_v13  ;;  %v5875_v22 = vrot.slane %v5873_v13, 4  ;;  %v5880_v54 = vrot.slane %v7855_v4, 5  ;;  %v7349_v60 = vld [vmem:[%s12435_s0 + $0x10c] sm:$0xf] }
 0x18c   :  { %6183 = vst.msk [vmem:[#allocation2 + $0x38] sm:$0xff] %vm6175_vm14, %v6094_v63  ;;  %4027 = vrot.lane.b32.xlu0 %v7563_v27, %s8247_s8  ;;  %v1451_v63 = vld [vmem:[%s12435_s0 + $0xf4] sm:$0xf]  ;;  %v4976_v15 = vrot.slane %v4975_v29, 4  ;;  %v5000_v61 = vrot.slane %v4999_v23, 4  ;;  %v5883_v27 = vrot.slane %v7856_v3, 5 }
 0x18d   :  { %2299 = vrot.lane.b32.xlu1 %v8188_v26, %s8245_s7  ;;  %v4966_v26 = vrot.slane %v4965_v59, 4  ;;  %v7149_v34 = vrot.slane %v1450_v7, 9  ;;  %v4995_v33 = vsel %vm8295_vm2, %v4990_v12, %v4994_v9  ;;  %v5877_v35 = vsel %vm8750_vm5, %v5875_v22, %v5876_v20  ;;  %v7348_v59 = vld [vmem:[%s12435_s0 + $0x108] sm:$0xf]  ;;  %v7350_v9 = vld [vmem:[%s12435_s0 + $0x110] sm:$0x1] }
 0x18e   :  { %v4012_v24 = vpop.permute.xlu0 %4011  ;;  %v4981_v53 = vsel %vm8295_vm2, %v4976_v15, %v4980_v0  ;;  %v5881_v36 = vsel %vm8750_vm5, %v7916_v39, %v5880_v54  ;;  %v5005_v38 = vsel %vm8295_vm2, %v5000_v61, %v5004_v17  ;;  %v1719_v43 = vrot.slane %v1451_v63, 5  ;;  %v7473_v13 = vld [vmem:[%s12435_s0 + $0xfc] sm:$0xe]  ;;  %v7474_v39 = vld [vmem:[%s12435_s0 + $0x100] sm:$0xf] }
 0x18f   :  { %v2284_v40 = vpop.permute.xlu1 %2283  ;;  %4100 = vst.msk [vmem:[#allocation2 + $0x40] sm:$0xff] %vm4091_vm11, %v4012_v24  ;;  %v4971_v11 = vsel %vm8295_vm2, %v4966_v26, %v4970_v51  ;;  %v7788_v47 = vcombine.low %v4995_v33, %v5005_v38  ;;  %v1722_v48 = vrot.slane %v1452_v45, 5  ;;  %v7150_v49 = vrot.slane %v1453_v21, 9  ;;  %v7347_v51 = vld [vmem:[%s12435_s0 + $0x104] sm:$0x1] }
 0x190   :  { %2371 = vst.msk [vmem:[#allocation2 + $0x48] sm:$0xff] %vm2361_vm9, %v2284_v40  ;;  %4381 = vrot.lane.b32.xlu0 %v8189_v58, %s8248_s25  ;;  %v7947_v40 = vcombine.low %v5874_v30, %v5877_v35  ;;  %v1726_v50 = vrot.slane %v1454_v62, 5  ;;  %v1720_v56 = vsel %vm8750_vm5, %v7149_v34, %v1719_v43  ;;  %v1721_v57 = vrot.slane %v1719_v43, 4  ;;  %v7476_v21 = vld [vmem:[%s12435_s0 + $0x108] sm:$0xe] }
 0x191   :  { %3388 = vrot.lane.b32.xlu1 %v7404_v32, %s8246_s21  ;;  %v7787_v32 = vcombine.low %v4971_v11, %v4981_v53  ;;  %v1729_v58 = vrot.slane %v1455_v37, 5  ;;  %v2923_v8 = vshrl.u32 %v7345_v44, 16  ;;  %v2926_v3 = vshll.u32 %v7345_v44, 16  ;;  %v7477_v34 = vld [vmem:[%s12435_s0 + $0x10c] sm:$0xf] }
 0x192   :  { %v4366_v31 = vpop.permute.xlu0 %4365  ;;  %v1727_v4 = vsel %vm8750_vm5, %v7150_v49, %v1726_v50  ;;  %v1728_v6 = vrot.slane %v1726_v50, 4  ;;  %v1723_v2 = vsel %vm8750_vm5, %v1721_v57, %v1722_v48  ;;  %v2932_v7 = vshll.u32 %v7346_v46, 16  ;;  %v7478_v43 = vld [vmem:[%s12435_s0 + $0x110] sm:$0x1] }
 0x193   :  { %v3373_v18 = vpop.permute.xlu1 %3372  ;;  %v6215_v25 = vld [vmem:[#allocation2 + $0x38] sm:$0xff]  ;;  %4454 = vst.msk [vmem:[#allocation2 + $0x40] sm:$0xff] %vm4445_vm12, %v4366_v31  ;;  %v2925_v29 = vrot.slane %v2923_v8, 4  ;;  %v2942_v10 = vshll.u32 %v7347_v51, 16  ;;  %v2947_v11 = vshrl.u32 %v7348_v59, 16  ;;  %v2950_v15 = vshll.u32 %v7348_v59, 16 }
 0x194   :  { %3460 = vst.msk [vmem:[#allocation2 + $0x48] sm:$0xff] %vm3450_vm10, %v3373_v18  ;;  %8052 = vmatmul.mubr.msk.bf16.gmra.mrb[12].mxu0 %vm6260_vm0, %v6215_v25  ;;  %5470 = vrot.lane.b32.xlu0 %v7787_v32, %s8249_s23  ;;  %v2936_v18 = vshrl.u32 %v7346_v46, 16  ;;  %v7181_v25 = vcombine.low %v1720_v56, %v1723_v2  ;;  %v1730_v26 = vsel %vm8750_vm5, %v1728_v6, %v1729_v58  ;;  %v2934_v19 = vrot.slane %v2932_v7, 5  ;;  %v8191_v31 = vld [vmem:[%s12435_s0 + $0xfc] sm:$0xff]   ;;  %v8192_v46 = vld [vmem:[%s12435_s0 + $0x108] sm:$0xff]  }
 0x195   :  { %4029 = vrot.lane.b32.xlu1 %v7564_v42, %s8247_s8  ;;  %v5882_v42 = vrot.slane %v5880_v54, 4  ;;  %v7182_v24 = vcombine.low %v1727_v4, %v1730_v26  ;;  %v2944_v63 = vrot.slane %v2942_v10, 5  ;;  %v2956_v23 = vshll.u32 %v7349_v60, 16  ;;  %v7475_v54 = vld [vmem:[%s12435_s0 + $0x104] sm:$0x1] }
 0x196   :  { %v5455_v0 = vpop.permute.xlu0 %5454  ;;  %v2938_v17 = vrot.slane %v2936_v18, 4  ;;  %v2960_v30 = vshrl.u32 %v7349_v60, 16  ;;  %v2966_v22 = vshll.u32 %v7350_v9, 16  ;;  %v2952_v53 = vrot.slane %v2950_v15, 5  ;;  %v7729_v51 = vld [vmem:[%s12435_s0 + $0x108] sm:$0xf] }
 0x197   :  { %v4014_v28 = vpop.permute.xlu1 %4013  ;;  %v5884_v55 = vsel %vm8750_vm5, %v5882_v42, %v5883_v27  ;;  %5543 = vst.msk [vmem:[#allocation2 + $0x40] sm:$0xff] %vm5534_vm13, %v5455_v0  ;;  %v2958_v61 = vrot.slane %v2956_v23, 5  ;;  %v7533_v27 = vrot.slane %v7473_v13, 9  ;;  %v3806_v42 = vrot.slane %v7475_v54, 5  ;;  %v7730_v58 = vld [vmem:[%s12435_s0 + $0x10c] sm:$0xf] }
 0x198   :  { %4101 = vst.msk [vmem:[#allocation2 + $0x48] sm:$0xff] %vm4091_vm11, %v4014_v28  ;;  %v7948_v1 = vcombine.low %v5881_v36, %v5884_v55  ;;  %6111 = vrot.lane.b32.xlu0 %v7947_v40, %s8250_s13  ;;  %v2939_v12 = vor.u32 %v2938_v17, %v2934_v19  ;;  %v2949_v28 = vrot.slane %v2947_v11, 4  ;;  %v2962_v35 = vrot.slane %v2960_v30, 4  ;;  %v7731_v6 = vld [vmem:[%s12435_s0 + $0x110] sm:$0x1] }
 0x199   :  { %4383 = vrot.lane.b32.xlu1 %v8190_v14, %s8248_s25  ;;  %v2928_v14 = vrot.slane %v2926_v3, 5  ;;  %v2968_v36 = vrot.slane %v2966_v22, 5  ;;  %v3803_v40 = vrot.slane %v7474_v39, 5  ;;  %v7534_v44 = vrot.slane %v7476_v21, 9  ;;  %v7858_v11 = vld [vmem:[%s12435_s0 + $0x10c] sm:$0xf] }
 0x19a   :  { %v6096_v20 = vpop.permute.xlu0 %6095  ;;  %v2940_v33 = vrot.slane %v2939_v12, 4  ;;  %v2953_v38 = vor.u32 %v2952_v53, %v2949_v28  ;;  %v2963_v49 = vor.u32 %v2962_v35, %v2958_v61  ;;  %v3810_v50 = vrot.slane %v7477_v34, 5  ;;  %v7859_v22 = vld [vmem:[%s12435_s0 + $0x110] sm:$0x1]  ;;  %v10777_v35 = vld [vmem:[%s12435_s0 + $0x11c] sm:$0x1] }
 0x19b   :  { %v4368_v52 = vpop.permute.xlu1 %4367  ;;  %6184 = vst.msk [vmem:[#allocation2 + $0x40] sm:$0xff] %vm6175_vm14, %v6096_v20  ;;  %v2929_v45 = vor.u32 %v2928_v14, %v2925_v29  ;;  %v10716_v56 = vsel %vm8750_vm5, %v7533_v27, %v3803_v40  ;;  %v3805_v57 = vrot.slane %v3803_v40, 4  ;;  %v3813_v4 = vrot.slane %v7478_v43, 5  ;;  %v7734_v14 = vld [vmem:[%s12435_s0 + $0x11c] sm:$0x1] }
 0x19c   :  { %4455 = vst.msk [vmem:[#allocation2 + $0x48] sm:$0xff] %vm4445_vm12, %v4368_v52  ;;  %1947 = vrot.lane.b32.xlu0 %v7181_v25, %s8244_s16  ;;  %v2945_v48 = vsel %vm8295_vm2, %v2940_v33, %v2944_v63  ;;  %v2954_v55 = vrot.slane %v2953_v38, 4  ;;  %v2964_v60 = vrot.slane %v2963_v49, 4  ;;  %v10724_v0 = vsel %vm8750_vm5, %v7534_v44, %v3810_v50  ;;  %v7732_v25 = vld [vmem:[%s12435_s0 + $0x114] sm:$0xf]  ;;  %v8193_v44 = vld [vmem:[%s12435_s0 + $0x108] sm:$0xff]  }
 0x19d   :  { %5472 = vrot.lane.b32.xlu1 %v7788_v47, %s8249_s23  ;;  %v2930_v32 = vrot.slane %v2929_v45, 4  ;;  %v3807_v3 = vsel %vm8750_vm5, %v3805_v57, %v3806_v42  ;;  %v5007_v7 = vshrl.u32 %v7729_v51, 16  ;;  %v5010_v18 = vshll.u32 %v7729_v51, 16  ;;  %v7857_v63 = vld [vmem:[%s12435_s0 + $0x108] sm:$0xe] }
 0x19e   :  { %v1932_v37 = vpop.permute.xlu0 %1931  ;;  %v2959_v2 = vsel %vm8295_vm2, %v2954_v55, %v2958_v61  ;;  %v2969_v26 = vsel %vm8295_vm2, %v2964_v60, %v2968_v36  ;;  %v7565_v29 = vcombine.low %v10716_v56, %v3807_v3  ;;  %v5020_v45 = vshrl.u32 %v7730_v58, 16  ;;  %v7860_v27 = vld [vmem:[%s12435_s0 + $0x114] sm:$0xe]  ;;  %v7861_v33 = vld [vmem:[%s12435_s0 + $0x118] sm:$0xf] }
 0x19f   :  { %v5457_v16 = vpop.permute.xlu1 %5456  ;;  %2018 = vst.msk [vmem:[#allocation2 + $0x50] sm:$0xff] %vm2007_vm8, %v1932_v37  ;;  %v2935_v47 = vsel %vm8295_vm2, %v2930_v32, %v2934_v19  ;;  %v7406_v19 = vcombine.low %v2959_v2, %v2969_v26  ;;  %v5009_v13 = vrot.slane %v5007_v7, 4  ;;  %v5012_v20 = vrot.slane %v5010_v18, 5  ;;  %v1456_v42 = vld [vmem:[%s12435_s0 + $0x108] sm:$0xe] }
 0x1a0   :  { %5544 = vst.msk [vmem:[#allocation2 + $0x48] sm:$0xff] %vm5534_vm13, %v5457_v16  ;;  %v7405_v52 = vcombine.low %v2935_v47, %v2945_v48  ;;  %2301 = vrot.lane.b32.xlu0 %v8191_v31, %s8245_s7  ;;  %v5016_v16 = vshll.u32 %v7730_v58, 16  ;;  %v5026_v12 = vshll.u32 %v7731_v6, 16  ;;  %v5031_v30 = vshrl.u32 %v7732_v25, 16  ;;  %v1457_v57 = vld [vmem:[%s12435_s0 + $0x10c] sm:$0xf] }
 0x1a1   :  { %6113 = vrot.lane.b32.xlu1 %v7948_v1, %s8250_s13  ;;  %v3812_v1 = vrot.slane %v3810_v50, 4  ;;  %v5013_v21 = vor.u32 %v5012_v20, %v5009_v13  ;;  %v5034_v28 = vshll.u32 %v7732_v25, 16  ;;  %v5022_v34 = vrot.slane %v5020_v45, 4  ;;  %v8194_v58 = vld [vmem:[%s12435_s0 + $0x114] sm:$0xff]   ;;  %v1458_v2 = vld [vmem:[%s12435_s0 + $0x110] sm:$0x1] }
 0x1a2   :  { %v2286_v8 = vpop.permute.xlu0 %2285  ;;  %v6216_v9 = vld [vmem:[#allocation2 + $0x40] sm:$0xff]  ;;  %v10759_v39 = vrot.slane %v5016_v16, 5  ;;  %v5033_v31 = vrot.slane %v5031_v30, 4  ;;  %v5050_v32 = vshll.u32 %v7734_v14, 16  ;;  %v7917_v48 = vrot.slane %v7857_v63, 9 }
 0x1a3   :  { %v6098_v62 = vpop.permute.xlu1 %6097  ;;  %2372 = vst.msk [vmem:[#allocation2 + $0x50] sm:$0xff] %vm2361_vm9, %v2286_v8  ;;  %8055 = vmatprep.mubr.msk.bf16.mxu0 %vm6260_vm0, %v6216_v9  ;;  %v3814_v10 = vsel %vm8750_vm5, %v3812_v1, %v3813_v4  ;;  %v5014_v36 = vrot.slane %v5013_v21, 4  ;;  %v5036_v37 = vrot.slane %v5034_v28, 5  ;;  %v5887_v49 = vrot.slane %v7858_v11, 5  ;;  %v1461_v13 = vld [vmem:[%s12435_s0 + $0x11c] sm:$0x1] }
 0x1a4   :  { %6185 = vst.msk [vmem:[#allocation2 + $0x48] sm:$0xff] %vm6175_vm14, %v6098_v62  ;;  %v7566_v17 = vcombine.low %v10724_v0, %v3814_v10  ;;  %3390 = vrot.lane.b32.xlu0 %v7405_v52, %s8246_s21  ;;  %v5028_v62 = vrot.slane %v5026_v12, 5  ;;  %v5052_v47 = vrot.slane %v5050_v32, 5  ;;  %v5890_v56 = vrot.slane %v7859_v22, 5  ;;  %v1460_v10 = vld [vmem:[%s12435_s0 + $0x118] sm:$0xf] }
 0x1a5   :  { %1949 = vrot.lane.b32.xlu1 %v7182_v24, %s8244_s16  ;;  %v7733_v24 = vld [vmem:[%s12435_s0 + $0x118] sm:$0xf]  ;;  %v5019_v51 = vsel %vm8295_vm2, %v5014_v36, %v10759_v39  ;;  %v5037_v52 = vor.u32 %v5036_v37, %v5033_v31  ;;  %v5888_v60 = vsel %vm8750_vm5, %v7917_v48, %v5887_v49  ;;  %v5889_v0 = vrot.slane %v5887_v49, 4  ;;  %v7351_v20 = vld [vmem:[%s12435_s0 + $0x114] sm:$0xf] }
 0x1a6   :  { %v3375_v54 = vpop.permute.xlu0 %3374  ;;  %v5040_v53 = vshll.u32 %v7733_v24, 16  ;;  %v5044_v61 = vshrl.u32 %v7733_v24, 16  ;;  %v7918_v1 = vrot.slane %v7860_v27, 9  ;;  %v5894_v8 = vrot.slane %v7861_v33, 5  ;;  %v7353_v45 = vld [vmem:[%s12435_s0 + $0x11c] sm:$0x1] }
 0x1a7   :  { %v1934_v59 = vpop.permute.xlu1 %1933  ;;  %3461 = vst.msk [vmem:[#allocation2 + $0x50] sm:$0xff] %vm3450_vm10, %v3375_v54  ;;  %v5038_v4 = vrot.slane %v5037_v52, 4  ;;  %v5897_v9 = vrot.slane %v10777_v35, 5  ;;  %v5891_v18 = vsel %vm8750_vm5, %v5889_v0, %v5890_v56  ;;  %v7151_v25 = vrot.slane %v1456_v42, 9  ;;  %v7354_v21 = vld [vmem:[%s12435_s0 + $0x120] sm:$0xf] }
 0x1a8   :  { %2019 = vst.msk [vmem:[#allocation2 + $0x58] sm:$0xff] %vm2007_vm8, %v1934_v59  ;;  %v5042_v38 = vrot.slane %v5040_v53, 5  ;;  %v5046_v40 = vrot.slane %v5044_v61, 4  ;;  %4031 = vrot.lane.b32.xlu0 %v7565_v29, %s8247_s8  ;;  %v1733_v26 = vrot.slane %v1457_v57, 5  ;;  %v1459_v29 = vld [vmem:[%s12435_s0 + $0x114] sm:$0xe]  ;;  %v5895_v11 = vsel %vm8750_vm5, %v7918_v1, %v5894_v8 }
 0x1a9   :  { %2303 = vrot.lane.b32.xlu1 %v8192_v46, %s8245_s7  ;;  %v5023_v46 = vor.u32 %v5022_v34, %v10759_v39  ;;  %v7352_v39 = vld [vmem:[%s12435_s0 + $0x118] sm:$0xf]  ;;  %v1736_v30 = vrot.slane %v1458_v2, 5  ;;  %v7152_v22 = vrot.slane %v1459_v29, 9  ;;  %v1740_v54 = vrot.slane %v1460_v10, 5 }
 0x1aa   :  { %v4016_v50 = vpop.permute.xlu0 %4015  ;;  %v5047_v55 = vor.u32 %v5046_v40, %v5042_v38  ;;  %v5043_v14 = vsel %vm8295_vm2, %v5038_v4, %v5042_v38  ;;  %v1735_v12 = vrot.slane %v1733_v26, 4  ;;  %v1743_v61 = vrot.slane %v1461_v13, 5  ;;  %v7356_v36 = vld [vmem:[%s12435_s0 + $0x128] sm:$0x1]  ;;  %v7479_v56 = vld [vmem:[%s12435_s0 + $0x114] sm:$0xe] }
 0x1ab   :  { %v2288_v15 = vpop.permute.xlu1 %2287  ;;  %v6217_v23 = vld [vmem:[#allocation2 + $0x48] sm:$0xff]  ;;  %4102 = vst.msk [vmem:[#allocation2 + $0x50] sm:$0xff] %vm4091_vm11, %v4016_v50  ;;  %v5024_v59 = vrot.slane %v5023_v46, 4  ;;  %v2971_v27 = vshrl.u32 %v7351_v20, 16  ;;  %v2974_v34 = vshll.u32 %v7351_v20, 16  ;;  %v1741_v33 = vsel %vm8750_vm5, %v7152_v22, %v1740_v54 }
 0x1ac   :  { %2373 = vst.msk [vmem:[#allocation2 + $0x58] sm:$0xff] %vm2361_vm9, %v2288_v15  ;;  %8056 = vmatmul.mubr.msk.bf16.gmra.mrb[16].mxu0 %vm6260_vm0, %v6217_v23  ;;  %v5048_v6 = vrot.slane %v5047_v55, 4  ;;  %4385 = vrot.lane.b32.xlu0 %v8193_v44, %s8248_s25  ;;  %v5896_v15 = vrot.slane %v5894_v8, 4  ;;  %v1734_v23 = vsel %vm8750_vm5, %v7151_v25, %v1733_v26  ;;  %v1737_v32 = vsel %vm8750_vm5, %v1735_v12, %v1736_v30  ;;  %v7480_v57 = vld [vmem:[%s12435_s0 + $0x118] sm:$0xf] }
 0x1ad   :  { %3392 = vrot.lane.b32.xlu1 %v7406_v19, %s8246_s21  ;;  %v5029_v7 = vsel %vm8295_vm2, %v5024_v59, %v5028_v62  ;;  %v7355_v62 = vld [vmem:[%s12435_s0 + $0x124] sm:$0xf]  ;;  %v1742_v35 = vrot.slane %v1740_v54, 4  ;;  %v7183_v38 = vcombine.low %v1734_v23, %v1737_v32  ;;  %v2973_v40 = vrot.slane %v2971_v27, 4  ;;  %v7481_v1 = vld [vmem:[%s12435_s0 + $0x11c] sm:$0x1] }
 0x1ae   :  { %v4370_v16 = vpop.permute.xlu0 %4369  ;;  %v7789_v24 = vcombine.low %v5019_v51, %v5029_v7  ;;  %v5053_v19 = vsel %vm8295_vm2, %v5048_v6, %v5052_v47  ;;  %v5898_v53 = vsel %vm8750_vm5, %v5896_v15, %v5897_v9  ;;  %v2976_v42 = vrot.slane %v2974_v34, 5  ;;  %v8195_v7 = vld [vmem:[%s12435_s0 + $0x114] sm:$0xff]   ;;  %v7483_v10 = vld [vmem:[%s12435_s0 + $0x124] sm:$0xf]  ;;  %v7484_v13 = vld [vmem:[%s12435_s0 + $0x128] sm:$0x1] }
 0x1af   :  { %v3377_v43 = vpop.permute.xlu1 %3376  ;;  %4456 = vst.msk [vmem:[#allocation2 + $0x50] sm:$0xff] %vm4445_vm12, %v4370_v16  ;;  %v7790_v63 = vcombine.low %v5043_v14, %v5053_v19  ;;  %v7950_v31 = vcombine.low %v5895_v11, %v5898_v53  ;;  %v1744_v44 = vsel %vm8750_vm5, %v1742_v35, %v1743_v61  ;;  %v2984_v46 = vshrl.u32 %v7352_v39, 16  ;;  %v7735_v20 = vld [vmem:[%s12435_s0 + $0x120] sm:$0xf]  ;;  %v7736_v61 = vld [vmem:[%s12435_s0 + $0x124] sm:$0xf] }
 0x1b0   :  { %3462 = vst.msk [vmem:[#allocation2 + $0x58] sm:$0xff] %vm3450_vm10, %v3377_v43  ;;  %5474 = vrot.lane.b32.xlu0 %v7789_v24, %s8249_s23  ;;  %v2980_v43 = vshll.u32 %v7352_v39, 16  ;;  %v2990_v47 = vshll.u32 %v7353_v45, 16  ;;  %v2995_v48 = vshrl.u32 %v7354_v21, 16  ;;  %v7184_v50 = vcombine.low %v1741_v33, %v1744_v44  ;;  %v8196_v45 = vld [vmem:[%s12435_s0 + $0x120] sm:$0xff]  }
 0x1b1   :  { %4033 = vrot.lane.b32.xlu1 %v7566_v17, %s8247_s8  ;;  %v7949_v17 = vcombine.low %v5888_v60, %v5891_v18  ;;  %v2977_v51 = vor.u32 %v2976_v42, %v2973_v40  ;;  %v2998_v55 = vshll.u32 %v7354_v21, 16  ;;  %v3004_v0 = vshll.u32 %v7355_v62, 16  ;;  %v7737_v27 = vld [vmem:[%s12435_s0 + $0x128] sm:$0x1] }
 0x1b2   :  { %v5459_v37 = vpop.permute.xlu0 %5458  ;;  %v2982_v52 = vrot.slane %v2980_v43, 5  ;;  %v2992_v59 = vrot.slane %v2990_v47, 5  ;;  %v2997_v60 = vrot.slane %v2995_v48, 4  ;;  %v3008_v9 = vshrl.u32 %v7355_v62, 16  ;;  %v7739_v43 = vld [vmem:[%s12435_s0 + $0x130] sm:$0xf] }
 0x1b3   :  { %v4018_v3 = vpop.permute.xlu1 %4017  ;;  %5545 = vst.msk [vmem:[#allocation2 + $0x50] sm:$0xff] %vm5534_vm13, %v5459_v37  ;;  %v2978_v6 = vrot.slane %v2977_v51, 4  ;;  %v3000_v8 = vrot.slane %v2998_v55, 5  ;;  %v3014_v2 = vshll.u32 %v7356_v36, 16  ;;  %v3006_v25 = vrot.slane %v3004_v0, 5 }
 0x1b4   :  { %4103 = vst.msk [vmem:[#allocation2 + $0x58] sm:$0xff] %vm4091_vm11, %v4018_v3  ;;  %6115 = vrot.lane.b32.xlu0 %v7949_v17, %s8250_s13  ;;  %v7482_v3 = vld [vmem:[%s12435_s0 + $0x120] sm:$0xe]  ;;  %v7535_v26 = vrot.slane %v7479_v56, 9  ;;  %v3817_v29 = vrot.slane %v7480_v57, 5  ;;  %v3010_v19 = vrot.slane %v3008_v9, 4 }
 0x1b5   :  { %4387 = vrot.lane.b32.xlu1 %v8194_v58, %s8248_s25  ;;  %v2986_v58 = vrot.slane %v2984_v46, 4  ;;  %v2983_v24 = vsel %vm8295_vm2, %v2978_v6, %v2982_v52  ;;  %v3001_v14 = vor.u32 %v3000_v8, %v2997_v60  ;;  %v3016_v17 = vrot.slane %v3014_v2, 5  ;;  %v7738_v36 = vld [vmem:[%s12435_s0 + $0x12c] sm:$0xf]  ;;  %v7740_v51 = vld [vmem:[%s12435_s0 + $0x134] sm:$0x1] }
 0x1b6   :  { %v6100_v4 = vpop.permute.xlu0 %6099  ;;  %v10894_v11 = vsel %vm8750_vm5, %v7535_v26, %v3817_v29  ;;  %v3819_v15 = vrot.slane %v3817_v29, 4  ;;  %v3820_v23 = vrot.slane %v7481_v1, 5  ;;  %v3011_v30 = vor.u32 %v3010_v19, %v3006_v25  ;;  %v7865_v9 = vld [vmem:[%s12435_s0 + $0x128] sm:$0x1]  ;;  %v7867_v26 = vld [vmem:[%s12435_s0 + $0x130] sm:$0xf] }
 0x1b7   :  { %v4372_v28 = vpop.permute.xlu1 %4371  ;;  %6186 = vst.msk [vmem:[#allocation2 + $0x50] sm:$0xff] %vm6175_vm14, %v6100_v4  ;;  %v2987_v18 = vor.u32 %v2986_v58, %v2982_v52  ;;  %v3002_v12 = vrot.slane %v3001_v14, 4  ;;  %v7536_v22 = vrot.slane %v7482_v3, 9  ;;  %v3824_v54 = vrot.slane %v7483_v10, 5  ;;  %v7863_v58 = vld [vmem:[%s12435_s0 + $0x120] sm:$0xe] }
 0x1b8   :  { %4457 = vst.msk [vmem:[#allocation2 + $0x58] sm:$0xff] %vm4445_vm12, %v4372_v28  ;;  %1951 = vrot.lane.b32.xlu0 %v7183_v38, %s8244_s16  ;;  %v10905_v28 = vsel %vm8750_vm5, %v3819_v15, %v3820_v23  ;;  %v3827_v53 = vrot.slane %v7484_v13, 5  ;;  %v5055_v34 = vshrl.u32 %v7735_v20, 16  ;;  %v3012_v33 = vrot.slane %v3011_v30, 4  ;;  %v8197_v10 = vld [vmem:[%s12435_s0 + $0x120] sm:$0xff]   ;;  %v8198_v30 = vld [vmem:[%s12435_s0 + $0x12c] sm:$0xff]  }
 0x1b9   :  { %5476 = vrot.lane.b32.xlu1 %v7790_v63, %s8249_s23  ;;  %v2988_v63 = vrot.slane %v2987_v18, 4  ;;  %v3007_v32 = vsel %vm8295_vm2, %v3002_v12, %v3006_v25  ;;  %v7567_v35 = vcombine.low %v10894_v11, %v10905_v28  ;;  %v10924_v37 = vsel %vm8750_vm5, %v7536_v22, %v3824_v54  ;;  %v7866_v25 = vld [vmem:[%s12435_s0 + $0x12c] sm:$0xe] }
 0x1ba   :  { %v1936_v39 = vpop.permute.xlu0 %1935  ;;  %v3826_v38 = vrot.slane %v3824_v54, 4  ;;  %v5057_v40 = vrot.slane %v5055_v34, 4  ;;  %v5058_v42 = vshll.u32 %v7735_v20, 16  ;;  %v3017_v47 = vsel %vm8295_vm2, %v3012_v33, %v3016_v17  ;;  %v7868_v17 = vld [vmem:[%s12435_s0 + $0x134] sm:$0x1] }
 0x1bb   :  { %v5461_v49 = vpop.permute.xlu1 %5460  ;;  %2020 = vst.msk [vmem:[#allocation2 + $0x60] sm:$0xff] %vm2007_vm8, %v1936_v39  ;;  %v2993_v21 = vsel %vm8295_vm2, %v2988_v63, %v2992_v59  ;;  %v5064_v48 = vshll.u32 %v7736_v61, 16  ;;  %v7408_v52 = vcombine.low %v3007_v32, %v3017_v47  ;;  %v5079_v57 = vshrl.u32 %v7738_v36, 16  ;;  %v7864_v59 = vld [vmem:[%s12435_s0 + $0x124] sm:$0xf] }
 0x1bc   :  { %5546 = vst.msk [vmem:[#allocation2 + $0x58] sm:$0xff] %vm5534_vm13, %v5461_v49  ;;  %2305 = vrot.lane.b32.xlu0 %v8195_v7, %s8245_s7  ;;  %v5068_v49 = vshrl.u32 %v7736_v61, 16  ;;  %v3828_v55 = vsel %vm8750_vm5, %v3826_v38, %v3827_v53  ;;  %v5060_v56 = vrot.slane %v5058_v42, 5  ;;  %v5082_v7 = vshll.u32 %v7738_v36, 16  ;;  %v1462_v53 = vld [vmem:[%s12435_s0 + $0x120] sm:$0xe] }
 0x1bd   :  { %6117 = vrot.lane.b32.xlu1 %v7950_v31, %s8250_s13  ;;  %v7407_v31 = vcombine.low %v2983_v24, %v2993_v21  ;;  %v7568_v1 = vcombine.low %v10924_v37, %v3828_v55  ;;  %v5066_v4 = vrot.slane %v5064_v48, 5  ;;  %v5081_v3 = vrot.slane %v5079_v57, 4  ;;  %v1463_v32 = vld [vmem:[%s12435_s0 + $0x124] sm:$0xf]  ;;  %v1464_v33 = vld [vmem:[%s12435_s0 + $0x128] sm:$0x1] }
 0x1be   :  { %v2290_v44 = vpop.permute.xlu0 %2289  ;;  %v6218_v46 = vld [vmem:[#allocation2 + $0x50] sm:$0xff]  ;;  %v5070_v6 = vrot.slane %v5068_v49, 4  ;;  %v5061_v2 = vor.u32 %v5060_v56, %v5057_v40  ;;  %v5088_v18 = vshll.u32 %v7739_v43, 16  ;;  %v5092_v24 = vshrl.u32 %v7739_v43, 16  ;;  %v1465_v40 = vld [vmem:[%s12435_s0 + $0x12c] sm:$0xe] }
 0x1bf   :  { %v6102_v16 = vpop.permute.xlu1 %6101  ;;  %2374 = vst.msk [vmem:[#allocation2 + $0x60] sm:$0xff] %vm2361_vm9, %v2290_v44  ;;  %8059 = vmatprep.mubr.msk.bf16.mxu0 %vm6260_vm0, %v6218_v46  ;;  %v5098_v14 = vshll.u32 %v7740_v51, 16  ;;  %v7919_v19 = vrot.slane %v7863_v58, 9  ;;  %v5084_v20 = vrot.slane %v5082_v7, 5  ;;  %v5901_v11 = vrot.slane %v7864_v59, 5 }
 0x1c0   :  { %6187 = vst.msk [vmem:[#allocation2 + $0x58] sm:$0xff] %vm6175_vm14, %v6102_v16  ;;  %3394 = vrot.lane.b32.xlu0 %v7407_v31, %s8246_s21  ;;  %v5071_v16 = vor.u32 %v5070_v6, %v5066_v4  ;;  %v5062_v13 = vrot.slane %v5061_v2, 4  ;;  %v5090_v63 = vrot.slane %v5088_v18, 5  ;;  %v5094_v39 = vrot.slane %v5092_v24, 4  ;;  %v1466_v42 = vld [vmem:[%s12435_s0 + $0x130] sm:$0xf] }
 0x1c1   :  { %1953 = vrot.lane.b32.xlu1 %v7184_v50, %s8244_s16  ;;  %v5074_v50 = vshll.u32 %v7737_v27, 16  ;;  %v5904_v12 = vrot.slane %v7865_v9, 5  ;;  %v5085_v54 = vor.u32 %v5084_v20, %v5081_v3  ;;  %v10975_v21 = vsel %vm8750_vm5, %v7919_v19, %v5901_v11  ;;  %v1467_v49 = vld [vmem:[%s12435_s0 + $0x134] sm:$0x1]  ;;  %v7357_v56 = vld [vmem:[%s12435_s0 + $0x12c] sm:$0xf] }
 0x1c2   :  { %v3379_v29 = vpop.permute.xlu0 %3378  ;;  %v5072_v23 = vrot.slane %v5071_v16, 4  ;;  %v5067_v22 = vsel %vm8295_vm2, %v5062_v13, %v5066_v4  ;;  %v5903_v28 = vrot.slane %v5901_v11, 4  ;;  %v5095_v34 = vor.u32 %v5094_v39, %v5090_v63  ;;  %v7359_v4 = vld [vmem:[%s12435_s0 + $0x134] sm:$0x1]  ;;  %v7360_v3 = vld [vmem:[%s12435_s0 + $0x138] sm:$0xf] }
 0x1c3   :  { %v1938_v62 = vpop.permute.xlu1 %1937  ;;  %v5076_v8 = vrot.slane %v5074_v50, 5  ;;  %3463 = vst.msk [vmem:[#allocation2 + $0x60] sm:$0xff] %vm3450_vm10, %v3379_v29  ;;  %v5908_v31 = vrot.slane %v7867_v26, 5  ;;  %v5086_v36 = vrot.slane %v5085_v54, 4  ;;  %v5911_v38 = vrot.slane %v7868_v17, 5 }
 0x1c4   :  { %2021 = vst.msk [vmem:[#allocation2 + $0x68] sm:$0xff] %vm2007_vm8, %v1938_v62  ;;  %4035 = vrot.lane.b32.xlu0 %v7567_v35, %s8247_s8  ;;  %v7920_v62 = vrot.slane %v7866_v25, 9  ;;  %v5905_v37 = vsel %vm8750_vm5, %v5903_v28, %v5904_v12  ;;  %v5096_v44 = vrot.slane %v5095_v34, 4  ;;  %v7153_v51 = vrot.slane %v1462_v53, 9  ;;  %v7361_v7 = vld [vmem:[%s12435_s0 + $0x13c] sm:$0xf] }
 0x1c5   :  { %2307 = vrot.lane.b32.xlu1 %v8196_v45, %s8245_s7  ;;  %v5100_v45 = vrot.slane %v5098_v14, 5  ;;  %v5077_v27 = vsel %vm8295_vm2, %v5072_v23, %v5076_v8  ;;  %v7951_v46 = vcombine.low %v10975_v21, %v5905_v37  ;;  %v5910_v48 = vrot.slane %v5908_v31, 4 }
 0x1c6   :  { %v4020_v61 = vpop.permute.xlu0 %4019  ;;  %v7791_v35 = vcombine.low %v5067_v22, %v5077_v27  ;;  %v5909_v47 = vsel %vm8750_vm5, %v7920_v62, %v5908_v31  ;;  %v5091_v50 = vsel %vm8295_vm2, %v5086_v36, %v5090_v63  ;;  %v1750_v55 = vrot.slane %v1464_v33, 5  ;;  %v7488_v33 = vld [vmem:[%s12435_s0 + $0x138] sm:$0xe] }
 0x1c7   :  { %v2292_v60 = vpop.permute.xlu1 %2291  ;;  %v6219_v0 = vld [vmem:[#allocation2 + $0x58] sm:$0xff]  ;;  %4104 = vst.msk [vmem:[#allocation2 + $0x60] sm:$0xff] %vm4091_vm11, %v4020_v61  ;;  %v5101_v58 = vsel %vm8295_vm2, %v5096_v44, %v5100_v45  ;;  %v5912_v59 = vsel %vm8750_vm5, %v5910_v48, %v5911_v38  ;;  %v1757_v29 = vrot.slane %v1467_v49, 5  ;;  %v3022_v24 = vshll.u32 %v7357_v56, 16  ;;  %v7486_v61 = vld [vmem:[%s12435_s0 + $0x130] sm:$0xf] }
 0x1c8   :  { %2375 = vst.msk [vmem:[#allocation2 + $0x68] sm:$0xff] %vm2361_vm9, %v2292_v60  ;;  %8060 = vmatmul.mubr.msk.bf16.gmra.mrb[20].mxu0 %vm6260_vm0, %v6219_v0  ;;  %4389 = vrot.lane.b32.xlu0 %v8197_v10, %s8248_s25  ;;  %v7154_v60 = vrot.slane %v1465_v40, 9  ;;  %v1754_v0 = vrot.slane %v1466_v42, 5  ;;  %v7792_v6 = vcombine.low %v5091_v50, %v5101_v58  ;;  %v7952_v8 = vcombine.low %v5909_v47, %v5912_v59  ;;  %v7489_v42 = vld [vmem:[%s12435_s0 + $0x13c] sm:$0xf]  ;;  %v8199_v49 = vld [vmem:[%s12435_s0 + $0x12c] sm:$0xff]  }
 0x1c9   :  { %3396 = vrot.lane.b32.xlu1 %v7408_v52, %s8246_s21  ;;  %v1747_v52 = vrot.slane %v1463_v32, 5  ;;  %v3019_v10 = vshrl.u32 %v7357_v56, 16  ;;  %v3038_v11 = vshll.u32 %v7359_v4, 16  ;;  %v3024_v39 = vrot.slane %v3022_v24, 5  ;;  %v7487_v32 = vld [vmem:[%s12435_s0 + $0x134] sm:$0x1] }
 0x1ca   :  { %v4374_v57 = vpop.permute.xlu0 %4373  ;;  %v1755_v25 = vsel %vm8750_vm5, %v7154_v60, %v1754_v0  ;;  %v1756_v26 = vrot.slane %v1754_v0, 4  ;;  %v3043_v21 = vshrl.u32 %v7360_v3, 16  ;;  %v3046_v28 = vshll.u32 %v7360_v3, 16  ;;  %v7741_v0 = vld [vmem:[%s12435_s0 + $0x138] sm:$0xf] }
 0x1cb   :  { %v3381_v15 = vpop.permute.xlu1 %3380  ;;  %4458 = vst.msk [vmem:[#allocation2 + $0x60] sm:$0xff] %vm4445_vm12, %v4374_v57  ;;  %v1748_v9 = vsel %vm8750_vm5, %v7153_v51, %v1747_v52  ;;  %v1749_v2 = vrot.slane %v1747_v52, 4  ;;  %v3021_v63 = vrot.slane %v3019_v10, 4  ;;  %v3040_v54 = vrot.slane %v3038_v11, 5  ;;  %v8200_v4 = vld [vmem:[%s12435_s0 + $0x138] sm:$0xff]  }
 0x1cc   :  { %3464 = vst.msk [vmem:[#allocation2 + $0x68] sm:$0xff] %vm3450_vm10, %v3381_v15  ;;  %5478 = vrot.lane.b32.xlu0 %v7791_v35, %s8249_s23  ;;  %v1758_v20 = vsel %vm8750_vm5, %v1756_v26, %v1757_v29  ;;  %v7362_v15 = vld [vmem:[%s12435_s0 + $0x140] sm:$0x1]  ;;  %v3052_v53 = vshll.u32 %v7361_v7, 16  ;;  %v3056_v62 = vshrl.u32 %v7361_v7, 16  ;;  %v3045_v36 = vrot.slane %v3043_v21, 4 }
 0x1cd   :  { %4037 = vrot.lane.b32.xlu1 %v7568_v1, %s8247_s8  ;;  %v7358_v1 = vld [vmem:[%s12435_s0 + $0x130] sm:$0xf]  ;;  %v1751_v16 = vsel %vm8750_vm5, %v1749_v2, %v1750_v55  ;;  %v7186_v23 = vcombine.low %v1755_v25, %v1758_v20  ;;  %v3025_v27 = vor.u32 %v3024_v39, %v3021_v63  ;;  %v3062_v31 = vshll.u32 %v7362_v15, 16  ;;  %v7490_v55 = vld [vmem:[%s12435_s0 + $0x140] sm:$0x1] }
 0x1ce   :  { %v3028_v14 = vshll.u32 %v7358_v1, 16  ;;  %v3032_v19 = vshrl.u32 %v7358_v1, 16  ;;  %v5463_v17 = vpop.permute.xlu0 %5462  ;;  %v7185_v13 = vcombine.low %v1748_v9, %v1751_v16  ;;  %v3048_v37 = vrot.slane %v3046_v28, 5  ;;  %v7742_v3 = vld [vmem:[%s12435_s0 + $0x13c] sm:$0xf] }
 0x1cf   :  { %v4022_v43 = vpop.permute.xlu1 %4021  ;;  %5547 = vst.msk [vmem:[#allocation2 + $0x60] sm:$0xff] %vm5534_vm13, %v5463_v17  ;;  %v3054_v38 = vrot.slane %v3052_v53, 5  ;;  %v3064_v47 = vrot.slane %v3062_v31, 5  ;;  %v3831_v51 = vrot.slane %v7486_v61, 5  ;;  %v3834_v52 = vrot.slane %v7487_v32, 5 }
 0x1d0   :  { %4105 = vst.msk [vmem:[#allocation2 + $0x68] sm:$0xff] %vm4091_vm11, %v4022_v43  ;;  %v3030_v45 = vrot.slane %v3028_v14, 5  ;;  %v3034_v12 = vrot.slane %v3032_v19, 4  ;;  %6119 = vrot.lane.b32.xlu0 %v7951_v46, %s8250_s13  ;;  %v3026_v43 = vrot.slane %v3025_v27, 4  ;;  %v3058_v46 = vrot.slane %v3056_v62, 4 }
 0x1d1   :  { %4391 = vrot.lane.b32.xlu1 %v8198_v30, %s8248_s25  ;;  %v7485_v30 = vld [vmem:[%s12435_s0 + $0x12c] sm:$0xe]  ;;  %v3049_v50 = vor.u32 %v3048_v37, %v3045_v36  ;;  %v7538_v56 = vrot.slane %v7488_v33, 9  ;;  %v3838_v60 = vrot.slane %v7489_v42, 5  ;;  %v3833_v2 = vrot.slane %v3831_v51, 4 }
 0x1d2   :  { %v3035_v34 = vor.u32 %v3034_v12, %v3030_v45  ;;  %v6104_v35 = vpop.permute.xlu0 %6103  ;;  %v7537_v40 = vrot.slane %v7485_v30, 9  ;;  %v3031_v57 = vsel %vm8295_vm2, %v3026_v43, %v3030_v45  ;;  %v3059_v59 = vor.u32 %v3058_v46, %v3054_v38  ;;  %v7743_v24 = vld [vmem:[%s12435_s0 + $0x140] sm:$0x1]  ;;  %v7744_v17 = vld [vmem:[%s12435_s0 + $0x144] sm:$0xf] }
 0x1d3   :  { %v4376_v18 = vpop.permute.xlu1 %4375  ;;  %6188 = vst.msk [vmem:[#allocation2 + $0x60] sm:$0xff] %vm6175_vm14, %v6104_v35  ;;  %v3840_v25 = vrot.slane %v3838_v60, 4  ;;  %v3841_v26 = vrot.slane %v7490_v55, 5  ;;  %v3835_v16 = vsel %vm8750_vm5, %v3833_v2, %v3834_v52  ;;  %v5103_v14 = vshrl.u32 %v7741_v0, 16  ;;  %v7745_v15 = vld [vmem:[%s12435_s0 + $0x148] sm:$0xf] }
 0x1d4   :  { %4459 = vst.msk [vmem:[#allocation2 + $0x68] sm:$0xff] %vm4445_vm12, %v4376_v18  ;;  %v3036_v44 = vrot.slane %v3035_v34, 4  ;;  %1955 = vrot.lane.b32.xlu0 %v7185_v13, %s8244_s16  ;;  %v11084_v9 = vsel %vm8750_vm5, %v7537_v40, %v3831_v51  ;;  %v3060_v7 = vrot.slane %v3059_v59, 4  ;;  %v11092_v18 = vsel %vm8750_vm5, %v7538_v56, %v3838_v60  ;;  %v7869_v21 = vld [vmem:[%s12435_s0 + $0x138] sm:$0xe]  ;;  %v8202_v2 = vld [vmem:[%s12435_s0 + $0x144] sm:$0xff]  }
 0x1d5   :  { %5480 = vrot.lane.b32.xlu1 %v7792_v6, %s8249_s23  ;;  %v5106_v19 = vshll.u32 %v7741_v0, 16  ;;  %v7569_v20 = vcombine.low %v11084_v9, %v3835_v16  ;;  %v3842_v63 = vsel %vm8750_vm5, %v3840_v25, %v3841_v26  ;;  %v5112_v11 = vshll.u32 %v7742_v3, 16  ;;  %v7870_v28 = vld [vmem:[%s12435_s0 + $0x13c] sm:$0xf]  ;;  %v7871_v62 = vld [vmem:[%s12435_s0 + $0x140] sm:$0x1] }
 0x1d6   :  { %v3041_v58 = vsel %vm8295_vm2, %v3036_v44, %v3040_v54  ;;  %v1940_v1 = vpop.permute.xlu0 %1939  ;;  %v3065_v13 = vsel %vm8295_vm2, %v3060_v7, %v3064_v47  ;;  %v7570_v30 = vcombine.low %v11092_v18, %v3842_v63  ;;  %v5116_v61 = vshrl.u32 %v7742_v3, 16  ;;  %v7873_v46 = vld [vmem:[%s12435_s0 + $0x148] sm:$0xf]  ;;  %v8201_v60 = vld [vmem:[%s12435_s0 + $0x138] sm:$0xff]   ;;  %v1471_v63 = vld [vmem:[%s12435_s0 + $0x144] sm:$0xe] }
 0x1d7   :  { %v5465_v22 = vpop.permute.xlu1 %5464  ;;  %v7409_v6 = vcombine.low %v3031_v57, %v3041_v58  ;;  %2022 = vst.msk [vmem:[#allocation2 + $0x70] sm:$0xff] %vm2007_vm8, %v1940_v1  ;;  %v5108_v54 = vrot.slane %v5106_v19, 5  ;;  %v11127_v53 = vrot.slane %v5112_v11, 5  ;;  %v5122_v27 = vshll.u32 %v7743_v24, 16  ;;  %v7874_v58 = vld [vmem:[%s12435_s0 + $0x14c] sm:$0x1] }
 0x1d8   :  { %5548 = vst.msk [vmem:[#allocation2 + $0x68] sm:$0xff] %vm5534_vm13, %v5465_v22  ;;  %2309 = vrot.lane.b32.xlu0 %v8199_v49, %s8245_s7  ;;  %v5105_v22 = vrot.slane %v5103_v14, 4  ;;  %v5127_v34 = vshrl.u32 %v7744_v17, 16  ;;  %v5130_v35 = vshll.u32 %v7744_v17, 16  ;;  %v5136_v36 = vshll.u32 %v7745_v15, 16 }
 0x1d9   :  { %6121 = vrot.lane.b32.xlu1 %v7952_v8, %s8250_s13  ;;  %v3050_v8 = vrot.slane %v3049_v50, 4  ;;  %v5140_v37 = vshrl.u32 %v7745_v15, 16  ;;  %v5118_v40 = vrot.slane %v5116_v61, 4  ;;  %v5124_v42 = vrot.slane %v5122_v27, 5  ;;  %v1469_v9 = vld [vmem:[%s12435_s0 + $0x13c] sm:$0xf] }
 0x1da   :  { %v2294_v39 = vpop.permute.xlu0 %2293  ;;  %v6220_v45 = vld [vmem:[#allocation2 + $0x60] sm:$0xff]  ;;  %v5109_v33 = vor.u32 %v5108_v54, %v5105_v22  ;;  %v5129_v43 = vrot.slane %v5127_v34, 4  ;;  %v5132_v49 = vrot.slane %v5130_v35, 5  ;;  %v5138_v50 = vrot.slane %v5136_v36, 5  ;;  %v1472_v11 = vld [vmem:[%s12435_s0 + $0x148] sm:$0xf] }
 0x1db   :  { %v6106_v48 = vpop.permute.xlu1 %6105  ;;  %v3055_v10 = vsel %vm8295_vm2, %v3050_v8, %v3054_v38  ;;  %2376 = vst.msk [vmem:[#allocation2 + $0x70] sm:$0xff] %vm2361_vm9, %v2294_v39  ;;  %8063 = vmatprep.mubr.msk.bf16.mxu0 %vm6260_vm0, %v6220_v45  ;;  %v7872_v38 = vld [vmem:[%s12435_s0 + $0x144] sm:$0xe]  ;;  %v5142_v51 = vrot.slane %v5140_v37, 4  ;;  %v5119_v52 = vor.u32 %v5118_v40, %v11127_v53  ;;  %v7921_v56 = vrot.slane %v7869_v21, 9 }
 0x1dc   :  { %6189 = vst.msk [vmem:[#allocation2 + $0x68] sm:$0xff] %vm6175_vm14, %v6106_v48  ;;  %v7410_v12 = vcombine.low %v3055_v10, %v3065_v13  ;;  %3398 = vrot.lane.b32.xlu0 %v7409_v6, %s8246_s21  ;;  %v5110_v48 = vrot.slane %v5109_v33, 4  ;;  %v5915_v57 = vrot.slane %v7870_v28, 5  ;;  %v5133_v1 = vor.u32 %v5132_v49, %v5129_v43  ;;  %v1468_v8 = vld [vmem:[%s12435_s0 + $0x138] sm:$0xe] }
 0x1dd   :  { %1957 = vrot.lane.b32.xlu1 %v7186_v23, %s8244_s16  ;;  %v7746_v23 = vld [vmem:[%s12435_s0 + $0x14c] sm:$0x1]  ;;  %v5918_v6 = vrot.slane %v7871_v62, 5  ;;  %v5120_v3 = vrot.slane %v5119_v52, 4  ;;  %v7922_v25 = vrot.slane %v7872_v38, 9  ;;  %v5922_v16 = vrot.slane %v7873_v46, 5 }
 0x1de   :  { %v5146_v44 = vshll.u32 %v7746_v23, 16  ;;  %v3383_v47 = vpop.permute.xlu0 %3382  ;;  %v5115_v0 = vsel %vm8295_vm2, %v5110_v48, %v11127_v53  ;;  %v11166_v7 = vsel %vm8750_vm5, %v7921_v56, %v5915_v57  ;;  %v5917_v18 = vrot.slane %v5915_v57, 4  ;;  %v1470_v14 = vld [vmem:[%s12435_s0 + $0x140] sm:$0x1]  ;;  %v7363_v22 = vld [vmem:[%s12435_s0 + $0x144] sm:$0xf] }
 0x1df   :  { %v1942_v29 = vpop.permute.xlu1 %1941  ;;  %3465 = vst.msk [vmem:[#allocation2 + $0x70] sm:$0xff] %vm3450_vm10, %v3383_v47  ;;  %v5925_v24 = vrot.slane %v7874_v58, 5  ;;  %v5125_v19 = vsel %vm8295_vm2, %v5120_v3, %v5124_v42  ;;  %v7155_v13 = vrot.slane %v1468_v8, 9  ;;  %v7364_v54 = vld [vmem:[%s12435_s0 + $0x148] sm:$0xf]  ;;  %v5923_v28 = vsel %vm8750_vm5, %v7922_v25, %v5922_v16 }
 0x1e0   :  { %2023 = vst.msk [vmem:[#allocation2 + $0x78] sm:$0xff] %vm2007_vm8, %v1942_v29  ;;  %v5148_v55 = vrot.slane %v5146_v44, 5  ;;  %4039 = vrot.lane.b32.xlu0 %v7569_v20, %s8247_s8  ;;  %v5134_v29 = vrot.slane %v5133_v1, 4  ;;  %v5919_v17 = vsel %vm8750_vm5, %v5917_v18, %v5918_v6  ;;  %v1761_v20 = vrot.slane %v1469_v9, 5  ;;  %v7365_v27 = vld [vmem:[%s12435_s0 + $0x14c] sm:$0x1] }
 0x1e1   :  { %2311 = vrot.lane.b32.xlu1 %v8200_v4, %s8245_s7  ;;  %v5143_v4 = vor.u32 %v5142_v51, %v5138_v50  ;;  %v7793_v23 = vcombine.low %v5115_v0, %v5125_v19  ;;  %v5924_v53 = vrot.slane %v5922_v16, 4  ;;  %v7366_v34 = vld [vmem:[%s12435_s0 + $0x150] sm:$0xf]  ;;  %v7156_v33 = vrot.slane %v1471_v63, 9  ;;  %v7367_v52 = vld [vmem:[%s12435_s0 + $0x154] sm:$0xf] }
 0x1e2   :  { %v4024_v26 = vpop.permute.xlu0 %4023  ;;  %v5139_v39 = vsel %vm8295_vm2, %v5134_v29, %v5138_v50  ;;  %v11203_v61 = vsel %vm8750_vm5, %v7155_v13, %v1761_v20  ;;  %v1768_v35 = vrot.slane %v1472_v11, 5  ;;  %v3067_v38 = vshrl.u32 %v7363_v22, 16  ;;  %v7491_v8 = vld [vmem:[%s12435_s0 + $0x144] sm:$0xe]  ;;  %v7492_v9 = vld [vmem:[%s12435_s0 + $0x148] sm:$0xf] }
 0x1e3   :  { %v2296_v31 = vpop.permute.xlu1 %2295  ;;  %v6221_v32 = vld [vmem:[#allocation2 + $0x68] sm:$0xff]  ;;  %v5144_v10 = vrot.slane %v5143_v4, 4  ;;  %4106 = vst.msk [vmem:[#allocation2 + $0x70] sm:$0xff] %vm4091_vm11, %v4024_v26  ;;  %v5926_v36 = vsel %vm8750_vm5, %v5924_v53, %v5925_v24  ;;  %v3070_v40 = vshll.u32 %v7363_v22, 16  ;;  %v3076_v51 = vshll.u32 %v7364_v54, 16 }
 0x1e4   :  { %2377 = vst.msk [vmem:[#allocation2 + $0x78] sm:$0xff] %vm2361_vm9, %v2296_v31  ;;  %8064 = vmatmul.mubr.msk.bf16.gmra.mrb[24].mxu0 %vm6260_vm0, %v6221_v32  ;;  %4393 = vrot.lane.b32.xlu0 %v8201_v60, %s8248_s25  ;;  %v1763_v31 = vrot.slane %v1761_v20, 4  ;;  %v1764_v32 = vrot.slane %v1470_v14, 5  ;;  %v7954_v43 = vcombine.low %v5923_v28, %v5926_v36  ;;  %v1769_v46 = vsel %vm8750_vm5, %v7156_v33, %v1768_v35  ;;  %v7493_v26 = vld [vmem:[%s12435_s0 + $0x14c] sm:$0x1] }
 0x1e5   :  { %3400 = vrot.lane.b32.xlu1 %v7410_v12, %s8246_s21  ;;  %v5149_v45 = vsel %vm8295_vm2, %v5144_v10, %v5148_v55  ;;  %v7953_v12 = vcombine.low %v11166_v7, %v5919_v17  ;;  %v1770_v47 = vrot.slane %v1768_v35, 4  ;;  %v3069_v49 = vrot.slane %v3067_v38, 4  ;;  %v7494_v14 = vld [vmem:[%s12435_s0 + $0x150] sm:$0xe]  ;;  %v7495_v11 = vld [vmem:[%s12435_s0 + $0x154] sm:$0xf] }
 0x1e6   :  { %v7794_v21 = vcombine.low %v5139_v39, %v5149_v45  ;;  %v4378_v62 = vpop.permute.xlu0 %4377  ;;  %v1765_v44 = vsel %vm8750_vm5, %v1763_v31, %v1764_v32  ;;  %v3072_v50 = vrot.slane %v3070_v40, 5  ;;  %v3080_v57 = vshrl.u32 %v7364_v54, 16  ;;  %v8203_v54 = vld [vmem:[%s12435_s0 + $0x144] sm:$0xff]   ;;  %v7748_v38 = vld [vmem:[%s12435_s0 + $0x154] sm:$0xf] }
 0x1e7   :  { %v3385_v59 = vpop.permute.xlu1 %3384  ;;  %4460 = vst.msk [vmem:[#allocation2 + $0x70] sm:$0xff] %vm4445_vm12, %v4378_v62  ;;  %v7187_v48 = vcombine.low %v11203_v61, %v1765_v44  ;;  %v3086_v58 = vshll.u32 %v7365_v27, 16  ;;  %v3091_v60 = vshrl.u32 %v7366_v34, 16  ;;  %v3078_v4 = vrot.slane %v3076_v51, 5  ;;  %v8204_v27 = vld [vmem:[%s12435_s0 + $0x150] sm:$0xff]  }
 0x1e8   :  { %3466 = vst.msk [vmem:[#allocation2 + $0x78] sm:$0xff] %vm3450_vm10, %v3385_v59  ;;  %5482 = vrot.lane.b32.xlu0 %v7793_v23, %s8249_s23  ;;  %v7368_v59 = vld [vmem:[%s12435_s0 + $0x158] sm:$0x1]  ;;  %v3073_v1 = vor.u32 %v3072_v50, %v3069_v49  ;;  %v3094_v6 = vshll.u32 %v7366_v34, 16  ;;  %v3082_v3 = vrot.slane %v3080_v57, 4  ;;  %v3100_v25 = vshll.u32 %v7367_v52, 16 }
 0x1e9   :  { %4041 = vrot.lane.b32.xlu1 %v7570_v30, %s8247_s8  ;;  %v1473_v30 = vld [vmem:[%s12435_s0 + $0x14c] sm:$0x1]  ;;  %v3088_v7 = vrot.slane %v3086_v58, 5  ;;  %v3093_v18 = vrot.slane %v3091_v60, 4  ;;  %v3104_v16 = vshrl.u32 %v7367_v52, 16  ;;  %v3110_v24 = vshll.u32 %v7368_v59, 16 }
 0x1ea   :  { %v1771_v37 = vrot.slane %v1473_v30, 5  ;;  %v5467_v55 = vpop.permute.xlu0 %5466  ;;  %v3074_v29 = vrot.slane %v3073_v1, 4  ;;  %v3096_v10 = vrot.slane %v3094_v6, 5  ;;  %v3083_v17 = vor.u32 %v3082_v3, %v3078_v4  ;;  %v7747_v30 = vld [vmem:[%s12435_s0 + $0x150] sm:$0xf] }
 0x1eb   :  { %v4026_v15 = vpop.permute.xlu1 %4025  ;;  %5549 = vst.msk [vmem:[#allocation2 + $0x70] sm:$0xff] %vm5534_vm13, %v5467_v55  ;;  %v3102_v13 = vrot.slane %v3100_v25, 5  ;;  %v7539_v20 = vrot.slane %v7491_v8, 9  ;;  %v3845_v63 = vrot.slane %v7492_v9, 5  ;;  %v3106_v39 = vrot.slane %v3104_v16, 4 }
 0x1ec   :  { %4107 = vst.msk [vmem:[#allocation2 + $0x78] sm:$0xff] %vm4091_vm11, %v4026_v15  ;;  %v1772_v56 = vsel %vm8750_vm5, %v1770_v47, %v1771_v37  ;;  %6123 = vrot.lane.b32.xlu0 %v7953_v12, %s8250_s13  ;;  %v3079_v15 = vsel %vm8295_vm2, %v3074_v29, %v3078_v4  ;;  %v3097_v23 = vor.u32 %v3096_v10, %v3093_v18  ;;  %v3112_v45 = vrot.slane %v3110_v24, 5  ;;  %v7496_v12 = vld [vmem:[%s12435_s0 + $0x158] sm:$0x1]  ;;  %v7751_v49 = vld [vmem:[%s12435_s0 + $0x160] sm:$0xf] }
 0x1ed   :  { %4395 = vrot.lane.b32.xlu1 %v8202_v2, %s8248_s25  ;;  %v7188_v0 = vcombine.low %v1769_v46, %v1772_v56  ;;  %v11265_v28 = vsel %vm8750_vm5, %v7539_v20, %v3845_v63  ;;  %v3847_v53 = vrot.slane %v3845_v63, 4  ;;  %v3848_v61 = vrot.slane %v7493_v26, 5  ;;  %v7749_v40 = vld [vmem:[%s12435_s0 + $0x158] sm:$0x1]  ;;  %v7752_v57 = vld [vmem:[%s12435_s0 + $0x164] sm:$0x1] }
 0x1ee   :  { %v6108_v19 = vpop.permute.xlu0 %6107  ;;  %v3098_v34 = vrot.slane %v3097_v23, 4  ;;  %v3107_v62 = vor.u32 %v3106_v39, %v3102_v13  ;;  %v7540_v31 = vrot.slane %v7494_v14, 9  ;;  %v3852_v32 = vrot.slane %v7495_v11, 5  ;;  %v11306_v58 = vld [vmem:[%s12435_s0 + $0x150] sm:$0xe] }
 0x1ef   :  { %v4380_v42 = vpop.permute.xlu1 %4379  ;;  %6190 = vst.msk [vmem:[#allocation2 + $0x70] sm:$0xff] %vm6175_vm14, %v6108_v19  ;;  %v11276_v36 = vsel %vm8750_vm5, %v3847_v53, %v3848_v61  ;;  %v3855_v37 = vrot.slane %v7496_v12, 5  ;;  %v5154_v56 = vshll.u32 %v7747_v30, 16  ;;  %v5160_v60 = vshll.u32 %v7748_v38, 16  ;;  %v11314_v4 = vld [vmem:[%s12435_s0 + $0x154] sm:$0xf] }
 0x1f0   :  { %4461 = vst.msk [vmem:[#allocation2 + $0x78] sm:$0xff] %vm4445_vm12, %v4380_v42  ;;  %1959 = vrot.lane.b32.xlu0 %v7187_v48, %s8244_s16  ;;  %v5151_v42 = vshrl.u32 %v7747_v30, 16  ;;  %v3103_v44 = vsel %vm8295_vm2, %v3098_v34, %v3102_v13  ;;  %v3108_v46 = vrot.slane %v3107_v62, 4  ;;  %v7571_v47 = vcombine.low %v11265_v28, %v11276_v36  ;;  %v7750_v48 = vld [vmem:[%s12435_s0 + $0x15c] sm:$0xf]  ;;  %v8205_v34 = vld [vmem:[%s12435_s0 + $0x150] sm:$0xff]  }
 0x1f1   :  { %5484 = vrot.lane.b32.xlu1 %v7794_v21, %s8249_s23  ;;  %v3084_v21 = vrot.slane %v3083_v17, 4  ;;  %v11298_v51 = vsel %vm8750_vm5, %v7540_v31, %v3852_v32  ;;  %v3854_v52 = vrot.slane %v3852_v32, 4  ;;  %v5170_v1 = vshll.u32 %v7749_v40, 16  ;;  %v7877_v18 = vld [vmem:[%s12435_s0 + $0x158] sm:$0x1]  ;;  %v8206_v62 = vld [vmem:[%s12435_s0 + $0x15c] sm:$0xff]  }
 0x1f2   :  { %v1944_v33 = vpop.permute.xlu0 %1943  ;;  %v5153_v55 = vrot.slane %v5151_v42, 4  ;;  %v3113_v59 = vsel %vm8295_vm2, %v3108_v46, %v3112_v45  ;;  %v5156_v3 = vrot.slane %v5154_v56, 5  ;;  %v5162_v26 = vrot.slane %v5160_v60, 5  ;;  %v7878_v20 = vld [vmem:[%s12435_s0 + $0x15c] sm:$0xe] }
 0x1f3   :  { %v5469_v2 = vpop.permute.xlu1 %5468  ;;  %v3089_v35 = vsel %vm8295_vm2, %v3084_v21, %v3088_v7  ;;  %2024 = vst.msk [vmem:[#allocation2 + $0x80] sm:$0xff] %vm2007_vm8, %v1944_v33  ;;  %v7412_v9 = vcombine.low %v3103_v44, %v3113_v59  ;;  %v5175_v7 = vshrl.u32 %v7750_v48, 16  ;;  %v5172_v10 = vrot.slane %v5170_v1, 5  ;;  %v7879_v63 = vld [vmem:[%s12435_s0 + $0x160] sm:$0xf] }
 0x1f4   :  { %5550 = vst.msk [vmem:[#allocation2 + $0x78] sm:$0xff] %vm5534_vm13, %v5469_v2  ;;  %2313 = vrot.lane.b32.xlu0 %v8203_v54, %s8245_s7  ;;  %v3856_v2 = vsel %vm8750_vm5, %v3854_v52, %v3855_v37  ;;  %v5157_v14 = vor.u32 %v5156_v3, %v5153_v55  ;;  %v5178_v17 = vshll.u32 %v7750_v48, 16  ;;  %v5184_v13 = vshll.u32 %v7751_v49, 16  ;;  %v7880_v61 = vld [vmem:[%s12435_s0 + $0x164] sm:$0x1] }
 0x1f5   :  { %6125 = vrot.lane.b32.xlu1 %v7954_v43, %s8250_s13  ;;  %v7411_v43 = vcombine.low %v3079_v15, %v3089_v35  ;;  %v7572_v25 = vcombine.low %v11298_v51, %v3856_v2  ;;  %v5177_v19 = vrot.slane %v5175_v7, 4  ;;  %v5188_v15 = vshrl.u32 %v7751_v49, 16  ;;  %v1474_v36 = vld [vmem:[%s12435_s0 + $0x150] sm:$0xe]  ;;  %v1476_v44 = vld [vmem:[%s12435_s0 + $0x158] sm:$0x1] }
 0x1f6   :  { %v2298_v6 = vpop.permute.xlu0 %2297  ;;  %v6222_v8 = vld [vmem:[#allocation2 + $0x70] sm:$0xff]  ;;  %v5194_v23 = vshll.u32 %v7752_v57, 16  ;;  %v7923_v39 = vrot.slane %v11306_v58, 9  ;;  %v5158_v12 = vrot.slane %v5157_v14, 4  ;;  %v5180_v30 = vrot.slane %v5178_v17, 5 }
 0x1f7   :  { %v6110_v22 = vpop.permute.xlu1 %6109  ;;  %2378 = vst.msk [vmem:[#allocation2 + $0x80] sm:$0xff] %vm2361_vm9, %v2298_v6  ;;  %8067 = vmatprep.mubr.msk.bf16.mxu0 %vm6260_vm0, %v6222_v8  ;;  %v5929_v54 = vrot.slane %v11314_v4, 5  ;;  %v5190_v28 = vrot.slane %v5188_v15, 4  ;;  %v5932_v53 = vrot.slane %v7877_v18, 5  ;;  %v7924_v40 = vrot.slane %v7878_v20, 9 }
 0x1f8   :  { %6191 = vst.msk [vmem:[#allocation2 + $0x78] sm:$0xff] %vm6175_vm14, %v6110_v22  ;;  %3402 = vrot.lane.b32.xlu0 %v7411_v43, %s8246_s21  ;;  %v5186_v22 = vrot.slane %v5184_v13, 5  ;;  %v5163_v31 = vsel %vm8295_vm2, %v5158_v12, %v5162_v26  ;;  %v5181_v32 = vor.u32 %v5180_v30, %v5177_v19  ;;  %v5196_v33 = vrot.slane %v5194_v23, 5  ;;  %v1475_v43 = vld [vmem:[%s12435_s0 + $0x154] sm:$0xf] }
 0x1f9   :  { %1961 = vrot.lane.b32.xlu1 %v7188_v0, %s8244_s16  ;;  %v5164_v0 = vshrl.u32 %v7748_v38, 16  ;;  %v5931_v35 = vrot.slane %v5929_v54, 4  ;;  %v5936_v42 = vrot.slane %v7879_v63, 5  ;;  %v5930_v49 = vsel %vm8750_vm5, %v7923_v39, %v5929_v54  ;;  %v1477_v51 = vld [vmem:[%s12435_s0 + $0x15c] sm:$0xe] }
 0x1fa   :  { %v3387_v45 = vpop.permute.xlu0 %3386  ;;  %v5191_v38 = vor.u32 %v5190_v28, %v5186_v22  ;;  %v5182_v48 = vrot.slane %v5181_v32, 4  ;;  %v1478_v52 = vld [vmem:[%s12435_s0 + $0x160] sm:$0xf]  ;;  %v1479_v59 = vld [vmem:[%s12435_s0 + $0x164] sm:$0x1]  ;;  %v7157_v1 = vrot.slane %v1474_v36, 9 }
 0x1fb   :  { %v1946_v50 = vpop.permute.xlu1 %1945  ;;  %v5166_v29 = vrot.slane %v5164_v0, 4  ;;  %3467 = vst.msk [vmem:[#allocation2 + $0x80] sm:$0xff] %vm3450_vm10, %v3387_v45  ;;  %v5933_v56 = vsel %vm8750_vm5, %v5931_v35, %v5932_v53  ;;  %v11376_v57 = vsel %vm8750_vm5, %v7924_v40, %v5936_v42  ;;  %v5938_v58 = vrot.slane %v5936_v42, 4  ;;  %v7369_v8 = vld [vmem:[%s12435_s0 + $0x15c] sm:$0xf] }
 0x1fc   :  { %2025 = vst.msk [vmem:[#allocation2 + $0x88] sm:$0xff] %vm2007_vm8, %v1946_v50  ;;  %4043 = vrot.lane.b32.xlu0 %v7571_v47, %s8247_s8  ;;  %v5939_v50 = vrot.slane %v7880_v61, 5  ;;  %v5192_v55 = vrot.slane %v5191_v38, 4  ;;  %v5187_v0 = vsel %vm8295_vm2, %v5182_v48, %v5186_v22  ;;  %v1775_v4 = vrot.slane %v1475_v43, 5  ;;  %v7370_v18 = vld [vmem:[%s12435_s0 + $0x160] sm:$0xf] }
 0x1fd   :  { %2315 = vrot.lane.b32.xlu1 %v8204_v27, %s8245_s7  ;;  %v5167_v11 = vor.u32 %v5166_v29, %v5162_v26  ;;  %v1778_v6 = vrot.slane %v1476_v44, 5  ;;  %v7158_v3 = vrot.slane %v1477_v51, 9  ;;  %v1782_v7 = vrot.slane %v1478_v52, 5  ;;  %v7372_v14 = vld [vmem:[%s12435_s0 + $0x168] sm:$0xf] }
 0x1fe   :  { %v4028_v46 = vpop.permute.xlu0 %4027  ;;  %v5940_v2 = vsel %vm8750_vm5, %v5938_v58, %v5939_v50  ;;  %v7373_v19 = vld [vmem:[%s12435_s0 + $0x16c] sm:$0xf]  ;;  %v1785_v20 = vrot.slane %v1479_v59, 5  ;;  %v3115_v63 = vshrl.u32 %v7369_v8, 16  ;;  %v3118_v23 = vshll.u32 %v7369_v8, 16 }
 0x1ff   :  { %v2300_v16 = vpop.permute.xlu1 %2299  ;;  %v6223_v24 = vld [vmem:[#allocation2 + $0x78] sm:$0xff]  ;;  %v5168_v21 = vrot.slane %v5167_v11, 4  ;;  %4108 = vst.msk [vmem:[#allocation2 + $0x80] sm:$0xff] %vm4091_vm11, %v4028_v46  ;;  %v7956_v17 = vcombine.low %v11376_v57, %v5940_v2  ;;  %v1784_v13 = vrot.slane %v1782_v7, 4  ;;  %v3124_v39 = vshll.u32 %v7370_v18, 16 }
 0x200   :  { %2379 = vst.msk [vmem:[#allocation2 + $0x88] sm:$0xff] %vm2361_vm9, %v2300_v16  ;;  %8068 = vmatmul.mubr.msk.bf16.gmra.mrb[28].mxu0 %vm6260_vm0, %v6223_v24  ;;  %4397 = vrot.lane.b32.xlu0 %v8205_v34, %s8248_s25  ;;  %v1776_v16 = vsel %vm8750_vm5, %v7157_v1, %v1775_v4  ;;  %v1777_v24 = vrot.slane %v1775_v4, 4  ;;  %v3128_v45 = vshrl.u32 %v7370_v18, 16  ;;  %v1783_v30 = vsel %vm8750_vm5, %v7158_v3, %v1782_v7  ;;  %v7497_v35 = vld [vmem:[%s12435_s0 + $0x15c] sm:$0xe]  ;;  %v8208_v18 = vld [vmem:[%s12435_s0 + $0x168] sm:$0xff]  }
 0x201   :  { %3404 = vrot.lane.b32.xlu1 %v7412_v9, %s8246_s21  ;;  %v5173_v37 = vsel %vm8295_vm2, %v5168_v21, %v5172_v10  ;;  %v5197_v9 = vsel %vm8295_vm2, %v5192_v55, %v5196_v33  ;;  %v7955_v10 = vcombine.low %v5930_v49, %v5933_v56  ;;  %v3117_v22 = vrot.slane %v3115_v63, 4  ;;  %v7374_v21 = vld [vmem:[%s12435_s0 + $0x170] sm:$0x1]  ;;  %v7498_v43 = vld [vmem:[%s12435_s0 + $0x160] sm:$0xf] }
 0x202   :  { %v7795_v47 = vcombine.low %v5163_v31, %v5173_v37  ;;  %v4382_v26 = vpop.permute.xlu0 %4381  ;;  %v7796_v29 = vcombine.low %v5187_v0, %v5197_v9  ;;  %v1779_v15 = vsel %vm8750_vm5, %v1777_v24, %v1778_v6  ;;  %v1786_v53 = vsel %vm8750_vm5, %v1784_v13, %v1785_v20  ;;  %v7499_v44 = vld [vmem:[%s12435_s0 + $0x164] sm:$0x1]  ;;  %v7500_v49 = vld [vmem:[%s12435_s0 + $0x168] sm:$0xe]  ;;  %v7501_v57 = vld [vmem:[%s12435_s0 + $0x16c] sm:$0xf] }
 0x203   :  { %v3389_v27 = vpop.permute.xlu1 %3388  ;;  %4462 = vst.msk [vmem:[#allocation2 + $0x80] sm:$0xff] %vm4445_vm12, %v4382_v26  ;;  %v7189_v12 = vcombine.low %v1776_v16, %v1779_v15  ;;  %v3120_v61 = vrot.slane %v3118_v23, 5  ;;  %v3130_v34 = vrot.slane %v3128_v45, 4  ;;  %v3139_v31 = vshrl.u32 %v7372_v14, 16  ;;  %v7502_v1 = vld [vmem:[%s12435_s0 + $0x170] sm:$0x1] }
 0x204   :  { %3468 = vst.msk [vmem:[#allocation2 + $0x88] sm:$0xff] %vm3450_vm10, %v3389_v27  ;;  %5486 = vrot.lane.b32.xlu0 %v7795_v47, %s8249_s23  ;;  %v3126_v27 = vrot.slane %v3124_v39, 5  ;;  %v3142_v32 = vshll.u32 %v7372_v14, 16  ;;  %v3148_v33 = vshll.u32 %v7373_v19, 16  ;;  %v3152_v40 = vshrl.u32 %v7373_v19, 16  ;;  %v8207_v6 = vld [vmem:[%s12435_s0 + $0x15c] sm:$0xff]  }
 0x205   :  { %4045 = vrot.lane.b32.xlu1 %v7572_v25, %s8247_s8  ;;  %v7371_v25 = vld [vmem:[%s12435_s0 + $0x164] sm:$0x1]  ;;  %v3121_v37 = vor.u32 %v3120_v61, %v3117_v22  ;;  %v3158_v42 = vshll.u32 %v7374_v21, 16  ;;  %v3141_v46 = vrot.slane %v3139_v31, 4  ;;  %v7190_v51 = vcombine.low %v1783_v30, %v1786_v53  ;;  %v7753_v7 = vld [vmem:[%s12435_s0 + $0x168] sm:$0xf] }
 0x206   :  { %v3134_v54 = vshll.u32 %v7371_v25, 16  ;;  %v5471_v28 = vpop.permute.xlu0 %5470  ;;  %v3131_v38 = vor.u32 %v3130_v34, %v3126_v27  ;;  %v3144_v47 = vrot.slane %v3142_v32, 5  ;;  %v3150_v48 = vrot.slane %v3148_v33, 5  ;;  %v7754_v13 = vld [vmem:[%s12435_s0 + $0x16c] sm:$0xf] }
 0x207   :  { %v4030_v60 = vpop.permute.xlu1 %4029  ;;  %5551 = vst.msk [vmem:[#allocation2 + $0x80] sm:$0xff] %vm5534_vm13, %v5471_v28  ;;  %v3122_v52 = vrot.slane %v3121_v37, 4  ;;  %v3154_v56 = vrot.slane %v3152_v40, 4  ;;  %v3160_v59 = vrot.slane %v3158_v42, 5  ;;  %v3859_v0 = vrot.slane %v7498_v43, 5 }
 0x208   :  { %4109 = vst.msk [vmem:[#allocation2 + $0x88] sm:$0xff] %vm4091_vm11, %v4030_v60  ;;  %6127 = vrot.lane.b32.xlu0 %v7955_v10, %s8250_s13  ;;  %v3132_v55 = vrot.slane %v3131_v38, 4  ;;  %v3145_v58 = vor.u32 %v3144_v47, %v3141_v46  ;;  %v7541_v60 = vrot.slane %v7497_v35, 9  ;;  %v3862_v3 = vrot.slane %v7499_v44, 5  ;;  %v7756_v39 = vld [vmem:[%s12435_s0 + $0x174] sm:$0xf] }
 0x209   :  { %4399 = vrot.lane.b32.xlu1 %v8206_v62, %s8248_s25  ;;  %v3136_v62 = vrot.slane %v3134_v54, 5  ;;  %v3127_v8 = vsel %vm8295_vm2, %v3122_v52, %v3126_v27  ;;  %v3155_v2 = vor.u32 %v3154_v56, %v3150_v48  ;;  %v3861_v10 = vrot.slane %v3859_v0, 4  ;;  %v7757_v21 = vld [vmem:[%s12435_s0 + $0x178] sm:$0xf]  ;;  %v7758_v28 = vld [vmem:[%s12435_s0 + $0x17c] sm:$0x1] }
 0x20a   :  { %v6112_v50 = vpop.permute.xlu0 %6111  ;;  %v3146_v26 = vrot.slane %v3145_v58, 4  ;;  %vm6650_vm1 = vcmask 523264   ;;  %vm6715_vm3 = vcmask 261120   ;;  %v7542_v14 = vrot.slane %v7500_v49, 9  ;;  %v7882_v31 = vld [vmem:[%s12435_s0 + $0x16c] sm:$0xf] }
 0x20b   :  { %v4384_v11 = vpop.permute.xlu1 %4383  ;;  %6192 = vst.msk [vmem:[#allocation2 + $0x80] sm:$0xff] %vm6175_vm14, %v6112_v50  ;;  %v3137_v9 = vsel %vm8295_vm2, %v3132_v55, %v3136_v62  ;;  %v3156_v24 = vrot.slane %v3155_v2, 4  ;;  %v3866_v19 = vrot.slane %v7501_v57, 5  ;;  %v3863_v63 = vsel %vm8750_vm5, %v3861_v10, %v3862_v3  ;;  %v7881_v62 = vld [vmem:[%s12435_s0 + $0x168] sm:$0xe] }
 0x20c   :  { %4463 = vst.msk [vmem:[#allocation2 + $0x88] sm:$0xff] %vm4445_vm12, %v4384_v11  ;;  %1963 = vrot.lane.b32.xlu0 %v7189_v12, %s8244_s16  ;;  %v7413_v25 = vcombine.low %v3127_v8, %v3137_v9  ;;  %v3151_v20 = vsel %vm8295_vm2, %v3146_v26, %v3150_v48  ;;  %v7755_v11 = vld [vmem:[%s12435_s0 + $0x170] sm:$0x1]  ;;  %v5199_v15 = vshrl.u32 %v7753_v7, 16  ;;  %v5202_v23 = vshll.u32 %v7753_v7, 16 }
 0x20d   :  { %5488 = vrot.lane.b32.xlu1 %v7796_v29, %s8249_s23  ;;  %v11461_v29 = vsel %vm8750_vm5, %v7541_v60, %v3859_v0  ;;  %v3161_v12 = vsel %vm8295_vm2, %v3156_v24, %v3160_v59  ;;  %v11484_v22 = vsel %vm8750_vm5, %v7542_v14, %v3866_v19  ;;  %v3868_v54 = vrot.slane %v3866_v19, 4  ;;  %v7883_v58 = vld [vmem:[%s12435_s0 + $0x170] sm:$0x1]  ;;  %v8210_v19 = vld [vmem:[%s12435_s0 + $0x174] sm:$0xff]  }
 0x20e   :  { %v1948_v16 = vpop.permute.xlu0 %1947  ;;  %v7573_v30 = vcombine.low %v11461_v29, %v3863_v63  ;;  %v7414_v53 = vcombine.low %v3151_v20, %v3161_v12  ;;  %v5201_v61 = vrot.slane %v5199_v15, 4  ;;  %v5204_v27 = vrot.slane %v5202_v23, 5  ;;  %v7884_v20 = vld [vmem:[%s12435_s0 + $0x174] sm:$0xe]  ;;  %v7885_v63 = vld [vmem:[%s12435_s0 + $0x178] sm:$0xf] }
 0x20f   :  { %v5473_v36 = vpop.permute.xlu1 %5472  ;;  %2026 = vst.msk [vmem:[#allocation2 + $0x90] sm:$0xff] %vm2007_vm8, %v1948_v16  ;;  %v5208_v34 = vshll.u32 %v7754_v13, 16  ;;  %v5218_v37 = vshll.u32 %v7755_v11, 16  ;;  %v5223_v38 = vshrl.u32 %v7756_v39, 16  ;;  %v5226_v44 = vshll.u32 %v7756_v39, 16 }
 0x210   :  { %5552 = vst.msk [vmem:[#allocation2 + $0x88] sm:$0xff] %vm5534_vm13, %v5473_v36  ;;  %2317 = vrot.lane.b32.xlu0 %v8207_v6, %s8245_s7  ;;  %v5212_v36 = vshrl.u32 %v7754_v13, 16  ;;  %v5205_v42 = vor.u32 %v5204_v27, %v5201_v61  ;;  %v5236_v56 = vshrl.u32 %v7757_v21, 16  ;;  %v5242_v57 = vshll.u32 %v7758_v28, 16  ;;  %v1481_v27 = vld [vmem:[%s12435_s0 + $0x16c] sm:$0xf] }
 0x211   :  { %6129 = vrot.lane.b32.xlu1 %v7956_v17, %s8250_s13  ;;  %v3869_v17 = vrot.slane %v7502_v1, 5  ;;  %v5210_v43 = vrot.slane %v5208_v34, 5  ;;  %v5220_v49 = vrot.slane %v5218_v37, 5  ;;  %v5225_v50 = vrot.slane %v5223_v38, 4  ;;  %v1484_v37 = vld [vmem:[%s12435_s0 + $0x178] sm:$0xf] }
 0x212   :  { %v2302_v32 = vpop.permute.xlu0 %2301  ;;  %v6224_v33 = vld [vmem:[#allocation2 + $0x80] sm:$0xff]  ;;  %v5214_v48 = vrot.slane %v5212_v36, 4  ;;  %v5206_v52 = vrot.slane %v5205_v42, 4  ;;  %v5228_v55 = vrot.slane %v5226_v44, 5  ;;  %v7925_v1 = vrot.slane %v7881_v62, 9 }
 0x213   :  { %v6114_v4 = vpop.permute.xlu1 %6113  ;;  %v3870_v35 = vsel %vm8750_vm5, %v3868_v54, %v3869_v17  ;;  %2380 = vst.msk [vmem:[#allocation2 + $0x90] sm:$0xff] %vm2361_vm9, %v2302_v32  ;;  %8071 = vmatprep.mubr.msk.bf16.mxu1 %vm6260_vm0, %v6224_v33  ;;  %v5238_v9 = vrot.slane %v5236_v56, 4  ;;  %v11517_v2 = vrot.slane %v5242_v57, 5  ;;  %v5946_v10 = vrot.slane %v7883_v58, 5  ;;  %v1483_v36 = vld [vmem:[%s12435_s0 + $0x174] sm:$0xe] }
 0x214   :  { %6193 = vst.msk [vmem:[#allocation2 + $0x88] sm:$0xff] %vm6175_vm14, %v6114_v4  ;;  %v7574_v40 = vcombine.low %v11484_v22, %v3870_v35  ;;  %3406 = vrot.lane.b32.xlu0 %v7413_v25, %s8246_s21  ;;  %v5215_v60 = vor.u32 %v5214_v48, %v5210_v43  ;;  %v5943_v4 = vrot.slane %v7882_v31, 5  ;;  %v5211_v6 = vsel %vm8295_vm2, %v5206_v52, %v5210_v43  ;;  %v1480_v22 = vld [vmem:[%s12435_s0 + $0x168] sm:$0xe]  ;;  %v1482_v35 = vld [vmem:[%s12435_s0 + $0x170] sm:$0x1] }
 0x215   :  { %1965 = vrot.lane.b32.xlu1 %v7190_v51, %s8244_s16  ;;  %v5232_v51 = vshll.u32 %v7757_v21, 16  ;;  %v5229_v8 = vor.u32 %v5228_v55, %v5225_v50  ;;  %v1485_v44 = vld [vmem:[%s12435_s0 + $0x17c] sm:$0x1]  ;;  %v7926_v48 = vrot.slane %v7884_v20, 9  ;;  %v7159_v56 = vrot.slane %v1480_v22, 9 }
 0x216   :  { %v3391_v59 = vpop.permute.xlu0 %3390  ;;  %v5216_v25 = vrot.slane %v5215_v60, 4  ;;  %v11525_v26 = vsel %vm8750_vm5, %v7925_v1, %v5943_v4  ;;  %v5945_v29 = vrot.slane %v5943_v4, 4  ;;  %v7375_v1 = vld [vmem:[%s12435_s0 + $0x174] sm:$0xf] }
 0x217   :  { %v1950_v45 = vpop.permute.xlu1 %1949  ;;  %v11512_v0 = vrot.slane %v5232_v51, 5  ;;  %3469 = vst.msk [vmem:[#allocation2 + $0x90] sm:$0xff] %vm3450_vm10, %v3391_v59  ;;  %v5230_v17 = vrot.slane %v5229_v8, 4  ;;  %v7160_v8 = vrot.slane %v1483_v36, 9 }
 0x218   :  { %2027 = vst.msk [vmem:[#allocation2 + $0x98] sm:$0xff] %vm2007_vm8, %v1950_v45  ;;  %4047 = vrot.lane.b32.xlu0 %v7573_v30, %s8247_s8  ;;  %v5221_v45 = vsel %vm8295_vm2, %v5216_v25, %v5220_v49  ;;  %v11553_v12 = vsel %vm8750_vm5, %v5945_v29, %v5946_v10  ;;  %v7886_v30 = vld [vmem:[%s12435_s0 + $0x17c] sm:$0x1]  ;;  %v5950_v49 = vrot.slane %v7885_v63, 5 }
 0x219   :  { %2319 = vrot.lane.b32.xlu1 %v8208_v18, %s8245_s7  ;;  %v8209_v18 = vld [vmem:[%s12435_s0 + $0x168] sm:$0xff]   ;;  %v5239_v13 = vor.u32 %v5238_v9, %v11512_v0  ;;  %v7797_v61 = vcombine.low %v5211_v6, %v5221_v45  ;;  %v5235_v33 = vsel %vm8295_vm2, %v5230_v17, %v11512_v0  ;;  %v7957_v43 = vcombine.low %v11525_v26, %v11553_v12  ;;  %v7377_v29 = vld [vmem:[%s12435_s0 + $0x17c] sm:$0x1]  ;;  %v7379_v12 = vld [vmem:[%s12435_s0 + $0x184] sm:$0xf] }
 0x21a   :  { %v4032_v39 = vpop.permute.xlu0 %4031  ;;  %v5953_v50 = vrot.slane %v7886_v30, 5  ;;  %v5951_v59 = vsel %vm8750_vm5, %v7926_v48, %v5950_v49  ;;  %v5952_v60 = vrot.slane %v5950_v49, 4  ;;  %v1789_v0 = vrot.slane %v1481_v27, 5  ;;  %v7380_v30 = vld [vmem:[%s12435_s0 + $0x188] sm:$0x1] }
 0x21b   :  { %v2304_v46 = vpop.permute.xlu1 %2303  ;;  %v6225_v47 = vld [vmem:[#allocation2 + $0x88] sm:$0xff]  ;;  %4110 = vst.msk [vmem:[#allocation2 + $0x90] sm:$0xff] %vm4091_vm11, %v4032_v39  ;;  %v5240_v42 = vrot.slane %v5239_v13, 4  ;;  %v1792_v6 = vrot.slane %v1482_v35, 5  ;;  %v1796_v9 = vrot.slane %v1484_v37, 5  ;;  %v1799_v26 = vrot.slane %v1485_v44, 5 }
 0x21c   :  { %2381 = vst.msk [vmem:[#allocation2 + $0x98] sm:$0xff] %vm2361_vm9, %v2304_v46  ;;  %8072 = vmatmul.mubr.msk.bf16.vlgmr.msra.gmra.mrb[0].mxu1 %vm6260_vm0, %v6225_v47  ;;  %4401 = vrot.lane.b32.xlu0 %v8209_v18, %s8248_s25  ;;  %v1790_v18 = vsel %vm8750_vm5, %v7159_v56, %v1789_v0  ;;  %v1791_v25 = vrot.slane %v1789_v0, 4  ;;  %v3166_v13 = vshll.u32 %v7375_v1, 16  ;;  %v3182_v45 = vshll.u32 %v7377_v29, 16  ;;  %v7503_v27 = vld [vmem:[%s12435_s0 + $0x174] sm:$0xe] }
 0x21d   :  { %3408 = vrot.lane.b32.xlu1 %v7414_v53, %s8246_s21  ;;  %v5245_v55 = vsel %vm8295_vm2, %v5240_v42, %v11517_v2  ;;  %v7376_v2 = vld [vmem:[%s12435_s0 + $0x178] sm:$0xf]  ;;  %v8212_v37 = vld [vmem:[%s12435_s0 + $0x180] sm:$0xff]   ;;  %v3206_v48 = vshll.u32 %v7380_v30, 16  ;;  %v7543_v49 = vrot.slane %v7503_v27, 9 }
 0x21e   :  { %v4386_v47 = vpop.permute.xlu0 %4385  ;;  %v7798_v58 = vcombine.low %v5235_v33, %v5245_v55  ;;  %v1793_v17 = vsel %vm8750_vm5, %v1791_v25, %v1792_v6  ;;  %v3172_v20 = vshll.u32 %v7376_v2, 16  ;;  %v3176_v63 = vshrl.u32 %v7376_v2, 16  ;;  %v7504_v35 = vld [vmem:[%s12435_s0 + $0x178] sm:$0xf]  ;;  %v7506_v44 = vld [vmem:[%s12435_s0 + $0x180] sm:$0xe] }
 0x21f   :  { %v3393_v3 = vpop.permute.xlu1 %3392  ;;  %v8041_v7 = vpop.f32.mrb[0].mxu0  ;;  %4464 = vst.msk [vmem:[#allocation2 + $0x90] sm:$0xff] %vm4445_vm12, %v4386_v47  ;;  %v3200_v47 = vshrl.u32 %v7379_v12, 16  ;;  %v3208_v0 = vrot.slane %v3206_v48, 5  ;;  %v11687_v6 = vld [vmem:[%s12435_s0 + $0x184] sm:$0xf] }
 0x220   :  { %3470 = vst.msk [vmem:[#allocation2 + $0x98] sm:$0xff] %vm3450_vm10, %v3393_v3  ;;  %v6719_v16 = vsel %vm6715_vm3, %v8041_v7, 0.0  ;;  %v6853_v24 = vmul.f32 %v8041_v7, %v8041_v7  ;;  %v6395_v14 = vpop.f32.mrb[1].mxu0  ;;  %5490 = vrot.lane.b32.xlu0 %v7797_v61, %s8249_s23  ;;  %v3178_v61 = vrot.slane %v3176_v63, 4 }
 0x221   :  { %6653 = vst.msk [vmem:[%s12437_s2 + $0x10] sm:$0xff] %vm6650_vm1, %v8041_v7  ;;  %6651 = vst.msk [vmem:[%s12437_s2] sm:$0xff] %vm6650_vm1, %v6395_v14  ;;  %v6716_v11 = vsel %vm6715_vm3, %v6395_v14, 0.0  ;;  %v6851_v15 = vmul.f32 %v6395_v14, %v6395_v14  ;;  %4049 = vrot.lane.b32.xlu1 %v7574_v40, %s8247_s8  ;;  %v8042_v23 = vpop.f32.mrb[2].mxu0  ;;  %v5954_v7 = vsel %vm8750_vm5, %v5952_v60, %v5953_v50  ;;  %v3163_v14 = vshrl.u32 %v7375_v1, 16 }
 0x222   :  { %v6918_v54 = vsel %vm6715_vm3, %v6853_v24, 0.0  ;;  %6654 = vst.msk [vmem:[%s12437_s2 + $0x18] sm:$0xff] %vm6650_vm1, %v8042_v23  ;;  %v11567_v21 = vsel %vm6715_vm3, %v8042_v23, 0.0  ;;  %v6854_v28 = vmul.f32 %v8042_v23, %v8042_v23  ;;  %v6398_v53 = vpop.f32.mrb[3].mxu0  ;;  %v5475_v3 = vpop.permute.xlu0 %5474  ;;  %v7958_v10 = vcombine.low %v5951_v59, %v5954_v7  ;;  %v7507_v50 = vld [vmem:[%s12435_s0 + $0x184] sm:$0xf] }
 0x223   :  { %v6915_v34 = vsel %vm6715_vm3, %v6851_v15, 0.0  ;;  %6652 = vst.msk [vmem:[%s12437_s2 + $0x8] sm:$0xff] %vm6650_vm1, %v6398_v53  ;;  %v6717_v62 = vsel %vm6715_vm3, %v6398_v53, 0.0  ;;  %v6852_v31 = vmul.f32 %v6398_v53, %v6398_v53  ;;  %v4034_v32 = vpop.permute.xlu1 %4033  ;;  %v1798_v24 = vrot.slane %v1796_v9, 4  ;;  %v11681_v59 = vld [vmem:[%s12435_s0 + $0x180] sm:$0xf] }
 0x224   :  { %v11593_v38 = vsel %vm6715_vm3, %v6854_v28, 0.0  ;;  %v6718_v40 = vadd.f32 %v6717_v62, %v6716_v11  ;;  %4111 = vst.msk [vmem:[#allocation2 + $0x98] sm:$0xff] %vm4091_vm11, %v4034_v32  ;;  %6131 = vrot.lane.b32.xlu0 %v7957_v43, %s8250_s13  ;;  %v7378_v11 = vld [vmem:[%s12435_s0 + $0x180] sm:$0xf]  ;;  %v7191_v15 = vcombine.low %v1790_v18, %v1793_v17  ;;  %v3165_v39 = vrot.slane %v3163_v14, 4 }
 0x225   :  { %v6916_v46 = vsel %vm6715_vm3, %v6852_v31, 0.0  ;;  %4403 = vrot.lane.b32.xlu1 %v8210_v19, %s8248_s25  ;;  %5553 = vst.msk [vmem:[#allocation2 + $0x90] sm:$0xff] %vm5534_vm13, %v5475_v3  ;;  %v1800_v23 = vsel %vm8750_vm5, %v1798_v24, %v1799_v26  ;;  %v3168_v28 = vrot.slane %v3166_v13, 5  ;;  %v3174_v53 = vrot.slane %v3172_v20, 5 }
 0x226   :  { %v6720_v51 = vadd.f32 %v6719_v16, %v6718_v40  ;;  %v6917_v52 = vadd.f32 %v6916_v46, %v6915_v34  ;;  %v1797_v16 = vsel %vm8750_vm5, %v7160_v8, %v1796_v9  ;;  %v6116_v22 = vpop.permute.xlu0 %6115  ;;  %v8211_v34 = vld [vmem:[%s12435_s0 + $0x174] sm:$0xff]   ;;  %v3184_v62 = vrot.slane %v3182_v45, 5 }
 0x227   :  { %v4388_v57 = vpop.permute.xlu1 %4387  ;;  %6194 = vst.msk [vmem:[#allocation2 + $0x90] sm:$0xff] %vm6175_vm14, %v6116_v22  ;;  %v3187_v33 = vshrl.u32 %v7378_v11, 16  ;;  %v3169_v40 = vor.u32 %v3168_v28, %v3165_v39  ;;  %v3179_v42 = vor.u32 %v3178_v61, %v3174_v53  ;;  %v3190_v43 = vshll.u32 %v7378_v11, 16 }
 0x228   :  { %v6919_v4 = vadd.f32 %v6918_v54, %v6917_v52  ;;  %4465 = vst.msk [vmem:[#allocation2 + $0x98] sm:$0xff] %vm4445_vm12, %v4388_v57  ;;  %v7192_v54 = vcombine.low %v1797_v16, %v1800_v23  ;;  %v11652_v31 = vadd.f32 %v11567_v21, %v6720_v51  ;;  %1967 = vrot.lane.b32.xlu0 %v7191_v15, %s8244_s16  ;;  %v3196_v21 = vshll.u32 %v7379_v12, 16  ;;  %v7508_v51 = vld [vmem:[%s12435_s0 + $0x188] sm:$0x1] }
 0x229   :  { %5492 = vrot.lane.b32.xlu1 %v7798_v58, %s8249_s23  ;;  %v3189_v46 = vrot.slane %v3187_v33, 4  ;;  %v3170_v55 = vrot.slane %v3169_v40, 4  ;;  %v3180_v56 = vrot.slane %v3179_v42, 4  ;;  %v3192_v57 = vrot.slane %v3190_v43, 5 }
 0x22a   :  { %v11655_v32 = vadd.f32 %v11593_v38, %v6919_v4  ;;  %v7505_v38 = vld [vmem:[%s12435_s0 + $0x17c] sm:$0x1]  ;;  %v1952_v52 = vpop.permute.xlu0 %1951  ;;  %v3198_v58 = vrot.slane %v3196_v21, 5  ;;  %v3202_v60 = vrot.slane %v3200_v47, 4  ;;  %v3873_v1 = vrot.slane %v7504_v35, 5 }
 0x22b   :  { %v5477_v19 = vpop.permute.xlu1 %5476  ;;  %2028 = vst.msk [vmem:[#allocation2 + $0xa0] sm:$0xff] %vm2007_vm8, %v1952_v52  ;;  %v3876_v4 = vrot.slane %v7505_v38, 5  ;;  %v3175_v9 = vsel %vm8295_vm2, %v3170_v55, %v3174_v53  ;;  %v3185_v2 = vsel %vm8295_vm2, %v3180_v56, %v3184_v62  ;;  %v3193_v3 = vor.u32 %v3192_v57, %v3189_v46 }
 0x22c   :  { %5554 = vst.msk [vmem:[#allocation2 + $0x98] sm:$0xff] %vm5534_vm13, %v5477_v19  ;;  %2321 = vrot.lane.b32.xlu0 %v8211_v34, %s8245_s7  ;;  %v7544_v7 = vrot.slane %v7506_v44, 9  ;;  %v7415_v18 = vcombine.low %v3175_v9, %v3185_v2  ;;  %v3203_v25 = vor.u32 %v3202_v60, %v3198_v58  ;;  %v3874_v26 = vsel %vm8750_vm5, %v7543_v49, %v3873_v1  ;;  %v7761_v44 = vld [vmem:[%s12435_s0 + $0x188] sm:$0x1]  ;;  %v7888_v9 = vld [vmem:[%s12435_s0 + $0x184] sm:$0xf] }
 0x22d   :  { %6133 = vrot.lane.b32.xlu1 %v7958_v10, %s8250_s13  ;;  %v3875_v29 = vrot.slane %v3873_v1, 4  ;;  %v3194_v24 = vrot.slane %v3193_v3, 4  ;;  %v3880_v14 = vrot.slane %v7507_v50, 5  ;;  %v3883_v19 = vrot.slane %v7508_v51, 5  ;;  %v8213_v50 = vld [vmem:[%s12435_s0 + $0x180] sm:$0xff]  }
 0x22e   :  { %v2306_v10 = vpop.permute.xlu0 %2305  ;;  %v6226_v16 = vld [vmem:[#allocation2 + $0x90] sm:$0xff]  ;;  %v5247_v17 = vshrl.u32 %v11681_v59, 16  ;;  %v3204_v13 = vrot.slane %v3203_v25, 4  ;;  %v5250_v63 = vshll.u32 %v11681_v59, 16  ;;  %v5256_v11 = vshll.u32 %v11687_v6, 16 }
 0x22f   :  { %v6118_v36 = vpop.permute.xlu1 %6117  ;;  %2382 = vst.msk [vmem:[#allocation2 + $0xa0] sm:$0xff] %vm2361_vm9, %v2306_v10  ;;  %8075 = vmatprep.mubr.msk.bf16.mxu1 %vm6260_vm0, %v6226_v16  ;;  %v3877_v20 = vsel %vm8750_vm5, %v3875_v29, %v3876_v4  ;;  %v3199_v45 = vsel %vm8295_vm2, %v3194_v24, %v3198_v58  ;;  %v3881_v30 = vsel %vm8750_vm5, %v7544_v7, %v3880_v14  ;;  %v3882_v22 = vrot.slane %v3880_v14, 4  ;;  %v7762_v51 = vld [vmem:[%s12435_s0 + $0x18c] sm:$0xf]  ;;  %v7763_v58 = vld [vmem:[%s12435_s0 + $0x190] sm:$0xf] }
 0x230   :  { %6195 = vst.msk [vmem:[#allocation2 + $0x98] sm:$0xff] %vm6175_vm14, %v6118_v36  ;;  %3410 = vrot.lane.b32.xlu0 %v7415_v18, %s8246_s21  ;;  %v7575_v12 = vcombine.low %v3874_v26, %v3877_v20  ;;  %v3209_v61 = vsel %vm8295_vm2, %v3204_v13, %v3208_v0  ;;  %v5249_v27 = vrot.slane %v5247_v17, 4  ;;  %v5252_v57 = vrot.slane %v5250_v63, 5  ;;  %v7764_v59 = vld [vmem:[%s12435_s0 + $0x194] sm:$0x1]  ;;  %v8214_v7 = vld [vmem:[%s12435_s0 + $0x18c] sm:$0xff]  }
 0x231   :  { %1969 = vrot.lane.b32.xlu1 %v7192_v54, %s8244_s16  ;;  %v7416_v33 = vcombine.low %v3199_v45, %v3209_v61  ;;  %v5258_v1 = vrot.slane %v5256_v11, 5  ;;  %v5266_v4 = vshll.u32 %v7761_v44, 16  ;;  %v7889_v25 = vld [vmem:[%s12435_s0 + $0x188] sm:$0x1]  ;;  %v5274_v16 = vshll.u32 %v7762_v51, 16 }
 0x232   :  { %v3395_v36 = vpop.permute.xlu0 %3394  ;;  %v5253_v18 = vor.u32 %v5252_v57, %v5249_v27  ;;  %v5280_v24 = vshll.u32 %v7763_v58, 16  ;;  %v7890_v14 = vld [vmem:[%s12435_s0 + $0x18c] sm:$0xe]  ;;  %v5284_v20 = vshrl.u32 %v7763_v58, 16  ;;  %v7891_v63 = vld [vmem:[%s12435_s0 + $0x190] sm:$0xf] }
 0x233   :  { %v1954_v8 = vpop.permute.xlu1 %1953  ;;  %3471 = vst.msk [vmem:[#allocation2 + $0xa0] sm:$0xff] %vm3450_vm10, %v3395_v36  ;;  %v5268_v10 = vrot.slane %v5266_v4, 5  ;;  %v5290_v45 = vshll.u32 %v7764_v59, 16  ;;  %v1491_v57 = vld [vmem:[%s12435_s0 + $0x194] sm:$0x1] }
 0x234   :  { %2029 = vst.msk [vmem:[#allocation2 + $0xa8] sm:$0xff] %vm2007_vm8, %v1954_v8  ;;  %4051 = vrot.lane.b32.xlu0 %v7575_v12, %s8247_s8  ;;  %v7887_v8 = vld [vmem:[%s12435_s0 + $0x180] sm:$0xe]  ;;  %v5254_v17 = vrot.slane %v5253_v18, 4 }
 0x235   :  { %2323 = vrot.lane.b32.xlu1 %v8212_v37, %s8245_s7  ;;  %v3884_v37 = vsel %vm8750_vm5, %v3882_v22, %v3883_v19  ;;  %v7927_v22 = vrot.slane %v7887_v8, 9 }
 0x236   :  { %v7576_v49 = vcombine.low %v3881_v30, %v3884_v37  ;;  %v4036_v0 = vpop.permute.xlu0 %4035  ;;  %v5259_v12 = vsel %vm8295_vm2, %v5254_v17, %v5258_v1  ;;  %v5286_v30 = vrot.slane %v5284_v20, 4  ;;  %v7383_v17 = vld [vmem:[%s12435_s0 + $0x194] sm:$0x1] }
 0x237   :  { %v2308_v15 = vpop.permute.xlu1 %2307  ;;  %v8045_v23 = vpop.f32.mrb[4].mxu0  ;;  %v6227_v39 = vld [vmem:[#allocation2 + $0x98] sm:$0xff]  ;;  %4112 = vst.msk [vmem:[#allocation2 + $0xa0] sm:$0xff] %vm4091_vm11, %v4036_v0 }
 0x238   :  { %2383 = vst.msk [vmem:[#allocation2 + $0xa8] sm:$0xff] %vm2361_vm9, %v2308_v15  ;;  %v6727_v54 = vsel %vm6715_vm3, %v8045_v23, 0.0  ;;  %v6857_v28 = vmul.f32 %v8045_v23, %v8045_v23  ;;  %v6411_v53 = vpop.f32.mrb[5].mxu0  ;;  %8076 = vmatmul.mubr.msk.bf16.gmra.mrb[4].mxu1 %vm6260_vm0, %v6227_v39  ;;  %4405 = vrot.lane.b32.xlu0 %v8213_v50, %s8248_s25  ;;  %v5282_v39 = vrot.slane %v5280_v24, 5 }
 0x239   :  { %6657 = vst.msk [vmem:[%s12437_s2 + $0x30] sm:$0xff] %vm6650_vm1, %v8045_v23  ;;  %6655 = vst.msk [vmem:[%s12437_s2 + $0x20] sm:$0xff] %vm6650_vm1, %v6411_v53  ;;  %v6723_v34 = vsel %vm6715_vm3, %v6411_v53, 0.0  ;;  %v6855_v62 = vmul.f32 %v6411_v53, %v6411_v53  ;;  %v8046_v35 = vpop.f32.mrb[6].mxu0  ;;  %3412 = vrot.lane.b32.xlu1 %v7416_v33, %s8246_s21  ;;  %v5276_v23 = vrot.slane %v5274_v16, 5 }
 0x23a   :  { %v6926_v40 = vsel %vm6715_vm3, %v6857_v28, 0.0  ;;  %v6724_v42 = vadd.f32 %v6723_v34, %v11652_v31  ;;  %6658 = vst.msk [vmem:[%s12437_s2 + $0x38] sm:$0xff] %vm6650_vm1, %v8046_v35  ;;  %v11733_v43 = vsel %vm6715_vm3, %v8046_v35, 0.0  ;;  %v6858_v21 = vmul.f32 %v8046_v35, %v8046_v35  ;;  %v6414_v38 = vpop.f32.mrb[7].mxu0  ;;  %v4390_v11 = vpop.permute.xlu0 %4389  ;;  %v7892_v28 = vld [vmem:[%s12435_s0 + $0x194] sm:$0x1] }
 0x23b   :  { %v6922_v46 = vsel %vm6715_vm3, %v6855_v62, 0.0  ;;  %6656 = vst.msk [vmem:[%s12437_s2 + $0x28] sm:$0xff] %vm6650_vm1, %v6414_v38  ;;  %v6725_v31 = vsel %vm6715_vm3, %v6414_v38, 0.0  ;;  %v6856_v47 = vmul.f32 %v6414_v38, %v6414_v38  ;;  %v3397_v48 = vpop.permute.xlu1 %3396  ;;  %v5292_v34 = vrot.slane %v5290_v45, 5  ;;  %v1486_v33 = vld [vmem:[%s12435_s0 + $0x180] sm:$0xe] }
 0x23c   :  { %v6923_v52 = vadd.f32 %v6922_v46, %v11655_v32  ;;  %v11755_v55 = vsel %vm6715_vm3, %v6858_v21, 0.0  ;;  %v6726_v56 = vadd.f32 %v6725_v31, %v6724_v42  ;;  %3472 = vst.msk [vmem:[#allocation2 + $0xa8] sm:$0xff] %vm3450_vm10, %v3397_v48  ;;  %v5260_v32 = vshrl.u32 %v11687_v6, 16  ;;  %v1487_v42 = vld [vmem:[%s12435_s0 + $0x184] sm:$0xf] }
 0x23d   :  { %v6924_v60 = vsel %vm6715_vm3, %v6856_v47, 0.0  ;;  %v5271_v6 = vshrl.u32 %v7762_v51, 16  ;;  %4053 = vrot.lane.b32.xlu1 %v7576_v49, %s8247_s8  ;;  %4466 = vst.msk [vmem:[#allocation2 + $0xa0] sm:$0xff] %vm4445_vm12, %v4390_v11  ;;  %v5960_v62 = vrot.slane %v7889_v25, 5  ;;  %v5287_v35 = vor.u32 %v5286_v30, %v5282_v39  ;;  %v1488_v21 = vld [vmem:[%s12435_s0 + $0x188] sm:$0x1] }
 0x23e   :  { %v11772_v2 = vadd.f32 %v6727_v54, %v6726_v56  ;;  %v6925_v3 = vadd.f32 %v6924_v60, %v6923_v52  ;;  %v5262_v29 = vrot.slane %v5260_v32, 4  ;;  %v5957_v54 = vrot.slane %v7888_v9, 5  ;;  %v5479_v46 = vpop.permute.xlu0 %5478  ;;  %v1489_v48 = vld [vmem:[%s12435_s0 + $0x18c] sm:$0xe]  ;;  %v1490_v56 = vld [vmem:[%s12435_s0 + $0x190] sm:$0xf] }
 0x23f   :  { %v4038_v26 = vpop.permute.xlu1 %4037  ;;  %v5273_v13 = vrot.slane %v5271_v6, 4  ;;  %v5964_v31 = vrot.slane %v7891_v63, 5  ;;  %v5967_v47 = vrot.slane %v7892_v28, 5  ;;  %v5288_v50 = vrot.slane %v5287_v35, 4  ;;  %5555 = vst.msk [vmem:[#allocation2 + $0xa0] sm:$0xff] %vm5534_vm13, %v5479_v46 }
 0x240   :  { %v11786_v19 = vadd.f32 %v6926_v40, %v6925_v3  ;;  %4113 = vst.msk [vmem:[#allocation2 + $0xa8] sm:$0xff] %vm4091_vm11, %v4038_v26  ;;  %v5263_v15 = vor.u32 %v5262_v29, %v5258_v1  ;;  %v5958_v36 = vsel %vm8750_vm5, %v7927_v22, %v5957_v54  ;;  %v5959_v37 = vrot.slane %v5957_v54, 4  ;;  %v7381_v3 = vld [vmem:[%s12435_s0 + $0x18c] sm:$0xf]  ;;  %v7382_v29 = vld [vmem:[%s12435_s0 + $0x190] sm:$0xf] }
 0x241   :  { %4407 = vrot.lane.b32.xlu1 %v8214_v7, %s8248_s25  ;;  %v5277_v27 = vor.u32 %v5276_v23, %v5273_v13  ;;  %v7928_v40 = vrot.slane %v7890_v14, 9  ;;  %v7161_v52 = vrot.slane %v1486_v33, 9  ;;  %v5966_v1 = vrot.slane %v5964_v31, 4 }
 0x242   :  { %v5264_v61 = vrot.slane %v5263_v15, 4  ;;  %v5961_v51 = vsel %vm8750_vm5, %v5959_v37, %v5960_v62  ;;  %v5293_v32 = vsel %vm8295_vm2, %v5288_v50, %v5292_v34  ;;  %v1803_v4 = vrot.slane %v1487_v42, 5  ;;  %v6120_v6 = vpop.permute.xlu0 %6119 }
 0x243   :  { %v4392_v53 = vpop.permute.xlu1 %4391  ;;  %v5278_v44 = vrot.slane %v5277_v27, 4  ;;  %v7959_v60 = vcombine.low %v5958_v36, %v5961_v51  ;;  %v5965_v0 = vsel %vm8750_vm5, %v7928_v40, %v5964_v31  ;;  %v1806_v8 = vrot.slane %v1488_v21, 5  ;;  %6196 = vst.msk [vmem:[#allocation2 + $0xa0] sm:$0xff] %vm6175_vm14, %v6120_v6 }
 0x244   :  { %4467 = vst.msk [vmem:[#allocation2 + $0xa8] sm:$0xff] %vm4445_vm12, %v4392_v53  ;;  %v5269_v38 = vsel %vm8295_vm2, %v5264_v61, %v5268_v10  ;;  %v7162_v9 = vrot.slane %v1489_v48, 9  ;;  %v5968_v18 = vsel %vm8750_vm5, %v5966_v1, %v5967_v47  ;;  %v1810_v25 = vrot.slane %v1490_v56, 5 }
 0x245   :  { %v7799_v49 = vcombine.low %v5259_v12, %v5269_v38  ;;  %v5283_v58 = vsel %vm8295_vm2, %v5278_v44, %v5282_v39  ;;  %v1813_v26 = vrot.slane %v1491_v57, 5  ;;  %v7960_v10 = vcombine.low %v5965_v0, %v5968_v18 }
 0x246   :  { %v7800_v7 = vcombine.low %v5283_v58, %v5293_v32  ;;  %v1804_v16 = vsel %vm8750_vm5, %v7161_v52, %v1803_v4  ;;  %v1805_v24 = vrot.slane %v1803_v4, 4  ;;  %v6730_v14 = vadd.f32 %v11733_v43, %v11772_v2 }
 0x247   :  { %v5481_v59 = vpop.permute.xlu1 %5480  ;;  %5494 = vrot.lane.b32.xlu0 %v7799_v49, %s8249_s23 }
 0x248   :  { %5556 = vst.msk [vmem:[#allocation2 + $0xa8] sm:$0xff] %vm5534_vm13, %v5481_v59 }
 0x249   :  { %9 = vsyncpa [#allocation4], 0  ;;  %5496 = vrot.lane.b32.xlu1 %v7800_v7, %s8249_s23  ;;  %v1811_v20 = vsel %vm8750_vm5, %v7162_v9, %v1810_v25  ;;  %v1812_v63 = vrot.slane %v1810_v25, 4  ;;  %v6929_v11 = vadd.f32 %v11755_v55, %v11786_v19  ;;  %v3211_v15 = vshrl.u32 %v7381_v3, 16  ;;  %v7384_v45 = vld [vmem:[%s12435_s0 + $0x198] sm:$0xf]  ;;  %v1956_v55 = vpop.permute.xlu0 %1955 }
 0x24a   :  { %v1807_v43 = vsel %vm8750_vm5, %v1805_v24, %v1806_v8  ;;  %v3214_v2 = vshll.u32 %v7381_v3, 16  ;;  %v3220_v23 = vshll.u32 %v7382_v29, 16  ;;  %v3224_v39 = vshrl.u32 %v7382_v29, 16  ;;  %v11866_v54 = vld [vmem:[%s12435_s0 + $0x19c] sm:$0xf]  ;;  %2030 = vst.msk [vmem:[#allocation2 + $0xb0] sm:$0xff] %vm2007_vm8, %v1956_v55 }
 0x24b   :  { %v6122_v13 = vpop.permute.xlu1 %6121  ;;  %6135 = vrot.lane.b32.xlu0 %v7959_v60, %s8250_s13  ;;  %v7193_v12 = vcombine.low %v1804_v16, %v1807_v43  ;;  %v1814_v30 = vsel %vm8750_vm5, %v1812_v63, %v1813_v26  ;;  %v3213_v19 = vrot.slane %v3211_v15, 4  ;;  %v3230_v22 = vshll.u32 %v7383_v17, 16  ;;  %v8215_v40 = vld [vmem:[%s12435_s0 + $0x18c] sm:$0xff]   ;;  %v6228_v49 = vld [vmem:[#allocation2 + $0xa0] sm:$0xff]  ;;  %v8216_v0 = vld [vmem:[%s12435_s0 + $0x198] sm:$0xff]  }
 0x24c   :  { %6197 = vst.msk [vmem:[#allocation2 + $0xa8] sm:$0xff] %vm6175_vm14, %v6122_v13  ;;  %v3216_v28 = vrot.slane %v3214_v2, 5  ;;  %v11869_v53 = vrot.slane %v3220_v23, 5  ;;  %v3226_v61 = vrot.slane %v3224_v39, 4  ;;  %v7194_v27 = vcombine.low %v1811_v20, %v1814_v30  ;;  %8079 = vmatprep.mubr.msk.bf16.mxu1 %vm6260_vm0, %v6228_v49  ;;  %v7386_v25 = vld [vmem:[%s12435_s0 + $0x1a0] sm:$0x1] }
 0x24d   :  { %6137 = vrot.lane.b32.xlu1 %v7960_v10, %s8250_s13  ;;  %v3232_v33 = vrot.slane %v3230_v22, 5  ;;  %v3235_v35 = vshrl.u32 %v7384_v45, 16  ;;  %v3238_v36 = vshll.u32 %v7384_v45, 16  ;;  %v3244_v44 = vshll.u32 %v11866_v54, 16  ;;  %v2310_v48 = vpop.permute.xlu0 %2309  ;;  %v7509_v26 = vld [vmem:[%s12435_s0 + $0x18c] sm:$0xe] }
 0x24e   :  { %v3217_v21 = vor.u32 %v3216_v28, %v3213_v19  ;;  %v3227_v38 = vor.u32 %v3226_v61, %v11869_v53  ;;  %2384 = vst.msk [vmem:[#allocation2 + $0xb0] sm:$0xff] %vm2361_vm9, %v2310_v48  ;;  %v7510_v17 = vld [vmem:[%s12435_s0 + $0x190] sm:$0xf]  ;;  %v7511_v13 = vld [vmem:[%s12435_s0 + $0x194] sm:$0x1]  ;;  %v3248_v15 = vshrl.u32 %v11866_v54, 16 }
 0x24f   :  { %v1958_v34 = vpop.permute.xlu1 %1957  ;;  %v8049_v62 = vpop.f32.mrb[8].mxu0  ;;  %1971 = vrot.lane.b32.xlu0 %v7193_v12, %s8244_s16  ;;  %v3237_v50 = vrot.slane %v3235_v35, 4  ;;  %v3240_v51 = vrot.slane %v3238_v36, 5  ;;  %v3246_v24 = vrot.slane %v3244_v44, 5  ;;  %v7512_v43 = vld [vmem:[%s12435_s0 + $0x198] sm:$0xe] }
 0x250   :  { %2031 = vst.msk [vmem:[#allocation2 + $0xb8] sm:$0xff] %vm2007_vm8, %v1958_v34  ;;  %v6861_v37 = vmul.f32 %v8049_v62, %v8049_v62  ;;  %v6427_v42 = vpop.f32.mrb[9].mxu0  ;;  %v6735_v52 = vsel %vm6715_vm3, %v8049_v62, 0.0  ;;  %v3218_v8 = vrot.slane %v3217_v21, 4  ;;  %v3228_v6 = vrot.slane %v3227_v38, 4 }
 0x251   :  { %6661 = vst.msk [vmem:[%s12437_s2 + $0x50] sm:$0xff] %vm6650_vm1, %v8049_v62  ;;  %6659 = vst.msk [vmem:[%s12437_s2 + $0x40] sm:$0xff] %vm6650_vm1, %v6427_v42  ;;  %v6731_v46 = vsel %vm6715_vm3, %v6427_v42, 0.0  ;;  %v6859_v31 = vmul.f32 %v6427_v42, %v6427_v42  ;;  %v8050_v47 = vpop.f32.mrb[10].mxu0  ;;  %1973 = vrot.lane.b32.xlu1 %v7194_v27, %s8244_s16  ;;  %v3241_v16 = vor.u32 %v3240_v51, %v3237_v50  ;;  %v7513_v2 = vld [vmem:[%s12435_s0 + $0x19c] sm:$0xf] }
 0x252   :  { %v6934_v56 = vsel %vm6715_vm3, %v6861_v37, 0.0  ;;  %v6732_v57 = vadd.f32 %v6731_v46, %v6730_v14  ;;  %6662 = vst.msk [vmem:[%s12437_s2 + $0x58] sm:$0xff] %vm6650_vm1, %v8050_v47  ;;  %v11895_v58 = vsel %vm6715_vm3, %v8050_v47, 0.0  ;;  %v6430_v59 = vpop.f32.mrb[11].mxu0  ;;  %v11910_v7 = vmul.f32 %v8050_v47, %v8050_v47  ;;  %v3399_v14 = vpop.permute.xlu0 %3398  ;;  %v7514_v55 = vld [vmem:[%s12435_s0 + $0x1a0] sm:$0x1] }
 0x253   :  { %v6930_v60 = vsel %vm6715_vm3, %v6859_v31, 0.0  ;;  %6660 = vst.msk [vmem:[%s12437_s2 + $0x48] sm:$0xff] %vm6650_vm1, %v6430_v59  ;;  %v6733_v1 = vsel %vm6715_vm3, %v6430_v59, 0.0  ;;  %v6860_v32 = vmul.f32 %v6430_v59, %v6430_v59  ;;  %v2312_v4 = vpop.permute.xlu1 %2311  ;;  %v6229_v9 = vld [vmem:[#allocation2 + $0xa8] sm:$0xff]  ;;  %2325 = vrot.lane.b32.xlu0 %v8215_v40, %s8245_s7  ;;  %v3223_v10 = vsel %vm8295_vm2, %v3218_v8, %v11869_v53  ;;  %v7765_v53 = vld [vmem:[%s12435_s0 + $0x198] sm:$0xf] }
 0x254   :  { %v6931_v3 = vadd.f32 %v6930_v60, %v6929_v11  ;;  %v6734_v18 = vadd.f32 %v6733_v1, %v6732_v57  ;;  %2385 = vst.msk [vmem:[#allocation2 + $0xb8] sm:$0xff] %vm2361_vm9, %v2312_v4  ;;  %8080 = vmatmul.mubr.msk.bf16.gmra.mrb[8].mxu1 %vm6260_vm0, %v6229_v9  ;;  %v3233_v11 = vsel %vm8295_vm2, %v3228_v6, %v3232_v33  ;;  %v3242_v39 = vrot.slane %v3241_v16, 4  ;;  %v7766_v35 = vld [vmem:[%s12435_s0 + $0x19c] sm:$0xf]  ;;  %v7767_v46 = vld [vmem:[%s12435_s0 + $0x1a0] sm:$0x1] }
 0x255   :  { %v6932_v29 = vsel %vm6715_vm3, %v6860_v32, 0.0  ;;  %3473 = vst.msk [vmem:[#allocation2 + $0xb0] sm:$0xff] %vm3450_vm10, %v3399_v14  ;;  %2327 = vrot.lane.b32.xlu1 %v8216_v0, %s8245_s7  ;;  %v7417_v23 = vcombine.low %v3223_v10, %v3233_v11  ;;  %v3254_v45 = vshll.u32 %v7386_v25, 16  ;;  %v7545_v30 = vrot.slane %v7509_v26, 9  ;;  %v7769_v1 = vld [vmem:[%s12435_s0 + $0x1a8] sm:$0xf] }
 0x256   :  { %v11930_v20 = vadd.f32 %v6735_v52, %v6734_v18  ;;  %v6933_v63 = vadd.f32 %v6932_v29, %v6931_v3  ;;  %v3250_v22 = vrot.slane %v3248_v15, 4  ;;  %v3887_v54 = vrot.slane %v7510_v17, 5  ;;  %v4040_v33 = vpop.permute.xlu0 %4039  ;;  %v7768_v52 = vld [vmem:[%s12435_s0 + $0x1a4] sm:$0xf]  ;;  %v7770_v3 = vld [vmem:[%s12435_s0 + $0x1ac] sm:$0x1] }
 0x257   :  { %v3401_v12 = vpop.permute.xlu1 %3400  ;;  %v3890_v28 = vrot.slane %v7511_v13, 5  ;;  %3414 = vrot.lane.b32.xlu0 %v7417_v23, %s8246_s21  ;;  %v3247_v61 = vsel %vm8295_vm2, %v3242_v39, %v3246_v24  ;;  %v3256_v27 = vrot.slane %v3254_v45, 5  ;;  %v7546_v34 = vrot.slane %v7512_v43, 9  ;;  %4114 = vst.msk [vmem:[#allocation2 + $0xb0] sm:$0xff] %vm4091_vm11, %v4040_v33  ;;  %v8217_v6 = vld [vmem:[%s12435_s0 + $0x198] sm:$0xff]  }
 0x258   :  { %v11946_v19 = vadd.f32 %v6934_v56, %v6933_v63  ;;  %3474 = vst.msk [vmem:[#allocation2 + $0xb8] sm:$0xff] %vm3450_vm10, %v3401_v12  ;;  %v3894_v62 = vrot.slane %v7513_v2, 5  ;;  %v3251_v36 = vor.u32 %v3250_v22, %v3246_v24  ;;  %v3888_v37 = vsel %vm8750_vm5, %v7545_v30, %v3887_v54  ;;  %v7893_v16 = vld [vmem:[%s12435_s0 + $0x198] sm:$0xe]  ;;  %v7894_v63 = vld [vmem:[%s12435_s0 + $0x19c] sm:$0xf] }
 0x259   :  { %v3889_v40 = vrot.slane %v3887_v54, 4  ;;  %v3897_v42 = vrot.slane %v7514_v55, 5  ;;  %v5295_v31 = vshrl.u32 %v7765_v53, 16  ;;  %v5298_v47 = vshll.u32 %v7765_v53, 16  ;;  %v7895_v39 = vld [vmem:[%s12435_s0 + $0x1a0] sm:$0x1] }
 0x25a   :  { %v11963_v21 = vsel %vm8750_vm5, %v7546_v34, %v3894_v62  ;;  %v3896_v38 = vrot.slane %v3894_v62, 4  ;;  %v3252_v48 = vrot.slane %v3251_v36, 4  ;;  %v5304_v50 = vshll.u32 %v7766_v35, 16  ;;  %v4394_v59 = vpop.permute.xlu0 %4393  ;;  %v7896_v22 = vld [vmem:[%s12435_s0 + $0x1a4] sm:$0xe] }
 0x25b   :  { %v4042_v44 = vpop.permute.xlu1 %4041  ;;  %v3891_v49 = vsel %vm8750_vm5, %v3889_v40, %v3890_v28  ;;  %v5308_v51 = vshrl.u32 %v7766_v35, 16  ;;  %v5297_v60 = vrot.slane %v5295_v31, 4  ;;  %v5300_v0 = vrot.slane %v5298_v47, 5  ;;  %4468 = vst.msk [vmem:[#allocation2 + $0xb0] sm:$0xff] %vm4445_vm12, %v4394_v59  ;;  %v7897_v34 = vld [vmem:[%s12435_s0 + $0x1a8] sm:$0xf] }
 0x25c   :  { %4115 = vst.msk [vmem:[#allocation2 + $0xb8] sm:$0xff] %vm4091_vm11, %v4042_v44  ;;  %v7577_v56 = vcombine.low %v3888_v37, %v3891_v49  ;;  %v3898_v57 = vsel %vm8750_vm5, %v3896_v38, %v3897_v42  ;;  %v3257_v32 = vsel %vm8295_vm2, %v3252_v48, %v3256_v27  ;;  %v5306_v8 = vrot.slane %v5304_v50, 5  ;;  %v7898_v37 = vld [vmem:[%s12435_s0 + $0x1ac] sm:$0x1]  ;;  %v8218_v42 = vld [vmem:[%s12435_s0 + $0x1a4] sm:$0xff]  }
 0x25d   :  { %v7578_v4 = vcombine.low %v11963_v21, %v3898_v57  ;;  %v5310_v9 = vrot.slane %v5308_v51, 4  ;;  %v7418_v18 = vcombine.low %v3247_v61, %v3257_v32  ;;  %v5301_v26 = vor.u32 %v5300_v0, %v5297_v60 }
 0x25e   :  { %4055 = vrot.lane.b32.xlu0 %v7577_v56, %s8247_s8  ;;  %v5314_v29 = vshll.u32 %v7767_v46, 16  ;;  %v5319_v10 = vshrl.u32 %v7768_v52, 16  ;;  %v5322_v14 = vshll.u32 %v7768_v52, 16  ;;  %v5328_v17 = vshll.u32 %v7769_v1, 16  ;;  %v5483_v23 = vpop.permute.xlu0 %5482 }
 0x25f   :  { %v4396_v25 = vpop.permute.xlu1 %4395  ;;  %v5311_v24 = vor.u32 %v5310_v9, %v5306_v8  ;;  %v5332_v13 = vshrl.u32 %v7769_v1, 16  ;;  %3416 = vrot.lane.b32.xlu1 %v7418_v18, %s8246_s21  ;;  %v5302_v11 = vrot.slane %v5301_v26, 4  ;;  %v5338_v2 = vshll.u32 %v7770_v3, 16  ;;  %5557 = vst.msk [vmem:[#allocation2 + $0xb0] sm:$0xff] %vm5534_vm13, %v5483_v23 }
 0x260   :  { %4469 = vst.msk [vmem:[#allocation2 + $0xb8] sm:$0xff] %vm4445_vm12, %v4396_v25  ;;  %v5316_v15 = vrot.slane %v5314_v29, 5  ;;  %v5321_v43 = vrot.slane %v5319_v10, 4  ;;  %v5324_v12 = vrot.slane %v5322_v14, 5  ;;  %v5330_v30 = vrot.slane %v5328_v17, 5 }
 0x261   :  { %v5312_v45 = vrot.slane %v5311_v24, 4  ;;  %v5334_v55 = vrot.slane %v5332_v13, 4  ;;  %v5307_v54 = vsel %vm8295_vm2, %v5302_v11, %v5306_v8  ;;  %v5340_v28 = vrot.slane %v5338_v2, 5 }
 0x262   :  { %4409 = vrot.lane.b32.xlu0 %v8217_v6, %s8248_s25  ;;  %v7929_v61 = vrot.slane %v7893_v16, 9  ;;  %v5971_v27 = vrot.slane %v7894_v63, 5  ;;  %v5325_v33 = vor.u32 %v5324_v12, %v5321_v43  ;;  %v5974_v36 = vrot.slane %v7895_v39, 5  ;;  %v6124_v46 = vpop.permute.xlu0 %6123 }
 0x263   :  { %v5485_v53 = vpop.permute.xlu1 %5484  ;;  %v5317_v62 = vsel %vm8295_vm2, %v5312_v45, %v5316_v15  ;;  %v5335_v35 = vor.u32 %v5334_v55, %v5330_v30  ;;  %v6936_v40 = vsel %vm6715_vm3, %v11910_v7, 0.0  ;;  %4057 = vrot.lane.b32.xlu1 %v7578_v4, %s8247_s8  ;;  %v7930_v48 = vrot.slane %v7896_v22, 9  ;;  %6198 = vst.msk [vmem:[#allocation2 + $0xb0] sm:$0xff] %vm6175_vm14, %v6124_v46 }
 0x264   :  { %5558 = vst.msk [vmem:[#allocation2 + $0xb8] sm:$0xff] %vm5534_vm13, %v5485_v53  ;;  %v7801_v21 = vcombine.low %v5307_v54, %v5317_v62  ;;  %v5972_v38 = vsel %vm8750_vm5, %v7929_v61, %v5971_v27  ;;  %v5973_v44 = vrot.slane %v5971_v27, 4  ;;  %v5326_v31 = vrot.slane %v5325_v33, 4 }
 0x265   :  { %v5336_v47 = vrot.slane %v5335_v35, 4  ;;  %v5978_v49 = vrot.slane %v7897_v34, 5  ;;  %v5981_v50 = vrot.slane %v7898_v37, 5  ;;  %v6738_v56 = vadd.f32 %v11895_v58, %v11930_v20 }
 0x266   :  { %5498 = vrot.lane.b32.xlu0 %v7801_v21, %s8249_s23  ;;  %v5975_v7 = vsel %vm8750_vm5, %v5973_v44, %v5974_v36  ;;  %v6937_v57 = vadd.f32 %v6936_v40, %v11946_v19  ;;  %v5331_v59 = vsel %vm8295_vm2, %v5326_v31, %v5330_v30  ;;  %v1960_v19 = vpop.permute.xlu0 %1959 }
 0x267   :  { %v6126_v51 = vpop.permute.xlu1 %6125  ;;  %v8053_v52 = vpop.f32.mrb[12].mxu0  ;;  %v5341_v60 = vsel %vm8295_vm2, %v5336_v47, %v5340_v28  ;;  %v7961_v0 = vcombine.low %v5972_v38, %v5975_v7  ;;  %4411 = vrot.lane.b32.xlu1 %v8218_v42, %s8248_s25  ;;  %v5980_v20 = vrot.slane %v5978_v49, 4  ;;  %v5979_v32 = vsel %vm8750_vm5, %v7930_v48, %v5978_v49  ;;  %2032 = vst.msk [vmem:[#allocation2 + $0xc0] sm:$0xff] %vm2007_vm8, %v1960_v19 }
 0x268   :  { %6199 = vst.msk [vmem:[#allocation2 + $0xb8] sm:$0xff] %vm6175_vm14, %v6126_v51  ;;  %v6443_v1 = vpop.f32.mrb[13].mxu0  ;;  %v7802_v58 = vcombine.low %v5331_v59, %v5341_v60  ;;  %v6865_v26 = vmul.f32 %v8053_v52, %v8053_v52  ;;  %v6743_v13 = vsel %vm6715_vm3, %v8053_v52, 0.0  ;;  %vm6849_vm2 = vcmask 253952  }
 0x269   :  { %6665 = vst.msk [vmem:[%s12437_s2 + $0x70] sm:$0xff] %vm6650_vm1, %v8053_v52  ;;  %6663 = vst.msk [vmem:[%s12437_s2 + $0x60] sm:$0xff] %vm6650_vm1, %v6443_v1  ;;  %v8054_v5 = vpop.f32.mrb[14].mxu0  ;;  %v6739_v4 = vsel %vm6715_vm3, %v6443_v1, 0.0  ;;  %v6863_v8 = vmul.f32 %v6443_v1, %v6443_v1  ;;  %v5982_v3 = vsel %vm8750_vm5, %v5980_v20, %v5981_v50 }
 0x26a   :  { %6666 = vst.msk [vmem:[%s12437_s2 + $0x78] sm:$0xff] %vm6650_vm1, %v8054_v5  ;;  %v6446_v9 = vpop.f32.mrb[15].mxu0  ;;  %6139 = vrot.lane.b32.xlu0 %v7961_v0, %s8250_s13  ;;  %v6740_v18 = vadd.f32 %v6739_v4, %v6738_v56  ;;  %v7962_v16 = vcombine.low %v5979_v32, %v5982_v3  ;;  %v2314_v14 = vpop.permute.xlu0 %2313  ;;  %v6230_v17 = vld [vmem:[#allocation2 + $0xb0] sm:$0xff]  ;;  %v6866_v63 = vmul.f32 %v8054_v5, %v8054_v5  ;;  %v6942_v39 = vsel %vm6715_vm3, %v6865_v26, 0.0 }
 0x26b   :  { %6664 = vst.msk [vmem:[%s12437_s2 + $0x68] sm:$0xff] %vm6650_vm1, %v6446_v9  ;;  %v6741_v6 = vsel %vm6715_vm3, %v6446_v9, 0.0  ;;  %v1962_v25 = vpop.permute.xlu1 %1961  ;;  %v6938_v29 = vsel %vm6715_vm3, %v6863_v8, 0.0  ;;  %v6864_v10 = vmul.f32 %v6446_v9, %v6446_v9  ;;  %5500 = vrot.lane.b32.xlu1 %v7802_v58, %s8249_s23  ;;  %8083 = vmatprep.mubr.msk.bf16.mxu1 %vm6260_vm0, %v6230_v17  ;;  %v6745_v45 = vsel %vm6715_vm3, %v8054_v5, 0.0 }
 0x26c   :  { %2033 = vst.msk [vmem:[#allocation2 + $0xc8] sm:$0xff] %vm2007_vm8, %v1962_v25  ;;  %v6939_v41 = vadd.f32 %v6938_v29, %v6937_v57  ;;  %v6742_v24 = vadd.f32 %v6741_v6, %v6740_v18  ;;  %v6944_v22 = vsel %vm6715_vm3, %v6866_v63, 0.0 }
 0x26d   :  { %v6940_v11 = vsel %vm6715_vm3, %v6864_v10, 0.0  ;;  %2386 = vst.msk [vmem:[#allocation2 + $0xc0] sm:$0xff] %vm2361_vm9, %v2314_v14 }
 0x26e   :  { %v6744_v15 = vadd.f32 %v6743_v13, %v6742_v24  ;;  %v6941_v43 = vadd.f32 %v6940_v11, %v6939_v41  ;;  %v3403_v30 = vpop.permute.xlu0 %3402 }
 0x26f   :  { %v2316_v2 = vpop.permute.xlu1 %2315  ;;  %v6231_v23 = vld [vmem:[#allocation2 + $0xb8] sm:$0xff]  ;;  %6141 = vrot.lane.b32.xlu1 %v7962_v16, %s8250_s13  ;;  %3475 = vst.msk [vmem:[#allocation2 + $0xc0] sm:$0xff] %vm3450_vm10, %v3403_v30 }
 0x270   :  { %2387 = vst.msk [vmem:[#allocation2 + $0xc8] sm:$0xff] %vm2361_vm9, %v2316_v2  ;;  %8084 = vmatmul.mubr.msk.bf16.gmra.mrb[12].mxu1 %vm6260_vm0, %v6231_v23  ;;  %v6943_v12 = vadd.f32 %v6942_v39, %v6941_v43  ;;  %v6746_v55 = vadd.f32 %v6745_v45, %v6744_v15 }
 0x272   :  { %v6945_v28 = vadd.f32 %v6944_v22, %v6943_v12  ;;  %v4044_v53 = vpop.permute.xlu0 %4043 }
 0x273   :  { %v3405_v54 = vpop.permute.xlu1 %3404  ;;  %4116 = vst.msk [vmem:[#allocation2 + $0xc0] sm:$0xff] %vm4091_vm11, %v4044_v53 }
 0x274   :  { %3476 = vst.msk [vmem:[#allocation2 + $0xc8] sm:$0xff] %vm3450_vm10, %v3405_v54 }
 0x276   :  { %v4398_v27 = vpop.permute.xlu0 %4397 }
 0x277   :  { %v4046_v61 = vpop.permute.xlu1 %4045  ;;  %4470 = vst.msk [vmem:[#allocation2 + $0xc0] sm:$0xff] %vm4445_vm12, %v4398_v27 }
 0x278   :  { %4117 = vst.msk [vmem:[#allocation2 + $0xc8] sm:$0xff] %vm4091_vm11, %v4046_v61 }
 0x27a   :  { %v5487_v62 = vpop.permute.xlu0 %5486 }
 0x27b   :  { %v4400_v34 = vpop.permute.xlu1 %4399  ;;  %5559 = vst.msk [vmem:[#allocation2 + $0xc0] sm:$0xff] %vm5534_vm13, %v5487_v62 }
 0x27c   :  { %4471 = vst.msk [vmem:[#allocation2 + $0xc8] sm:$0xff] %vm4445_vm12, %v4400_v34 }
 0x27e   :  { %v6128_v21 = vpop.permute.xlu0 %6127 }
 0x27f   :  { %v5489_v33 = vpop.permute.xlu1 %5488  ;;  %v8057_v35 = vpop.f32.mrb[16].mxu0  ;;  %6200 = vst.msk [vmem:[#allocation2 + $0xc0] sm:$0xff] %vm6175_vm14, %v6128_v21 }
 0x280   :  { %5560 = vst.msk [vmem:[#allocation2 + $0xc8] sm:$0xff] %vm5534_vm13, %v5489_v33  ;;  %v6459_v36 = vpop.f32.mrb[17].mxu0  ;;  %v6869_v46 = vmul.f32 %v8057_v35, %v8057_v35  ;;  %v6751_v51 = vsel %vm6715_vm3, %v8057_v35, 0.0 }
 0x281   :  { %6669 = vst.msk [vmem:[%s12437_s2 + $0x90] sm:$0xff] %vm6650_vm1, %v8057_v35  ;;  %6667 = vst.msk [vmem:[%s12437_s2 + $0x80] sm:$0xff] %vm6650_vm1, %v6459_v36  ;;  %v6747_v37 = vsel %vm6715_vm3, %v6459_v36, 0.0  ;;  %v6867_v40 = vmul.f32 %v6459_v36, %v6459_v36  ;;  %v8058_v42 = vpop.f32.mrb[18].mxu0 }
 0x282   :  { %v6748_v38 = vadd.f32 %v6747_v37, %v6746_v55  ;;  %6670 = vst.msk [vmem:[%s12437_s2 + $0x98] sm:$0xff] %vm6650_vm1, %v8058_v42  ;;  %v6462_v44 = vpop.f32.mrb[19].mxu0  ;;  %v6870_v52 = vmul.f32 %v8058_v42, %v8058_v42  ;;  %v1964_v57 = vpop.permute.xlu0 %1963  ;;  %v6950_v0 = vsel %vm6715_vm3, %v6869_v46, 0.0  ;;  %v6753_v1 = vsel %vm6715_vm3, %v8058_v42, 0.0 }
 0x283   :  { %v6946_v31 = vsel %vm6715_vm3, %v6867_v40, 0.0  ;;  %6668 = vst.msk [vmem:[%s12437_s2 + $0x88] sm:$0xff] %vm6650_vm1, %v6462_v44  ;;  %v6749_v47 = vsel %vm6715_vm3, %v6462_v44, 0.0  ;;  %v6868_v48 = vmul.f32 %v6462_v44, %v6462_v44  ;;  %v6130_v49 = vpop.permute.xlu1 %6129 }
 0x284   :  { %v6947_v7 = vadd.f32 %v6946_v31, %v6945_v28  ;;  %v6750_v50 = vadd.f32 %v6749_v47, %v6748_v38  ;;  %6201 = vst.msk [vmem:[#allocation2 + $0xc8] sm:$0xff] %vm6175_vm14, %v6130_v49  ;;  %v6952_v19 = vsel %vm6715_vm3, %v6870_v52, 0.0 }
 0x285   :  { %v6948_v56 = vsel %vm6715_vm3, %v6868_v48, 0.0  ;;  %2034 = vst.msk [vmem:[#allocation2 + $0xd0] sm:$0xff] %vm2007_vm8, %v1964_v57 }
 0x286   :  { %v6752_v59 = vadd.f32 %v6751_v51, %v6750_v50  ;;  %v6949_v60 = vadd.f32 %v6948_v56, %v6947_v7  ;;  %v2318_v32 = vpop.permute.xlu0 %2317  ;;  %v6232_v4 = vld [vmem:[#allocation2 + $0xc0] sm:$0xff] }
 0x287   :  { %v1966_v58 = vpop.permute.xlu1 %1965  ;;  %2388 = vst.msk [vmem:[#allocation2 + $0xd0] sm:$0xff] %vm2361_vm9, %v2318_v32  ;;  %8087 = vmatprep.mubr.msk.bf16.mxu1 %vm6260_vm0, %v6232_v4 }
 0x288   :  { %v6951_v20 = vadd.f32 %v6950_v0, %v6949_v60  ;;  %2035 = vst.msk [vmem:[#allocation2 + $0xd8] sm:$0xff] %vm2007_vm8, %v1966_v58  ;;  %v6754_v5 = vadd.f32 %v6753_v1, %v6752_v59 }
 0x28a   :  { %v6953_v8 = vadd.f32 %v6952_v19, %v6951_v20  ;;  %v3407_v18 = vpop.permute.xlu0 %3406 }
 0x28b   :  { %v2320_v9 = vpop.permute.xlu1 %2319  ;;  %v6233_v3 = vld [vmem:[#allocation2 + $0xc8] sm:$0xff]  ;;  %3477 = vst.msk [vmem:[#allocation2 + $0xd0] sm:$0xff] %vm3450_vm10, %v3407_v18 }
 0x28c   :  { %2389 = vst.msk [vmem:[#allocation2 + $0xd8] sm:$0xff] %vm2361_vm9, %v2320_v9  ;;  %8088 = vmatmul.mubr.msk.bf16.gmra.mrb[16].mxu1 %vm6260_vm0, %v6233_v3 }
 0x28e   :  { %v4048_v25 = vpop.permute.xlu0 %4047 }
 0x28f   :  { %v3409_v6 = vpop.permute.xlu1 %3408  ;;  %4118 = vst.msk [vmem:[#allocation2 + $0xd0] sm:$0xff] %vm4091_vm11, %v4048_v25 }
 0x290   :  { %3478 = vst.msk [vmem:[#allocation2 + $0xd8] sm:$0xff] %vm3450_vm10, %v3409_v6 }
 0x292   :  { %v4402_v29 = vpop.permute.xlu0 %4401 }
 0x293   :  { %v4050_v26 = vpop.permute.xlu1 %4049  ;;  %4472 = vst.msk [vmem:[#allocation2 + $0xd0] sm:$0xff] %vm4445_vm12, %v4402_v29 }
 0x294   :  { %4119 = vst.msk [vmem:[#allocation2 + $0xd8] sm:$0xff] %vm4091_vm11, %v4050_v26 }
 0x296   :  { %v5491_v16 = vpop.permute.xlu0 %5490 }
 0x297   :  { %v4404_v10 = vpop.permute.xlu1 %4403  ;;  %5561 = vst.msk [vmem:[#allocation2 + $0xd0] sm:$0xff] %vm5534_vm13, %v5491_v16 }
 0x298   :  { %4473 = vst.msk [vmem:[#allocation2 + $0xd8] sm:$0xff] %vm4445_vm12, %v4404_v10 }
 0x29a   :  { %v6132_v11 = vpop.permute.xlu0 %6131 }
 0x29b   :  { %v5493_v41 = vpop.permute.xlu1 %5492  ;;  %v8061_v24 = vpop.f32.mrb[20].mxu0  ;;  %6202 = vst.msk [vmem:[#allocation2 + $0xd0] sm:$0xff] %vm6175_vm14, %v6132_v11 }
 0x29c   :  { %5562 = vst.msk [vmem:[#allocation2 + $0xd8] sm:$0xff] %vm5534_vm13, %v5493_v41  ;;  %v6475_v14 = vpop.f32.mrb[21].mxu0  ;;  %v6873_v2 = vmul.f32 %v8061_v24, %v8061_v24  ;;  %v6759_v22 = vsel %vm6715_vm3, %v8061_v24, 0.0 }
 0x29d   :  { %6673 = vst.msk [vmem:[%s12437_s2 + $0xb0] sm:$0xff] %vm6650_vm1, %v8061_v24  ;;  %6671 = vst.msk [vmem:[%s12437_s2 + $0xa0] sm:$0xff] %vm6650_vm1, %v6475_v14  ;;  %v6755_v17 = vsel %vm6715_vm3, %v6475_v14, 0.0  ;;  %v6871_v13 = vmul.f32 %v6475_v14, %v6475_v14  ;;  %v8062_v63 = vpop.f32.mrb[22].mxu0 }
 0x29e   :  { %v6756_v15 = vadd.f32 %v6755_v17, %v6754_v5  ;;  %6674 = vst.msk [vmem:[%s12437_s2 + $0xb8] sm:$0xff] %vm6650_vm1, %v8062_v63  ;;  %v6478_v43 = vpop.f32.mrb[23].mxu0  ;;  %v6874_v54 = vmul.f32 %v8062_v63, %v8062_v63  ;;  %v1968_v53 = vpop.permute.xlu0 %1967  ;;  %v6958_v34 = vsel %vm6715_vm3, %v6873_v2, 0.0  ;;  %v6761_v62 = vsel %vm6715_vm3, %v8062_v63, 0.0 }
 0x29f   :  { %v6954_v23 = vsel %vm6715_vm3, %v6871_v13, 0.0  ;;  %6672 = vst.msk [vmem:[%s12437_s2 + $0xa8] sm:$0xff] %vm6650_vm1, %v6478_v43  ;;  %v6757_v39 = vsel %vm6715_vm3, %v6478_v43, 0.0  ;;  %v6872_v45 = vmul.f32 %v6478_v43, %v6478_v43  ;;  %v6134_v12 = vpop.permute.xlu1 %6133 }
 0x2a0   :  { %v6955_v30 = vadd.f32 %v6954_v23, %v6953_v8  ;;  %v6758_v55 = vadd.f32 %v6757_v39, %v6756_v15  ;;  %6203 = vst.msk [vmem:[#allocation2 + $0xd8] sm:$0xff] %vm6175_vm14, %v6134_v12  ;;  %v6960_v37 = vsel %vm6715_vm3, %v6874_v54, 0.0 }
 0x2a1   :  { %v6956_v28 = vsel %vm6715_vm3, %v6872_v45, 0.0  ;;  %2036 = vst.msk [vmem:[#allocation2 + $0xe0] sm:$0xff] %vm2007_vm8, %v1968_v53 }
 0x2a2   :  { %v6760_v61 = vadd.f32 %v6759_v22, %v6758_v55  ;;  %v6957_v27 = vadd.f32 %v6956_v28, %v6955_v30  ;;  %v2322_v40 = vpop.permute.xlu0 %2321  ;;  %v6234_v42 = vld [vmem:[#allocation2 + $0xd0] sm:$0xff] }
 0x2a3   :  { %v1970_v33 = vpop.permute.xlu1 %1969  ;;  %2390 = vst.msk [vmem:[#allocation2 + $0xe0] sm:$0xff] %vm2361_vm9, %v2322_v40  ;;  %8091 = vmatprep.mubr.msk.bf16.mxu1 %vm6260_vm0, %v6234_v42 }
 0x2a4   :  { %v6959_v35 = vadd.f32 %v6958_v34, %v6957_v27  ;;  %2037 = vst.msk [vmem:[#allocation2 + $0xe8] sm:$0xff] %vm2007_vm8, %v1970_v33  ;;  %v6762_v36 = vadd.f32 %v6761_v62, %v6760_v61 }
 0x2a6   :  { %v6961_v21 = vadd.f32 %v6960_v37, %v6959_v35  ;;  %v3411_v46 = vpop.permute.xlu0 %3410 }
 0x2a7   :  { %v2324_v38 = vpop.permute.xlu1 %2323  ;;  %v6235_v44 = vld [vmem:[#allocation2 + $0xd8] sm:$0xff]  ;;  %3479 = vst.msk [vmem:[#allocation2 + $0xe0] sm:$0xff] %vm3450_vm10, %v3411_v46 }
 0x2a8   :  { %2391 = vst.msk [vmem:[#allocation2 + $0xe8] sm:$0xff] %vm2361_vm9, %v2324_v38  ;;  %8092 = vmatmul.mubr.msk.bf16.gmra.mrb[20].mxu1 %vm6260_vm0, %v6235_v44 }
 0x2aa   :  { %v4052_v47 = vpop.permute.xlu0 %4051 }
 0x2ab   :  { %v3413_v31 = vpop.permute.xlu1 %3412  ;;  %4120 = vst.msk [vmem:[#allocation2 + $0xe0] sm:$0xff] %vm4091_vm11, %v4052_v47 }
 0x2ac   :  { %3480 = vst.msk [vmem:[#allocation2 + $0xe8] sm:$0xff] %vm3450_vm10, %v3413_v31 }
 0x2ae   :  { %v4406_v49 = vpop.permute.xlu0 %4405 }
 0x2af   :  { %v4054_v48 = vpop.permute.xlu1 %4053  ;;  %4474 = vst.msk [vmem:[#allocation2 + $0xe0] sm:$0xff] %vm4445_vm12, %v4406_v49 }
 0x2b0   :  { %4121 = vst.msk [vmem:[#allocation2 + $0xe8] sm:$0xff] %vm4091_vm11, %v4054_v48 }
 0x2b3   :  { %v4408_v7 = vpop.permute.xlu1 %4407 }
 0x2b4   :  { %4475 = vst.msk [vmem:[#allocation2 + $0xe8] sm:$0xff] %vm4445_vm12, %v4408_v7 }
 0x2b7   :  { %v8065_v50 = vpop.f32.mrb[24].mxu0 }
 0x2b8   :  { %6677 = vst.msk [vmem:[%s12437_s2 + $0xd0] sm:$0xff] %vm6650_vm1, %v8065_v50  ;;  %v6491_v51 = vpop.f32.mrb[25].mxu0  ;;  %v6877_v1 = vmul.f32 %v8065_v50, %v8065_v50  ;;  %v6767_v8 = vsel %vm6715_vm3, %v8065_v50, 0.0 }
 0x2b9   :  { %6675 = vst.msk [vmem:[%s12437_s2 + $0xc0] sm:$0xff] %vm6650_vm1, %v6491_v51  ;;  %v6763_v52 = vsel %vm6715_vm3, %v6491_v51, 0.0  ;;  %v6875_v56 = vmul.f32 %v6491_v51, %v6491_v51  ;;  %v8066_v57 = vpop.f32.mrb[26].mxu0  ;;  %v5495_v59 = vpop.permute.xlu0 %5494 }
 0x2ba   :  { %v6764_v60 = vadd.f32 %v6763_v52, %v6762_v36  ;;  %6678 = vst.msk [vmem:[%s12437_s2 + $0xd8] sm:$0xff] %vm6650_vm1, %v8066_v57  ;;  %v6494_v0 = vpop.f32.mrb[27].mxu0  ;;  %v6878_v9 = vmul.f32 %v8066_v57, %v8066_v57  ;;  %v6966_v26 = vsel %vm6715_vm3, %v6877_v1, 0.0  ;;  %v6769_v29 = vsel %vm6715_vm3, %v8066_v57, 0.0 }
 0x2bb   :  { %5563 = vst.msk [vmem:[#allocation2 + $0xe0] sm:$0xff] %vm5534_vm13, %v5495_v59  ;;  %v6962_v58 = vsel %vm6715_vm3, %v6875_v56, 0.0  ;;  %v6765_v20 = vsel %vm6715_vm3, %v6494_v0, 0.0  ;;  %v6876_v5 = vmul.f32 %v6494_v0, %v6494_v0  ;;  %v5497_v4 = vpop.permute.xlu1 %5496 }
 0x2bc   :  { %6676 = vst.msk [vmem:[%s12437_s2 + $0xc8] sm:$0xff] %vm6650_vm1, %v6494_v0  ;;  %v6963_v19 = vadd.f32 %v6962_v58, %v6961_v21  ;;  %v6766_v32 = vadd.f32 %v6765_v20, %v6764_v60  ;;  %v6968_v41 = vsel %vm6715_vm3, %v6878_v9, 0.0 }
 0x2bd   :  { %v6964_v3 = vsel %vm6715_vm3, %v6876_v5, 0.0  ;;  %5564 = vst.msk [vmem:[#allocation2 + $0xe8] sm:$0xff] %vm5534_vm13, %v5497_v4  ;;  %v6136_v18 = vpop.permute.xlu0 %6135 }
 0x2be   :  { %v6768_v6 = vadd.f32 %v6767_v8, %v6766_v32  ;;  %v6965_v25 = vadd.f32 %v6964_v3, %v6963_v19  ;;  %6204 = vst.msk [vmem:[#allocation2 + $0xe0] sm:$0xff] %vm6175_vm14, %v6136_v18 }
 0x2bf   :  { %v6138_v24 = vpop.permute.xlu1 %6137 }
 0x2c0   :  { %v6967_v10 = vadd.f32 %v6966_v26, %v6965_v25  ;;  %v6770_v16 = vadd.f32 %v6769_v29, %v6768_v6  ;;  %6205 = vst.msk [vmem:[#allocation2 + $0xe8] sm:$0xff] %vm6175_vm14, %v6138_v24 }
 0x2c1   :  { %v1972_v14 = vpop.permute.xlu0 %1971 }
 0x2c2   :  { %v6969_v17 = vadd.f32 %v6968_v41, %v6967_v10  ;;  %2038 = vst.msk [vmem:[#allocation2 + $0xf0] sm:$0xff] %vm2007_vm8, %v1972_v14 }
 0x2c3   :  { %v1974_v13 = vpop.permute.xlu1 %1973 }
 0x2c4   :  { %2039 = vst.msk [vmem:[#allocation2 + $0xf8] sm:$0xff] %vm2007_vm8, %v1974_v13 }
 0x2c5   :  { %v2326_v63 = vpop.permute.xlu0 %2325  ;;  %v6236_v11 = vld [vmem:[#allocation2 + $0xe0] sm:$0xff] }
 0x2c6   :  { %2392 = vst.msk [vmem:[#allocation2 + $0xf0] sm:$0xff] %vm2361_vm9, %v2326_v63  ;;  %8095 = vmatprep.mubr.msk.bf16.mxu1 %vm6260_vm0, %v6236_v11 }
 0x2c7   :  { %v2328_v15 = vpop.permute.xlu1 %2327  ;;  %v6237_v43 = vld [vmem:[#allocation2 + $0xe8] sm:$0xff] }
 0x2c8   :  { %2393 = vst.msk [vmem:[#allocation2 + $0xf8] sm:$0xff] %vm2361_vm9, %v2328_v15  ;;  %8096 = vmatmul.mubr.msk.bf16.gmra.mrb[24].mxu1 %vm6260_vm0, %v6237_v43 }
 0x2c9   :  { %v3415_v2 = vpop.permute.xlu0 %3414 }
 0x2ca   :  { %3481 = vst.msk [vmem:[#allocation2 + $0xf0] sm:$0xff] %vm3450_vm10, %v3415_v2 }
 0x2d0   :  { %v4056_v23 = vpop.permute.xlu0 %4055 }
 0x2d1   :  { %4122 = vst.msk [vmem:[#allocation2 + $0xf0] sm:$0xff] %vm4091_vm11, %v4056_v23  ;;  %v3417_v39 = vpop.permute.xlu1 %3416 }
 0x2d2   :  { %3482 = vst.msk [vmem:[#allocation2 + $0xf8] sm:$0xff] %vm3450_vm10, %v3417_v39 }
 0x2d3   :  { %v8069_v45 = vpop.f32.mrb[28].mxu0 }
 0x2d4   :  { %6681 = vst.msk [vmem:[%s12437_s2 + $0xf0] sm:$0xff] %vm6650_vm1, %v8069_v45  ;;  %v6507_v12 = vpop.f32.mrb[29].mxu0  ;;  %v4410_v30 = vpop.permute.xlu0 %4409  ;;  %v6881_v27 = vmul.f32 %v8069_v45, %v8069_v45  ;;  %v6775_v40 = vsel %vm6715_vm3, %v8069_v45, 0.0 }
 0x2d5   :  { %6679 = vst.msk [vmem:[%s12437_s2 + $0xe0] sm:$0xff] %vm6650_vm1, %v6507_v12  ;;  %v6771_v55 = vsel %vm6715_vm3, %v6507_v12, 0.0  ;;  %v6879_v22 = vmul.f32 %v6507_v12, %v6507_v12  ;;  %v8070_v54 = vpop.f32.mrb[30].mxu0  ;;  %v4058_v61 = vpop.permute.xlu1 %4057 }
 0x2d6   :  { %4476 = vst.msk [vmem:[#allocation2 + $0xf0] sm:$0xff] %vm4445_vm12, %v4410_v30  ;;  %v6772_v28 = vadd.f32 %v6771_v55, %v6770_v16  ;;  %v6510_v53 = vpop.f32.mrb[31].mxu0  ;;  %v6882_v42 = vmul.f32 %v8070_v54, %v8070_v54  ;;  %v6974_v31 = vsel %vm6715_vm3, %v6881_v27, 0.0  ;;  %v6777_v47 = vsel %vm6715_vm3, %v8070_v54, 0.0 }
 0x2d7   :  { %6682 = vst.msk [vmem:[%s12437_s2 + $0xf8] sm:$0xff] %vm6650_vm1, %v8070_v54  ;;  %v6970_v34 = vsel %vm6715_vm3, %v6879_v22, 0.0  ;;  %6680 = vst.msk [vmem:[%s12437_s2 + $0xe8] sm:$0xff] %vm6650_vm1, %v6510_v53  ;;  %v6773_v62 = vsel %vm6715_vm3, %v6510_v53, 0.0  ;;  %v6880_v33 = vmul.f32 %v6510_v53, %v6510_v53 }
 0x2d8   :  { %4123 = vst.msk [vmem:[#allocation2 + $0xf8] sm:$0xff] %vm4091_vm11, %v4058_v61  ;;  %v6971_v35 = vadd.f32 %v6970_v34, %v6969_v17  ;;  %v6774_v36 = vadd.f32 %v6773_v62, %v6772_v28  ;;  %v5499_v37 = vpop.permute.xlu0 %5498  ;;  %v6976_v7 = vsel %vm6715_vm3, %v6882_v42, 0.0 }
 0x2d9   :  { %v6972_v21 = vsel %vm6715_vm3, %v6880_v33, 0.0  ;;  %5565 = vst.msk [vmem:[#allocation2 + $0xf0] sm:$0xff] %vm5534_vm13, %v5499_v37  ;;  %v4412_v46 = vpop.permute.xlu1 %4411 }
 0x2da   :  { %v6776_v38 = vadd.f32 %v6775_v40, %v6774_v36  ;;  %v6973_v44 = vadd.f32 %v6972_v21, %v6971_v35  ;;  %4477 = vst.msk [vmem:[#allocation2 + $0xf8] sm:$0xff] %vm4445_vm12, %v4412_v46 }
 0x2dc   :  { %v6975_v48 = vadd.f32 %v6974_v31, %v6973_v44  ;;  %v6778_v49 = vadd.f32 %v6777_v47, %v6776_v38  ;;  %v6140_v50 = vpop.permute.xlu0 %6139 }
 0x2dd   :  { %6206 = vst.msk [vmem:[#allocation2 + $0xf0] sm:$0xff] %vm6175_vm14, %v6140_v50  ;;  %v5501_v52 = vpop.permute.xlu1 %5500 }
 0x2de   :  { %v6977_v51 = vadd.f32 %v6976_v7, %v6975_v48  ;;  %5566 = vst.msk [vmem:[#allocation2 + $0xf8] sm:$0xff] %vm5534_vm13, %v5501_v52 }
 0x2e1   :  { %v6142_v56 = vpop.permute.xlu1 %6141 }
 0x2e2   :  { %6207 = vst.msk [vmem:[#allocation2 + $0xf8] sm:$0xff] %vm6175_vm14, %v6142_v56 }
 0x2e4   :  { %v6238_v57 = vld [vmem:[#allocation2 + $0xf0] sm:$0xff] }
 0x2e5   :  { %8099 = vmatprep.mubr.msk.bf16.mxu1 %vm6260_vm0, %v6238_v57 }
 0x2e9   :  { %v6239_v59 = vld [vmem:[#allocation2 + $0xf8] sm:$0xff] }
 0x2ea   :  { %8100 = vmatmul.mubr.msk.bf16.gmra.mrb[28].mxu1 %vm6260_vm0, %v6239_v59 }
 0x2ef   :  { %v8073_v60 = vpop.f32.mrb[0].mxu1 }
 0x2f0   :  { %6685 = vst.msk [vmem:[%s12437_s2 + $0x110] sm:$0xff] %vm6650_vm1, %v8073_v60  ;;  %v6523_v0 = vpop.f32.mrb[1].mxu1  ;;  %v6885_v32 = vmul.f32 %v8073_v60, %v8073_v60  ;;  %v6783_v6 = vsel %vm6715_vm3, %v8073_v60, 0.0 }
 0x2f1   :  { %6683 = vst.msk [vmem:[%s12437_s2 + $0x100] sm:$0xff] %vm6650_vm1, %v6523_v0  ;;  %v6779_v1 = vsel %vm6715_vm3, %v6523_v0, 0.0  ;;  %v6883_v58 = vmul.f32 %v6523_v0, %v6523_v0  ;;  %v8074_v20 = vpop.f32.mrb[2].mxu1 }
 0x2f2   :  { %v6780_v5 = vadd.f32 %v6779_v1, %v6778_v49  ;;  %6686 = vst.msk [vmem:[%s12437_s2 + $0x118] sm:$0xff] %vm6650_vm1, %v8074_v20  ;;  %v6526_v19 = vpop.f32.mrb[3].mxu1  ;;  %v6886_v25 = vmul.f32 %v8074_v20, %v8074_v20  ;;  %v6982_v16 = vsel %vm6715_vm3, %v6885_v32, 0.0  ;;  %v6785_v41 = vsel %vm6715_vm3, %v8074_v20, 0.0 }
 0x2f3   :  { %v6978_v4 = vsel %vm6715_vm3, %v6883_v58, 0.0  ;;  %6684 = vst.msk [vmem:[%s12437_s2 + $0x108] sm:$0xff] %vm6650_vm1, %v6526_v19  ;;  %v6781_v8 = vsel %vm6715_vm3, %v6526_v19, 0.0  ;;  %v6884_v9 = vmul.f32 %v6526_v19, %v6526_v19 }
 0x2f4   :  { %v6979_v3 = vadd.f32 %v6978_v4, %v6977_v51  ;;  %v6782_v18 = vadd.f32 %v6781_v8, %v6780_v5  ;;  %v6984_v17 = vsel %vm6715_vm3, %v6886_v25, 0.0 }
 0x2f5   :  { %v6980_v26 = vsel %vm6715_vm3, %v6884_v9, 0.0 }
 0x2f6   :  { %v6784_v29 = vadd.f32 %v6783_v6, %v6782_v18  ;;  %v6981_v10 = vadd.f32 %v6980_v26, %v6979_v3 }
 0x2f8   :  { %v6983_v24 = vadd.f32 %v6982_v16, %v6981_v10  ;;  %v6786_v14 = vadd.f32 %v6785_v41, %v6784_v29 }
 0x2fa   :  { %v6985_v13 = vadd.f32 %v6984_v17, %v6983_v24 }
 0x30b   :  { %v8077_v63 = vpop.f32.mrb[4].mxu1 }
 0x30c   :  { %6689 = vst.msk [vmem:[%s12437_s2 + $0x130] sm:$0xff] %vm6650_vm1, %v8077_v63  ;;  %v6539_v11 = vpop.f32.mrb[5].mxu1  ;;  %v6889_v45 = vmul.f32 %v8077_v63, %v8077_v63  ;;  %v6791_v28 = vsel %vm6715_vm3, %v8077_v63, 0.0 }
 0x30d   :  { %6687 = vst.msk [vmem:[%s12437_s2 + $0x120] sm:$0xff] %vm6650_vm1, %v6539_v11  ;;  %v6787_v15 = vsel %vm6715_vm3, %v6539_v11, 0.0  ;;  %v6887_v43 = vmul.f32 %v6539_v11, %v6539_v11  ;;  %v8078_v2 = vpop.f32.mrb[6].mxu1 }
 0x30e   :  { %v6788_v23 = vadd.f32 %v6787_v15, %v6786_v14  ;;  %6690 = vst.msk [vmem:[%s12437_s2 + $0x138] sm:$0xff] %vm6650_vm1, %v8078_v2  ;;  %v6542_v39 = vpop.f32.mrb[7].mxu1  ;;  %v6890_v53 = vmul.f32 %v8078_v2, %v8078_v2  ;;  %v6990_v62 = vsel %vm6715_vm3, %v6889_v45, 0.0  ;;  %v6793_v33 = vsel %vm6715_vm3, %v8078_v2, 0.0 }
 0x30f   :  { %v6986_v12 = vsel %vm6715_vm3, %v6887_v43, 0.0  ;;  %6688 = vst.msk [vmem:[%s12437_s2 + $0x128] sm:$0xff] %vm6650_vm1, %v6542_v39  ;;  %v6789_v30 = vsel %vm6715_vm3, %v6542_v39, 0.0  ;;  %v6888_v55 = vmul.f32 %v6542_v39, %v6542_v39 }
 0x310   :  { %v6987_v22 = vadd.f32 %v6986_v12, %v6985_v13  ;;  %v6790_v54 = vadd.f32 %v6789_v30, %v6788_v23  ;;  %v6992_v37 = vsel %vm6715_vm3, %v6890_v53, 0.0 }
 0x311   :  { %v6988_v61 = vsel %vm6715_vm3, %v6888_v55, 0.0 }
 0x312   :  { %v6792_v27 = vadd.f32 %v6791_v28, %v6790_v54  ;;  %v6989_v34 = vadd.f32 %v6988_v61, %v6987_v22 }
 0x314   :  { %v6991_v35 = vadd.f32 %v6990_v62, %v6989_v34  ;;  %v6794_v36 = vadd.f32 %v6793_v33, %v6792_v27 }
 0x316   :  { %v6993_v40 = vadd.f32 %v6992_v37, %v6991_v35 }
 0x327   :  { %v8081_v42 = vpop.f32.mrb[8].mxu1 }
 0x328   :  { %6693 = vst.msk [vmem:[%s12437_s2 + $0x150] sm:$0xff] %vm6650_vm1, %v8081_v42  ;;  %v6555_v21 = vpop.f32.mrb[9].mxu1  ;;  %v6893_v48 = vmul.f32 %v8081_v42, %v8081_v42  ;;  %v6799_v56 = vsel %vm6715_vm3, %v8081_v42, 0.0 }
 0x329   :  { %6691 = vst.msk [vmem:[%s12437_s2 + $0x140] sm:$0xff] %vm6650_vm1, %v6555_v21  ;;  %v6795_v38 = vsel %vm6715_vm3, %v6555_v21, 0.0  ;;  %v6891_v44 = vmul.f32 %v6555_v21, %v6555_v21  ;;  %v8082_v46 = vpop.f32.mrb[10].mxu1 }
 0x32a   :  { %v6796_v31 = vadd.f32 %v6795_v38, %v6794_v36  ;;  %6694 = vst.msk [vmem:[%s12437_s2 + $0x158] sm:$0xff] %vm6650_vm1, %v8082_v46  ;;  %v6558_v47 = vpop.f32.mrb[11].mxu1  ;;  %v6894_v57 = vmul.f32 %v8082_v46, %v8082_v46  ;;  %v6998_v1 = vsel %vm6715_vm3, %v6893_v48, 0.0  ;;  %v6801_v58 = vsel %vm6715_vm3, %v8082_v46, 0.0 }
 0x32b   :  { %v6994_v49 = vsel %vm6715_vm3, %v6891_v44, 0.0  ;;  %6692 = vst.msk [vmem:[%s12437_s2 + $0x148] sm:$0xff] %vm6650_vm1, %v6558_v47  ;;  %v6797_v7 = vsel %vm6715_vm3, %v6558_v47, 0.0  ;;  %v6892_v50 = vmul.f32 %v6558_v47, %v6558_v47 }
 0x32c   :  { %v6995_v51 = vadd.f32 %v6994_v49, %v6993_v40  ;;  %v6798_v52 = vadd.f32 %v6797_v7, %v6796_v31  ;;  %v7000_v19 = vsel %vm6715_vm3, %v6894_v57, 0.0 }
 0x32d   :  { %v6996_v59 = vsel %vm6715_vm3, %v6892_v50, 0.0 }
 0x32e   :  { %v6800_v60 = vadd.f32 %v6799_v56, %v6798_v52  ;;  %v6997_v0 = vadd.f32 %v6996_v59, %v6995_v51 }
 0x330   :  { %v6999_v20 = vadd.f32 %v6998_v1, %v6997_v0  ;;  %v6802_v5 = vadd.f32 %v6801_v58, %v6800_v60 }
 0x332   :  { %v7001_v32 = vadd.f32 %v7000_v19, %v6999_v20 }
 0x343   :  { %v8085_v4 = vpop.f32.mrb[12].mxu1 }
 0x344   :  { %6697 = vst.msk [vmem:[%s12437_s2 + $0x170] sm:$0xff] %vm6650_vm1, %v8085_v4  ;;  %v6571_v8 = vpop.f32.mrb[13].mxu1  ;;  %v6897_v26 = vmul.f32 %v8085_v4, %v8085_v4  ;;  %v6807_v14 = vsel %vm6715_vm3, %v8085_v4, 0.0 }
 0x345   :  { %6695 = vst.msk [vmem:[%s12437_s2 + $0x160] sm:$0xff] %vm6650_vm1, %v6571_v8  ;;  %v6803_v9 = vsel %vm6715_vm3, %v6571_v8, 0.0  ;;  %v6895_v3 = vmul.f32 %v6571_v8, %v6571_v8  ;;  %v8086_v18 = vpop.f32.mrb[14].mxu1 }
 0x346   :  { %v6804_v6 = vadd.f32 %v6803_v9, %v6802_v5  ;;  %6698 = vst.msk [vmem:[%s12437_s2 + $0x178] sm:$0xff] %vm6650_vm1, %v8086_v18  ;;  %v6574_v25 = vpop.f32.mrb[15].mxu1  ;;  %v6898_v17 = vmul.f32 %v8086_v18, %v8086_v18  ;;  %v7006_v15 = vsel %vm6715_vm3, %v6897_v26, 0.0  ;;  %v6809_v43 = vsel %vm6715_vm3, %v8086_v18, 0.0 }
 0x347   :  { %v7002_v29 = vsel %vm6715_vm3, %v6895_v3, 0.0  ;;  %6696 = vst.msk [vmem:[%s12437_s2 + $0x168] sm:$0xff] %vm6650_vm1, %v6574_v25  ;;  %v6805_v10 = vsel %vm6715_vm3, %v6574_v25, 0.0  ;;  %v6896_v16 = vmul.f32 %v6574_v25, %v6574_v25 }
 0x348   :  { %v7003_v41 = vadd.f32 %v7002_v29, %v7001_v32  ;;  %v6806_v24 = vadd.f32 %v6805_v10, %v6804_v6  ;;  %v7008_v39 = vsel %vm6715_vm3, %v6898_v17, 0.0 }
 0x349   :  { %v7004_v13 = vsel %vm6715_vm3, %v6896_v16, 0.0 }
 0x34a   :  { %v6808_v63 = vadd.f32 %v6807_v14, %v6806_v24  ;;  %v7005_v11 = vadd.f32 %v7004_v13, %v7003_v41 }
 0x34c   :  { %v7007_v2 = vadd.f32 %v7006_v15, %v7005_v11  ;;  %v6810_v23 = vadd.f32 %v6809_v43, %v6808_v63 }
 0x34e   :  { %v7009_v45 = vadd.f32 %v7008_v39, %v7007_v2 }
 0x35f   :  { %v8089_v12 = vpop.f32.mrb[16].mxu1 }
 0x360   :  { %6701 = vst.msk [vmem:[%s12437_s2 + $0x190] sm:$0xff] %vm6650_vm1, %v8089_v12  ;;  %v6587_v30 = vpop.f32.mrb[17].mxu1  ;;  %v6901_v61 = vmul.f32 %v8089_v12, %v8089_v12  ;;  %v6815_v36 = vsel %vm6715_vm3, %v8089_v12, 0.0 }
 0x361   :  { %6699 = vst.msk [vmem:[%s12437_s2 + $0x180] sm:$0xff] %vm6650_vm1, %v6587_v30  ;;  %v6811_v55 = vsel %vm6715_vm3, %v6587_v30, 0.0  ;;  %v6899_v22 = vmul.f32 %v6587_v30, %v6587_v30  ;;  %v8090_v54 = vpop.f32.mrb[18].mxu1 }
 0x362   :  { %v6812_v28 = vadd.f32 %v6811_v55, %v6810_v23  ;;  %6702 = vst.msk [vmem:[%s12437_s2 + $0x198] sm:$0xff] %vm6650_vm1, %v8090_v54  ;;  %v6590_v53 = vpop.f32.mrb[19].mxu1  ;;  %v6902_v37 = vmul.f32 %v8090_v54, %v8090_v54  ;;  %v7014_v38 = vsel %vm6715_vm3, %v6901_v61, 0.0  ;;  %v6817_v44 = vsel %vm6715_vm3, %v8090_v54, 0.0 }
 0x363   :  { %v7010_v27 = vsel %vm6715_vm3, %v6899_v22, 0.0  ;;  %6700 = vst.msk [vmem:[%s12437_s2 + $0x188] sm:$0xff] %vm6650_vm1, %v6590_v53  ;;  %v6813_v34 = vsel %vm6715_vm3, %v6590_v53, 0.0  ;;  %v6900_v62 = vmul.f32 %v6590_v53, %v6590_v53 }
 0x364   :  { %v7011_v33 = vadd.f32 %v7010_v27, %v7009_v45  ;;  %v6814_v35 = vadd.f32 %v6813_v34, %v6812_v28  ;;  %v7016_v47 = vsel %vm6715_vm3, %v6902_v37, 0.0 }
 0x365   :  { %v7012_v40 = vsel %vm6715_vm3, %v6900_v62, 0.0 }
 0x366   :  { %v6816_v42 = vadd.f32 %v6815_v36, %v6814_v35  ;;  %v7013_v21 = vadd.f32 %v7012_v40, %v7011_v33 }
 0x368   :  { %v7015_v46 = vadd.f32 %v7014_v38, %v7013_v21  ;;  %v6818_v31 = vadd.f32 %v6817_v44, %v6816_v42 }
 0x36a   :  { %v7017_v48 = vadd.f32 %v7016_v47, %v7015_v46 }
 0x37b   :  { %v8093_v49 = vpop.f32.mrb[20].mxu1 }
 0x37c   :  { %6705 = vst.msk [vmem:[%s12437_s2 + $0x1b0] sm:$0xff] %vm6650_vm1, %v8093_v49  ;;  %v6603_v7 = vpop.f32.mrb[21].mxu1  ;;  %v6905_v59 = vmul.f32 %v8093_v49, %v8093_v49  ;;  %v6823_v5 = vsel %vm6715_vm3, %v8093_v49, 0.0 }
 0x37d   :  { %6703 = vst.msk [vmem:[%s12437_s2 + $0x1a0] sm:$0xff] %vm6650_vm1, %v6603_v7  ;;  %v6819_v50 = vsel %vm6715_vm3, %v6603_v7, 0.0  ;;  %v6903_v51 = vmul.f32 %v6603_v7, %v6603_v7  ;;  %v8094_v52 = vpop.f32.mrb[22].mxu1 }
 0x37e   :  { %v6820_v56 = vadd.f32 %v6819_v50, %v6818_v31  ;;  %6706 = vst.msk [vmem:[%s12437_s2 + $0x1b8] sm:$0xff] %vm6650_vm1, %v8094_v52  ;;  %v6606_v57 = vpop.f32.mrb[23].mxu1  ;;  %v6906_v19 = vmul.f32 %v8094_v52, %v8094_v52  ;;  %v7022_v9 = vsel %vm6715_vm3, %v6905_v59, 0.0  ;;  %v6825_v3 = vsel %vm6715_vm3, %v8094_v52, 0.0 }
 0x37f   :  { %v7018_v60 = vsel %vm6715_vm3, %v6903_v51, 0.0  ;;  %6704 = vst.msk [vmem:[%s12437_s2 + $0x1a8] sm:$0xff] %vm6650_vm1, %v6606_v57  ;;  %v6821_v0 = vsel %vm6715_vm3, %v6606_v57, 0.0  ;;  %v6904_v1 = vmul.f32 %v6606_v57, %v6606_v57 }
 0x380   :  { %v7019_v58 = vadd.f32 %v7018_v60, %v7017_v48  ;;  %v6822_v20 = vadd.f32 %v6821_v0, %v6820_v56  ;;  %v7024_v25 = vsel %vm6715_vm3, %v6906_v19, 0.0 }
 0x381   :  { %v7020_v32 = vsel %vm6715_vm3, %v6904_v1, 0.0 }
 0x382   :  { %v6824_v4 = vadd.f32 %v6823_v5, %v6822_v20  ;;  %v7021_v8 = vadd.f32 %v7020_v32, %v7019_v58 }
 0x384   :  { %v7023_v18 = vadd.f32 %v7022_v9, %v7021_v8  ;;  %v6826_v6 = vadd.f32 %v6825_v3, %v6824_v4 }
 0x386   :  { %v7025_v26 = vadd.f32 %v7024_v25, %v7023_v18 }
 0x39b   :  { %v8097_v29 = vpop.f32.mrb[24].mxu1 }
 0x39c   :  { %6709 = vst.msk [vmem:[%s12437_s2 + $0x1d0] sm:$0xff] %vm6650_vm1, %v8097_v29  ;;  %v6619_v10 = vpop.f32.mrb[25].mxu1  ;;  %v6909_v13 = vmul.f32 %v8097_v29, %v8097_v29  ;;  %v6831_v23 = vsel %vm6715_vm3, %v8097_v29, 0.0 }
 0x39d   :  { %6707 = vst.msk [vmem:[%s12437_s2 + $0x1c0] sm:$0xff] %vm6650_vm1, %v6619_v10  ;;  %v6827_v16 = vsel %vm6715_vm3, %v6619_v10, 0.0  ;;  %v6907_v41 = vmul.f32 %v6619_v10, %v6619_v10  ;;  %v8098_v24 = vpop.f32.mrb[26].mxu1 }
 0x39e   :  { %v6828_v14 = vadd.f32 %v6827_v16, %v6826_v6  ;;  %6710 = vst.msk [vmem:[%s12437_s2 + $0x1d8] sm:$0xff] %vm6650_vm1, %v8098_v24  ;;  %v6622_v17 = vpop.f32.mrb[27].mxu1  ;;  %v6910_v39 = vmul.f32 %v8098_v24, %v8098_v24  ;;  %v7030_v55 = vsel %vm6715_vm3, %v6909_v13, 0.0  ;;  %v6833_v22 = vsel %vm6715_vm3, %v8098_v24, 0.0 }
 0x39f   :  { %v7026_v63 = vsel %vm6715_vm3, %v6907_v41, 0.0  ;;  %6708 = vst.msk [vmem:[%s12437_s2 + $0x1c8] sm:$0xff] %vm6650_vm1, %v6622_v17  ;;  %v6829_v11 = vsel %vm6715_vm3, %v6622_v17, 0.0  ;;  %v6908_v15 = vmul.f32 %v6622_v17, %v6622_v17 }
 0x3a0   :  { %v7027_v43 = vadd.f32 %v7026_v63, %v7025_v26  ;;  %v6830_v2 = vadd.f32 %v6829_v11, %v6828_v14  ;;  %v7032_v53 = vsel %vm6715_vm3, %v6910_v39, 0.0 }
 0x3a1   :  { %v7028_v45 = vsel %vm6715_vm3, %v6908_v15, 0.0 }
 0x3a2   :  { %v6832_v12 = vadd.f32 %v6831_v23, %v6830_v2  ;;  %v7029_v30 = vadd.f32 %v7028_v45, %v7027_v43 }
 0x3a4   :  { %v7031_v54 = vadd.f32 %v7030_v55, %v7029_v30  ;;  %v6834_v28 = vadd.f32 %v6833_v22, %v6832_v12 }
 0x3a6   :  { %v7033_v61 = vadd.f32 %v7032_v53, %v7031_v54 }
 0x3bd   :  { %v8101_v27 = vpop.f32.mrb[28].mxu1 }
 0x3be   :  { %6713 = vst.msk [vmem:[%s12437_s2 + $0x1f0] sm:$0xff] %vm6650_vm1, %v8101_v27  ;;  %v6635_v34 = vpop.f32.mrb[29].mxu1  ;;  %v6913_v40 = vmul.f32 %v8101_v27, %v8101_v27  ;;  %v6839_v31 = vsel %vm6715_vm3, %v8101_v27, 0.0 }
 0x3bf   :  { %6711 = vst.msk [vmem:[%s12437_s2 + $0x1e0] sm:$0xff] %vm6650_vm1, %v6635_v34  ;;  %v6835_v62 = vsel %vm6715_vm3, %v6635_v34, 0.0  ;;  %v6911_v33 = vmul.f32 %v6635_v34, %v6635_v34  ;;  %v8102_v35 = vpop.f32.mrb[30].mxu1 }
 0x3c0   :  { %v6836_v36 = vadd.f32 %v6835_v62, %v6834_v28  ;;  %6714 = vst.msk [vmem:[%s12437_s2 + $0x1f8] sm:$0xff] %vm6650_vm1, %v8102_v35  ;;  %v6638_v37 = vpop.f32.mrb[31].mxu1  ;;  %v6914_v47 = vmul.f32 %v8102_v35, %v8102_v35  ;;  %v7038_v50 = vsel %vm6715_vm3, %v6913_v40, 0.0  ;;  %v6841_v51 = vsel %vm6715_vm3, %v8102_v35, 0.0 }
 0x3c1   :  { %v7034_v42 = vsel %vm6715_vm3, %v6911_v33, 0.0  ;;  %6712 = vst.msk [vmem:[%s12437_s2 + $0x1e8] sm:$0xff] %vm6650_vm1, %v6638_v37  ;;  %v6837_v21 = vsel %vm6715_vm3, %v6638_v37, 0.0  ;;  %v6912_v38 = vmul.f32 %v6638_v37, %v6638_v37  ;;  %s8251_s2 = smov [#allocation3]  }
 0x3c2   :  { %v7035_v44 = vadd.f32 %v7034_v42, %v7033_v61  ;;  %v6838_v46 = vadd.f32 %v6837_v21, %v6836_v36  ;;  %v7040_v57 = vsel %vm6715_vm3, %v6914_v47, 0.0  ;;  %s7057_s24 = sshll.u32 %s8251_s2, 4  ;;  %s7058_s24 = int_to_ptr.vmem [resolvable:$true] %s7057_s24 }
 0x3c3   :  { %v7036_v48 = vsel %vm6715_vm3, %v6912_v38, 0.0  ;;  %s8219_s26 = scalar_lea.vmem %s7058_s24, 32  ;;  %p8224_p1 = scmp.lt.s32.totalorder %s7058_s24, %s7058_s24 }
 0x3c4   :  { %v6840_v49 = vadd.f32 %v6839_v31, %v6838_v46  ;;  %v7037_v7 = vadd.f32 %v7036_v48, %v7035_v44  ;;  %p8220_p0 = scmp.ne.s32.totalorder %s7058_s24, %s8219_s26  ;;  %p8225_p2 = scmp.lt.s32.totalorder %s8219_s26, %s8219_s26 }
 0x3c6   :  { %v6842_v52 = vadd.f32 %v6841_v51, %v6840_v49  ;;  %v7039_v56 = vadd.f32 %v7038_v50, %v7037_v7  ;;  %p8226_p3 = por %p8225_p2, %p8224_p1 }
 0x3c8   :  { %v6843_v59 = vrot.slane %v6842_v52, 4  ;;  %v7041_v60 = vadd.f32 %v7040_v57, %v7039_v56  ;;  %p8227_p4 = pnand %p8226_p3, %p8220_p0 }
 0x3ca   :  { %v6844_v0 = vadd.f32 %v6843_v59, %v6842_v52  ;;  %v7042_v1 = vrot.slane %v7041_v60, 4 }
 0x3cc   :  { %v6845_v58 = vrot.slane %v6844_v0, 2  ;;  %v7043_v20 = vadd.f32 %v7042_v1, %v7041_v60 }
 0x3ce   :  { %v6846_v5 = vadd.f32 %v6845_v58, %v6844_v0  ;;  %v7044_v19 = vrot.slane %v7043_v20, 2 }
 0x3d0   :  { %v6847_v32 = vrot.slane %v6846_v5, 1  ;;  %v7045_v4 = vadd.f32 %v7044_v19, %v7043_v20 }
 0x3d2   :  { %v6848_v8 = vadd.f32 %v6847_v32, %v6846_v5  ;;  %v7046_v9 = vrot.slane %v7045_v4, 1 }
 0x3d4   :  { %6850 = vst.msk [vmem:[#allocation3] sm:$0x1] %vm6849_vm2, %v6848_v8  ;;  %v7047_v3 = vadd.f32 %v7046_v9, %v7045_v4 }
 0x3d6   :  { %7048 = vst.msk [vmem:[#allocation3 + $0x1] sm:$0x1] %vm6849_vm2, %v7047_v3 }
 0x3d7   :  { %8230 = shalt.err (!%p8227_p4)
}
 0x3d8   :  { %s8231_s29 = scalar_lea.hbm %s12438_s3, 32 }
 0x3d9   :  { %p8232_p5 = scmp.ne.s32.totalorder %s12438_s3, %s8231_s29  ;;  %p8235_p6 = scmp.lt.u32.totalorder %s8231_s29, %s12438_s3 }
 0x3db   :  { %p8237_p7 = pnand %p8235_p6, %p8232_p5 }
 0x3dd   :  { %8240 = shalt.err (!%p8237_p7)
}
 0x3de   :  { %7060 = dma.vmem_to_hbm [thread:$0]  %s7058_s24, 32, %s12438_s3, [#allocation4]  }
 0x3df   :  { %8241 = dma.done.wait [#allocation4], 32  }
 0x3e0   :  { %8242 = vsyncadd [#allocation4], 4294967264 }
 0x3e1   :  { %7066 = vsyncpa [#allocation4], 1 }

</bundles_post_ra>
